<compile_context>
chip_gen: v7x
topology: tpu7x:2x2x1
jax: 0.10.0
libtpu: 0.0.40
codegen_flags: <defaults>
</compile_context>

<pallas_src>
import math

import jax
import jax.numpy as jnp
import numpy as np
from jax.experimental import pallas as pl
from jax.experimental.pallas import tpu as pltpu


# ------------------------------ fused kernel ---------------------------------

def make_fused_kernel(H, W, Cout, Cp, G, WPAD, COL0, RY, eps=1e-5):
    HW = H * W
    cpg = Cout // G
    inv_n = 1.0 / float(HW * cpg)
    base = WPAD + COL0            # flat slab row of interior pixel (y=0, x=0)
    MP = H * WPAD                 # rows of the padded-M conv2 accumulation
    R = RY * WPAD                 # conv2 chunk rows (RY image rows)
    NCH = H // RY
    PADL = COL0                   # zero columns left of the interior in a slab row
    PADR = WPAD - COL0 - W        # zero columns right of the interior

    def kernel(patches_ref, te_ref, w1r_ref, b1_ref, g1_ref, be1_ref,
               wm_ref, bm_ref, br_ref,
               w2_ref, b2_ref, g2_ref, be2_ref,
               gmat_ref, gmatt_ref,
               out_ref, hp_ref, acc2_ref):
        f32 = jnp.float32

        def finalize_stats(s, sq):
            # s / sq: (1, Cp) per-channel sum and sum-of-squares over HW pixels.
            if cpg == 1:                       # each group is a single channel
                mean = s * inv_n
                var = sq * inv_n - mean * mean
            else:                              # fold per-channel stats into groups
                stats = jnp.concatenate([s, sq], axis=0)             # (2, Cp)
                gstats = jnp.dot(stats, gmat_ref[...],
                                 precision=jax.lax.Precision.HIGHEST,
                                 preferred_element_type=f32) * inv_n
                cstats = jnp.dot(gstats, gmatt_ref[...],
                                 precision=jax.lax.Precision.HIGHEST,
                                 preferred_element_type=f32)
                mean = cstats[0:1, :]
                var = cstats[1:2, :] - mean * mean
            var = jnp.maximum(var, 0.0)        # one-pass variance, clamp
            return mean, jax.lax.rsqrt(var + eps)

        # ---- time-embedding MLP (tiny; overlaps the conv matmuls) -----------
        t = te_ref[0]                                              # (1, T) f32
        t = t * jax.nn.sigmoid(t)
        tproj = jnp.dot(t, wm_ref[...],
                        preferred_element_type=f32) + bm_ref[...]  # (1, Cp)

        # ---- conv1 (3x3, im2col) + residual 1x1 conv as ONE fused matmul ----
        p = patches_ref[0]                                         # (HW, 9*Cin) bf16
        pr = jnp.dot(p, w1r_ref[...],
                     preferred_element_type=f32)                   # (HW, 2*Cp) f32
        out_ref[0] = pr[:, Cp:] + br_ref[...]   # residual path stored now, dies here
        acc1 = pr[:, :Cp] + b1_ref[...]         # conv1 pre-norm activations

        # ---- GroupNorm-1 stats ----------------------------------------------
        s1 = jnp.sum(acc1, axis=0, keepdims=True)
        sq1 = jnp.sum(acc1 * acc1, axis=0, keepdims=True)
        mean1, rstd1 = finalize_stats(s1, sq1)
        g1, be1 = g1_ref[...], be1_ref[...]

        # ---- stage h1 = SiLU(GN(acc1)) + tproj into the flat padded slab ----
        zrow = jnp.zeros((WPAD, Cp), hp_ref.dtype)
        hp_ref[0:WPAD, :] = zrow                                   # top halo row
        hp_ref[(H + 1) * WPAD:(H + 2) * WPAD, :] = zrow            # bottom halo row
        zl = jnp.zeros((PADL, Cp), f32)
        zr = jnp.zeros((PADR, Cp), f32)
        for y in range(H):                                         # chunked GN+SiLU
            a = acc1[y * W:(y + 1) * W, :]                         # (W, Cp)
            v = (a - mean1) * rstd1 * g1 + be1
            hrow = v * jax.nn.sigmoid(v) + tproj
            row = jnp.concatenate([zl, hrow, zr], axis=0)          # (WPAD, Cp)
            hp_ref[(y + 1) * WPAD:(y + 2) * WPAD, :] = row.astype(hp_ref.dtype)

        # ---- conv2: 9 taps as contiguous flat slab slices, chunked over rows -
        b2 = b2_ref[...]
        rmod = jax.lax.broadcasted_iota(jnp.int32, (R, 1), 0) % WPAD
        interior = rmod < W                    # identical for every chunk (R % WPAD == 0)
        s2 = jnp.zeros((1, Cp), f32)
        sq2 = jnp.zeros((1, Cp), f32)
        for c in range(NCH):
            acc = jnp.zeros((R, Cp), f32)
            for ky in range(3):
                for kx in range(3):
                    off = base + (ky - 1) * WPAD + (kx - 1) + c * R
                    acc = acc + jnp.dot(hp_ref[off:off + R, :], w2_ref[ky, kx],
                                        preferred_element_type=f32)
            acc = acc + b2
            hm = jnp.where(interior, acc, 0.0)     # drop gap/halo rows (NaN-safe)
            s2 = s2 + jnp.sum(hm, axis=0, keepdims=True)
            sq2 = sq2 + jnp.sum(hm * hm, axis=0, keepdims=True)
            acc2_ref[c * R:(c + 1) * R, :] = acc
        mean2, rstd2 = finalize_stats(s2, sq2)
        g2, be2 = g2_ref[...], be2_ref[...]

        # ---- GroupNorm-2 + SiLU + residual add, per image row ---------------
        for y in range(H):
            a = acc2_ref[y * WPAD:y * WPAD + W, :]                 # interior rows only
            v = (a - mean2) * rstd2 * g2 + be2
            h2 = v * jax.nn.sigmoid(v)
            out_ref[0, y * W:(y + 1) * W, :] = (
                out_ref[0, y * W:(y + 1) * W, :] + h2)

    return kernel


# -------------------------------- wrapper -------------------------------------

def _full_spec(arr):
    nd = arr.ndim
    return pl.BlockSpec(arr.shape, lambda b, _nd=nd: (0,) * _nd)


def resnet_block_pallas(x_nchw, time_emb, params, groups=8):
    B, Cin, H, W = x_nchw.shape
    Cout = params["w1"].shape[-1]
    T = params["wm"].shape[0]
    G = groups
    cpg = Cout // G
    HW = H * W
    K1 = 9 * Cin
    Cp = ((Cout + 127) // 128) * 128            # lane-dense padded channel count
    f32 = jnp.float32
    bf16 = jnp.bfloat16

    # flat padded-slab geometry for the conv2 halo
    COL0 = 8                                    # interior column offset inside a slab row
    WPAD = ((W + COL0 + 1 + 15) // 16) * 16     # slab row width (>= W + halos, 16-aligned)
    RY = max(1, 128 // WPAD)                    # image rows per conv2 chunk
    while H % RY:
        RY -= 1
    MPAD = (H + 3) * WPAD                       # slab rows (covers max tap read + slack)
    MP = H * WPAD                               # conv2 accumulation rows

    def padc(a):                                # zero-pad last dim Cout -> Cp
        a = a.astype(f32)
        return jnp.pad(a, [(0, 0)] * (a.ndim - 1) + [(0, Cp - Cout)])

    # im2col of x for the 3x3 SAME conv (cheap XLA work at these sizes).
    x_nhwc = jnp.transpose(x_nchw, (0, 2, 3, 1)).astype(f32)
    xp = jnp.pad(x_nhwc, ((0, 0), (1, 1), (1, 1), (0, 0)))
    patches = jnp.concatenate(
        [xp[:, dy:dy + H, dx:dx + W, :].reshape(B, HW, Cin)
         for dy in range(3) for dx in range(3)], axis=-1).astype(bf16)  # (B, HW, 9*Cin)

    # conv1 weight + residual 1x1 (on the centre-tap rows) fused along N.
    w1p = padc(params["w1"]).reshape(K1, Cp)
    wrp = jnp.zeros((K1, Cp), f32).at[4 * Cin:5 * Cin, :Cout].set(
        params["wr"].astype(f32))
    w1r = jnp.concatenate([w1p, wrp], axis=1).astype(bf16)           # (K1, 2*Cp)

    b1p, g1p, be1p = padc(params["b1"]), padc(params["g1"]), padc(params["be1"])
    wmp, bmp = padc(params["wm"]), padc(params["bm"])
    brp = padc(params["br"])
    w2p = padc(jnp.pad(params["w2"].astype(f32),
                       ((0, 0), (0, 0), (0, Cp - Cout), (0, 0)))).astype(bf16)
    b2p, g2p, be2p = padc(params["b2"]), padc(params["g2"]), padc(params["be2"])

    # one-hot channel -> group matrices (only used when cpg > 1).
    gmat = jnp.zeros((Cp, G), f32).at[jnp.arange(Cout),
                                      jnp.arange(Cout) // cpg].set(1.0)
    gmat_t = gmat.T

    te3 = time_emb.astype(f32).reshape(B, 1, T)

    kernel = make_fused_kernel(H, W, Cout, Cp, G, WPAD, COL0, RY)

    out_flat = pl.pallas_call(
        kernel,
        out_shape=jax.ShapeDtypeStruct((B, HW, Cp), f32),
        grid_spec=pltpu.PrefetchScalarGridSpec(
            num_scalar_prefetch=0, grid=(B,),
            in_specs=[
                pl.BlockSpec((1, HW, K1), lambda b: (b, 0, 0)),     # im2col(x) (bf16)
                pl.BlockSpec((1, 1, T), lambda b: (b, 0, 0)),       # time_emb row
                _full_spec(w1r), _full_spec(b1p), _full_spec(g1p), _full_spec(be1p),
                _full_spec(wmp), _full_spec(bmp), _full_spec(brp),
                _full_spec(w2p), _full_spec(b2p), _full_spec(g2p), _full_spec(be2p),
                _full_spec(gmat), _full_spec(gmat_t),
            ],
            out_specs=pl.BlockSpec((1, HW, Cp), lambda b: (b, 0, 0)),
            scratch_shapes=[pltpu.VMEM((MPAD, Cp), bf16),           # h1 padded slab
                            pltpu.VMEM((MP, Cp), f32)]),            # conv2 accumulator
        compiler_params=pltpu.CompilerParams(
            dimension_semantics=("parallel",),                      # batch -> both TCs
            vmem_limit_bytes=32 * 1024 * 1024),
    )(patches, te3,
      w1r, b1p, g1p, be1p, wmp, bmp, brp,
      w2p, b2p, g2p, be2p, gmat, gmat_t)

    out = out_flat[:, :, :Cout].reshape(B, H, W, Cout)
    return jnp.transpose(out, (0, 3, 1, 2))       # back to NCHW


# ---------------------------- pure-JAX reference ------------------------------

def resnet_block_ref(x_nchw, time_emb, params, groups=8):
    x = jnp.transpose(x_nchw, (0, 2, 3, 1))
    silu = lambda v: v * jax.nn.sigmoid(v)

    def conv3(v, w, b):
        out = jax.lax.conv_general_dilated(
            v, w, (1, 1), "SAME",
            dimension_numbers=("NHWC", "HWIO", "NHWC"),
            precision=jax.lax.Precision.HIGHEST)
        return out + b.reshape(1, 1, 1, -1)

    def gn(v, gamma, beta):
        B, H, W, C = v.shape
        vg = v.reshape(B, H, W, groups, C // groups)
        mean = vg.mean(axis=(1, 2, 4), keepdims=True)
        var = vg.var(axis=(1, 2, 4), keepdims=True)
        vn = ((vg - mean) / jnp.sqrt(var + 1e-5)).reshape(B, H, W, C)
        return vn * gamma.reshape(1, 1, 1, -1) + beta.reshape(1, 1, 1, -1)

    h = silu(gn(conv3(x, params["w1"], params["b1"]), params["g1"], params["be1"]))
    t = silu(time_emb) @ params["wm"] + params["bm"]                # (B, Cout)
    h = h + t[:, None, None, :]
    h = silu(gn(conv3(h, params["w2"], params["b2"]), params["g2"], params["be2"]))
    res = jnp.einsum("bhwc,cd->bhwd", x, params["wr"],
                     precision=jax.lax.Precision.HIGHEST) + params["br"].reshape(1, 1, 1, -1)
    return jnp.transpose(h + res, (0, 3, 1, 2))


# ----------------------------------- main --------------------------------------

if __name__ == "__main__":
    B, Cin, Cout, H, W, T, G = 2, 4, 8, 16, 16, 32, 8

    key = jax.random.PRNGKey(0)
    ks = jax.random.split(key, 14)
    nrm = lambda k, shape, s: jax.random.normal(k, shape, jnp.float32) * s

    params = dict(
        # block1: Conv2d(Cin, Cout, 3, padding=1) + GroupNorm(G, Cout)
        w1=nrm(ks[0], (3, 3, Cin, Cout), 1.0 / math.sqrt(9 * Cin)),
        b1=nrm(ks[1], (1, Cout), 0.1),
        g1=1.0 + nrm(ks[2], (1, Cout), 0.1),
        be1=nrm(ks[3], (1, Cout), 0.1),
        # mlp: Linear(T, Cout) applied after SiLU(time_emb)
        wm=nrm(ks[4], (T, Cout), 1.0 / math.sqrt(T)),
        bm=nrm(ks[5], (1, Cout), 0.1),
        # block2: Conv2d(Cout, Cout, 3, padding=1) + GroupNorm(G, Cout)
        w2=nrm(ks[6], (3, 3, Cout, Cout), 1.0 / math.sqrt(9 * Cout)),
        b2=nrm(ks[7], (1, Cout), 0.1),
        g2=1.0 + nrm(ks[8], (1, Cout), 0.1),
        be2=nrm(ks[9], (1, Cout), 0.1),
        # res_conv: Conv2d(Cin, Cout, 1)  (dim != dim_out)
        wr=nrm(ks[10], (Cin, Cout), 1.0 / math.sqrt(Cin)),
        br=nrm(ks[11], (1, Cout), 0.1),
    )

    x = nrm(ks[12], (B, Cin, H, W), 1.0)        # NCHW, mirroring the PyTorch API
    time_emb = nrm(ks[13], (B, T), 1.0)

    out = resnet_block_pallas(x, time_emb, params, groups=G)
    out = jax.block_until_ready(out)

    ref = jax.block_until_ready(resnet_block_ref(x, time_emb, params, groups=G))

    assert out.shape == (B, Cout, H, W)
    assert np.all(np.isfinite(np.asarray(out)))
    np.testing.assert_allclose(np.asarray(out), np.asarray(ref),
                               rtol=5e-2, atol=5e-2)
    print("KERNEL_OK")
</pallas_src>

<mosaic_0001>
module attributes {stable_mosaic.version = 11 : i64} {
  func.func @kernel(%arg0: i32, %arg1: memref<1x256x36xbf16, #tpu.memory_space<vmem>>, %arg2: memref<1x1x32xf32, #tpu.memory_space<vmem>>, %arg3: memref<36x256xbf16, #tpu.memory_space<vmem>>, %arg4: memref<1x128xf32, #tpu.memory_space<vmem>>, %arg5: memref<1x128xf32, #tpu.memory_space<vmem>>, %arg6: memref<1x128xf32, #tpu.memory_space<vmem>>, %arg7: memref<32x128xf32, #tpu.memory_space<vmem>>, %arg8: memref<1x128xf32, #tpu.memory_space<vmem>>, %arg9: memref<1x128xf32, #tpu.memory_space<vmem>>, %arg10: memref<3x3x128x128xbf16, #tpu.memory_space<vmem>>, %arg11: memref<1x128xf32, #tpu.memory_space<vmem>>, %arg12: memref<1x128xf32, #tpu.memory_space<vmem>>, %arg13: memref<1x128xf32, #tpu.memory_space<vmem>>, %arg14: memref<128x8xf32, #tpu.memory_space<vmem>>, %arg15: memref<8x128xf32, #tpu.memory_space<vmem>>, %arg16: memref<1x256x128xf32, #tpu.memory_space<vmem>>, %arg17: memref<608x128xbf16, #tpu.memory_space<vmem>>, %arg18: memref<512x128xf32, #tpu.memory_space<vmem>>) attributes {dimension_semantics = [#tpu.dimension_semantics<parallel>], iteration_bounds = array<i64: 2>, scalar_prefetch = 0 : i64, scratch_operands = 2 : i64, tpu.core_type = #tpu.core_type<tc>, window_params = [{transform_indices = @transform_0, window_bounds = array<i64: 1, 256, 36>}, {transform_indices = @transform_1, window_bounds = array<i64: 1, 1, 32>}, {pipeline_mode = #tpu.pipeline_mode<synchronous>, transform_indices = @transform_2, window_bounds = array<i64: 36, 256>}, {pipeline_mode = #tpu.pipeline_mode<synchronous>, transform_indices = @transform_3, window_bounds = array<i64: 1, 128>}, {pipeline_mode = #tpu.pipeline_mode<synchronous>, transform_indices = @transform_4, window_bounds = array<i64: 1, 128>}, {pipeline_mode = #tpu.pipeline_mode<synchronous>, transform_indices = @transform_5, window_bounds = array<i64: 1, 128>}, {pipeline_mode = #tpu.pipeline_mode<synchronous>, transform_indices = @transform_6, window_bounds = array<i64: 32, 128>}, {pipeline_mode = #tpu.pipeline_mode<synchronous>, transform_indices = @transform_7, window_bounds = array<i64: 1, 128>}, {pipeline_mode = #tpu.pipeline_mode<synchronous>, transform_indices = @transform_8, window_bounds = array<i64: 1, 128>}, {pipeline_mode = #tpu.pipeline_mode<synchronous>, transform_indices = @transform_9, window_bounds = array<i64: 3, 3, 128, 128>}, {pipeline_mode = #tpu.pipeline_mode<synchronous>, transform_indices = @transform_10, window_bounds = array<i64: 1, 128>}, {pipeline_mode = #tpu.pipeline_mode<synchronous>, transform_indices = @transform_11, window_bounds = array<i64: 1, 128>}, {pipeline_mode = #tpu.pipeline_mode<synchronous>, transform_indices = @transform_12, window_bounds = array<i64: 1, 128>}, {pipeline_mode = #tpu.pipeline_mode<synchronous>, transform_indices = @transform_13, window_bounds = array<i64: 128, 8>}, {pipeline_mode = #tpu.pipeline_mode<synchronous>, transform_indices = @transform_14, window_bounds = array<i64: 8, 128>}, {transform_indices = @transform_15, window_bounds = array<i64: 1, 256, 128>}]} {
    %c0 = arith.constant 0 : index
    %c0_0 = arith.constant 0 : index
    %c0_1 = arith.constant 0 : index
    %0 = vector.load %arg2[%c0, %c0_0, %c0_1] : memref<1x1x32xf32, #tpu.memory_space<vmem>>, vector<1x1x32xf32>
    %1 = vector.shape_cast %0 : vector<1x1x32xf32> to vector<1x32xf32>
    %2 = arith.negf %1 : vector<1x32xf32>
    %3 = math.exp %2 : vector<1x32xf32>
    %cst = arith.constant 1.000000e+00 : f32
    %4 = vector.broadcast %cst : f32 to vector<1x32xf32>
    %5 = arith.addf %4, %3 : vector<1x32xf32>
    %6 = arith.divf %4, %5 : vector<1x32xf32>
    %7 = arith.mulf %1, %6 : vector<1x32xf32>
    %c0_2 = arith.constant 0 : index
    %c0_3 = arith.constant 0 : index
    %8 = vector.load %arg7[%c0_2, %c0_3] : memref<32x128xf32, #tpu.memory_space<vmem>>, vector<32x128xf32>
    %cst_4 = arith.constant dense<0.000000e+00> : vector<1x128xf32>
    %9 = tpu.matmul %7, %8, %cst_4 {dimension_numbers = #tpu.dot_dimension_numbers<[1], [0], [0], [1], [0, 0, 1, 1], [], []>} : vector<1x32xf32>, vector<32x128xf32>, vector<1x128xf32> -> vector<1x128xf32>
    %c0_5 = arith.constant 0 : index
    %c0_6 = arith.constant 0 : index
    %10 = vector.load %arg8[%c0_5, %c0_6] : memref<1x128xf32, #tpu.memory_space<vmem>>, vector<1x128xf32>
    %11 = arith.addf %9, %10 : vector<1x128xf32>
    %c0_7 = arith.constant 0 : index
    %c0_8 = arith.constant 0 : index
    %c0_9 = arith.constant 0 : index
    %12 = vector.load %arg1[%c0_7, %c0_8, %c0_9] : memref<1x256x36xbf16, #tpu.memory_space<vmem>>, vector<1x256x36xbf16>
    %13 = vector.shape_cast %12 : vector<1x256x36xbf16> to vector<256x36xbf16>
    %c0_10 = arith.constant 0 : index
    %c0_11 = arith.constant 0 : index
    %14 = vector.load %arg3[%c0_10, %c0_11] : memref<36x256xbf16, #tpu.memory_space<vmem>>, vector<36x256xbf16>
    %cst_12 = arith.constant dense<0.000000e+00> : vector<256x256xf32>
    %15 = tpu.matmul %13, %14, %cst_12 {dimension_numbers = #tpu.dot_dimension_numbers<[1], [0], [0], [1], [0, 0, 1, 1], [], []>} : vector<256x36xbf16>, vector<36x256xbf16>, vector<256x256xf32> -> vector<256x256xf32>
    %16 = vector.extract_strided_slice %15 {offsets = [0, 128], sizes = [256, 128], strides = [1, 1]} : vector<256x256xf32> to vector<256x128xf32>
    %c0_13 = arith.constant 0 : index
    %c0_14 = arith.constant 0 : index
    %17 = vector.load %arg9[%c0_13, %c0_14] : memref<1x128xf32, #tpu.memory_space<vmem>>, vector<1x128xf32>
    %18 = vector.broadcast %17 : vector<1x128xf32> to vector<256x128xf32>
    %19 = arith.addf %16, %18 : vector<256x128xf32>
    %c0_15 = arith.constant 0 : index
    %c0_16 = arith.constant 0 : index
    %c0_17 = arith.constant 0 : index
    %20 = vector.load %arg16[%c0_15, %c0_16, %c0_17] : memref<1x256x128xf32, #tpu.memory_space<vmem>>, vector<1x256x128xf32>
    %21 = vector.shape_cast %20 : vector<1x256x128xf32> to vector<256x128xf32>
    %22 = vector.shape_cast %19 : vector<256x128xf32> to vector<1x256x128xf32>
    tpu.vector_store %arg16[%c0_15, %c0_16, %c0_17], %22 {strides = array<i32>} : memref<1x256x128xf32, #tpu.memory_space<vmem>>, vector<1x256x128xf32>,
    %23 = vector.extract_strided_slice %15 {offsets = [0, 0], sizes = [256, 128], strides = [1, 1]} : vector<256x256xf32> to vector<256x128xf32>
    %c0_18 = arith.constant 0 : index
    %c0_19 = arith.constant 0 : index
    %24 = vector.load %arg4[%c0_18, %c0_19] : memref<1x128xf32, #tpu.memory_space<vmem>>, vector<1x128xf32>
    %25 = vector.broadcast %24 : vector<1x128xf32> to vector<256x128xf32>
    %26 = arith.addf %23, %25 : vector<256x128xf32>
    %cst_20 = arith.constant dense<0.000000e+00> : vector<128xf32>
    %27 = vector.multi_reduction <add>, %26, %cst_20 [0] : vector<256x128xf32> to vector<128xf32>
    %28 = vector.shape_cast %27 : vector<128xf32> to vector<1x128xf32>
    %29 = arith.mulf %26, %26 : vector<256x128xf32>
    %cst_21 = arith.constant dense<0.000000e+00> : vector<128xf32>
    %30 = vector.multi_reduction <add>, %29, %cst_21 [0] : vector<256x128xf32> to vector<128xf32>
    %31 = vector.shape_cast %30 : vector<128xf32> to vector<1x128xf32>
    %cst_22 = arith.constant 3.906250e-03 : f32
    %32 = vector.broadcast %cst_22 : f32 to vector<1x128xf32>
    %33 = arith.mulf %28, %32 : vector<1x128xf32>
    %cst_23 = arith.constant 3.906250e-03 : f32
    %34 = vector.broadcast %cst_23 : f32 to vector<1x128xf32>
    %35 = arith.mulf %31, %34 : vector<1x128xf32>
    %36 = arith.mulf %33, %33 : vector<1x128xf32>
    %37 = arith.subf %35, %36 : vector<1x128xf32>
    %cst_24 = arith.constant 0.000000e+00 : f32
    %38 = vector.broadcast %cst_24 : f32 to vector<1x128xf32>
    %39 = arith.maximumf %37, %38 : vector<1x128xf32>
    %cst_25 = arith.constant 9.99999974E-6 : f32
    %40 = vector.broadcast %cst_25 : f32 to vector<1x128xf32>
    %41 = arith.addf %39, %40 : vector<1x128xf32>
    %42 = math.rsqrt %41 : vector<1x128xf32>
    %c0_26 = arith.constant 0 : index
    %c0_27 = arith.constant 0 : index
    %43 = vector.load %arg5[%c0_26, %c0_27] : memref<1x128xf32, #tpu.memory_space<vmem>>, vector<1x128xf32>
    %c0_28 = arith.constant 0 : index
    %c0_29 = arith.constant 0 : index
    %44 = vector.load %arg6[%c0_28, %c0_29] : memref<1x128xf32, #tpu.memory_space<vmem>>, vector<1x128xf32>
    %cst_30 = arith.constant 0.000000e+00 : bf16
    %45 = vector.broadcast %cst_30 : bf16 to vector<32x128xbf16>
    %c0_31 = arith.constant 0 : index
    %c0_32 = arith.constant 0 : index
    %46 = vector.load %arg17[%c0_31, %c0_32] : memref<608x128xbf16, #tpu.memory_space<vmem>>, vector<32x128xbf16>
    tpu.vector_store %arg17[%c0_31, %c0_32], %45 {strides = array<i32>} : memref<608x128xbf16, #tpu.memory_space<vmem>>, vector<32x128xbf16>,
    %c544 = arith.constant 544 : index
    %c0_33 = arith.constant 0 : index
    %47 = vector.load %arg17[%c544, %c0_33] : memref<608x128xbf16, #tpu.memory_space<vmem>>, vector<32x128xbf16>
    tpu.vector_store %arg17[%c544, %c0_33], %45 {strides = array<i32>} : memref<608x128xbf16, #tpu.memory_space<vmem>>, vector<32x128xbf16>,
    %cst_34 = arith.constant 0.000000e+00 : f32
    %48 = vector.broadcast %cst_34 : f32 to vector<8x128xf32>
    %cst_35 = arith.constant 0.000000e+00 : f32
    %49 = vector.broadcast %cst_35 : f32 to vector<8x128xf32>
    %50 = vector.extract_strided_slice %26 {offsets = [0, 0], sizes = [16, 128], strides = [1, 1]} : vector<256x128xf32> to vector<16x128xf32>
    %51 = vector.broadcast %33 : vector<1x128xf32> to vector<16x128xf32>
    %52 = arith.subf %50, %51 : vector<16x128xf32>
    %53 = vector.broadcast %42 : vector<1x128xf32> to vector<16x128xf32>
    %54 = arith.mulf %52, %53 : vector<16x128xf32>
    %55 = vector.broadcast %43 : vector<1x128xf32> to vector<16x128xf32>
    %56 = arith.mulf %54, %55 : vector<16x128xf32>
    %57 = vector.broadcast %44 : vector<1x128xf32> to vector<16x128xf32>
    %58 = arith.addf %56, %57 : vector<16x128xf32>
    %59 = arith.negf %58 : vector<16x128xf32>
    %60 = math.exp %59 : vector<16x128xf32>
    %cst_36 = arith.constant 1.000000e+00 : f32
    %61 = vector.broadcast %cst_36 : f32 to vector<16x128xf32>
    %62 = arith.addf %61, %60 : vector<16x128xf32>
    %63 = arith.divf %61, %62 : vector<16x128xf32>
    %64 = arith.mulf %58, %63 : vector<16x128xf32>
    %65 = vector.broadcast %11 : vector<1x128xf32> to vector<16x128xf32>
    %66 = arith.addf %64, %65 : vector<16x128xf32>
    %67 = tpu.concatenate %48, %66, %49 in 0 : vector<8x128xf32>, vector<16x128xf32>, vector<8x128xf32> -> vector<32x128xf32>
    %68 = arith.truncf %67 : vector<32x128xf32> to vector<32x128xbf16>
    %c32 = arith.constant 32 : index
    %c0_37 = arith.constant 0 : index
    %69 = vector.load %arg17[%c32, %c0_37] : memref<608x128xbf16, #tpu.memory_space<vmem>>, vector<32x128xbf16>
    tpu.vector_store %arg17[%c32, %c0_37], %68 {strides = array<i32>} : memref<608x128xbf16, #tpu.memory_space<vmem>>, vector<32x128xbf16>,
    %70 = vector.extract_strided_slice %26 {offsets = [16, 0], sizes = [16, 128], strides = [1, 1]} : vector<256x128xf32> to vector<16x128xf32>
    %71 = vector.broadcast %33 : vector<1x128xf32> to vector<16x128xf32>
    %72 = arith.subf %70, %71 : vector<16x128xf32>
    %73 = vector.broadcast %42 : vector<1x128xf32> to vector<16x128xf32>
    %74 = arith.mulf %72, %73 : vector<16x128xf32>
    %75 = vector.broadcast %43 : vector<1x128xf32> to vector<16x128xf32>
    %76 = arith.mulf %74, %75 : vector<16x128xf32>
    %77 = vector.broadcast %44 : vector<1x128xf32> to vector<16x128xf32>
    %78 = arith.addf %76, %77 : vector<16x128xf32>
    %79 = arith.negf %78 : vector<16x128xf32>
    %80 = math.exp %79 : vector<16x128xf32>
    %cst_38 = arith.constant 1.000000e+00 : f32
    %81 = vector.broadcast %cst_38 : f32 to vector<16x128xf32>
    %82 = arith.addf %81, %80 : vector<16x128xf32>
    %83 = arith.divf %81, %82 : vector<16x128xf32>
    %84 = arith.mulf %78, %83 : vector<16x128xf32>
    %85 = vector.broadcast %11 : vector<1x128xf32> to vector<16x128xf32>
    %86 = arith.addf %84, %85 : vector<16x128xf32>
    %87 = tpu.concatenate %48, %86, %49 in 0 : vector<8x128xf32>, vector<16x128xf32>, vector<8x128xf32> -> vector<32x128xf32>
    %88 = arith.truncf %87 : vector<32x128xf32> to vector<32x128xbf16>
    %c64 = arith.constant 64 : index
    %c0_39 = arith.constant 0 : index
    %89 = vector.load %arg17[%c64, %c0_39] : memref<608x128xbf16, #tpu.memory_space<vmem>>, vector<32x128xbf16>
    tpu.vector_store %arg17[%c64, %c0_39], %88 {strides = array<i32>} : memref<608x128xbf16, #tpu.memory_space<vmem>>, vector<32x128xbf16>,
    %90 = vector.extract_strided_slice %26 {offsets = [32, 0], sizes = [16, 128], strides = [1, 1]} : vector<256x128xf32> to vector<16x128xf32>
    %91 = vector.broadcast %33 : vector<1x128xf32> to vector<16x128xf32>
    %92 = arith.subf %90, %91 : vector<16x128xf32>
    %93 = vector.broadcast %42 : vector<1x128xf32> to vector<16x128xf32>
    %94 = arith.mulf %92, %93 : vector<16x128xf32>
    %95 = vector.broadcast %43 : vector<1x128xf32> to vector<16x128xf32>
    %96 = arith.mulf %94, %95 : vector<16x128xf32>
    %97 = vector.broadcast %44 : vector<1x128xf32> to vector<16x128xf32>
    %98 = arith.addf %96, %97 : vector<16x128xf32>
    %99 = arith.negf %98 : vector<16x128xf32>
    %100 = math.exp %99 : vector<16x128xf32>
    %cst_40 = arith.constant 1.000000e+00 : f32
    %101 = vector.broadcast %cst_40 : f32 to vector<16x128xf32>
    %102 = arith.addf %101, %100 : vector<16x128xf32>
    %103 = arith.divf %101, %102 : vector<16x128xf32>
    %104 = arith.mulf %98, %103 : vector<16x128xf32>
    %105 = vector.broadcast %11 : vector<1x128xf32> to vector<16x128xf32>
    %106 = arith.addf %104, %105 : vector<16x128xf32>
    %107 = tpu.concatenate %48, %106, %49 in 0 : vector<8x128xf32>, vector<16x128xf32>, vector<8x128xf32> -> vector<32x128xf32>
    %108 = arith.truncf %107 : vector<32x128xf32> to vector<32x128xbf16>
    %c96 = arith.constant 96 : index
    %c0_41 = arith.constant 0 : index
    %109 = vector.load %arg17[%c96, %c0_41] : memref<608x128xbf16, #tpu.memory_space<vmem>>, vector<32x128xbf16>
    tpu.vector_store %arg17[%c96, %c0_41], %108 {strides = array<i32>} : memref<608x128xbf16, #tpu.memory_space<vmem>>, vector<32x128xbf16>,
    %110 = vector.extract_strided_slice %26 {offsets = [48, 0], sizes = [16, 128], strides = [1, 1]} : vector<256x128xf32> to vector<16x128xf32>
    %111 = vector.broadcast %33 : vector<1x128xf32> to vector<16x128xf32>
    %112 = arith.subf %110, %111 : vector<16x128xf32>
    %113 = vector.broadcast %42 : vector<1x128xf32> to vector<16x128xf32>
    %114 = arith.mulf %112, %113 : vector<16x128xf32>
    %115 = vector.broadcast %43 : vector<1x128xf32> to vector<16x128xf32>
    %116 = arith.mulf %114, %115 : vector<16x128xf32>
    %117 = vector.broadcast %44 : vector<1x128xf32> to vector<16x128xf32>
    %118 = arith.addf %116, %117 : vector<16x128xf32>
    %119 = arith.negf %118 : vector<16x128xf32>
    %120 = math.exp %119 : vector<16x128xf32>
    %cst_42 = arith.constant 1.000000e+00 : f32
    %121 = vector.broadcast %cst_42 : f32 to vector<16x128xf32>
    %122 = arith.addf %121, %120 : vector<16x128xf32>
    %123 = arith.divf %121, %122 : vector<16x128xf32>
    %124 = arith.mulf %118, %123 : vector<16x128xf32>
    %125 = vector.broadcast %11 : vector<1x128xf32> to vector<16x128xf32>
    %126 = arith.addf %124, %125 : vector<16x128xf32>
    %127 = tpu.concatenate %48, %126, %49 in 0 : vector<8x128xf32>, vector<16x128xf32>, vector<8x128xf32> -> vector<32x128xf32>
    %128 = arith.truncf %127 : vector<32x128xf32> to vector<32x128xbf16>
    %c128 = arith.constant 128 : index
    %c0_43 = arith.constant 0 : index
    %129 = vector.load %arg17[%c128, %c0_43] : memref<608x128xbf16, #tpu.memory_space<vmem>>, vector<32x128xbf16>
    tpu.vector_store %arg17[%c128, %c0_43], %128 {strides = array<i32>} : memref<608x128xbf16, #tpu.memory_space<vmem>>, vector<32x128xbf16>,
    %130 = vector.extract_strided_slice %26 {offsets = [64, 0], sizes = [16, 128], strides = [1, 1]} : vector<256x128xf32> to vector<16x128xf32>
    %131 = vector.broadcast %33 : vector<1x128xf32> to vector<16x128xf32>
    %132 = arith.subf %130, %131 : vector<16x128xf32>
    %133 = vector.broadcast %42 : vector<1x128xf32> to vector<16x128xf32>
    %134 = arith.mulf %132, %133 : vector<16x128xf32>
    %135 = vector.broadcast %43 : vector<1x128xf32> to vector<16x128xf32>
    %136 = arith.mulf %134, %135 : vector<16x128xf32>
    %137 = vector.broadcast %44 : vector<1x128xf32> to vector<16x128xf32>
    %138 = arith.addf %136, %137 : vector<16x128xf32>
    %139 = arith.negf %138 : vector<16x128xf32>
    %140 = math.exp %139 : vector<16x128xf32>
    %cst_44 = arith.constant 1.000000e+00 : f32
    %141 = vector.broadcast %cst_44 : f32 to vector<16x128xf32>
    %142 = arith.addf %141, %140 : vector<16x128xf32>
    %143 = arith.divf %141, %142 : vector<16x128xf32>
    %144 = arith.mulf %138, %143 : vector<16x128xf32>
    %145 = vector.broadcast %11 : vector<1x128xf32> to vector<16x128xf32>
    %146 = arith.addf %144, %145 : vector<16x128xf32>
    %147 = tpu.concatenate %48, %146, %49 in 0 : vector<8x128xf32>, vector<16x128xf32>, vector<8x128xf32> -> vector<32x128xf32>
    %148 = arith.truncf %147 : vector<32x128xf32> to vector<32x128xbf16>
    %c160 = arith.constant 160 : index
    %c0_45 = arith.constant 0 : index
    %149 = vector.load %arg17[%c160, %c0_45] : memref<608x128xbf16, #tpu.memory_space<vmem>>, vector<32x128xbf16>
    tpu.vector_store %arg17[%c160, %c0_45], %148 {strides = array<i32>} : memref<608x128xbf16, #tpu.memory_space<vmem>>, vector<32x128xbf16>,
    %150 = vector.extract_strided_slice %26 {offsets = [80, 0], sizes = [16, 128], strides = [1, 1]} : vector<256x128xf32> to vector<16x128xf32>
    %151 = vector.broadcast %33 : vector<1x128xf32> to vector<16x128xf32>
    %152 = arith.subf %150, %151 : vector<16x128xf32>
    %153 = vector.broadcast %42 : vector<1x128xf32> to vector<16x128xf32>
    %154 = arith.mulf %152, %153 : vector<16x128xf32>
    %155 = vector.broadcast %43 : vector<1x128xf32> to vector<16x128xf32>
    %156 = arith.mulf %154, %155 : vector<16x128xf32>
    %157 = vector.broadcast %44 : vector<1x128xf32> to vector<16x128xf32>
    %158 = arith.addf %156, %157 : vector<16x128xf32>
    %159 = arith.negf %158 : vector<16x128xf32>
    %160 = math.exp %159 : vector<16x128xf32>
    %cst_46 = arith.constant 1.000000e+00 : f32
    %161 = vector.broadcast %cst_46 : f32 to vector<16x128xf32>
    %162 = arith.addf %161, %160 : vector<16x128xf32>
    %163 = arith.divf %161, %162 : vector<16x128xf32>
    %164 = arith.mulf %158, %163 : vector<16x128xf32>
    %165 = vector.broadcast %11 : vector<1x128xf32> to vector<16x128xf32>
    %166 = arith.addf %164, %165 : vector<16x128xf32>
    %167 = tpu.concatenate %48, %166, %49 in 0 : vector<8x128xf32>, vector<16x128xf32>, vector<8x128xf32> -> vector<32x128xf32>
    %168 = arith.truncf %167 : vector<32x128xf32> to vector<32x128xbf16>
    %c192 = arith.constant 192 : index
    %c0_47 = arith.constant 0 : index
    %169 = vector.load %arg17[%c192, %c0_47] : memref<608x128xbf16, #tpu.memory_space<vmem>>, vector<32x128xbf16>
    tpu.vector_store %arg17[%c192, %c0_47], %168 {strides = array<i32>} : memref<608x128xbf16, #tpu.memory_space<vmem>>, vector<32x128xbf16>,
    %170 = vector.extract_strided_slice %26 {offsets = [96, 0], sizes = [16, 128], strides = [1, 1]} : vector<256x128xf32> to vector<16x128xf32>
    %171 = vector.broadcast %33 : vector<1x128xf32> to vector<16x128xf32>
    %172 = arith.subf %170, %171 : vector<16x128xf32>
    %173 = vector.broadcast %42 : vector<1x128xf32> to vector<16x128xf32>
    %174 = arith.mulf %172, %173 : vector<16x128xf32>
    %175 = vector.broadcast %43 : vector<1x128xf32> to vector<16x128xf32>
    %176 = arith.mulf %174, %175 : vector<16x128xf32>
    %177 = vector.broadcast %44 : vector<1x128xf32> to vector<16x128xf32>
    %178 = arith.addf %176, %177 : vector<16x128xf32>
    %179 = arith.negf %178 : vector<16x128xf32>
    %180 = math.exp %179 : vector<16x128xf32>
    %cst_48 = arith.constant 1.000000e+00 : f32
    %181 = vector.broadcast %cst_48 : f32 to vector<16x128xf32>
    %182 = arith.addf %181, %180 : vector<16x128xf32>
    %183 = arith.divf %181, %182 : vector<16x128xf32>
    %184 = arith.mulf %178, %183 : vector<16x128xf32>
    %185 = vector.broadcast %11 : vector<1x128xf32> to vector<16x128xf32>
    %186 = arith.addf %184, %185 : vector<16x128xf32>
    %187 = tpu.concatenate %48, %186, %49 in 0 : vector<8x128xf32>, vector<16x128xf32>, vector<8x128xf32> -> vector<32x128xf32>
    %188 = arith.truncf %187 : vector<32x128xf32> to vector<32x128xbf16>
    %c224 = arith.constant 224 : index
    %c0_49 = arith.constant 0 : index
    %189 = vector.load %arg17[%c224, %c0_49] : memref<608x128xbf16, #tpu.memory_space<vmem>>, vector<32x128xbf16>
    tpu.vector_store %arg17[%c224, %c0_49], %188 {strides = array<i32>} : memref<608x128xbf16, #tpu.memory_space<vmem>>, vector<32x128xbf16>,
    %190 = vector.extract_strided_slice %26 {offsets = [112, 0], sizes = [16, 128], strides = [1, 1]} : vector<256x128xf32> to vector<16x128xf32>
    %191 = vector.broadcast %33 : vector<1x128xf32> to vector<16x128xf32>
    %192 = arith.subf %190, %191 : vector<16x128xf32>
    %193 = vector.broadcast %42 : vector<1x128xf32> to vector<16x128xf32>
    %194 = arith.mulf %192, %193 : vector<16x128xf32>
    %195 = vector.broadcast %43 : vector<1x128xf32> to vector<16x128xf32>
    %196 = arith.mulf %194, %195 : vector<16x128xf32>
    %197 = vector.broadcast %44 : vector<1x128xf32> to vector<16x128xf32>
    %198 = arith.addf %196, %197 : vector<16x128xf32>
    %199 = arith.negf %198 : vector<16x128xf32>
    %200 = math.exp %199 : vector<16x128xf32>
    %cst_50 = arith.constant 1.000000e+00 : f32
    %201 = vector.broadcast %cst_50 : f32 to vector<16x128xf32>
    %202 = arith.addf %201, %200 : vector<16x128xf32>
    %203 = arith.divf %201, %202 : vector<16x128xf32>
    %204 = arith.mulf %198, %203 : vector<16x128xf32>
    %205 = vector.broadcast %11 : vector<1x128xf32> to vector<16x128xf32>
    %206 = arith.addf %204, %205 : vector<16x128xf32>
    %207 = tpu.concatenate %48, %206, %49 in 0 : vector<8x128xf32>, vector<16x128xf32>, vector<8x128xf32> -> vector<32x128xf32>
    %208 = arith.truncf %207 : vector<32x128xf32> to vector<32x128xbf16>
    %c256 = arith.constant 256 : index
    %c0_51 = arith.constant 0 : index
    %209 = vector.load %arg17[%c256, %c0_51] : memref<608x128xbf16, #tpu.memory_space<vmem>>, vector<32x128xbf16>
    tpu.vector_store %arg17[%c256, %c0_51], %208 {strides = array<i32>} : memref<608x128xbf16, #tpu.memory_space<vmem>>, vector<32x128xbf16>,
    %210 = vector.extract_strided_slice %26 {offsets = [128, 0], sizes = [16, 128], strides = [1, 1]} : vector<256x128xf32> to vector<16x128xf32>
    %211 = vector.broadcast %33 : vector<1x128xf32> to vector<16x128xf32>
    %212 = arith.subf %210, %211 : vector<16x128xf32>
    %213 = vector.broadcast %42 : vector<1x128xf32> to vector<16x128xf32>
    %214 = arith.mulf %212, %213 : vector<16x128xf32>
    %215 = vector.broadcast %43 : vector<1x128xf32> to vector<16x128xf32>
    %216 = arith.mulf %214, %215 : vector<16x128xf32>
    %217 = vector.broadcast %44 : vector<1x128xf32> to vector<16x128xf32>
    %218 = arith.addf %216, %217 : vector<16x128xf32>
    %219 = arith.negf %218 : vector<16x128xf32>
    %220 = math.exp %219 : vector<16x128xf32>
    %cst_52 = arith.constant 1.000000e+00 : f32
    %221 = vector.broadcast %cst_52 : f32 to vector<16x128xf32>
    %222 = arith.addf %221, %220 : vector<16x128xf32>
    %223 = arith.divf %221, %222 : vector<16x128xf32>
    %224 = arith.mulf %218, %223 : vector<16x128xf32>
    %225 = vector.broadcast %11 : vector<1x128xf32> to vector<16x128xf32>
    %226 = arith.addf %224, %225 : vector<16x128xf32>
    %227 = tpu.concatenate %48, %226, %49 in 0 : vector<8x128xf32>, vector<16x128xf32>, vector<8x128xf32> -> vector<32x128xf32>
    %228 = arith.truncf %227 : vector<32x128xf32> to vector<32x128xbf16>
    %c288 = arith.constant 288 : index
    %c0_53 = arith.constant 0 : index
    %229 = vector.load %arg17[%c288, %c0_53] : memref<608x128xbf16, #tpu.memory_space<vmem>>, vector<32x128xbf16>
    tpu.vector_store %arg17[%c288, %c0_53], %228 {strides = array<i32>} : memref<608x128xbf16, #tpu.memory_space<vmem>>, vector<32x128xbf16>,
    %230 = vector.extract_strided_slice %26 {offsets = [144, 0], sizes = [16, 128], strides = [1, 1]} : vector<256x128xf32> to vector<16x128xf32>
    %231 = vector.broadcast %33 : vector<1x128xf32> to vector<16x128xf32>
    %232 = arith.subf %230, %231 : vector<16x128xf32>
    %233 = vector.broadcast %42 : vector<1x128xf32> to vector<16x128xf32>
    %234 = arith.mulf %232, %233 : vector<16x128xf32>
    %235 = vector.broadcast %43 : vector<1x128xf32> to vector<16x128xf32>
    %236 = arith.mulf %234, %235 : vector<16x128xf32>
    %237 = vector.broadcast %44 : vector<1x128xf32> to vector<16x128xf32>
    %238 = arith.addf %236, %237 : vector<16x128xf32>
    %239 = arith.negf %238 : vector<16x128xf32>
    %240 = math.exp %239 : vector<16x128xf32>
    %cst_54 = arith.constant 1.000000e+00 : f32
    %241 = vector.broadcast %cst_54 : f32 to vector<16x128xf32>
    %242 = arith.addf %241, %240 : vector<16x128xf32>
    %243 = arith.divf %241, %242 : vector<16x128xf32>
    %244 = arith.mulf %238, %243 : vector<16x128xf32>
    %245 = vector.broadcast %11 : vector<1x128xf32> to vector<16x128xf32>
    %246 = arith.addf %244, %245 : vector<16x128xf32>
    %247 = tpu.concatenate %48, %246, %49 in 0 : vector<8x128xf32>, vector<16x128xf32>, vector<8x128xf32> -> vector<32x128xf32>
    %248 = arith.truncf %247 : vector<32x128xf32> to vector<32x128xbf16>
    %c320 = arith.constant 320 : index
    %c0_55 = arith.constant 0 : index
    %249 = vector.load %arg17[%c320, %c0_55] : memref<608x128xbf16, #tpu.memory_space<vmem>>, vector<32x128xbf16>
    tpu.vector_store %arg17[%c320, %c0_55], %248 {strides = array<i32>} : memref<608x128xbf16, #tpu.memory_space<vmem>>, vector<32x128xbf16>,
    %250 = vector.extract_strided_slice %26 {offsets = [160, 0], sizes = [16, 128], strides = [1, 1]} : vector<256x128xf32> to vector<16x128xf32>
    %251 = vector.broadcast %33 : vector<1x128xf32> to vector<16x128xf32>
    %252 = arith.subf %250, %251 : vector<16x128xf32>
    %253 = vector.broadcast %42 : vector<1x128xf32> to vector<16x128xf32>
    %254 = arith.mulf %252, %253 : vector<16x128xf32>
    %255 = vector.broadcast %43 : vector<1x128xf32> to vector<16x128xf32>
    %256 = arith.mulf %254, %255 : vector<16x128xf32>
    %257 = vector.broadcast %44 : vector<1x128xf32> to vector<16x128xf32>
    %258 = arith.addf %256, %257 : vector<16x128xf32>
    %259 = arith.negf %258 : vector<16x128xf32>
    %260 = math.exp %259 : vector<16x128xf32>
    %cst_56 = arith.constant 1.000000e+00 : f32
    %261 = vector.broadcast %cst_56 : f32 to vector<16x128xf32>
    %262 = arith.addf %261, %260 : vector<16x128xf32>
    %263 = arith.divf %261, %262 : vector<16x128xf32>
    %264 = arith.mulf %258, %263 : vector<16x128xf32>
    %265 = vector.broadcast %11 : vector<1x128xf32> to vector<16x128xf32>
    %266 = arith.addf %264, %265 : vector<16x128xf32>
    %267 = tpu.concatenate %48, %266, %49 in 0 : vector<8x128xf32>, vector<16x128xf32>, vector<8x128xf32> -> vector<32x128xf32>
    %268 = arith.truncf %267 : vector<32x128xf32> to vector<32x128xbf16>
    %c352 = arith.constant 352 : index
    %c0_57 = arith.constant 0 : index
    %269 = vector.load %arg17[%c352, %c0_57] : memref<608x128xbf16, #tpu.memory_space<vmem>>, vector<32x128xbf16>
    tpu.vector_store %arg17[%c352, %c0_57], %268 {strides = array<i32>} : memref<608x128xbf16, #tpu.memory_space<vmem>>, vector<32x128xbf16>,
    %270 = vector.extract_strided_slice %26 {offsets = [176, 0], sizes = [16, 128], strides = [1, 1]} : vector<256x128xf32> to vector<16x128xf32>
    %271 = vector.broadcast %33 : vector<1x128xf32> to vector<16x128xf32>
    %272 = arith.subf %270, %271 : vector<16x128xf32>
    %273 = vector.broadcast %42 : vector<1x128xf32> to vector<16x128xf32>
    %274 = arith.mulf %272, %273 : vector<16x128xf32>
    %275 = vector.broadcast %43 : vector<1x128xf32> to vector<16x128xf32>
    %276 = arith.mulf %274, %275 : vector<16x128xf32>
    %277 = vector.broadcast %44 : vector<1x128xf32> to vector<16x128xf32>
    %278 = arith.addf %276, %277 : vector<16x128xf32>
    %279 = arith.negf %278 : vector<16x128xf32>
    %280 = math.exp %279 : vector<16x128xf32>
    %cst_58 = arith.constant 1.000000e+00 : f32
    %281 = vector.broadcast %cst_58 : f32 to vector<16x128xf32>
    %282 = arith.addf %281, %280 : vector<16x128xf32>
    %283 = arith.divf %281, %282 : vector<16x128xf32>
    %284 = arith.mulf %278, %283 : vector<16x128xf32>
    %285 = vector.broadcast %11 : vector<1x128xf32> to vector<16x128xf32>
    %286 = arith.addf %284, %285 : vector<16x128xf32>
    %287 = tpu.concatenate %48, %286, %49 in 0 : vector<8x128xf32>, vector<16x128xf32>, vector<8x128xf32> -> vector<32x128xf32>
    %288 = arith.truncf %287 : vector<32x128xf32> to vector<32x128xbf16>
    %c384 = arith.constant 384 : index
    %c0_59 = arith.constant 0 : index
    %289 = vector.load %arg17[%c384, %c0_59] : memref<608x128xbf16, #tpu.memory_space<vmem>>, vector<32x128xbf16>
    tpu.vector_store %arg17[%c384, %c0_59], %288 {strides = array<i32>} : memref<608x128xbf16, #tpu.memory_space<vmem>>, vector<32x128xbf16>,
    %290 = vector.extract_strided_slice %26 {offsets = [192, 0], sizes = [16, 128], strides = [1, 1]} : vector<256x128xf32> to vector<16x128xf32>
    %291 = vector.broadcast %33 : vector<1x128xf32> to vector<16x128xf32>
    %292 = arith.subf %290, %291 : vector<16x128xf32>
    %293 = vector.broadcast %42 : vector<1x128xf32> to vector<16x128xf32>
    %294 = arith.mulf %292, %293 : vector<16x128xf32>
    %295 = vector.broadcast %43 : vector<1x128xf32> to vector<16x128xf32>
    %296 = arith.mulf %294, %295 : vector<16x128xf32>
    %297 = vector.broadcast %44 : vector<1x128xf32> to vector<16x128xf32>
    %298 = arith.addf %296, %297 : vector<16x128xf32>
    %299 = arith.negf %298 : vector<16x128xf32>
    %300 = math.exp %299 : vector<16x128xf32>
    %cst_60 = arith.constant 1.000000e+00 : f32
    %301 = vector.broadcast %cst_60 : f32 to vector<16x128xf32>
    %302 = arith.addf %301, %300 : vector<16x128xf32>
    %303 = arith.divf %301, %302 : vector<16x128xf32>
    %304 = arith.mulf %298, %303 : vector<16x128xf32>
    %305 = vector.broadcast %11 : vector<1x128xf32> to vector<16x128xf32>
    %306 = arith.addf %304, %305 : vector<16x128xf32>
    %307 = tpu.concatenate %48, %306, %49 in 0 : vector<8x128xf32>, vector<16x128xf32>, vector<8x128xf32> -> vector<32x128xf32>
    %308 = arith.truncf %307 : vector<32x128xf32> to vector<32x128xbf16>
    %c416 = arith.constant 416 : index
    %c0_61 = arith.constant 0 : index
    %309 = vector.load %arg17[%c416, %c0_61] : memref<608x128xbf16, #tpu.memory_space<vmem>>, vector<32x128xbf16>
    tpu.vector_store %arg17[%c416, %c0_61], %308 {strides = array<i32>} : memref<608x128xbf16, #tpu.memory_space<vmem>>, vector<32x128xbf16>,
    %310 = vector.extract_strided_slice %26 {offsets = [208, 0], sizes = [16, 128], strides = [1, 1]} : vector<256x128xf32> to vector<16x128xf32>
    %311 = vector.broadcast %33 : vector<1x128xf32> to vector<16x128xf32>
    %312 = arith.subf %310, %311 : vector<16x128xf32>
    %313 = vector.broadcast %42 : vector<1x128xf32> to vector<16x128xf32>
    %314 = arith.mulf %312, %313 : vector<16x128xf32>
    %315 = vector.broadcast %43 : vector<1x128xf32> to vector<16x128xf32>
    %316 = arith.mulf %314, %315 : vector<16x128xf32>
    %317 = vector.broadcast %44 : vector<1x128xf32> to vector<16x128xf32>
    %318 = arith.addf %316, %317 : vector<16x128xf32>
    %319 = arith.negf %318 : vector<16x128xf32>
    %320 = math.exp %319 : vector<16x128xf32>
    %cst_62 = arith.constant 1.000000e+00 : f32
    %321 = vector.broadcast %cst_62 : f32 to vector<16x128xf32>
    %322 = arith.addf %321, %320 : vector<16x128xf32>
    %323 = arith.divf %321, %322 : vector<16x128xf32>
    %324 = arith.mulf %318, %323 : vector<16x128xf32>
    %325 = vector.broadcast %11 : vector<1x128xf32> to vector<16x128xf32>
    %326 = arith.addf %324, %325 : vector<16x128xf32>
    %327 = tpu.concatenate %48, %326, %49 in 0 : vector<8x128xf32>, vector<16x128xf32>, vector<8x128xf32> -> vector<32x128xf32>
    %328 = arith.truncf %327 : vector<32x128xf32> to vector<32x128xbf16>
    %c448 = arith.constant 448 : index
    %c0_63 = arith.constant 0 : index
    %329 = vector.load %arg17[%c448, %c0_63] : memref<608x128xbf16, #tpu.memory_space<vmem>>, vector<32x128xbf16>
    tpu.vector_store %arg17[%c448, %c0_63], %328 {strides = array<i32>} : memref<608x128xbf16, #tpu.memory_space<vmem>>, vector<32x128xbf16>,
    %330 = vector.extract_strided_slice %26 {offsets = [224, 0], sizes = [16, 128], strides = [1, 1]} : vector<256x128xf32> to vector<16x128xf32>
    %331 = vector.broadcast %33 : vector<1x128xf32> to vector<16x128xf32>
    %332 = arith.subf %330, %331 : vector<16x128xf32>
    %333 = vector.broadcast %42 : vector<1x128xf32> to vector<16x128xf32>
    %334 = arith.mulf %332, %333 : vector<16x128xf32>
    %335 = vector.broadcast %43 : vector<1x128xf32> to vector<16x128xf32>
    %336 = arith.mulf %334, %335 : vector<16x128xf32>
    %337 = vector.broadcast %44 : vector<1x128xf32> to vector<16x128xf32>
    %338 = arith.addf %336, %337 : vector<16x128xf32>
    %339 = arith.negf %338 : vector<16x128xf32>
    %340 = math.exp %339 : vector<16x128xf32>
    %cst_64 = arith.constant 1.000000e+00 : f32
    %341 = vector.broadcast %cst_64 : f32 to vector<16x128xf32>
    %342 = arith.addf %341, %340 : vector<16x128xf32>
    %343 = arith.divf %341, %342 : vector<16x128xf32>
    %344 = arith.mulf %338, %343 : vector<16x128xf32>
    %345 = vector.broadcast %11 : vector<1x128xf32> to vector<16x128xf32>
    %346 = arith.addf %344, %345 : vector<16x128xf32>
    %347 = tpu.concatenate %48, %346, %49 in 0 : vector<8x128xf32>, vector<16x128xf32>, vector<8x128xf32> -> vector<32x128xf32>
    %348 = arith.truncf %347 : vector<32x128xf32> to vector<32x128xbf16>
    %c480 = arith.constant 480 : index
    %c0_65 = arith.constant 0 : index
    %349 = vector.load %arg17[%c480, %c0_65] : memref<608x128xbf16, #tpu.memory_space<vmem>>, vector<32x128xbf16>
    tpu.vector_store %arg17[%c480, %c0_65], %348 {strides = array<i32>} : memref<608x128xbf16, #tpu.memory_space<vmem>>, vector<32x128xbf16>,
    %350 = vector.extract_strided_slice %26 {offsets = [240, 0], sizes = [16, 128], strides = [1, 1]} : vector<256x128xf32> to vector<16x128xf32>
    %351 = vector.broadcast %33 : vector<1x128xf32> to vector<16x128xf32>
    %352 = arith.subf %350, %351 : vector<16x128xf32>
    %353 = vector.broadcast %42 : vector<1x128xf32> to vector<16x128xf32>
    %354 = arith.mulf %352, %353 : vector<16x128xf32>
    %355 = vector.broadcast %43 : vector<1x128xf32> to vector<16x128xf32>
    %356 = arith.mulf %354, %355 : vector<16x128xf32>
    %357 = vector.broadcast %44 : vector<1x128xf32> to vector<16x128xf32>
    %358 = arith.addf %356, %357 : vector<16x128xf32>
    %359 = arith.negf %358 : vector<16x128xf32>
    %360 = math.exp %359 : vector<16x128xf32>
    %cst_66 = arith.constant 1.000000e+00 : f32
    %361 = vector.broadcast %cst_66 : f32 to vector<16x128xf32>
    %362 = arith.addf %361, %360 : vector<16x128xf32>
    %363 = arith.divf %361, %362 : vector<16x128xf32>
    %364 = arith.mulf %358, %363 : vector<16x128xf32>
    %365 = vector.broadcast %11 : vector<1x128xf32> to vector<16x128xf32>
    %366 = arith.addf %364, %365 : vector<16x128xf32>
    %367 = tpu.concatenate %48, %366, %49 in 0 : vector<8x128xf32>, vector<16x128xf32>, vector<8x128xf32> -> vector<32x128xf32>
    %368 = arith.truncf %367 : vector<32x128xf32> to vector<32x128xbf16>
    %c512 = arith.constant 512 : index
    %c0_67 = arith.constant 0 : index
    %369 = vector.load %arg17[%c512, %c0_67] : memref<608x128xbf16, #tpu.memory_space<vmem>>, vector<32x128xbf16>
    tpu.vector_store %arg17[%c512, %c0_67], %368 {strides = array<i32>} : memref<608x128xbf16, #tpu.memory_space<vmem>>, vector<32x128xbf16>,
    %c0_68 = arith.constant 0 : index
    %c0_69 = arith.constant 0 : index
    %370 = vector.load %arg11[%c0_68, %c0_69] : memref<1x128xf32, #tpu.memory_space<vmem>>, vector<1x128xf32>
    %371 = tpu.iota {dimensions = array<i32: 0>} : vector<128x1xi32>
    %c32_i32 = arith.constant 32 : i32
    %c0_i32 = arith.constant 0 : i32
    %372 = arith.cmpi eq, %c32_i32, %c0_i32 : i32
    %c1_i32 = arith.constant 1 : i32
    %373 = arith.select %372, %c1_i32, %c32_i32 : i32
    %374 = vector.broadcast %373 : i32 to vector<128x1xi32>
    %375 = arith.remsi %371, %374 : vector<128x1xi32>
    %c0_i32_70 = arith.constant 0 : i32
    %376 = vector.broadcast %c0_i32_70 : i32 to vector<128x1xi32>
    %377 = arith.cmpi ne, %375, %376 : vector<128x1xi32>
    %c0_i32_71 = arith.constant 0 : i32
    %378 = vector.broadcast %c0_i32_71 : i32 to vector<128x1xi32>
    %379 = arith.cmpi slt, %375, %378 : vector<128x1xi32>
    %c0_i32_72 = arith.constant 0 : i32
    %380 = arith.cmpi slt, %373, %c0_i32_72 : i32
    %381 = vector.broadcast %380 : i1 to vector<128x1xi1>
    %382 = vector.broadcast %381 : vector<128x1xi1> to vector<128x1xi1>
    %383 = arith.xori %379, %382 : vector<128x1xi1>
    %384 = arith.andi %383, %377 : vector<128x1xi1>
    %385 = vector.broadcast %373 : i32 to vector<128x1xi32>
    %386 = arith.addi %375, %385 : vector<128x1xi32>
    %387 = arith.select %384, %386, %375 : vector<128x1xi1>, vector<128x1xi32>
    %c16_i32 = arith.constant 16 : i32
    %388 = vector.broadcast %c16_i32 : i32 to vector<128x1xi32>
    %389 = arith.cmpi slt, %387, %388 : vector<128x1xi32>
    %cst_73 = arith.constant 0.000000e+00 : f32
    %390 = vector.broadcast %cst_73 : f32 to vector<1x128xf32>
    %cst_74 = arith.constant 0.000000e+00 : f32
    %391 = vector.broadcast %cst_74 : f32 to vector<1x128xf32>
    %cst_75 = arith.constant 0.000000e+00 : f32
    %392 = vector.broadcast %cst_75 : f32 to vector<128x128xf32>
    %c7 = arith.constant 7 : index
    %c0_76 = arith.constant 0 : index
    %393 = vector.load %arg17[%c7, %c0_76] : memref<608x128xbf16, #tpu.memory_space<vmem>>, vector<128x128xbf16>
    %c0_77 = arith.constant 0 : index
    %c0_78 = arith.constant 0 : index
    %c0_79 = arith.constant 0 : index
    %c0_80 = arith.constant 0 : index
    %394 = vector.load %arg10[%c0_77, %c0_78, %c0_79, %c0_80] : memref<3x3x128x128xbf16, #tpu.memory_space<vmem>>, vector<1x1x128x128xbf16>
    %395 = vector.shape_cast %394 : vector<1x1x128x128xbf16> to vector<128x128xbf16>
    %cst_81 = arith.constant dense<0.000000e+00> : vector<128x128xf32>
    %396 = tpu.matmul %393, %395, %cst_81 {dimension_numbers = #tpu.dot_dimension_numbers<[1], [0], [0], [1], [0, 0, 1, 1], [], []>} : vector<128x128xbf16>, vector<128x128xbf16>, vector<128x128xf32> -> vector<128x128xf32>
    %397 = arith.addf %392, %396 : vector<128x128xf32>
    %c8 = arith.constant 8 : index
    %c0_82 = arith.constant 0 : index
    %398 = vector.load %arg17[%c8, %c0_82] : memref<608x128xbf16, #tpu.memory_space<vmem>>, vector<128x128xbf16>
    %c0_83 = arith.constant 0 : index
    %c1 = arith.constant 1 : index
    %c0_84 = arith.constant 0 : index
    %c0_85 = arith.constant 0 : index
    %399 = vector.load %arg10[%c0_83, %c1, %c0_84, %c0_85] : memref<3x3x128x128xbf16, #tpu.memory_space<vmem>>, vector<1x1x128x128xbf16>
    %400 = vector.shape_cast %399 : vector<1x1x128x128xbf16> to vector<128x128xbf16>
    %cst_86 = arith.constant dense<0.000000e+00> : vector<128x128xf32>
    %401 = tpu.matmul %398, %400, %cst_86 {dimension_numbers = #tpu.dot_dimension_numbers<[1], [0], [0], [1], [0, 0, 1, 1], [], []>} : vector<128x128xbf16>, vector<128x128xbf16>, vector<128x128xf32> -> vector<128x128xf32>
    %402 = arith.addf %397, %401 : vector<128x128xf32>
    %c9 = arith.constant 9 : index
    %c0_87 = arith.constant 0 : index
    %403 = vector.load %arg17[%c9, %c0_87] : memref<608x128xbf16, #tpu.memory_space<vmem>>, vector<128x128xbf16>
    %c0_88 = arith.constant 0 : index
    %c2 = arith.constant 2 : index
    %c0_89 = arith.constant 0 : index
    %c0_90 = arith.constant 0 : index
    %404 = vector.load %arg10[%c0_88, %c2, %c0_89, %c0_90] : memref<3x3x128x128xbf16, #tpu.memory_space<vmem>>, vector<1x1x128x128xbf16>
    %405 = vector.shape_cast %404 : vector<1x1x128x128xbf16> to vector<128x128xbf16>
    %cst_91 = arith.constant dense<0.000000e+00> : vector<128x128xf32>
    %406 = tpu.matmul %403, %405, %cst_91 {dimension_numbers = #tpu.dot_dimension_numbers<[1], [0], [0], [1], [0, 0, 1, 1], [], []>} : vector<128x128xbf16>, vector<128x128xbf16>, vector<128x128xf32> -> vector<128x128xf32>
    %407 = arith.addf %402, %406 : vector<128x128xf32>
    %c39 = arith.constant 39 : index
    %c0_92 = arith.constant 0 : index
    %408 = vector.load %arg17[%c39, %c0_92] : memref<608x128xbf16, #tpu.memory_space<vmem>>, vector<128x128xbf16>
    %c1_93 = arith.constant 1 : index
    %c0_94 = arith.constant 0 : index
    %c0_95 = arith.constant 0 : index
    %c0_96 = arith.constant 0 : index
    %409 = vector.load %arg10[%c1_93, %c0_94, %c0_95, %c0_96] : memref<3x3x128x128xbf16, #tpu.memory_space<vmem>>, vector<1x1x128x128xbf16>
    %410 = vector.shape_cast %409 : vector<1x1x128x128xbf16> to vector<128x128xbf16>
    %cst_97 = arith.constant dense<0.000000e+00> : vector<128x128xf32>
    %411 = tpu.matmul %408, %410, %cst_97 {dimension_numbers = #tpu.dot_dimension_numbers<[1], [0], [0], [1], [0, 0, 1, 1], [], []>} : vector<128x128xbf16>, vector<128x128xbf16>, vector<128x128xf32> -> vector<128x128xf32>
    %412 = arith.addf %407, %411 : vector<128x128xf32>
    %c40 = arith.constant 40 : index
    %c0_98 = arith.constant 0 : index
    %413 = vector.load %arg17[%c40, %c0_98] : memref<608x128xbf16, #tpu.memory_space<vmem>>, vector<128x128xbf16>
    %c1_99 = arith.constant 1 : index
    %c1_100 = arith.constant 1 : index
    %c0_101 = arith.constant 0 : index
    %c0_102 = arith.constant 0 : index
    %414 = vector.load %arg10[%c1_99, %c1_100, %c0_101, %c0_102] : memref<3x3x128x128xbf16, #tpu.memory_space<vmem>>, vector<1x1x128x128xbf16>
    %415 = vector.shape_cast %414 : vector<1x1x128x128xbf16> to vector<128x128xbf16>
    %cst_103 = arith.constant dense<0.000000e+00> : vector<128x128xf32>
    %416 = tpu.matmul %413, %415, %cst_103 {dimension_numbers = #tpu.dot_dimension_numbers<[1], [0], [0], [1], [0, 0, 1, 1], [], []>} : vector<128x128xbf16>, vector<128x128xbf16>, vector<128x128xf32> -> vector<128x128xf32>
    %417 = arith.addf %412, %416 : vector<128x128xf32>
    %c41 = arith.constant 41 : index
    %c0_104 = arith.constant 0 : index
    %418 = vector.load %arg17[%c41, %c0_104] : memref<608x128xbf16, #tpu.memory_space<vmem>>, vector<128x128xbf16>
    %c1_105 = arith.constant 1 : index
    %c2_106 = arith.constant 2 : index
    %c0_107 = arith.constant 0 : index
    %c0_108 = arith.constant 0 : index
    %419 = vector.load %arg10[%c1_105, %c2_106, %c0_107, %c0_108] : memref<3x3x128x128xbf16, #tpu.memory_space<vmem>>, vector<1x1x128x128xbf16>
    %420 = vector.shape_cast %419 : vector<1x1x128x128xbf16> to vector<128x128xbf16>
    %cst_109 = arith.constant dense<0.000000e+00> : vector<128x128xf32>
    %421 = tpu.matmul %418, %420, %cst_109 {dimension_numbers = #tpu.dot_dimension_numbers<[1], [0], [0], [1], [0, 0, 1, 1], [], []>} : vector<128x128xbf16>, vector<128x128xbf16>, vector<128x128xf32> -> vector<128x128xf32>
    %422 = arith.addf %417, %421 : vector<128x128xf32>
    %c71 = arith.constant 71 : index
    %c0_110 = arith.constant 0 : index
    %423 = vector.load %arg17[%c71, %c0_110] : memref<608x128xbf16, #tpu.memory_space<vmem>>, vector<128x128xbf16>
    %c2_111 = arith.constant 2 : index
    %c0_112 = arith.constant 0 : index
    %c0_113 = arith.constant 0 : index
    %c0_114 = arith.constant 0 : index
    %424 = vector.load %arg10[%c2_111, %c0_112, %c0_113, %c0_114] : memref<3x3x128x128xbf16, #tpu.memory_space<vmem>>, vector<1x1x128x128xbf16>
    %425 = vector.shape_cast %424 : vector<1x1x128x128xbf16> to vector<128x128xbf16>
    %cst_115 = arith.constant dense<0.000000e+00> : vector<128x128xf32>
    %426 = tpu.matmul %423, %425, %cst_115 {dimension_numbers = #tpu.dot_dimension_numbers<[1], [0], [0], [1], [0, 0, 1, 1], [], []>} : vector<128x128xbf16>, vector<128x128xbf16>, vector<128x128xf32> -> vector<128x128xf32>
    %427 = arith.addf %422, %426 : vector<128x128xf32>
    %c72 = arith.constant 72 : index
    %c0_116 = arith.constant 0 : index
    %428 = vector.load %arg17[%c72, %c0_116] : memref<608x128xbf16, #tpu.memory_space<vmem>>, vector<128x128xbf16>
    %c2_117 = arith.constant 2 : index
    %c1_118 = arith.constant 1 : index
    %c0_119 = arith.constant 0 : index
    %c0_120 = arith.constant 0 : index
    %429 = vector.load %arg10[%c2_117, %c1_118, %c0_119, %c0_120] : memref<3x3x128x128xbf16, #tpu.memory_space<vmem>>, vector<1x1x128x128xbf16>
    %430 = vector.shape_cast %429 : vector<1x1x128x128xbf16> to vector<128x128xbf16>
    %cst_121 = arith.constant dense<0.000000e+00> : vector<128x128xf32>
    %431 = tpu.matmul %428, %430, %cst_121 {dimension_numbers = #tpu.dot_dimension_numbers<[1], [0], [0], [1], [0, 0, 1, 1], [], []>} : vector<128x128xbf16>, vector<128x128xbf16>, vector<128x128xf32> -> vector<128x128xf32>
    %432 = arith.addf %427, %431 : vector<128x128xf32>
    %c73 = arith.constant 73 : index
    %c0_122 = arith.constant 0 : index
    %433 = vector.load %arg17[%c73, %c0_122] : memref<608x128xbf16, #tpu.memory_space<vmem>>, vector<128x128xbf16>
    %c2_123 = arith.constant 2 : index
    %c2_124 = arith.constant 2 : index
    %c0_125 = arith.constant 0 : index
    %c0_126 = arith.constant 0 : index
    %434 = vector.load %arg10[%c2_123, %c2_124, %c0_125, %c0_126] : memref<3x3x128x128xbf16, #tpu.memory_space<vmem>>, vector<1x1x128x128xbf16>
    %435 = vector.shape_cast %434 : vector<1x1x128x128xbf16> to vector<128x128xbf16>
    %cst_127 = arith.constant dense<0.000000e+00> : vector<128x128xf32>
    %436 = tpu.matmul %433, %435, %cst_127 {dimension_numbers = #tpu.dot_dimension_numbers<[1], [0], [0], [1], [0, 0, 1, 1], [], []>} : vector<128x128xbf16>, vector<128x128xbf16>, vector<128x128xf32> -> vector<128x128xf32>
    %437 = arith.addf %432, %436 : vector<128x128xf32>
    %438 = vector.broadcast %370 : vector<1x128xf32> to vector<128x128xf32>
    %439 = arith.addf %437, %438 : vector<128x128xf32>
    %cst_128 = arith.constant 0.000000e+00 : f32
    %440 = vector.shape_cast %389 : vector<128x1xi1> to vector<128x1xi1>
    %441 = vector.broadcast %440 : vector<128x1xi1> to vector<128x128xi1>
    %442 = vector.broadcast %cst_128 : f32 to vector<128x128xf32>
    %443 = arith.select %441, %439, %442 : vector<128x128xi1>, vector<128x128xf32>
    %cst_129 = arith.constant dense<0.000000e+00> : vector<128xf32>
    %444 = vector.multi_reduction <add>, %443, %cst_129 [0] : vector<128x128xf32> to vector<128xf32>
    %445 = vector.shape_cast %444 : vector<128xf32> to vector<1x128xf32>
    %446 = arith.addf %390, %445 : vector<1x128xf32>
    %447 = arith.mulf %443, %443 : vector<128x128xf32>
    %cst_130 = arith.constant dense<0.000000e+00> : vector<128xf32>
    %448 = vector.multi_reduction <add>, %447, %cst_130 [0] : vector<128x128xf32> to vector<128xf32>
    %449 = vector.shape_cast %448 : vector<128xf32> to vector<1x128xf32>
    %450 = arith.addf %391, %449 : vector<1x128xf32>
    %c0_131 = arith.constant 0 : index
    %c0_132 = arith.constant 0 : index
    %451 = vector.load %arg18[%c0_131, %c0_132] : memref<512x128xf32, #tpu.memory_space<vmem>>, vector<128x128xf32>
    tpu.vector_store %arg18[%c0_131, %c0_132], %439 {strides = array<i32>} : memref<512x128xf32, #tpu.memory_space<vmem>>, vector<128x128xf32>,
    %cst_133 = arith.constant 0.000000e+00 : f32
    %452 = vector.broadcast %cst_133 : f32 to vector<128x128xf32>
    %c135 = arith.constant 135 : index
    %c0_134 = arith.constant 0 : index
    %453 = vector.load %arg17[%c135, %c0_134] : memref<608x128xbf16, #tpu.memory_space<vmem>>, vector<128x128xbf16>
    %c0_135 = arith.constant 0 : index
    %c0_136 = arith.constant 0 : index
    %c0_137 = arith.constant 0 : index
    %c0_138 = arith.constant 0 : index
    %454 = vector.load %arg10[%c0_135, %c0_136, %c0_137, %c0_138] : memref<3x3x128x128xbf16, #tpu.memory_space<vmem>>, vector<1x1x128x128xbf16>
    %455 = vector.shape_cast %454 : vector<1x1x128x128xbf16> to vector<128x128xbf16>
    %cst_139 = arith.constant dense<0.000000e+00> : vector<128x128xf32>
    %456 = tpu.matmul %453, %455, %cst_139 {dimension_numbers = #tpu.dot_dimension_numbers<[1], [0], [0], [1], [0, 0, 1, 1], [], []>} : vector<128x128xbf16>, vector<128x128xbf16>, vector<128x128xf32> -> vector<128x128xf32>
    %457 = arith.addf %452, %456 : vector<128x128xf32>
    %c136 = arith.constant 136 : index
    %c0_140 = arith.constant 0 : index
    %458 = vector.load %arg17[%c136, %c0_140] : memref<608x128xbf16, #tpu.memory_space<vmem>>, vector<128x128xbf16>
    %c0_141 = arith.constant 0 : index
    %c1_142 = arith.constant 1 : index
    %c0_143 = arith.constant 0 : index
    %c0_144 = arith.constant 0 : index
    %459 = vector.load %arg10[%c0_141, %c1_142, %c0_143, %c0_144] : memref<3x3x128x128xbf16, #tpu.memory_space<vmem>>, vector<1x1x128x128xbf16>
    %460 = vector.shape_cast %459 : vector<1x1x128x128xbf16> to vector<128x128xbf16>
    %cst_145 = arith.constant dense<0.000000e+00> : vector<128x128xf32>
    %461 = tpu.matmul %458, %460, %cst_145 {dimension_numbers = #tpu.dot_dimension_numbers<[1], [0], [0], [1], [0, 0, 1, 1], [], []>} : vector<128x128xbf16>, vector<128x128xbf16>, vector<128x128xf32> -> vector<128x128xf32>
    %462 = arith.addf %457, %461 : vector<128x128xf32>
    %c137 = arith.constant 137 : index
    %c0_146 = arith.constant 0 : index
    %463 = vector.load %arg17[%c137, %c0_146] : memref<608x128xbf16, #tpu.memory_space<vmem>>, vector<128x128xbf16>
    %c0_147 = arith.constant 0 : index
    %c2_148 = arith.constant 2 : index
    %c0_149 = arith.constant 0 : index
    %c0_150 = arith.constant 0 : index
    %464 = vector.load %arg10[%c0_147, %c2_148, %c0_149, %c0_150] : memref<3x3x128x128xbf16, #tpu.memory_space<vmem>>, vector<1x1x128x128xbf16>
    %465 = vector.shape_cast %464 : vector<1x1x128x128xbf16> to vector<128x128xbf16>
    %cst_151 = arith.constant dense<0.000000e+00> : vector<128x128xf32>
    %466 = tpu.matmul %463, %465, %cst_151 {dimension_numbers = #tpu.dot_dimension_numbers<[1], [0], [0], [1], [0, 0, 1, 1], [], []>} : vector<128x128xbf16>, vector<128x128xbf16>, vector<128x128xf32> -> vector<128x128xf32>
    %467 = arith.addf %462, %466 : vector<128x128xf32>
    %c167 = arith.constant 167 : index
    %c0_152 = arith.constant 0 : index
    %468 = vector.load %arg17[%c167, %c0_152] : memref<608x128xbf16, #tpu.memory_space<vmem>>, vector<128x128xbf16>
    %c1_153 = arith.constant 1 : index
    %c0_154 = arith.constant 0 : index
    %c0_155 = arith.constant 0 : index
    %c0_156 = arith.constant 0 : index
    %469 = vector.load %arg10[%c1_153, %c0_154, %c0_155, %c0_156] : memref<3x3x128x128xbf16, #tpu.memory_space<vmem>>, vector<1x1x128x128xbf16>
    %470 = vector.shape_cast %469 : vector<1x1x128x128xbf16> to vector<128x128xbf16>
    %cst_157 = arith.constant dense<0.000000e+00> : vector<128x128xf32>
    %471 = tpu.matmul %468, %470, %cst_157 {dimension_numbers = #tpu.dot_dimension_numbers<[1], [0], [0], [1], [0, 0, 1, 1], [], []>} : vector<128x128xbf16>, vector<128x128xbf16>, vector<128x128xf32> -> vector<128x128xf32>
    %472 = arith.addf %467, %471 : vector<128x128xf32>
    %c168 = arith.constant 168 : index
    %c0_158 = arith.constant 0 : index
    %473 = vector.load %arg17[%c168, %c0_158] : memref<608x128xbf16, #tpu.memory_space<vmem>>, vector<128x128xbf16>
    %c1_159 = arith.constant 1 : index
    %c1_160 = arith.constant 1 : index
    %c0_161 = arith.constant 0 : index
    %c0_162 = arith.constant 0 : index
    %474 = vector.load %arg10[%c1_159, %c1_160, %c0_161, %c0_162] : memref<3x3x128x128xbf16, #tpu.memory_space<vmem>>, vector<1x1x128x128xbf16>
    %475 = vector.shape_cast %474 : vector<1x1x128x128xbf16> to vector<128x128xbf16>
    %cst_163 = arith.constant dense<0.000000e+00> : vector<128x128xf32>
    %476 = tpu.matmul %473, %475, %cst_163 {dimension_numbers = #tpu.dot_dimension_numbers<[1], [0], [0], [1], [0, 0, 1, 1], [], []>} : vector<128x128xbf16>, vector<128x128xbf16>, vector<128x128xf32> -> vector<128x128xf32>
    %477 = arith.addf %472, %476 : vector<128x128xf32>
    %c169 = arith.constant 169 : index
    %c0_164 = arith.constant 0 : index
    %478 = vector.load %arg17[%c169, %c0_164] : memref<608x128xbf16, #tpu.memory_space<vmem>>, vector<128x128xbf16>
    %c1_165 = arith.constant 1 : index
    %c2_166 = arith.constant 2 : index
    %c0_167 = arith.constant 0 : index
    %c0_168 = arith.constant 0 : index
    %479 = vector.load %arg10[%c1_165, %c2_166, %c0_167, %c0_168] : memref<3x3x128x128xbf16, #tpu.memory_space<vmem>>, vector<1x1x128x128xbf16>
    %480 = vector.shape_cast %479 : vector<1x1x128x128xbf16> to vector<128x128xbf16>
    %cst_169 = arith.constant dense<0.000000e+00> : vector<128x128xf32>
    %481 = tpu.matmul %478, %480, %cst_169 {dimension_numbers = #tpu.dot_dimension_numbers<[1], [0], [0], [1], [0, 0, 1, 1], [], []>} : vector<128x128xbf16>, vector<128x128xbf16>, vector<128x128xf32> -> vector<128x128xf32>
    %482 = arith.addf %477, %481 : vector<128x128xf32>
    %c199 = arith.constant 199 : index
    %c0_170 = arith.constant 0 : index
    %483 = vector.load %arg17[%c199, %c0_170] : memref<608x128xbf16, #tpu.memory_space<vmem>>, vector<128x128xbf16>
    %c2_171 = arith.constant 2 : index
    %c0_172 = arith.constant 0 : index
    %c0_173 = arith.constant 0 : index
    %c0_174 = arith.constant 0 : index
    %484 = vector.load %arg10[%c2_171, %c0_172, %c0_173, %c0_174] : memref<3x3x128x128xbf16, #tpu.memory_space<vmem>>, vector<1x1x128x128xbf16>
    %485 = vector.shape_cast %484 : vector<1x1x128x128xbf16> to vector<128x128xbf16>
    %cst_175 = arith.constant dense<0.000000e+00> : vector<128x128xf32>
    %486 = tpu.matmul %483, %485, %cst_175 {dimension_numbers = #tpu.dot_dimension_numbers<[1], [0], [0], [1], [0, 0, 1, 1], [], []>} : vector<128x128xbf16>, vector<128x128xbf16>, vector<128x128xf32> -> vector<128x128xf32>
    %487 = arith.addf %482, %486 : vector<128x128xf32>
    %c200 = arith.constant 200 : index
    %c0_176 = arith.constant 0 : index
    %488 = vector.load %arg17[%c200, %c0_176] : memref<608x128xbf16, #tpu.memory_space<vmem>>, vector<128x128xbf16>
    %c2_177 = arith.constant 2 : index
    %c1_178 = arith.constant 1 : index
    %c0_179 = arith.constant 0 : index
    %c0_180 = arith.constant 0 : index
    %489 = vector.load %arg10[%c2_177, %c1_178, %c0_179, %c0_180] : memref<3x3x128x128xbf16, #tpu.memory_space<vmem>>, vector<1x1x128x128xbf16>
    %490 = vector.shape_cast %489 : vector<1x1x128x128xbf16> to vector<128x128xbf16>
    %cst_181 = arith.constant dense<0.000000e+00> : vector<128x128xf32>
    %491 = tpu.matmul %488, %490, %cst_181 {dimension_numbers = #tpu.dot_dimension_numbers<[1], [0], [0], [1], [0, 0, 1, 1], [], []>} : vector<128x128xbf16>, vector<128x128xbf16>, vector<128x128xf32> -> vector<128x128xf32>
    %492 = arith.addf %487, %491 : vector<128x128xf32>
    %c201 = arith.constant 201 : index
    %c0_182 = arith.constant 0 : index
    %493 = vector.load %arg17[%c201, %c0_182] : memref<608x128xbf16, #tpu.memory_space<vmem>>, vector<128x128xbf16>
    %c2_183 = arith.constant 2 : index
    %c2_184 = arith.constant 2 : index
    %c0_185 = arith.constant 0 : index
    %c0_186 = arith.constant 0 : index
    %494 = vector.load %arg10[%c2_183, %c2_184, %c0_185, %c0_186] : memref<3x3x128x128xbf16, #tpu.memory_space<vmem>>, vector<1x1x128x128xbf16>
    %495 = vector.shape_cast %494 : vector<1x1x128x128xbf16> to vector<128x128xbf16>
    %cst_187 = arith.constant dense<0.000000e+00> : vector<128x128xf32>
    %496 = tpu.matmul %493, %495, %cst_187 {dimension_numbers = #tpu.dot_dimension_numbers<[1], [0], [0], [1], [0, 0, 1, 1], [], []>} : vector<128x128xbf16>, vector<128x128xbf16>, vector<128x128xf32> -> vector<128x128xf32>
    %497 = arith.addf %492, %496 : vector<128x128xf32>
    %498 = vector.broadcast %370 : vector<1x128xf32> to vector<128x128xf32>
    %499 = arith.addf %497, %498 : vector<128x128xf32>
    %cst_188 = arith.constant 0.000000e+00 : f32
    %500 = vector.shape_cast %389 : vector<128x1xi1> to vector<128x1xi1>
    %501 = vector.broadcast %500 : vector<128x1xi1> to vector<128x128xi1>
    %502 = vector.broadcast %cst_188 : f32 to vector<128x128xf32>
    %503 = arith.select %501, %499, %502 : vector<128x128xi1>, vector<128x128xf32>
    %cst_189 = arith.constant dense<0.000000e+00> : vector<128xf32>
    %504 = vector.multi_reduction <add>, %503, %cst_189 [0] : vector<128x128xf32> to vector<128xf32>
    %505 = vector.shape_cast %504 : vector<128xf32> to vector<1x128xf32>
    %506 = arith.addf %446, %505 : vector<1x128xf32>
    %507 = arith.mulf %503, %503 : vector<128x128xf32>
    %cst_190 = arith.constant dense<0.000000e+00> : vector<128xf32>
    %508 = vector.multi_reduction <add>, %507, %cst_190 [0] : vector<128x128xf32> to vector<128xf32>
    %509 = vector.shape_cast %508 : vector<128xf32> to vector<1x128xf32>
    %510 = arith.addf %450, %509 : vector<1x128xf32>
    %c128_191 = arith.constant 128 : index
    %c0_192 = arith.constant 0 : index
    %511 = vector.load %arg18[%c128_191, %c0_192] : memref<512x128xf32, #tpu.memory_space<vmem>>, vector<128x128xf32>
    tpu.vector_store %arg18[%c128_191, %c0_192], %499 {strides = array<i32>} : memref<512x128xf32, #tpu.memory_space<vmem>>, vector<128x128xf32>,
    %cst_193 = arith.constant 0.000000e+00 : f32
    %512 = vector.broadcast %cst_193 : f32 to vector<128x128xf32>
    %c263 = arith.constant 263 : index
    %c0_194 = arith.constant 0 : index
    %513 = vector.load %arg17[%c263, %c0_194] : memref<608x128xbf16, #tpu.memory_space<vmem>>, vector<128x128xbf16>
    %c0_195 = arith.constant 0 : index
    %c0_196 = arith.constant 0 : index
    %c0_197 = arith.constant 0 : index
    %c0_198 = arith.constant 0 : index
    %514 = vector.load %arg10[%c0_195, %c0_196, %c0_197, %c0_198] : memref<3x3x128x128xbf16, #tpu.memory_space<vmem>>, vector<1x1x128x128xbf16>
    %515 = vector.shape_cast %514 : vector<1x1x128x128xbf16> to vector<128x128xbf16>
    %cst_199 = arith.constant dense<0.000000e+00> : vector<128x128xf32>
    %516 = tpu.matmul %513, %515, %cst_199 {dimension_numbers = #tpu.dot_dimension_numbers<[1], [0], [0], [1], [0, 0, 1, 1], [], []>} : vector<128x128xbf16>, vector<128x128xbf16>, vector<128x128xf32> -> vector<128x128xf32>
    %517 = arith.addf %512, %516 : vector<128x128xf32>
    %c264 = arith.constant 264 : index
    %c0_200 = arith.constant 0 : index
    %518 = vector.load %arg17[%c264, %c0_200] : memref<608x128xbf16, #tpu.memory_space<vmem>>, vector<128x128xbf16>
    %c0_201 = arith.constant 0 : index
    %c1_202 = arith.constant 1 : index
    %c0_203 = arith.constant 0 : index
    %c0_204 = arith.constant 0 : index
    %519 = vector.load %arg10[%c0_201, %c1_202, %c0_203, %c0_204] : memref<3x3x128x128xbf16, #tpu.memory_space<vmem>>, vector<1x1x128x128xbf16>
    %520 = vector.shape_cast %519 : vector<1x1x128x128xbf16> to vector<128x128xbf16>
    %cst_205 = arith.constant dense<0.000000e+00> : vector<128x128xf32>
    %521 = tpu.matmul %518, %520, %cst_205 {dimension_numbers = #tpu.dot_dimension_numbers<[1], [0], [0], [1], [0, 0, 1, 1], [], []>} : vector<128x128xbf16>, vector<128x128xbf16>, vector<128x128xf32> -> vector<128x128xf32>
    %522 = arith.addf %517, %521 : vector<128x128xf32>
    %c265 = arith.constant 265 : index
    %c0_206 = arith.constant 0 : index
    %523 = vector.load %arg17[%c265, %c0_206] : memref<608x128xbf16, #tpu.memory_space<vmem>>, vector<128x128xbf16>
    %c0_207 = arith.constant 0 : index
    %c2_208 = arith.constant 2 : index
    %c0_209 = arith.constant 0 : index
    %c0_210 = arith.constant 0 : index
    %524 = vector.load %arg10[%c0_207, %c2_208, %c0_209, %c0_210] : memref<3x3x128x128xbf16, #tpu.memory_space<vmem>>, vector<1x1x128x128xbf16>
    %525 = vector.shape_cast %524 : vector<1x1x128x128xbf16> to vector<128x128xbf16>
    %cst_211 = arith.constant dense<0.000000e+00> : vector<128x128xf32>
    %526 = tpu.matmul %523, %525, %cst_211 {dimension_numbers = #tpu.dot_dimension_numbers<[1], [0], [0], [1], [0, 0, 1, 1], [], []>} : vector<128x128xbf16>, vector<128x128xbf16>, vector<128x128xf32> -> vector<128x128xf32>
    %527 = arith.addf %522, %526 : vector<128x128xf32>
    %c295 = arith.constant 295 : index
    %c0_212 = arith.constant 0 : index
    %528 = vector.load %arg17[%c295, %c0_212] : memref<608x128xbf16, #tpu.memory_space<vmem>>, vector<128x128xbf16>
    %c1_213 = arith.constant 1 : index
    %c0_214 = arith.constant 0 : index
    %c0_215 = arith.constant 0 : index
    %c0_216 = arith.constant 0 : index
    %529 = vector.load %arg10[%c1_213, %c0_214, %c0_215, %c0_216] : memref<3x3x128x128xbf16, #tpu.memory_space<vmem>>, vector<1x1x128x128xbf16>
    %530 = vector.shape_cast %529 : vector<1x1x128x128xbf16> to vector<128x128xbf16>
    %cst_217 = arith.constant dense<0.000000e+00> : vector<128x128xf32>
    %531 = tpu.matmul %528, %530, %cst_217 {dimension_numbers = #tpu.dot_dimension_numbers<[1], [0], [0], [1], [0, 0, 1, 1], [], []>} : vector<128x128xbf16>, vector<128x128xbf16>, vector<128x128xf32> -> vector<128x128xf32>
    %532 = arith.addf %527, %531 : vector<128x128xf32>
    %c296 = arith.constant 296 : index
    %c0_218 = arith.constant 0 : index
    %533 = vector.load %arg17[%c296, %c0_218] : memref<608x128xbf16, #tpu.memory_space<vmem>>, vector<128x128xbf16>
    %c1_219 = arith.constant 1 : index
    %c1_220 = arith.constant 1 : index
    %c0_221 = arith.constant 0 : index
    %c0_222 = arith.constant 0 : index
    %534 = vector.load %arg10[%c1_219, %c1_220, %c0_221, %c0_222] : memref<3x3x128x128xbf16, #tpu.memory_space<vmem>>, vector<1x1x128x128xbf16>
    %535 = vector.shape_cast %534 : vector<1x1x128x128xbf16> to vector<128x128xbf16>
    %cst_223 = arith.constant dense<0.000000e+00> : vector<128x128xf32>
    %536 = tpu.matmul %533, %535, %cst_223 {dimension_numbers = #tpu.dot_dimension_numbers<[1], [0], [0], [1], [0, 0, 1, 1], [], []>} : vector<128x128xbf16>, vector<128x128xbf16>, vector<128x128xf32> -> vector<128x128xf32>
    %537 = arith.addf %532, %536 : vector<128x128xf32>
    %c297 = arith.constant 297 : index
    %c0_224 = arith.constant 0 : index
    %538 = vector.load %arg17[%c297, %c0_224] : memref<608x128xbf16, #tpu.memory_space<vmem>>, vector<128x128xbf16>
    %c1_225 = arith.constant 1 : index
    %c2_226 = arith.constant 2 : index
    %c0_227 = arith.constant 0 : index
    %c0_228 = arith.constant 0 : index
    %539 = vector.load %arg10[%c1_225, %c2_226, %c0_227, %c0_228] : memref<3x3x128x128xbf16, #tpu.memory_space<vmem>>, vector<1x1x128x128xbf16>
    %540 = vector.shape_cast %539 : vector<1x1x128x128xbf16> to vector<128x128xbf16>
    %cst_229 = arith.constant dense<0.000000e+00> : vector<128x128xf32>
    %541 = tpu.matmul %538, %540, %cst_229 {dimension_numbers = #tpu.dot_dimension_numbers<[1], [0], [0], [1], [0, 0, 1, 1], [], []>} : vector<128x128xbf16>, vector<128x128xbf16>, vector<128x128xf32> -> vector<128x128xf32>
    %542 = arith.addf %537, %541 : vector<128x128xf32>
    %c327 = arith.constant 327 : index
    %c0_230 = arith.constant 0 : index
    %543 = vector.load %arg17[%c327, %c0_230] : memref<608x128xbf16, #tpu.memory_space<vmem>>, vector<128x128xbf16>
    %c2_231 = arith.constant 2 : index
    %c0_232 = arith.constant 0 : index
    %c0_233 = arith.constant 0 : index
    %c0_234 = arith.constant 0 : index
    %544 = vector.load %arg10[%c2_231, %c0_232, %c0_233, %c0_234] : memref<3x3x128x128xbf16, #tpu.memory_space<vmem>>, vector<1x1x128x128xbf16>
    %545 = vector.shape_cast %544 : vector<1x1x128x128xbf16> to vector<128x128xbf16>
    %cst_235 = arith.constant dense<0.000000e+00> : vector<128x128xf32>
    %546 = tpu.matmul %543, %545, %cst_235 {dimension_numbers = #tpu.dot_dimension_numbers<[1], [0], [0], [1], [0, 0, 1, 1], [], []>} : vector<128x128xbf16>, vector<128x128xbf16>, vector<128x128xf32> -> vector<128x128xf32>
    %547 = arith.addf %542, %546 : vector<128x128xf32>
    %c328 = arith.constant 328 : index
    %c0_236 = arith.constant 0 : index
    %548 = vector.load %arg17[%c328, %c0_236] : memref<608x128xbf16, #tpu.memory_space<vmem>>, vector<128x128xbf16>
    %c2_237 = arith.constant 2 : index
    %c1_238 = arith.constant 1 : index
    %c0_239 = arith.constant 0 : index
    %c0_240 = arith.constant 0 : index
    %549 = vector.load %arg10[%c2_237, %c1_238, %c0_239, %c0_240] : memref<3x3x128x128xbf16, #tpu.memory_space<vmem>>, vector<1x1x128x128xbf16>
    %550 = vector.shape_cast %549 : vector<1x1x128x128xbf16> to vector<128x128xbf16>
    %cst_241 = arith.constant dense<0.000000e+00> : vector<128x128xf32>
    %551 = tpu.matmul %548, %550, %cst_241 {dimension_numbers = #tpu.dot_dimension_numbers<[1], [0], [0], [1], [0, 0, 1, 1], [], []>} : vector<128x128xbf16>, vector<128x128xbf16>, vector<128x128xf32> -> vector<128x128xf32>
    %552 = arith.addf %547, %551 : vector<128x128xf32>
    %c329 = arith.constant 329 : index
    %c0_242 = arith.constant 0 : index
    %553 = vector.load %arg17[%c329, %c0_242] : memref<608x128xbf16, #tpu.memory_space<vmem>>, vector<128x128xbf16>
    %c2_243 = arith.constant 2 : index
    %c2_244 = arith.constant 2 : index
    %c0_245 = arith.constant 0 : index
    %c0_246 = arith.constant 0 : index
    %554 = vector.load %arg10[%c2_243, %c2_244, %c0_245, %c0_246] : memref<3x3x128x128xbf16, #tpu.memory_space<vmem>>, vector<1x1x128x128xbf16>
    %555 = vector.shape_cast %554 : vector<1x1x128x128xbf16> to vector<128x128xbf16>
    %cst_247 = arith.constant dense<0.000000e+00> : vector<128x128xf32>
    %556 = tpu.matmul %553, %555, %cst_247 {dimension_numbers = #tpu.dot_dimension_numbers<[1], [0], [0], [1], [0, 0, 1, 1], [], []>} : vector<128x128xbf16>, vector<128x128xbf16>, vector<128x128xf32> -> vector<128x128xf32>
    %557 = arith.addf %552, %556 : vector<128x128xf32>
    %558 = vector.broadcast %370 : vector<1x128xf32> to vector<128x128xf32>
    %559 = arith.addf %557, %558 : vector<128x128xf32>
    %cst_248 = arith.constant 0.000000e+00 : f32
    %560 = vector.shape_cast %389 : vector<128x1xi1> to vector<128x1xi1>
    %561 = vector.broadcast %560 : vector<128x1xi1> to vector<128x128xi1>
    %562 = vector.broadcast %cst_248 : f32 to vector<128x128xf32>
    %563 = arith.select %561, %559, %562 : vector<128x128xi1>, vector<128x128xf32>
    %cst_249 = arith.constant dense<0.000000e+00> : vector<128xf32>
    %564 = vector.multi_reduction <add>, %563, %cst_249 [0] : vector<128x128xf32> to vector<128xf32>
    %565 = vector.shape_cast %564 : vector<128xf32> to vector<1x128xf32>
    %566 = arith.addf %506, %565 : vector<1x128xf32>
    %567 = arith.mulf %563, %563 : vector<128x128xf32>
    %cst_250 = arith.constant dense<0.000000e+00> : vector<128xf32>
    %568 = vector.multi_reduction <add>, %567, %cst_250 [0] : vector<128x128xf32> to vector<128xf32>
    %569 = vector.shape_cast %568 : vector<128xf32> to vector<1x128xf32>
    %570 = arith.addf %510, %569 : vector<1x128xf32>
    %c256_251 = arith.constant 256 : index
    %c0_252 = arith.constant 0 : index
    %571 = vector.load %arg18[%c256_251, %c0_252] : memref<512x128xf32, #tpu.memory_space<vmem>>, vector<128x128xf32>
    tpu.vector_store %arg18[%c256_251, %c0_252], %559 {strides = array<i32>} : memref<512x128xf32, #tpu.memory_space<vmem>>, vector<128x128xf32>,
    %cst_253 = arith.constant 0.000000e+00 : f32
    %572 = vector.broadcast %cst_253 : f32 to vector<128x128xf32>
    %c391 = arith.constant 391 : index
    %c0_254 = arith.constant 0 : index
    %573 = vector.load %arg17[%c391, %c0_254] : memref<608x128xbf16, #tpu.memory_space<vmem>>, vector<128x128xbf16>
    %c0_255 = arith.constant 0 : index
    %c0_256 = arith.constant 0 : index
    %c0_257 = arith.constant 0 : index
    %c0_258 = arith.constant 0 : index
    %574 = vector.load %arg10[%c0_255, %c0_256, %c0_257, %c0_258] : memref<3x3x128x128xbf16, #tpu.memory_space<vmem>>, vector<1x1x128x128xbf16>
    %575 = vector.shape_cast %574 : vector<1x1x128x128xbf16> to vector<128x128xbf16>
    %cst_259 = arith.constant dense<0.000000e+00> : vector<128x128xf32>
    %576 = tpu.matmul %573, %575, %cst_259 {dimension_numbers = #tpu.dot_dimension_numbers<[1], [0], [0], [1], [0, 0, 1, 1], [], []>} : vector<128x128xbf16>, vector<128x128xbf16>, vector<128x128xf32> -> vector<128x128xf32>
    %577 = arith.addf %572, %576 : vector<128x128xf32>
    %c392 = arith.constant 392 : index
    %c0_260 = arith.constant 0 : index
    %578 = vector.load %arg17[%c392, %c0_260] : memref<608x128xbf16, #tpu.memory_space<vmem>>, vector<128x128xbf16>
    %c0_261 = arith.constant 0 : index
    %c1_262 = arith.constant 1 : index
    %c0_263 = arith.constant 0 : index
    %c0_264 = arith.constant 0 : index
    %579 = vector.load %arg10[%c0_261, %c1_262, %c0_263, %c0_264] : memref<3x3x128x128xbf16, #tpu.memory_space<vmem>>, vector<1x1x128x128xbf16>
    %580 = vector.shape_cast %579 : vector<1x1x128x128xbf16> to vector<128x128xbf16>
    %cst_265 = arith.constant dense<0.000000e+00> : vector<128x128xf32>
    %581 = tpu.matmul %578, %580, %cst_265 {dimension_numbers = #tpu.dot_dimension_numbers<[1], [0], [0], [1], [0, 0, 1, 1], [], []>} : vector<128x128xbf16>, vector<128x128xbf16>, vector<128x128xf32> -> vector<128x128xf32>
    %582 = arith.addf %577, %581 : vector<128x128xf32>
    %c393 = arith.constant 393 : index
    %c0_266 = arith.constant 0 : index
    %583 = vector.load %arg17[%c393, %c0_266] : memref<608x128xbf16, #tpu.memory_space<vmem>>, vector<128x128xbf16>
    %c0_267 = arith.constant 0 : index
    %c2_268 = arith.constant 2 : index
    %c0_269 = arith.constant 0 : index
    %c0_270 = arith.constant 0 : index
    %584 = vector.load %arg10[%c0_267, %c2_268, %c0_269, %c0_270] : memref<3x3x128x128xbf16, #tpu.memory_space<vmem>>, vector<1x1x128x128xbf16>
    %585 = vector.shape_cast %584 : vector<1x1x128x128xbf16> to vector<128x128xbf16>
    %cst_271 = arith.constant dense<0.000000e+00> : vector<128x128xf32>
    %586 = tpu.matmul %583, %585, %cst_271 {dimension_numbers = #tpu.dot_dimension_numbers<[1], [0], [0], [1], [0, 0, 1, 1], [], []>} : vector<128x128xbf16>, vector<128x128xbf16>, vector<128x128xf32> -> vector<128x128xf32>
    %587 = arith.addf %582, %586 : vector<128x128xf32>
    %c423 = arith.constant 423 : index
    %c0_272 = arith.constant 0 : index
    %588 = vector.load %arg17[%c423, %c0_272] : memref<608x128xbf16, #tpu.memory_space<vmem>>, vector<128x128xbf16>
    %c1_273 = arith.constant 1 : index
    %c0_274 = arith.constant 0 : index
    %c0_275 = arith.constant 0 : index
    %c0_276 = arith.constant 0 : index
    %589 = vector.load %arg10[%c1_273, %c0_274, %c0_275, %c0_276] : memref<3x3x128x128xbf16, #tpu.memory_space<vmem>>, vector<1x1x128x128xbf16>
    %590 = vector.shape_cast %589 : vector<1x1x128x128xbf16> to vector<128x128xbf16>
    %cst_277 = arith.constant dense<0.000000e+00> : vector<128x128xf32>
    %591 = tpu.matmul %588, %590, %cst_277 {dimension_numbers = #tpu.dot_dimension_numbers<[1], [0], [0], [1], [0, 0, 1, 1], [], []>} : vector<128x128xbf16>, vector<128x128xbf16>, vector<128x128xf32> -> vector<128x128xf32>
    %592 = arith.addf %587, %591 : vector<128x128xf32>
    %c424 = arith.constant 424 : index
    %c0_278 = arith.constant 0 : index
    %593 = vector.load %arg17[%c424, %c0_278] : memref<608x128xbf16, #tpu.memory_space<vmem>>, vector<128x128xbf16>
    %c1_279 = arith.constant 1 : index
    %c1_280 = arith.constant 1 : index
    %c0_281 = arith.constant 0 : index
    %c0_282 = arith.constant 0 : index
    %594 = vector.load %arg10[%c1_279, %c1_280, %c0_281, %c0_282] : memref<3x3x128x128xbf16, #tpu.memory_space<vmem>>, vector<1x1x128x128xbf16>
    %595 = vector.shape_cast %594 : vector<1x1x128x128xbf16> to vector<128x128xbf16>
    %cst_283 = arith.constant dense<0.000000e+00> : vector<128x128xf32>
    %596 = tpu.matmul %593, %595, %cst_283 {dimension_numbers = #tpu.dot_dimension_numbers<[1], [0], [0], [1], [0, 0, 1, 1], [], []>} : vector<128x128xbf16>, vector<128x128xbf16>, vector<128x128xf32> -> vector<128x128xf32>
    %597 = arith.addf %592, %596 : vector<128x128xf32>
    %c425 = arith.constant 425 : index
    %c0_284 = arith.constant 0 : index
    %598 = vector.load %arg17[%c425, %c0_284] : memref<608x128xbf16, #tpu.memory_space<vmem>>, vector<128x128xbf16>
    %c1_285 = arith.constant 1 : index
    %c2_286 = arith.constant 2 : index
    %c0_287 = arith.constant 0 : index
    %c0_288 = arith.constant 0 : index
    %599 = vector.load %arg10[%c1_285, %c2_286, %c0_287, %c0_288] : memref<3x3x128x128xbf16, #tpu.memory_space<vmem>>, vector<1x1x128x128xbf16>
    %600 = vector.shape_cast %599 : vector<1x1x128x128xbf16> to vector<128x128xbf16>
    %cst_289 = arith.constant dense<0.000000e+00> : vector<128x128xf32>
    %601 = tpu.matmul %598, %600, %cst_289 {dimension_numbers = #tpu.dot_dimension_numbers<[1], [0], [0], [1], [0, 0, 1, 1], [], []>} : vector<128x128xbf16>, vector<128x128xbf16>, vector<128x128xf32> -> vector<128x128xf32>
    %602 = arith.addf %597, %601 : vector<128x128xf32>
    %c455 = arith.constant 455 : index
    %c0_290 = arith.constant 0 : index
    %603 = vector.load %arg17[%c455, %c0_290] : memref<608x128xbf16, #tpu.memory_space<vmem>>, vector<128x128xbf16>
    %c2_291 = arith.constant 2 : index
    %c0_292 = arith.constant 0 : index
    %c0_293 = arith.constant 0 : index
    %c0_294 = arith.constant 0 : index
    %604 = vector.load %arg10[%c2_291, %c0_292, %c0_293, %c0_294] : memref<3x3x128x128xbf16, #tpu.memory_space<vmem>>, vector<1x1x128x128xbf16>
    %605 = vector.shape_cast %604 : vector<1x1x128x128xbf16> to vector<128x128xbf16>
    %cst_295 = arith.constant dense<0.000000e+00> : vector<128x128xf32>
    %606 = tpu.matmul %603, %605, %cst_295 {dimension_numbers = #tpu.dot_dimension_numbers<[1], [0], [0], [1], [0, 0, 1, 1], [], []>} : vector<128x128xbf16>, vector<128x128xbf16>, vector<128x128xf32> -> vector<128x128xf32>
    %607 = arith.addf %602, %606 : vector<128x128xf32>
    %c456 = arith.constant 456 : index
    %c0_296 = arith.constant 0 : index
    %608 = vector.load %arg17[%c456, %c0_296] : memref<608x128xbf16, #tpu.memory_space<vmem>>, vector<128x128xbf16>
    %c2_297 = arith.constant 2 : index
    %c1_298 = arith.constant 1 : index
    %c0_299 = arith.constant 0 : index
    %c0_300 = arith.constant 0 : index
    %609 = vector.load %arg10[%c2_297, %c1_298, %c0_299, %c0_300] : memref<3x3x128x128xbf16, #tpu.memory_space<vmem>>, vector<1x1x128x128xbf16>
    %610 = vector.shape_cast %609 : vector<1x1x128x128xbf16> to vector<128x128xbf16>
    %cst_301 = arith.constant dense<0.000000e+00> : vector<128x128xf32>
    %611 = tpu.matmul %608, %610, %cst_301 {dimension_numbers = #tpu.dot_dimension_numbers<[1], [0], [0], [1], [0, 0, 1, 1], [], []>} : vector<128x128xbf16>, vector<128x128xbf16>, vector<128x128xf32> -> vector<128x128xf32>
    %612 = arith.addf %607, %611 : vector<128x128xf32>
    %c457 = arith.constant 457 : index
    %c0_302 = arith.constant 0 : index
    %613 = vector.load %arg17[%c457, %c0_302] : memref<608x128xbf16, #tpu.memory_space<vmem>>, vector<128x128xbf16>
    %c2_303 = arith.constant 2 : index
    %c2_304 = arith.constant 2 : index
    %c0_305 = arith.constant 0 : index
    %c0_306 = arith.constant 0 : index
    %614 = vector.load %arg10[%c2_303, %c2_304, %c0_305, %c0_306] : memref<3x3x128x128xbf16, #tpu.memory_space<vmem>>, vector<1x1x128x128xbf16>
    %615 = vector.shape_cast %614 : vector<1x1x128x128xbf16> to vector<128x128xbf16>
    %cst_307 = arith.constant dense<0.000000e+00> : vector<128x128xf32>
    %616 = tpu.matmul %613, %615, %cst_307 {dimension_numbers = #tpu.dot_dimension_numbers<[1], [0], [0], [1], [0, 0, 1, 1], [], []>} : vector<128x128xbf16>, vector<128x128xbf16>, vector<128x128xf32> -> vector<128x128xf32>
    %617 = arith.addf %612, %616 : vector<128x128xf32>
    %618 = vector.broadcast %370 : vector<1x128xf32> to vector<128x128xf32>
    %619 = arith.addf %617, %618 : vector<128x128xf32>
    %cst_308 = arith.constant 0.000000e+00 : f32
    %620 = vector.shape_cast %389 : vector<128x1xi1> to vector<128x1xi1>
    %621 = vector.broadcast %620 : vector<128x1xi1> to vector<128x128xi1>
    %622 = vector.broadcast %cst_308 : f32 to vector<128x128xf32>
    %623 = arith.select %621, %619, %622 : vector<128x128xi1>, vector<128x128xf32>
    %cst_309 = arith.constant dense<0.000000e+00> : vector<128xf32>
    %624 = vector.multi_reduction <add>, %623, %cst_309 [0] : vector<128x128xf32> to vector<128xf32>
    %625 = vector.shape_cast %624 : vector<128xf32> to vector<1x128xf32>
    %626 = arith.addf %566, %625 : vector<1x128xf32>
    %627 = arith.mulf %623, %623 : vector<128x128xf32>
    %cst_310 = arith.constant dense<0.000000e+00> : vector<128xf32>
    %628 = vector.multi_reduction <add>, %627, %cst_310 [0] : vector<128x128xf32> to vector<128xf32>
    %629 = vector.shape_cast %628 : vector<128xf32> to vector<1x128xf32>
    %630 = arith.addf %570, %629 : vector<1x128xf32>
    %c384_311 = arith.constant 384 : index
    %c0_312 = arith.constant 0 : index
    %631 = vector.load %arg18[%c384_311, %c0_312] : memref<512x128xf32, #tpu.memory_space<vmem>>, vector<128x128xf32>
    tpu.vector_store %arg18[%c384_311, %c0_312], %619 {strides = array<i32>} : memref<512x128xf32, #tpu.memory_space<vmem>>, vector<128x128xf32>,
    %cst_313 = arith.constant 3.906250e-03 : f32
    %632 = vector.broadcast %cst_313 : f32 to vector<1x128xf32>
    %633 = arith.mulf %626, %632 : vector<1x128xf32>
    %cst_314 = arith.constant 3.906250e-03 : f32
    %634 = vector.broadcast %cst_314 : f32 to vector<1x128xf32>
    %635 = arith.mulf %630, %634 : vector<1x128xf32>
    %636 = arith.mulf %633, %633 : vector<1x128xf32>
    %637 = arith.subf %635, %636 : vector<1x128xf32>
    %cst_315 = arith.constant 0.000000e+00 : f32
    %638 = vector.broadcast %cst_315 : f32 to vector<1x128xf32>
    %639 = arith.maximumf %637, %638 : vector<1x128xf32>
    %cst_316 = arith.constant 9.99999974E-6 : f32
    %640 = vector.broadcast %cst_316 : f32 to vector<1x128xf32>
    %641 = arith.addf %639, %640 : vector<1x128xf32>
    %642 = math.rsqrt %641 : vector<1x128xf32>
    %c0_317 = arith.constant 0 : index
    %c0_318 = arith.constant 0 : index
    %643 = vector.load %arg12[%c0_317, %c0_318] : memref<1x128xf32, #tpu.memory_space<vmem>>, vector<1x128xf32>
    %c0_319 = arith.constant 0 : index
    %c0_320 = arith.constant 0 : index
    %644 = vector.load %arg13[%c0_319, %c0_320] : memref<1x128xf32, #tpu.memory_space<vmem>>, vector<1x128xf32>
    %c0_321 = arith.constant 0 : index
    %c0_322 = arith.constant 0 : index
    %645 = vector.load %arg18[%c0_321, %c0_322] : memref<512x128xf32, #tpu.memory_space<vmem>>, vector<16x128xf32>
    %646 = vector.broadcast %633 : vector<1x128xf32> to vector<16x128xf32>
    %647 = arith.subf %645, %646 : vector<16x128xf32>
    %648 = vector.broadcast %642 : vector<1x128xf32> to vector<16x128xf32>
    %649 = arith.mulf %647, %648 : vector<16x128xf32>
    %650 = vector.broadcast %643 : vector<1x128xf32> to vector<16x128xf32>
    %651 = arith.mulf %649, %650 : vector<16x128xf32>
    %652 = vector.broadcast %644 : vector<1x128xf32> to vector<16x128xf32>
    %653 = arith.addf %651, %652 : vector<16x128xf32>
    %654 = arith.negf %653 : vector<16x128xf32>
    %655 = math.exp %654 : vector<16x128xf32>
    %cst_323 = arith.constant 1.000000e+00 : f32
    %656 = vector.broadcast %cst_323 : f32 to vector<16x128xf32>
    %657 = arith.addf %656, %655 : vector<16x128xf32>
    %658 = arith.divf %656, %657 : vector<16x128xf32>
    %659 = arith.mulf %653, %658 : vector<16x128xf32>
    %c0_324 = arith.constant 0 : index
    %c0_325 = arith.constant 0 : index
    %c0_326 = arith.constant 0 : index
    %660 = vector.load %arg16[%c0_324, %c0_325, %c0_326] : memref<1x256x128xf32, #tpu.memory_space<vmem>>, vector<1x16x128xf32>
    %661 = vector.shape_cast %660 : vector<1x16x128xf32> to vector<16x128xf32>
    %662 = arith.addf %661, %659 : vector<16x128xf32>
    %c0_327 = arith.constant 0 : index
    %c0_328 = arith.constant 0 : index
    %c0_329 = arith.constant 0 : index
    %663 = vector.load %arg16[%c0_327, %c0_328, %c0_329] : memref<1x256x128xf32, #tpu.memory_space<vmem>>, vector<1x16x128xf32>
    %664 = vector.shape_cast %663 : vector<1x16x128xf32> to vector<16x128xf32>
    %665 = vector.shape_cast %662 : vector<16x128xf32> to vector<1x16x128xf32>
    tpu.vector_store %arg16[%c0_327, %c0_328, %c0_329], %665 {strides = array<i32>} : memref<1x256x128xf32, #tpu.memory_space<vmem>>, vector<1x16x128xf32>,
    %c32_330 = arith.constant 32 : index
    %c0_331 = arith.constant 0 : index
    %666 = vector.load %arg18[%c32_330, %c0_331] : memref<512x128xf32, #tpu.memory_space<vmem>>, vector<16x128xf32>
    %667 = vector.broadcast %633 : vector<1x128xf32> to vector<16x128xf32>
    %668 = arith.subf %666, %667 : vector<16x128xf32>
    %669 = vector.broadcast %642 : vector<1x128xf32> to vector<16x128xf32>
    %670 = arith.mulf %668, %669 : vector<16x128xf32>
    %671 = vector.broadcast %643 : vector<1x128xf32> to vector<16x128xf32>
    %672 = arith.mulf %670, %671 : vector<16x128xf32>
    %673 = vector.broadcast %644 : vector<1x128xf32> to vector<16x128xf32>
    %674 = arith.addf %672, %673 : vector<16x128xf32>
    %675 = arith.negf %674 : vector<16x128xf32>
    %676 = math.exp %675 : vector<16x128xf32>
    %cst_332 = arith.constant 1.000000e+00 : f32
    %677 = vector.broadcast %cst_332 : f32 to vector<16x128xf32>
    %678 = arith.addf %677, %676 : vector<16x128xf32>
    %679 = arith.divf %677, %678 : vector<16x128xf32>
    %680 = arith.mulf %674, %679 : vector<16x128xf32>
    %c0_333 = arith.constant 0 : index
    %c16 = arith.constant 16 : index
    %c0_334 = arith.constant 0 : index
    %681 = vector.load %arg16[%c0_333, %c16, %c0_334] : memref<1x256x128xf32, #tpu.memory_space<vmem>>, vector<1x16x128xf32>
    %682 = vector.shape_cast %681 : vector<1x16x128xf32> to vector<16x128xf32>
    %683 = arith.addf %682, %680 : vector<16x128xf32>
    %c0_335 = arith.constant 0 : index
    %c16_336 = arith.constant 16 : index
    %c0_337 = arith.constant 0 : index
    %684 = vector.load %arg16[%c0_335, %c16_336, %c0_337] : memref<1x256x128xf32, #tpu.memory_space<vmem>>, vector<1x16x128xf32>
    %685 = vector.shape_cast %684 : vector<1x16x128xf32> to vector<16x128xf32>
    %686 = vector.shape_cast %683 : vector<16x128xf32> to vector<1x16x128xf32>
    tpu.vector_store %arg16[%c0_335, %c16_336, %c0_337], %686 {strides = array<i32>} : memref<1x256x128xf32, #tpu.memory_space<vmem>>, vector<1x16x128xf32>,
    %c64_338 = arith.constant 64 : index
    %c0_339 = arith.constant 0 : index
    %687 = vector.load %arg18[%c64_338, %c0_339] : memref<512x128xf32, #tpu.memory_space<vmem>>, vector<16x128xf32>
    %688 = vector.broadcast %633 : vector<1x128xf32> to vector<16x128xf32>
    %689 = arith.subf %687, %688 : vector<16x128xf32>
    %690 = vector.broadcast %642 : vector<1x128xf32> to vector<16x128xf32>
    %691 = arith.mulf %689, %690 : vector<16x128xf32>
    %692 = vector.broadcast %643 : vector<1x128xf32> to vector<16x128xf32>
    %693 = arith.mulf %691, %692 : vector<16x128xf32>
    %694 = vector.broadcast %644 : vector<1x128xf32> to vector<16x128xf32>
    %695 = arith.addf %693, %694 : vector<16x128xf32>
    %696 = arith.negf %695 : vector<16x128xf32>
    %697 = math.exp %696 : vector<16x128xf32>
    %cst_340 = arith.constant 1.000000e+00 : f32
    %698 = vector.broadcast %cst_340 : f32 to vector<16x128xf32>
    %699 = arith.addf %698, %697 : vector<16x128xf32>
    %700 = arith.divf %698, %699 : vector<16x128xf32>
    %701 = arith.mulf %695, %700 : vector<16x128xf32>
    %c0_341 = arith.constant 0 : index
    %c32_342 = arith.constant 32 : index
    %c0_343 = arith.constant 0 : index
    %702 = vector.load %arg16[%c0_341, %c32_342, %c0_343] : memref<1x256x128xf32, #tpu.memory_space<vmem>>, vector<1x16x128xf32>
    %703 = vector.shape_cast %702 : vector<1x16x128xf32> to vector<16x128xf32>
    %704 = arith.addf %703, %701 : vector<16x128xf32>
    %c0_344 = arith.constant 0 : index
    %c32_345 = arith.constant 32 : index
    %c0_346 = arith.constant 0 : index
    %705 = vector.load %arg16[%c0_344, %c32_345, %c0_346] : memref<1x256x128xf32, #tpu.memory_space<vmem>>, vector<1x16x128xf32>
    %706 = vector.shape_cast %705 : vector<1x16x128xf32> to vector<16x128xf32>
    %707 = vector.shape_cast %704 : vector<16x128xf32> to vector<1x16x128xf32>
    tpu.vector_store %arg16[%c0_344, %c32_345, %c0_346], %707 {strides = array<i32>} : memref<1x256x128xf32, #tpu.memory_space<vmem>>, vector<1x16x128xf32>,
    %c96_347 = arith.constant 96 : index
    %c0_348 = arith.constant 0 : index
    %708 = vector.load %arg18[%c96_347, %c0_348] : memref<512x128xf32, #tpu.memory_space<vmem>>, vector<16x128xf32>
    %709 = vector.broadcast %633 : vector<1x128xf32> to vector<16x128xf32>
    %710 = arith.subf %708, %709 : vector<16x128xf32>
    %711 = vector.broadcast %642 : vector<1x128xf32> to vector<16x128xf32>
    %712 = arith.mulf %710, %711 : vector<16x128xf32>
    %713 = vector.broadcast %643 : vector<1x128xf32> to vector<16x128xf32>
    %714 = arith.mulf %712, %713 : vector<16x128xf32>
    %715 = vector.broadcast %644 : vector<1x128xf32> to vector<16x128xf32>
    %716 = arith.addf %714, %715 : vector<16x128xf32>
    %717 = arith.negf %716 : vector<16x128xf32>
    %718 = math.exp %717 : vector<16x128xf32>
    %cst_349 = arith.constant 1.000000e+00 : f32
    %719 = vector.broadcast %cst_349 : f32 to vector<16x128xf32>
    %720 = arith.addf %719, %718 : vector<16x128xf32>
    %721 = arith.divf %719, %720 : vector<16x128xf32>
    %722 = arith.mulf %716, %721 : vector<16x128xf32>
    %c0_350 = arith.constant 0 : index
    %c48 = arith.constant 48 : index
    %c0_351 = arith.constant 0 : index
    %723 = vector.load %arg16[%c0_350, %c48, %c0_351] : memref<1x256x128xf32, #tpu.memory_space<vmem>>, vector<1x16x128xf32>
    %724 = vector.shape_cast %723 : vector<1x16x128xf32> to vector<16x128xf32>
    %725 = arith.addf %724, %722 : vector<16x128xf32>
    %c0_352 = arith.constant 0 : index
    %c48_353 = arith.constant 48 : index
    %c0_354 = arith.constant 0 : index
    %726 = vector.load %arg16[%c0_352, %c48_353, %c0_354] : memref<1x256x128xf32, #tpu.memory_space<vmem>>, vector<1x16x128xf32>
    %727 = vector.shape_cast %726 : vector<1x16x128xf32> to vector<16x128xf32>
    %728 = vector.shape_cast %725 : vector<16x128xf32> to vector<1x16x128xf32>
    tpu.vector_store %arg16[%c0_352, %c48_353, %c0_354], %728 {strides = array<i32>} : memref<1x256x128xf32, #tpu.memory_space<vmem>>, vector<1x16x128xf32>,
    %c128_355 = arith.constant 128 : index
    %c0_356 = arith.constant 0 : index
    %729 = vector.load %arg18[%c128_355, %c0_356] : memref<512x128xf32, #tpu.memory_space<vmem>>, vector<16x128xf32>
    %730 = vector.broadcast %633 : vector<1x128xf32> to vector<16x128xf32>
    %731 = arith.subf %729, %730 : vector<16x128xf32>
    %732 = vector.broadcast %642 : vector<1x128xf32> to vector<16x128xf32>
    %733 = arith.mulf %731, %732 : vector<16x128xf32>
    %734 = vector.broadcast %643 : vector<1x128xf32> to vector<16x128xf32>
    %735 = arith.mulf %733, %734 : vector<16x128xf32>
    %736 = vector.broadcast %644 : vector<1x128xf32> to vector<16x128xf32>
    %737 = arith.addf %735, %736 : vector<16x128xf32>
    %738 = arith.negf %737 : vector<16x128xf32>
    %739 = math.exp %738 : vector<16x128xf32>
    %cst_357 = arith.constant 1.000000e+00 : f32
    %740 = vector.broadcast %cst_357 : f32 to vector<16x128xf32>
    %741 = arith.addf %740, %739 : vector<16x128xf32>
    %742 = arith.divf %740, %741 : vector<16x128xf32>
    %743 = arith.mulf %737, %742 : vector<16x128xf32>
    %c0_358 = arith.constant 0 : index
    %c64_359 = arith.constant 64 : index
    %c0_360 = arith.constant 0 : index
    %744 = vector.load %arg16[%c0_358, %c64_359, %c0_360] : memref<1x256x128xf32, #tpu.memory_space<vmem>>, vector<1x16x128xf32>
    %745 = vector.shape_cast %744 : vector<1x16x128xf32> to vector<16x128xf32>
    %746 = arith.addf %745, %743 : vector<16x128xf32>
    %c0_361 = arith.constant 0 : index
    %c64_362 = arith.constant 64 : index
    %c0_363 = arith.constant 0 : index
    %747 = vector.load %arg16[%c0_361, %c64_362, %c0_363] : memref<1x256x128xf32, #tpu.memory_space<vmem>>, vector<1x16x128xf32>
    %748 = vector.shape_cast %747 : vector<1x16x128xf32> to vector<16x128xf32>
    %749 = vector.shape_cast %746 : vector<16x128xf32> to vector<1x16x128xf32>
    tpu.vector_store %arg16[%c0_361, %c64_362, %c0_363], %749 {strides = array<i32>} : memref<1x256x128xf32, #tpu.memory_space<vmem>>, vector<1x16x128xf32>,
    %c160_364 = arith.constant 160 : index
    %c0_365 = arith.constant 0 : index
    %750 = vector.load %arg18[%c160_364, %c0_365] : memref<512x128xf32, #tpu.memory_space<vmem>>, vector<16x128xf32>
    %751 = vector.broadcast %633 : vector<1x128xf32> to vector<16x128xf32>
    %752 = arith.subf %750, %751 : vector<16x128xf32>
    %753 = vector.broadcast %642 : vector<1x128xf32> to vector<16x128xf32>
    %754 = arith.mulf %752, %753 : vector<16x128xf32>
    %755 = vector.broadcast %643 : vector<1x128xf32> to vector<16x128xf32>
    %756 = arith.mulf %754, %755 : vector<16x128xf32>
    %757 = vector.broadcast %644 : vector<1x128xf32> to vector<16x128xf32>
    %758 = arith.addf %756, %757 : vector<16x128xf32>
    %759 = arith.negf %758 : vector<16x128xf32>
    %760 = math.exp %759 : vector<16x128xf32>
    %cst_366 = arith.constant 1.000000e+00 : f32
    %761 = vector.broadcast %cst_366 : f32 to vector<16x128xf32>
    %762 = arith.addf %761, %760 : vector<16x128xf32>
    %763 = arith.divf %761, %762 : vector<16x128xf32>
    %764 = arith.mulf %758, %763 : vector<16x128xf32>
    %c0_367 = arith.constant 0 : index
    %c80 = arith.constant 80 : index
    %c0_368 = arith.constant 0 : index
    %765 = vector.load %arg16[%c0_367, %c80, %c0_368] : memref<1x256x128xf32, #tpu.memory_space<vmem>>, vector<1x16x128xf32>
    %766 = vector.shape_cast %765 : vector<1x16x128xf32> to vector<16x128xf32>
    %767 = arith.addf %766, %764 : vector<16x128xf32>
    %c0_369 = arith.constant 0 : index
    %c80_370 = arith.constant 80 : index
    %c0_371 = arith.constant 0 : index
    %768 = vector.load %arg16[%c0_369, %c80_370, %c0_371] : memref<1x256x128xf32, #tpu.memory_space<vmem>>, vector<1x16x128xf32>
    %769 = vector.shape_cast %768 : vector<1x16x128xf32> to vector<16x128xf32>
    %770 = vector.shape_cast %767 : vector<16x128xf32> to vector<1x16x128xf32>
    tpu.vector_store %arg16[%c0_369, %c80_370, %c0_371], %770 {strides = array<i32>} : memref<1x256x128xf32, #tpu.memory_space<vmem>>, vector<1x16x128xf32>,
    %c192_372 = arith.constant 192 : index
    %c0_373 = arith.constant 0 : index
    %771 = vector.load %arg18[%c192_372, %c0_373] : memref<512x128xf32, #tpu.memory_space<vmem>>, vector<16x128xf32>
    %772 = vector.broadcast %633 : vector<1x128xf32> to vector<16x128xf32>
    %773 = arith.subf %771, %772 : vector<16x128xf32>
    %774 = vector.broadcast %642 : vector<1x128xf32> to vector<16x128xf32>
    %775 = arith.mulf %773, %774 : vector<16x128xf32>
    %776 = vector.broadcast %643 : vector<1x128xf32> to vector<16x128xf32>
    %777 = arith.mulf %775, %776 : vector<16x128xf32>
    %778 = vector.broadcast %644 : vector<1x128xf32> to vector<16x128xf32>
    %779 = arith.addf %777, %778 : vector<16x128xf32>
    %780 = arith.negf %779 : vector<16x128xf32>
    %781 = math.exp %780 : vector<16x128xf32>
    %cst_374 = arith.constant 1.000000e+00 : f32
    %782 = vector.broadcast %cst_374 : f32 to vector<16x128xf32>
    %783 = arith.addf %782, %781 : vector<16x128xf32>
    %784 = arith.divf %782, %783 : vector<16x128xf32>
    %785 = arith.mulf %779, %784 : vector<16x128xf32>
    %c0_375 = arith.constant 0 : index
    %c96_376 = arith.constant 96 : index
    %c0_377 = arith.constant 0 : index
    %786 = vector.load %arg16[%c0_375, %c96_376, %c0_377] : memref<1x256x128xf32, #tpu.memory_space<vmem>>, vector<1x16x128xf32>
    %787 = vector.shape_cast %786 : vector<1x16x128xf32> to vector<16x128xf32>
    %788 = arith.addf %787, %785 : vector<16x128xf32>
    %c0_378 = arith.constant 0 : index
    %c96_379 = arith.constant 96 : index
    %c0_380 = arith.constant 0 : index
    %789 = vector.load %arg16[%c0_378, %c96_379, %c0_380] : memref<1x256x128xf32, #tpu.memory_space<vmem>>, vector<1x16x128xf32>
    %790 = vector.shape_cast %789 : vector<1x16x128xf32> to vector<16x128xf32>
    %791 = vector.shape_cast %788 : vector<16x128xf32> to vector<1x16x128xf32>
    tpu.vector_store %arg16[%c0_378, %c96_379, %c0_380], %791 {strides = array<i32>} : memref<1x256x128xf32, #tpu.memory_space<vmem>>, vector<1x16x128xf32>,
    %c224_381 = arith.constant 224 : index
    %c0_382 = arith.constant 0 : index
    %792 = vector.load %arg18[%c224_381, %c0_382] : memref<512x128xf32, #tpu.memory_space<vmem>>, vector<16x128xf32>
    %793 = vector.broadcast %633 : vector<1x128xf32> to vector<16x128xf32>
    %794 = arith.subf %792, %793 : vector<16x128xf32>
    %795 = vector.broadcast %642 : vector<1x128xf32> to vector<16x128xf32>
    %796 = arith.mulf %794, %795 : vector<16x128xf32>
    %797 = vector.broadcast %643 : vector<1x128xf32> to vector<16x128xf32>
    %798 = arith.mulf %796, %797 : vector<16x128xf32>
    %799 = vector.broadcast %644 : vector<1x128xf32> to vector<16x128xf32>
    %800 = arith.addf %798, %799 : vector<16x128xf32>
    %801 = arith.negf %800 : vector<16x128xf32>
    %802 = math.exp %801 : vector<16x128xf32>
    %cst_383 = arith.constant 1.000000e+00 : f32
    %803 = vector.broadcast %cst_383 : f32 to vector<16x128xf32>
    %804 = arith.addf %803, %802 : vector<16x128xf32>
    %805 = arith.divf %803, %804 : vector<16x128xf32>
    %806 = arith.mulf %800, %805 : vector<16x128xf32>
    %c0_384 = arith.constant 0 : index
    %c112 = arith.constant 112 : index
    %c0_385 = arith.constant 0 : index
    %807 = vector.load %arg16[%c0_384, %c112, %c0_385] : memref<1x256x128xf32, #tpu.memory_space<vmem>>, vector<1x16x128xf32>
    %808 = vector.shape_cast %807 : vector<1x16x128xf32> to vector<16x128xf32>
    %809 = arith.addf %808, %806 : vector<16x128xf32>
    %c0_386 = arith.constant 0 : index
    %c112_387 = arith.constant 112 : index
    %c0_388 = arith.constant 0 : index
    %810 = vector.load %arg16[%c0_386, %c112_387, %c0_388] : memref<1x256x128xf32, #tpu.memory_space<vmem>>, vector<1x16x128xf32>
    %811 = vector.shape_cast %810 : vector<1x16x128xf32> to vector<16x128xf32>
    %812 = vector.shape_cast %809 : vector<16x128xf32> to vector<1x16x128xf32>
    tpu.vector_store %arg16[%c0_386, %c112_387, %c0_388], %812 {strides = array<i32>} : memref<1x256x128xf32, #tpu.memory_space<vmem>>, vector<1x16x128xf32>,
    %c256_389 = arith.constant 256 : index
    %c0_390 = arith.constant 0 : index
    %813 = vector.load %arg18[%c256_389, %c0_390] : memref<512x128xf32, #tpu.memory_space<vmem>>, vector<16x128xf32>
    %814 = vector.broadcast %633 : vector<1x128xf32> to vector<16x128xf32>
    %815 = arith.subf %813, %814 : vector<16x128xf32>
    %816 = vector.broadcast %642 : vector<1x128xf32> to vector<16x128xf32>
    %817 = arith.mulf %815, %816 : vector<16x128xf32>
    %818 = vector.broadcast %643 : vector<1x128xf32> to vector<16x128xf32>
    %819 = arith.mulf %817, %818 : vector<16x128xf32>
    %820 = vector.broadcast %644 : vector<1x128xf32> to vector<16x128xf32>
    %821 = arith.addf %819, %820 : vector<16x128xf32>
    %822 = arith.negf %821 : vector<16x128xf32>
    %823 = math.exp %822 : vector<16x128xf32>
    %cst_391 = arith.constant 1.000000e+00 : f32
    %824 = vector.broadcast %cst_391 : f32 to vector<16x128xf32>
    %825 = arith.addf %824, %823 : vector<16x128xf32>
    %826 = arith.divf %824, %825 : vector<16x128xf32>
    %827 = arith.mulf %821, %826 : vector<16x128xf32>
    %c0_392 = arith.constant 0 : index
    %c128_393 = arith.constant 128 : index
    %c0_394 = arith.constant 0 : index
    %828 = vector.load %arg16[%c0_392, %c128_393, %c0_394] : memref<1x256x128xf32, #tpu.memory_space<vmem>>, vector<1x16x128xf32>
    %829 = vector.shape_cast %828 : vector<1x16x128xf32> to vector<16x128xf32>
    %830 = arith.addf %829, %827 : vector<16x128xf32>
    %c0_395 = arith.constant 0 : index
    %c128_396 = arith.constant 128 : index
    %c0_397 = arith.constant 0 : index
    %831 = vector.load %arg16[%c0_395, %c128_396, %c0_397] : memref<1x256x128xf32, #tpu.memory_space<vmem>>, vector<1x16x128xf32>
    %832 = vector.shape_cast %831 : vector<1x16x128xf32> to vector<16x128xf32>
    %833 = vector.shape_cast %830 : vector<16x128xf32> to vector<1x16x128xf32>
    tpu.vector_store %arg16[%c0_395, %c128_396, %c0_397], %833 {strides = array<i32>} : memref<1x256x128xf32, #tpu.memory_space<vmem>>, vector<1x16x128xf32>,
    %c288_398 = arith.constant 288 : index
    %c0_399 = arith.constant 0 : index
    %834 = vector.load %arg18[%c288_398, %c0_399] : memref<512x128xf32, #tpu.memory_space<vmem>>, vector<16x128xf32>
    %835 = vector.broadcast %633 : vector<1x128xf32> to vector<16x128xf32>
    %836 = arith.subf %834, %835 : vector<16x128xf32>
    %837 = vector.broadcast %642 : vector<1x128xf32> to vector<16x128xf32>
    %838 = arith.mulf %836, %837 : vector<16x128xf32>
    %839 = vector.broadcast %643 : vector<1x128xf32> to vector<16x128xf32>
    %840 = arith.mulf %838, %839 : vector<16x128xf32>
    %841 = vector.broadcast %644 : vector<1x128xf32> to vector<16x128xf32>
    %842 = arith.addf %840, %841 : vector<16x128xf32>
    %843 = arith.negf %842 : vector<16x128xf32>
    %844 = math.exp %843 : vector<16x128xf32>
    %cst_400 = arith.constant 1.000000e+00 : f32
    %845 = vector.broadcast %cst_400 : f32 to vector<16x128xf32>
    %846 = arith.addf %845, %844 : vector<16x128xf32>
    %847 = arith.divf %845, %846 : vector<16x128xf32>
    %848 = arith.mulf %842, %847 : vector<16x128xf32>
    %c0_401 = arith.constant 0 : index
    %c144 = arith.constant 144 : index
    %c0_402 = arith.constant 0 : index
    %849 = vector.load %arg16[%c0_401, %c144, %c0_402] : memref<1x256x128xf32, #tpu.memory_space<vmem>>, vector<1x16x128xf32>
    %850 = vector.shape_cast %849 : vector<1x16x128xf32> to vector<16x128xf32>
    %851 = arith.addf %850, %848 : vector<16x128xf32>
    %c0_403 = arith.constant 0 : index
    %c144_404 = arith.constant 144 : index
    %c0_405 = arith.constant 0 : index
    %852 = vector.load %arg16[%c0_403, %c144_404, %c0_405] : memref<1x256x128xf32, #tpu.memory_space<vmem>>, vector<1x16x128xf32>
    %853 = vector.shape_cast %852 : vector<1x16x128xf32> to vector<16x128xf32>
    %854 = vector.shape_cast %851 : vector<16x128xf32> to vector<1x16x128xf32>
    tpu.vector_store %arg16[%c0_403, %c144_404, %c0_405], %854 {strides = array<i32>} : memref<1x256x128xf32, #tpu.memory_space<vmem>>, vector<1x16x128xf32>,
    %c320_406 = arith.constant 320 : index
    %c0_407 = arith.constant 0 : index
    %855 = vector.load %arg18[%c320_406, %c0_407] : memref<512x128xf32, #tpu.memory_space<vmem>>, vector<16x128xf32>
    %856 = vector.broadcast %633 : vector<1x128xf32> to vector<16x128xf32>
    %857 = arith.subf %855, %856 : vector<16x128xf32>
    %858 = vector.broadcast %642 : vector<1x128xf32> to vector<16x128xf32>
    %859 = arith.mulf %857, %858 : vector<16x128xf32>
    %860 = vector.broadcast %643 : vector<1x128xf32> to vector<16x128xf32>
    %861 = arith.mulf %859, %860 : vector<16x128xf32>
    %862 = vector.broadcast %644 : vector<1x128xf32> to vector<16x128xf32>
    %863 = arith.addf %861, %862 : vector<16x128xf32>
    %864 = arith.negf %863 : vector<16x128xf32>
    %865 = math.exp %864 : vector<16x128xf32>
    %cst_408 = arith.constant 1.000000e+00 : f32
    %866 = vector.broadcast %cst_408 : f32 to vector<16x128xf32>
    %867 = arith.addf %866, %865 : vector<16x128xf32>
    %868 = arith.divf %866, %867 : vector<16x128xf32>
    %869 = arith.mulf %863, %868 : vector<16x128xf32>
    %c0_409 = arith.constant 0 : index
    %c160_410 = arith.constant 160 : index
    %c0_411 = arith.constant 0 : index
    %870 = vector.load %arg16[%c0_409, %c160_410, %c0_411] : memref<1x256x128xf32, #tpu.memory_space<vmem>>, vector<1x16x128xf32>
    %871 = vector.shape_cast %870 : vector<1x16x128xf32> to vector<16x128xf32>
    %872 = arith.addf %871, %869 : vector<16x128xf32>
    %c0_412 = arith.constant 0 : index
    %c160_413 = arith.constant 160 : index
    %c0_414 = arith.constant 0 : index
    %873 = vector.load %arg16[%c0_412, %c160_413, %c0_414] : memref<1x256x128xf32, #tpu.memory_space<vmem>>, vector<1x16x128xf32>
    %874 = vector.shape_cast %873 : vector<1x16x128xf32> to vector<16x128xf32>
    %875 = vector.shape_cast %872 : vector<16x128xf32> to vector<1x16x128xf32>
    tpu.vector_store %arg16[%c0_412, %c160_413, %c0_414], %875 {strides = array<i32>} : memref<1x256x128xf32, #tpu.memory_space<vmem>>, vector<1x16x128xf32>,
    %c352_415 = arith.constant 352 : index
    %c0_416 = arith.constant 0 : index
    %876 = vector.load %arg18[%c352_415, %c0_416] : memref<512x128xf32, #tpu.memory_space<vmem>>, vector<16x128xf32>
    %877 = vector.broadcast %633 : vector<1x128xf32> to vector<16x128xf32>
    %878 = arith.subf %876, %877 : vector<16x128xf32>
    %879 = vector.broadcast %642 : vector<1x128xf32> to vector<16x128xf32>
    %880 = arith.mulf %878, %879 : vector<16x128xf32>
    %881 = vector.broadcast %643 : vector<1x128xf32> to vector<16x128xf32>
    %882 = arith.mulf %880, %881 : vector<16x128xf32>
    %883 = vector.broadcast %644 : vector<1x128xf32> to vector<16x128xf32>
    %884 = arith.addf %882, %883 : vector<16x128xf32>
    %885 = arith.negf %884 : vector<16x128xf32>
    %886 = math.exp %885 : vector<16x128xf32>
    %cst_417 = arith.constant 1.000000e+00 : f32
    %887 = vector.broadcast %cst_417 : f32 to vector<16x128xf32>
    %888 = arith.addf %887, %886 : vector<16x128xf32>
    %889 = arith.divf %887, %888 : vector<16x128xf32>
    %890 = arith.mulf %884, %889 : vector<16x128xf32>
    %c0_418 = arith.constant 0 : index
    %c176 = arith.constant 176 : index
    %c0_419 = arith.constant 0 : index
    %891 = vector.load %arg16[%c0_418, %c176, %c0_419] : memref<1x256x128xf32, #tpu.memory_space<vmem>>, vector<1x16x128xf32>
    %892 = vector.shape_cast %891 : vector<1x16x128xf32> to vector<16x128xf32>
    %893 = arith.addf %892, %890 : vector<16x128xf32>
    %c0_420 = arith.constant 0 : index
    %c176_421 = arith.constant 176 : index
    %c0_422 = arith.constant 0 : index
    %894 = vector.load %arg16[%c0_420, %c176_421, %c0_422] : memref<1x256x128xf32, #tpu.memory_space<vmem>>, vector<1x16x128xf32>
    %895 = vector.shape_cast %894 : vector<1x16x128xf32> to vector<16x128xf32>
    %896 = vector.shape_cast %893 : vector<16x128xf32> to vector<1x16x128xf32>
    tpu.vector_store %arg16[%c0_420, %c176_421, %c0_422], %896 {strides = array<i32>} : memref<1x256x128xf32, #tpu.memory_space<vmem>>, vector<1x16x128xf32>,
    %c384_423 = arith.constant 384 : index
    %c0_424 = arith.constant 0 : index
    %897 = vector.load %arg18[%c384_423, %c0_424] : memref<512x128xf32, #tpu.memory_space<vmem>>, vector<16x128xf32>
    %898 = vector.broadcast %633 : vector<1x128xf32> to vector<16x128xf32>
    %899 = arith.subf %897, %898 : vector<16x128xf32>
    %900 = vector.broadcast %642 : vector<1x128xf32> to vector<16x128xf32>
    %901 = arith.mulf %899, %900 : vector<16x128xf32>
    %902 = vector.broadcast %643 : vector<1x128xf32> to vector<16x128xf32>
    %903 = arith.mulf %901, %902 : vector<16x128xf32>
    %904 = vector.broadcast %644 : vector<1x128xf32> to vector<16x128xf32>
    %905 = arith.addf %903, %904 : vector<16x128xf32>
    %906 = arith.negf %905 : vector<16x128xf32>
    %907 = math.exp %906 : vector<16x128xf32>
    %cst_425 = arith.constant 1.000000e+00 : f32
    %908 = vector.broadcast %cst_425 : f32 to vector<16x128xf32>
    %909 = arith.addf %908, %907 : vector<16x128xf32>
    %910 = arith.divf %908, %909 : vector<16x128xf32>
    %911 = arith.mulf %905, %910 : vector<16x128xf32>
    %c0_426 = arith.constant 0 : index
    %c192_427 = arith.constant 192 : index
    %c0_428 = arith.constant 0 : index
    %912 = vector.load %arg16[%c0_426, %c192_427, %c0_428] : memref<1x256x128xf32, #tpu.memory_space<vmem>>, vector<1x16x128xf32>
    %913 = vector.shape_cast %912 : vector<1x16x128xf32> to vector<16x128xf32>
    %914 = arith.addf %913, %911 : vector<16x128xf32>
    %c0_429 = arith.constant 0 : index
    %c192_430 = arith.constant 192 : index
    %c0_431 = arith.constant 0 : index
    %915 = vector.load %arg16[%c0_429, %c192_430, %c0_431] : memref<1x256x128xf32, #tpu.memory_space<vmem>>, vector<1x16x128xf32>
    %916 = vector.shape_cast %915 : vector<1x16x128xf32> to vector<16x128xf32>
    %917 = vector.shape_cast %914 : vector<16x128xf32> to vector<1x16x128xf32>
    tpu.vector_store %arg16[%c0_429, %c192_430, %c0_431], %917 {strides = array<i32>} : memref<1x256x128xf32, #tpu.memory_space<vmem>>, vector<1x16x128xf32>,
    %c416_432 = arith.constant 416 : index
    %c0_433 = arith.constant 0 : index
    %918 = vector.load %arg18[%c416_432, %c0_433] : memref<512x128xf32, #tpu.memory_space<vmem>>, vector<16x128xf32>
    %919 = vector.broadcast %633 : vector<1x128xf32> to vector<16x128xf32>
    %920 = arith.subf %918, %919 : vector<16x128xf32>
    %921 = vector.broadcast %642 : vector<1x128xf32> to vector<16x128xf32>
    %922 = arith.mulf %920, %921 : vector<16x128xf32>
    %923 = vector.broadcast %643 : vector<1x128xf32> to vector<16x128xf32>
    %924 = arith.mulf %922, %923 : vector<16x128xf32>
    %925 = vector.broadcast %644 : vector<1x128xf32> to vector<16x128xf32>
    %926 = arith.addf %924, %925 : vector<16x128xf32>
    %927 = arith.negf %926 : vector<16x128xf32>
    %928 = math.exp %927 : vector<16x128xf32>
    %cst_434 = arith.constant 1.000000e+00 : f32
    %929 = vector.broadcast %cst_434 : f32 to vector<16x128xf32>
    %930 = arith.addf %929, %928 : vector<16x128xf32>
    %931 = arith.divf %929, %930 : vector<16x128xf32>
    %932 = arith.mulf %926, %931 : vector<16x128xf32>
    %c0_435 = arith.constant 0 : index
    %c208 = arith.constant 208 : index
    %c0_436 = arith.constant 0 : index
    %933 = vector.load %arg16[%c0_435, %c208, %c0_436] : memref<1x256x128xf32, #tpu.memory_space<vmem>>, vector<1x16x128xf32>
    %934 = vector.shape_cast %933 : vector<1x16x128xf32> to vector<16x128xf32>
    %935 = arith.addf %934, %932 : vector<16x128xf32>
    %c0_437 = arith.constant 0 : index
    %c208_438 = arith.constant 208 : index
    %c0_439 = arith.constant 0 : index
    %936 = vector.load %arg16[%c0_437, %c208_438, %c0_439] : memref<1x256x128xf32, #tpu.memory_space<vmem>>, vector<1x16x128xf32>
    %937 = vector.shape_cast %936 : vector<1x16x128xf32> to vector<16x128xf32>
    %938 = vector.shape_cast %935 : vector<16x128xf32> to vector<1x16x128xf32>
    tpu.vector_store %arg16[%c0_437, %c208_438, %c0_439], %938 {strides = array<i32>} : memref<1x256x128xf32, #tpu.memory_space<vmem>>, vector<1x16x128xf32>,
    %c448_440 = arith.constant 448 : index
    %c0_441 = arith.constant 0 : index
    %939 = vector.load %arg18[%c448_440, %c0_441] : memref<512x128xf32, #tpu.memory_space<vmem>>, vector<16x128xf32>
    %940 = vector.broadcast %633 : vector<1x128xf32> to vector<16x128xf32>
    %941 = arith.subf %939, %940 : vector<16x128xf32>
    %942 = vector.broadcast %642 : vector<1x128xf32> to vector<16x128xf32>
    %943 = arith.mulf %941, %942 : vector<16x128xf32>
    %944 = vector.broadcast %643 : vector<1x128xf32> to vector<16x128xf32>
    %945 = arith.mulf %943, %944 : vector<16x128xf32>
    %946 = vector.broadcast %644 : vector<1x128xf32> to vector<16x128xf32>
    %947 = arith.addf %945, %946 : vector<16x128xf32>
    %948 = arith.negf %947 : vector<16x128xf32>
    %949 = math.exp %948 : vector<16x128xf32>
    %cst_442 = arith.constant 1.000000e+00 : f32
    %950 = vector.broadcast %cst_442 : f32 to vector<16x128xf32>
    %951 = arith.addf %950, %949 : vector<16x128xf32>
    %952 = arith.divf %950, %951 : vector<16x128xf32>
    %953 = arith.mulf %947, %952 : vector<16x128xf32>
    %c0_443 = arith.constant 0 : index
    %c224_444 = arith.constant 224 : index
    %c0_445 = arith.constant 0 : index
    %954 = vector.load %arg16[%c0_443, %c224_444, %c0_445] : memref<1x256x128xf32, #tpu.memory_space<vmem>>, vector<1x16x128xf32>
    %955 = vector.shape_cast %954 : vector<1x16x128xf32> to vector<16x128xf32>
    %956 = arith.addf %955, %953 : vector<16x128xf32>
    %c0_446 = arith.constant 0 : index
    %c224_447 = arith.constant 224 : index
    %c0_448 = arith.constant 0 : index
    %957 = vector.load %arg16[%c0_446, %c224_447, %c0_448] : memref<1x256x128xf32, #tpu.memory_space<vmem>>, vector<1x16x128xf32>
    %958 = vector.shape_cast %957 : vector<1x16x128xf32> to vector<16x128xf32>
    %959 = vector.shape_cast %956 : vector<16x128xf32> to vector<1x16x128xf32>
    tpu.vector_store %arg16[%c0_446, %c224_447, %c0_448], %959 {strides = array<i32>} : memref<1x256x128xf32, #tpu.memory_space<vmem>>, vector<1x16x128xf32>,
    %c480_449 = arith.constant 480 : index
    %c0_450 = arith.constant 0 : index
    %960 = vector.load %arg18[%c480_449, %c0_450] : memref<512x128xf32, #tpu.memory_space<vmem>>, vector<16x128xf32>
    %961 = vector.broadcast %633 : vector<1x128xf32> to vector<16x128xf32>
    %962 = arith.subf %960, %961 : vector<16x128xf32>
    %963 = vector.broadcast %642 : vector<1x128xf32> to vector<16x128xf32>
    %964 = arith.mulf %962, %963 : vector<16x128xf32>
    %965 = vector.broadcast %643 : vector<1x128xf32> to vector<16x128xf32>
    %966 = arith.mulf %964, %965 : vector<16x128xf32>
    %967 = vector.broadcast %644 : vector<1x128xf32> to vector<16x128xf32>
    %968 = arith.addf %966, %967 : vector<16x128xf32>
    %969 = arith.negf %968 : vector<16x128xf32>
    %970 = math.exp %969 : vector<16x128xf32>
    %cst_451 = arith.constant 1.000000e+00 : f32
    %971 = vector.broadcast %cst_451 : f32 to vector<16x128xf32>
    %972 = arith.addf %971, %970 : vector<16x128xf32>
    %973 = arith.divf %971, %972 : vector<16x128xf32>
    %974 = arith.mulf %968, %973 : vector<16x128xf32>
    %c0_452 = arith.constant 0 : index
    %c240 = arith.constant 240 : index
    %c0_453 = arith.constant 0 : index
    %975 = vector.load %arg16[%c0_452, %c240, %c0_453] : memref<1x256x128xf32, #tpu.memory_space<vmem>>, vector<1x16x128xf32>
    %976 = vector.shape_cast %975 : vector<1x16x128xf32> to vector<16x128xf32>
    %977 = arith.addf %976, %974 : vector<16x128xf32>
    %c0_454 = arith.constant 0 : index
    %c240_455 = arith.constant 240 : index
    %c0_456 = arith.constant 0 : index
    %978 = vector.load %arg16[%c0_454, %c240_455, %c0_456] : memref<1x256x128xf32, #tpu.memory_space<vmem>>, vector<1x16x128xf32>
    %979 = vector.shape_cast %978 : vector<1x16x128xf32> to vector<16x128xf32>
    %980 = vector.shape_cast %977 : vector<16x128xf32> to vector<1x16x128xf32>
    tpu.vector_store %arg16[%c0_454, %c240_455, %c0_456], %980 {strides = array<i32>} : memref<1x256x128xf32, #tpu.memory_space<vmem>>, vector<1x16x128xf32>,
    return
  }
  func.func @transform_0(%arg0: i32) -> (i32, i32, i32) {
    %c0_i32 = arith.constant 0 : i32
    %c0_i32_0 = arith.constant 0 : i32
    %c0_i32_1 = arith.constant 0 : i32
    return %arg0, %c0_i32, %c0_i32_0 : i32, i32, i32
  }
  func.func @transform_1(%arg0: i32) -> (i32, i32, i32) {
    %c0_i32 = arith.constant 0 : i32
    %c0_i32_0 = arith.constant 0 : i32
    %c0_i32_1 = arith.constant 0 : i32
    return %arg0, %c0_i32, %c0_i32_0 : i32, i32, i32
  }
  func.func @transform_2(%arg0: i32) -> (i32, i32) {
    %c0_i32 = arith.constant 0 : i32
    %c0_i32_0 = arith.constant 0 : i32
    %c0_i32_1 = arith.constant 0 : i32
    return %c0_i32, %c0_i32_0 : i32, i32
  }
  func.func @transform_3(%arg0: i32) -> (i32, i32) {
    %c0_i32 = arith.constant 0 : i32
    %c0_i32_0 = arith.constant 0 : i32
    %c0_i32_1 = arith.constant 0 : i32
    return %c0_i32, %c0_i32_0 : i32, i32
  }
  func.func @transform_4(%arg0: i32) -> (i32, i32) {
    %c0_i32 = arith.constant 0 : i32
    %c0_i32_0 = arith.constant 0 : i32
    %c0_i32_1 = arith.constant 0 : i32
    return %c0_i32, %c0_i32_0 : i32, i32
  }
  func.func @transform_5(%arg0: i32) -> (i32, i32) {
    %c0_i32 = arith.constant 0 : i32
    %c0_i32_0 = arith.constant 0 : i32
    %c0_i32_1 = arith.constant 0 : i32
    return %c0_i32, %c0_i32_0 : i32, i32
  }
  func.func @transform_6(%arg0: i32) -> (i32, i32) {
    %c0_i32 = arith.constant 0 : i32
    %c0_i32_0 = arith.constant 0 : i32
    %c0_i32_1 = arith.constant 0 : i32
    return %c0_i32, %c0_i32_0 : i32, i32
  }
  func.func @transform_7(%arg0: i32) -> (i32, i32) {
    %c0_i32 = arith.constant 0 : i32
    %c0_i32_0 = arith.constant 0 : i32
    %c0_i32_1 = arith.constant 0 : i32
    return %c0_i32, %c0_i32_0 : i32, i32
  }
  func.func @transform_8(%arg0: i32) -> (i32, i32) {
    %c0_i32 = arith.constant 0 : i32
    %c0_i32_0 = arith.constant 0 : i32
    %c0_i32_1 = arith.constant 0 : i32
    return %c0_i32, %c0_i32_0 : i32, i32
  }
  func.func @transform_9(%arg0: i32) -> (i32, i32, i32, i32) {
    %c0_i32 = arith.constant 0 : i32
    %c0_i32_0 = arith.constant 0 : i32
    %c0_i32_1 = arith.constant 0 : i32
    %c0_i32_2 = arith.constant 0 : i32
    %c0_i32_3 = arith.constant 0 : i32
    return %c0_i32, %c0_i32_0, %c0_i32_1, %c0_i32_2 : i32, i32, i32, i32
  }
  func.func @transform_10(%arg0: i32) -> (i32, i32) {
    %c0_i32 = arith.constant 0 : i32
    %c0_i32_0 = arith.constant 0 : i32
    %c0_i32_1 = arith.constant 0 : i32
    return %c0_i32, %c0_i32_0 : i32, i32
  }
  func.func @transform_11(%arg0: i32) -> (i32, i32) {
    %c0_i32 = arith.constant 0 : i32
    %c0_i32_0 = arith.constant 0 : i32
    %c0_i32_1 = arith.constant 0 : i32
    return %c0_i32, %c0_i32_0 : i32, i32
  }
  func.func @transform_12(%arg0: i32) -> (i32, i32) {
    %c0_i32 = arith.constant 0 : i32
    %c0_i32_0 = arith.constant 0 : i32
    %c0_i32_1 = arith.constant 0 : i32
    return %c0_i32, %c0_i32_0 : i32, i32
  }
  func.func @transform_13(%arg0: i32) -> (i32, i32) {
    %c0_i32 = arith.constant 0 : i32
    %c0_i32_0 = arith.constant 0 : i32
    %c0_i32_1 = arith.constant 0 : i32
    return %c0_i32, %c0_i32_0 : i32, i32
  }
  func.func @transform_14(%arg0: i32) -> (i32, i32) {
    %c0_i32 = arith.constant 0 : i32
    %c0_i32_0 = arith.constant 0 : i32
    %c0_i32_1 = arith.constant 0 : i32
    return %c0_i32, %c0_i32_0 : i32, i32
  }
  func.func @transform_15(%arg0: i32) -> (i32, i32, i32) {
    %c0_i32 = arith.constant 0 : i32
    %c0_i32_0 = arith.constant 0 : i32
    %c0_i32_1 = arith.constant 0 : i32
    return %arg0, %c0_i32, %c0_i32_0 : i32, i32, i32
  }
}

</mosaic_0001>

<bundles_post_ra>
// kernel: tpu_custom_call.1
= control target key start
LH: loop header
LB: loop body
LE: loop exit
PB: predicated region body
PF: predicated region fallthrough
CT: control target
= control target key end

     0   :  { %s18548_s0 = inlined_call_operand.vmem [shape: bf16[2,256,36], index: 0, kind: input, shape index: {}]   ;;  %s18549_s1 = inlined_call_operand.vmem [shape: f32[2,1,32], index: 1, kind: input, shape index: {}]   ;;  %s18550_s2 = inlined_call_operand.vmem [shape: bf16[36,256], index: 2, kind: input, shape index: {}]   ;;  %s18551_s3 = inlined_call_operand.vmem [shape: f32[1,128], index: 3, kind: input, shape index: {}]   ;;  %s18552_s4 = inlined_call_operand.vmem [shape: f32[1,128], index: 4, kind: input, shape index: {}]   ;;  %s18553_s5 = inlined_call_operand.vmem [shape: f32[1,128], index: 5, kind: input, shape index: {}]   ;;  %s18554_s6 = inlined_call_operand.vmem [shape: f32[32,128], index: 6, kind: input, shape index: {}]   ;;  %s18555_s7 = inlined_call_operand.vmem [shape: f32[1,128], index: 7, kind: input, shape index: {}]   ;;  %s18556_s8 = inlined_call_operand.vmem [shape: f32[1,128], index: 8, kind: input, shape index: {}]   ;;  %s18557_s9 = inlined_call_operand.hbm [shape: bf16[3,3,128,128], index: 9, kind: input, shape index: {}]   ;;  %s18558_s10 = inlined_call_operand.vmem [shape: f32[1,128], index: 10, kind: input, shape index: {}]   ;;  %s18559_s11 = inlined_call_operand.vmem [shape: f32[1,128], index: 11, kind: input, shape index: {}]   ;;  %s18560_s12 = inlined_call_operand.vmem [shape: f32[1,128], index: 12, kind: input, shape index: {}]   ;;  %s18561_s13 = inlined_call_operand.vmem [shape: f32[128,8], index: 13, kind: input, shape index: {}]   ;;  %s18562_s14 = inlined_call_operand.vmem [shape: f32[8,128], index: 14, kind: input, shape index: {}]   ;;  %s18563_s15 = inlined_call_operand.hbm [shape: f32[2,256,128], index: 15, kind: output, shape index: {}]  }
   0x1   :  { %18674 = sst [smem:[#allocation74_spill]] %s18557_s9 }
   0x2   :  { %20 = vsyncpa [#allocation5], 0 }
   0x3   :  { %21 = vsyncpa [#allocation6], 0 }
   0x4   :  { %23 = vsyncpa [#allocation6 + $0x1], 0  ;;  %s14506_s18 = smov 0   ;;  %s14508_s19 = smov 0  }
   0x5   :  { %s14510_s20 = smov 0   ;;  %s14512_s21 = smov 0  }
   0x6 LB: > { %18675 = sst [smem:[#allocation10_spill]] %s14410_s20  ;;  %s14527_s13 = sadd.s32 4294967295, %s14414_s21   ;;  %s14414_s21 = sphi %s14512_s21, %s18993_s21   ;;  %s14410_s20 = sphi %s14510_s20, %s18995_s20   ;;  %s14406_s19 = sphi %s14508_s19, %s18997_s19   ;;  %s14402_s18 = sphi %s14506_s18, %s18996_s18  }
   0x7   : > { %s11475_s14 = sadd.s32 4294967294, %s14414_s21   ;;  %s14531_s22 = sadd.s32 1, %s14414_s21  }
   0x8   : > { %18676 = sst [smem:[#allocation11_spill]] %s14531_s22  ;;  %s361_s23 = sadd.s32 1, %s14410_s20 }
   0x9   : > { %s358_s24 = ssub.s32 %s14414_s21, %s14531_s22  ;;  %p371_p0 = scmp.ne.s32.totalorder %s14410_s20, %s14406_s19 }
   0xa   : > { %p359_p1 = scmp.eq.s32.totalorder %s358_s24, 0  ;;  %p372_p2 = scmp.eq.s32.totalorder %s14527_s13, 1 }
   0xb   : > { %p377_p3 = scmp.ne.s32.totalorder %s14406_s19, %s14402_s18  ;;  %p378_p4 = scmp.eq.s32.totalorder %s11475_s14, 1 }
   0xc   : > { %s14542_s25 = scalar_select %p359_p1, %s14410_s20, %s361_s23  }
   0xd   : > { %p14544_p5 = por %p372_p2, %p371_p0  ;;  %p14548_p6 = por %p378_p4, %p377_p3 }
   0xe   : > { %18677 = sst [smem:[#allocation12_spill]] %s14542_s25  ;;  %p11476_p7 = scmp.ge.s32.totalorder %s14414_s21, 1 }
   0xf   : > { %s18678_s26 = scalar_select %p14544_p5, 1, 0 }
  0x10   : > { %s18679_s27 = scalar_select %p14548_p6, 1, 0 }
  0x11   : > { %p385_p8 = scmp.lt.s32.totalorder %s14414_s21, 3  ;;  %p18567_p9 = scmp.eq.s32.totalorder %s14527_s13, 0 }
  0x12   : > { %18680 = sst [smem:[#allocation13_spill]] %s18679_s27  ;;  %s14416_s29 = smov [#allocation4]  }
  0x13   : > { %p14555_p10 = pnand %p11476_p7, %p385_p8  ;;  %s418_s30 = sshll.u32 %s14416_s29, 4  ;;  %s419_s30 = int_to_ptr.vmem [resolvable:$true] %s418_s30 }
  0x14   : > { %s18683_s9 = sld [smem:[#allocation74_spill]] }
  0x15   : > { %s18681_s28 = scalar_select %p14555_p10, 1, 0 }
  0x16   : > { %p13647_p11 = pneg %p14555_p10 }
  0x18   : > { %p14563_p12 = pnand %p18567_p9, %p13647_p11 }
  0x1a   : > { %s14320_s23 = scalar_lea.hbm %s18683_s9, 9216  ;;  %p14322_p0 = pneg %p14563_p12 }
  0x1b   : > { %p14321_p13 = scmp.ne.s32.totalorder %s18683_s9, %s14320_s23  ;;  %p14327_p3 = scmp.lt.u32.totalorder %s14320_s23, %s18683_s9 }
  0x1d   : > { %p14323_p1 = pnand %p14322_p0, %p14321_p13 }
  0x1f   : > { %p14324_p2 = pneg %p14323_p1 }
  0x21   : > { %p14329_p4 = pnand %p14327_p3, %p14324_p2 }
  0x23   : > { %14332 = shalt.err (!%p14329_p4)
}
  0x24   : > { %s14333_s22 = scalar_lea.vmem %s419_s30, 9216  ;;  %p14341_p9 = scmp.lt.s32.totalorder %s419_s30, %s419_s30 }
  0x25   : > { %p14334_p7 = scmp.ne.s32.totalorder %s419_s30, %s14333_s22  ;;  %p14342_p6 = scmp.lt.s32.totalorder %s14333_s22, %s14333_s22 }
  0x27   : > { %p14336_p8 = pnand %p14334_p7, %p14322_p0  ;;  %p14343_p5 = por %p14342_p6, %p14341_p9 }
  0x29   : > { %p14337_p11 = pneg %p14336_p8 }
  0x2b   : > { %p14344_p10 = pnand %p14343_p5, %p14337_p11 }
  0x2d   : > { %14347 = shalt.err (!%p14344_p10)
}
  0x2e   : > { %s14417_s25 = smov 64   ;;  %s14418_s17 = smov 4  }
  0x2f   : > { %13650 = dma.hbm_to_vmem [thread:$0]  (!%p14563_p12), %s18683_s9, 9216, %s419_s30, [#allocation5], %s14417_s25, %s14417_s25, %s14418_s17  }
  0x30   : > { %p18684_p13 = scmp.ne.s32.totalorder %s18681_s28, 0 }
  0x32   : > { %463 = sbr.rel (%p18684_p13) target bundleno = 1540 (0x604), region = 80 }
  0x39   : > { %p18685_p1 = scmp.eq.s32.totalorder %s14527_s13, 0 }
  0x3b   : > { %14393 = dma.done.wait (%p18685_p1), [#allocation5], 9216   ;;  %p18686_p0 = pmov %p18685_p1 }
  0x3c   : > { %p514_p5 = scmp.lt.s32.totalorder %s14527_s13, 1  ;;  %v14419_v0 = vmov 0.0|0.0   ;;  %vm14420_vm0 = vmmov 0   ;;  %v18574_v1 = vmov 0.0   ;;  %v14422_v2 = vmov 0   ;;  %v531_v3 = vld [vmem:[%s18554_s6] sm:$0xff] }
  0x3d   : > { %14395 = vsyncadd (%p18686_p0), [#allocation5], 4294958080  ;;  %13635 = vmatprep.subr.bf16.mxu1 %v14419_v0  ;;  %12480 = vmatprep.mubr.msk.f32.mxu1 %vm14420_vm0, %v18574_v1  ;;  %1226 = vst [vmem:[#allocation2] sm:$0xff] %v14422_v2  ;;  %v532_v4 = vld [vmem:[%s18554_s6 + $0x8] sm:$0xff]  ;;  %v533_v5 = vld [vmem:[%s18554_s6 + $0x10] sm:$0xff]  ;;  %vm536_vm1 = vcmask 261120  }
  0x3e   : > { %s515_s20 = scalar_select %p514_p5, %s14527_s13, 1  ;;  %1228 = vst [vmem:[#allocation2 + $0x110] sm:$0xff] %v14422_v2  ;;  %v13636_v6 = vpack.c.bf16 %v532_v4, %v531_v3  ;;  %v534_v7 = vld [vmem:[%s18554_s6 + $0x18] sm:$0xff]  ;;  %v13701_v11 = vld [vmem:[%s18550_s2 + $0x4] ss:$8 sps:$4 sm:$0xff]   ;;  %vm801_vm2 = vcmask 1041408  }
  0x3f   : > { %v13639_v9 = vpack.c.bf16 %v534_v7, %v533_v5  ;;  %v13699_v14 = vld [vmem:[%s18550_s2] ss:$8 sps:$4 sm:$0xff]   ;;  %v13704_v15 = vld [vmem:[%s18550_s2 + $0x14] ss:$8 sps:$4 sm:$0xff]   ;;  %v13702_v19 = vld [vmem:[%s18550_s2 + $0x10] ss:$8 sps:$4 sm:$0xff]  }
  0x40   : > { %s521_s30 = scalar_lea.vmem %s18549_s1, %s515_s20  ;;  %s11889_s24 = sshll.u32 %s515_s20, 7  ;;  %13637 = vmatpush3.bf16.msra.mxu1 %v13636_v6  ;;  %v646_v17 = vld [vmem:[%s18550_s2 + $0x20] sm:$0x33]  ;;  %vm752_vm3 = vcmask 293888   ;;  %vm1972_vm4 = vcmask 1043456  }
  0x41   : > { %v523_v8 = vld [vmem:[%s521_s30] sm:$0x1]  ;;  %s14612_s16 = scalar_lea.vmem %s18548_s0, %s11889_s24  ;;  %13638 = vmatprep.subr.bf16.mxu1 %v14419_v0  ;;  %v11506_v20 = vcombine.low %v646_v17, %v646_v17  ;;  %v11507_v21 = vcombine.high %v646_v17, %v646_v17  ;;  %s511_s22 = sand.u32 1, %s14406_s19   ;;  %vm2143_vm5 = vsmask.f32 4352 }
  0x42   : > { %v11484_v10 = vmul.f32 -1.442695, %v523_v8  ;;  %v13707_v23 = vld [vmem:[%s14612_s16] sm:$0xff]   ;;  %v13708_v24 = vld [vmem:[%s14612_s16 + $0x8] sm:$0xff]   ;;  %v13709_v25 = vld [vmem:[%s14612_s16 + $0x10] sm:$0xff]   ;;  %s11481_s28 = sshll.u32 %s511_s22, 8 }
  0x43   : > { %v803_v22 = vsel %vm801_vm2, %v11506_v20, 0  ;;  %v13710_v26 = vld [vmem:[%s14612_s16 + $0x18] sm:$0xff]   ;;  %v13711_v27 = vld [vmem:[%s14612_s16 + $0x20] sm:$0xff]   ;;  %v13712_v28 = vld [vmem:[%s14612_s16 + $0x28] sm:$0xff]   ;;  %vm2395_vm6 = vsmask.f32 3328 }
  0x44   : > { %14011 = vpow2.f32 %v11484_v10  ;;  %13640 = vmatpush3.bf16.msra.mxu1 %v13639_v9  ;;  %v13713_v29 = vld [vmem:[%s14612_s16 + $0x30] sm:$0xff]   ;;  %v13714_v30 = vld [vmem:[%s14612_s16 + $0x38] sm:$0xff]   ;;  %v13715_v31 = vld [vmem:[%s14612_s16 + $0x40] sm:$0xff]   ;;  %s11890_s24 = sshll.u32 %s14527_s13, 12  ;;  %s18507_s9 = scalar_lea.sflag [#allocation6], %s511_s22 }
  0x45   : > { %808 = vmatprep.subr.bf16.mxu1 %v13701_v11  ;;  %v13716_v32 = vld [vmem:[%s14612_s16 + $0x48] sm:$0xff]   ;;  %v13717_v33 = vld [vmem:[%s14612_s16 + $0x50] sm:$0xff]   ;;  %v13718_v34 = vld [vmem:[%s14612_s16 + $0x58] sm:$0xff]   ;;  %s18498_s29 = scalar_lea.hbm %s18563_s15, %s11890_s24  ;;  %p18990_p9 = scmp.ne.s32.totalorder %s18678_s26, 0 }
  0x46   : > { %v13719_v35 = vld [vmem:[%s14612_s16 + $0x60] sm:$0xff]   ;;  %v13720_v36 = vld [vmem:[%s14612_s16 + $0x68] sm:$0xff]   ;;  %v13721_v37 = vld [vmem:[%s14612_s16 + $0x70] sm:$0xff]   ;;  %s14423_s20 = smov [#allocation7]  }
  0x47   : > { %v14676_v38 = vld [vmem:[#allocation2] sm:$0xff]  ;;  %v13722_v39 = vld [vmem:[%s14612_s16 + $0x78] sm:$0xff]   ;;  %s14692_s16 = scalar_lea.vmem [#allocation7], %s11481_s28  ;;  %s14352_s30 = sshll.u32 %s14423_s20, 4  ;;  %s14353_s30 = int_to_ptr.vmem [resolvable:$false] %s14352_s30 }
  0x48   : > { %v14689_v42 = vld [vmem:[%s18556_s8] ss:$0 sm:$0xff]  ;;  %s11392_s28 = sshll.u32 %s14692_s16, 4  ;;  %s14354_s25 = scalar_lea.vmem %s14353_s30, 8192  ;;  %s18500_s28 = int_to_ptr.vmem [resolvable:$true] %s11392_s28 }
  0x49   : > { %v14705_v60 = vld [vmem:[%s18551_s3] ss:$0 sm:$0xff]  ;;  %s14348_s27 = scalar_lea.vmem %s18500_s28, 4096  ;;  %p14355_p2 = scmp.lt.s32.totalorder %s18500_s28, %s14353_s30 }
  0x4a   : > { %p14349_p6 = scmp.ne.s32.totalorder %s18500_s28, %s14348_s27  ;;  %p14356_p3 = scmp.lt.s32.totalorder %s14354_s25, %s14348_s27 }
  0x4c   : > { %p14350_p10 = pnand %p14349_p6, %p18990_p9  ;;  %p14357_p4 = por %p14356_p3, %p14355_p2 }
  0x4e   : > { %v14012_v12 = vpop.eup %14011  ;;  %p14351_p12 = pneg %p14350_p10 }
  0x4f   : > { %v527_v13 = vadd.f32 1.0, %v14012_v12 }
  0x50   : > { %p14358_p7 = pnand %p14357_p4, %p14351_p12 }
  0x51   : > { %14013 = vrcp.f32 %v527_v13 }
  0x5b   : > { %v14014_v16 = vpop.eup %14013 }
  0x5c   : > { %v530_v18 = vmul.f32 %v14014_v16, %v523_v8 }
  0x5e   : > { %12481 = vmatmul.mubr.msk.f32.vlgmr.msra.gmra.mrb[0].mxu1 %vm536_vm1, %v530_v18 }
  0x5f   : > { %809 = vmatpush1.bf16.msra.mxu1 %v13699_v14  ;;  %840 = vmatprep.mubr.bf16.mxu1 %v14422_v2 }
  0x60   : > { %810 = vmatprep.subr.bf16.mxu1 %v13704_v15 }
  0x63   : > { %811 = vmatpush1.bf16.msra.mxu1 %v13702_v19 }
  0x64   : > { %11508 = vmatprep.subr.msk.bf16.mxu1 %vm801_vm2, %v11507_v21 }
  0x67   : > { %813 = vmatpush1.bf16.msra.mxu1 %v803_v22 }
  0x6a   : > { %11509 = vmatmul.mubr.msk.bf16.vlgmr.msra.gmra.mrb[4].mxu1 %vm752_vm3, %v13707_v23 }
  0x6b   : > { %850 = vmatprep.mubr.bf16.mxu1 %v14422_v2 }
  0x72   : > { %11510 = vmatmul.mubr.msk.bf16.gmra.mrb[8].mxu1 %vm752_vm3, %v13708_v24 }
  0x73   : > { %860 = vmatprep.mubr.bf16.mxu1 %v14422_v2 }
  0x7a   : > { %11511 = vmatmul.mubr.msk.bf16.gmra.mrb[12].mxu1 %vm752_vm3, %v13709_v25 }
  0x7b   : > { %870 = vmatprep.mubr.bf16.mxu1 %v14422_v2 }
  0x82   : > { %11512 = vmatmul.mubr.msk.bf16.gmra.mrb[16].mxu1 %vm752_vm3, %v13710_v26 }
  0x83   : > { %880 = vmatprep.mubr.bf16.mxu1 %v14422_v2 }
  0x8a   : > { %11513 = vmatmul.mubr.msk.bf16.gmra.mrb[20].mxu1 %vm752_vm3, %v13711_v27 }
  0x8b   : > { %890 = vmatprep.mubr.bf16.mxu1 %v14422_v2 }
  0x92   : > { %11514 = vmatmul.mubr.msk.bf16.gmra.mrb[24].mxu1 %vm752_vm3, %v13712_v28 }
  0x93   : > { %900 = vmatprep.mubr.bf16.mxu1 %v14422_v2 }
  0x9a   : > { %11515 = vmatmul.mubr.msk.bf16.gmra.mrb[28].mxu1 %vm752_vm3, %v13713_v29 }
  0x9b   : > { %910 = vmatprep.mubr.bf16.mxu1 %v14422_v2 }
  0xa2   : > { %11516 = vmatmul.mubr.msk.bf16.gmra.mrb[32].mxu1 %vm752_vm3, %v13714_v30 }
  0xa3   : > { %920 = vmatprep.mubr.bf16.mxu1 %v14422_v2 }
  0xaa   : > { %11517 = vmatmul.mubr.msk.bf16.gmra.mrb[36].mxu1 %vm752_vm3, %v13715_v31 }
  0xab   : > { %930 = vmatprep.mubr.bf16.mxu1 %v14422_v2 }
  0xb2   : > { %11518 = vmatmul.mubr.msk.bf16.gmra.mrb[40].mxu1 %vm752_vm3, %v13716_v32 }
  0xb3   : > { %940 = vmatprep.mubr.bf16.mxu1 %v14422_v2 }
  0xba   : > { %11519 = vmatmul.mubr.msk.bf16.gmra.mrb[44].mxu1 %vm752_vm3, %v13717_v33 }
  0xbb   : > { %950 = vmatprep.mubr.bf16.mxu1 %v14422_v2 }
  0xc2   : > { %11520 = vmatmul.mubr.msk.bf16.gmra.mrb[48].mxu1 %vm752_vm3, %v13718_v34 }
  0xc3   : > { %960 = vmatprep.mubr.bf16.mxu1 %v14422_v2 }
  0xca   : > { %11521 = vmatmul.mubr.msk.bf16.gmra.mrb[52].mxu1 %vm752_vm3, %v13719_v35 }
  0xcb   : > { %970 = vmatprep.mubr.bf16.mxu1 %v14422_v2 }
  0xd2   : > { %11522 = vmatmul.mubr.msk.bf16.gmra.mrb[56].mxu1 %vm752_vm3, %v13720_v36 }
  0xd3   : > { %980 = vmatprep.mubr.bf16.mxu1 %v14422_v2 }
  0xda   : > { %11523 = vmatmul.mubr.msk.bf16.gmra.mrb[60].mxu1 %vm752_vm3, %v13721_v37 }
  0xdb   : > { %990 = vmatprep.mubr.bf16.mxu1 %v14676_v38 }
  0xe2   : > { %11524 = vmatmul.mubr.msk.bf16.gmra.mrb[64].mxu1 %vm752_vm3, %v13722_v39 }
 0x131   : > { %v14681_v40 = vpop.f32.mrb[0].mxu1 }
 0x132   : > { %v12482_v41 = vpop.f32.mrb[1].mxu1 }
 0x13d   : > { %v842_v43 = vpop.f32.mrb[4].mxu1 }
 0x13e   : > { %v844_v44 = vpop.f32.mrb[5].mxu1  ;;  %v14714_v63 = vadd.f32 %v14705_v60, %v842_v43 }
 0x13f   : > { %v1008_v45 = vadd.f32 %v14689_v42, %v844_v44  ;;  %v846_v46 = vpop.f32.mrb[6].mxu1 }
 0x140   : > { %v848_v47 = vpop.f32.mrb[7].mxu1  ;;  %v14710_v62 = vadd.f32 %v14705_v60, %v846_v46  ;;  %v1148_v7 = vmul.f32 %v14714_v63, %v14714_v63 }
 0x141   : > { %1040 = vst [vmem:[%s14692_s16] sm:$0xff] %v1008_v45  ;;  %v1009_v48 = vadd.f32 %v14689_v42, %v848_v47 }
 0x142   : > { %v1149_v3 = vmul.f32 %v14710_v62, %v14710_v62  ;;  %v1111_v8 = vadd.f32 %v14710_v62, %v14714_v63 }
 0x143   : > { %1041 = vst [vmem:[%s14692_s16 + $0x8] sm:$0xff] %v1009_v48 }
 0x144   : > { %v1180_v13 = vadd.f32 %v1149_v3, %v1148_v7 }
 0x145   : > { %v852_v49 = vpop.f32.mrb[8].mxu1 }
 0x146   : > { %v854_v50 = vpop.f32.mrb[9].mxu1  ;;  %v14717_v0 = vadd.f32 %v14705_v60, %v852_v49 }
 0x147   : > { %v1010_v51 = vadd.f32 %v14689_v42, %v854_v50  ;;  %v856_v52 = vpop.f32.mrb[10].mxu1 }
 0x148   : > { %v858_v53 = vpop.f32.mrb[11].mxu1  ;;  %v1150_v9 = vmul.f32 %v14717_v0, %v14717_v0  ;;  %v14729_v10 = vadd.f32 %v14705_v60, %v856_v52  ;;  %v1112_v14 = vadd.f32 %v1111_v8, %v14717_v0 }
 0x149   : > { %1042 = vst [vmem:[%s14692_s16 + $0x10] sm:$0xff] %v1010_v51  ;;  %v1011_v54 = vadd.f32 %v14689_v42, %v858_v53 }
 0x14a   : > { %v1181_v16 = vadd.f32 %v1180_v13, %v1150_v9  ;;  %v1151_v17 = vmul.f32 %v14729_v10, %v14729_v10  ;;  %v1113_v19 = vadd.f32 %v1112_v14, %v14729_v10 }
 0x14b   : > { %1043 = vst [vmem:[%s14692_s16 + $0x18] sm:$0xff] %v1011_v54 }
 0x14c   : > { %v1182_v25 = vadd.f32 %v1181_v16, %v1151_v17 }
 0x14d   : > { %v862_v55 = vpop.f32.mrb[12].mxu1 }
 0x14e   : > { %v864_v56 = vpop.f32.mrb[13].mxu1  ;;  %v14735_v15 = vadd.f32 %v14705_v60, %v862_v55 }
 0x14f   : > { %v1012_v57 = vadd.f32 %v14689_v42, %v864_v56  ;;  %v866_v58 = vpop.f32.mrb[14].mxu1 }
 0x150   : > { %v868_v59 = vpop.f32.mrb[15].mxu1  ;;  %v1152_v20 = vmul.f32 %v14735_v15, %v14735_v15  ;;  %v14744_v21 = vadd.f32 %v14705_v60, %v866_v58  ;;  %v1114_v26 = vadd.f32 %v1113_v19, %v14735_v15 }
 0x151   : > { %1044 = vst [vmem:[%s14692_s16 + $0x20] sm:$0xff] %v1012_v57  ;;  %v1013_v61 = vadd.f32 %v14689_v42, %v868_v59 }
 0x152   : > { %v1183_v30 = vadd.f32 %v1182_v25, %v1152_v20  ;;  %v1153_v31 = vmul.f32 %v14744_v21, %v14744_v21  ;;  %v1115_v32 = vadd.f32 %v1114_v26, %v14744_v21 }
 0x153   : > { %1045 = vst [vmem:[%s14692_s16 + $0x28] sm:$0xff] %v1013_v61 }
 0x154   : > { %v1184_v36 = vadd.f32 %v1183_v30, %v1153_v31 }
 0x155   : > { %v872_v2 = vpop.f32.mrb[16].mxu1 }
 0x156   : > { %v874_v4 = vpop.f32.mrb[17].mxu1  ;;  %v14749_v27 = vadd.f32 %v14705_v60, %v872_v2 }
 0x157   : > { %v1014_v5 = vadd.f32 %v14689_v42, %v874_v4  ;;  %v876_v6 = vpop.f32.mrb[18].mxu1 }
 0x158   : > { %v878_v11 = vpop.f32.mrb[19].mxu1  ;;  %v1154_v33 = vmul.f32 %v14749_v27, %v14749_v27  ;;  %v14760_v34 = vadd.f32 %v14705_v60, %v876_v6  ;;  %v1116_v37 = vadd.f32 %v1115_v32, %v14749_v27 }
 0x159   : > { %1046 = vst [vmem:[%s14692_s16 + $0x30] sm:$0xff] %v1014_v5  ;;  %v1015_v12 = vadd.f32 %v14689_v42, %v878_v11 }
 0x15a   : > { %v1185_v45 = vadd.f32 %v1184_v36, %v1154_v33  ;;  %v1155_v46 = vmul.f32 %v14760_v34, %v14760_v34  ;;  %v1117_v49 = vadd.f32 %v1116_v37, %v14760_v34 }
 0x15b   : > { %1047 = vst [vmem:[%s14692_s16 + $0x38] sm:$0xff] %v1015_v12 }
 0x15c   : > { %v1186_v52 = vadd.f32 %v1185_v45, %v1155_v46 }
 0x15d   : > { %v882_v18 = vpop.f32.mrb[20].mxu1 }
 0x15e   : > { %v884_v22 = vpop.f32.mrb[21].mxu1  ;;  %v14764_v39 = vadd.f32 %v14705_v60, %v882_v18 }
 0x15f   : > { %v1016_v23 = vadd.f32 %v14689_v42, %v884_v22  ;;  %v886_v24 = vpop.f32.mrb[22].mxu1 }
 0x160   : > { %v888_v28 = vpop.f32.mrb[23].mxu1  ;;  %v1156_v50 = vmul.f32 %v14764_v39, %v14764_v39  ;;  %v14775_v51 = vadd.f32 %v14705_v60, %v886_v24  ;;  %v1118_v53 = vadd.f32 %v1117_v49, %v14764_v39 }
 0x161   : > { %1048 = vst [vmem:[%s14692_s16 + $0x40] sm:$0xff] %v1016_v23  ;;  %v1017_v29 = vadd.f32 %v14689_v42, %v888_v28 }
 0x162   : > { %v1187_v56 = vadd.f32 %v1186_v52, %v1156_v50  ;;  %v1157_v57 = vmul.f32 %v14775_v51, %v14775_v51  ;;  %v1119_v2 = vadd.f32 %v1118_v53, %v14775_v51 }
 0x163   : > { %1049 = vst [vmem:[%s14692_s16 + $0x48] sm:$0xff] %v1017_v29 }
 0x164   : > { %v1188_v7 = vadd.f32 %v1187_v56, %v1157_v57 }
 0x165   : > { %v892_v35 = vpop.f32.mrb[24].mxu1 }
 0x166   : > { %v894_v41 = vpop.f32.mrb[25].mxu1  ;;  %v14780_v54 = vadd.f32 %v14705_v60, %v892_v35 }
 0x167   : > { %v1018_v43 = vadd.f32 %v14689_v42, %v894_v41  ;;  %v896_v44 = vpop.f32.mrb[26].mxu1 }
 0x168   : > { %v898_v47 = vpop.f32.mrb[27].mxu1  ;;  %v1158_v3 = vmul.f32 %v14780_v54, %v14780_v54  ;;  %v14789_v4 = vadd.f32 %v14705_v60, %v896_v44  ;;  %v1120_v8 = vadd.f32 %v1119_v2, %v14780_v54 }
 0x169   : > { %1050 = vst [vmem:[%s14692_s16 + $0x50] sm:$0xff] %v1018_v43  ;;  %v1019_v48 = vadd.f32 %v14689_v42, %v898_v47 }
 0x16a   : > { %v1189_v11 = vadd.f32 %v1188_v7, %v1158_v3  ;;  %v1159_v12 = vmul.f32 %v14789_v4, %v14789_v4  ;;  %v1121_v14 = vadd.f32 %v1120_v8, %v14789_v4 }
 0x16b   : > { %1051 = vst [vmem:[%s14692_s16 + $0x58] sm:$0xff] %v1019_v48 }
 0x16c   : > { %v1190_v22 = vadd.f32 %v1189_v11, %v1159_v12 }
 0x16d   : > { %v902_v55 = vpop.f32.mrb[28].mxu1 }
 0x16e   : > { %v904_v58 = vpop.f32.mrb[29].mxu1  ;;  %v14795_v9 = vadd.f32 %v14705_v60, %v902_v55 }
 0x16f   : > { %v1020_v59 = vadd.f32 %v14689_v42, %v904_v58  ;;  %v906_v61 = vpop.f32.mrb[30].mxu1 }
 0x170   : > { %v908_v5 = vpop.f32.mrb[31].mxu1  ;;  %v1160_v16 = vmul.f32 %v14795_v9, %v14795_v9  ;;  %v14804_v17 = vadd.f32 %v14705_v60, %v906_v61  ;;  %v1122_v23 = vadd.f32 %v1121_v14, %v14795_v9 }
 0x171   : > { %1052 = vst [vmem:[%s14692_s16 + $0x60] sm:$0xff] %v1020_v59  ;;  %v1021_v6 = vadd.f32 %v14689_v42, %v908_v5 }
 0x172   : > { %v1191_v28 = vadd.f32 %v1190_v22, %v1160_v16  ;;  %v1161_v29 = vmul.f32 %v14804_v17, %v14804_v17  ;;  %v1123_v30 = vadd.f32 %v1122_v23, %v14804_v17 }
 0x173   : > { %1053 = vst [vmem:[%s14692_s16 + $0x68] sm:$0xff] %v1021_v6 }
 0x174   : > { %v1192_v35 = vadd.f32 %v1191_v28, %v1161_v29 }
 0x175   : > { %v912_v13 = vpop.f32.mrb[32].mxu1 }
 0x176   : > { %v914_v18 = vpop.f32.mrb[33].mxu1  ;;  %v14809_v24 = vadd.f32 %v14705_v60, %v912_v13 }
 0x177   : > { %v1022_v19 = vadd.f32 %v14689_v42, %v914_v18  ;;  %v916_v20 = vpop.f32.mrb[34].mxu1 }
 0x178   : > { %v918_v25 = vpop.f32.mrb[35].mxu1  ;;  %v1162_v31 = vmul.f32 %v14809_v24, %v14809_v24  ;;  %v14820_v32 = vadd.f32 %v14705_v60, %v916_v20  ;;  %v1124_v36 = vadd.f32 %v1123_v30, %v14809_v24 }
 0x179   : > { %1054 = vst [vmem:[%s14692_s16 + $0x70] sm:$0xff] %v1022_v19  ;;  %v1023_v26 = vadd.f32 %v14689_v42, %v918_v25 }
 0x17a   : > { %v1193_v45 = vadd.f32 %v1192_v35, %v1162_v31  ;;  %v1163_v46 = vmul.f32 %v14820_v32, %v14820_v32  ;;  %v1125_v49 = vadd.f32 %v1124_v36, %v14820_v32 }
 0x17b   : > { %1055 = vst [vmem:[%s14692_s16 + $0x78] sm:$0xff] %v1023_v26 }
 0x17c   : > { %v1194_v53 = vadd.f32 %v1193_v45, %v1163_v46 }
 0x17d   : > { %v922_v33 = vpop.f32.mrb[36].mxu1 }
 0x17e   : > { %v14824_v37 = vadd.f32 %v14705_v60, %v922_v33  ;;  %v924_v41 = vpop.f32.mrb[37].mxu1 }
 0x17f   : > { %v1024_v43 = vadd.f32 %v14689_v42, %v924_v41  ;;  %v926_v44 = vpop.f32.mrb[38].mxu1 }
 0x180   : > { %v928_v47 = vpop.f32.mrb[39].mxu1  ;;  %v1164_v50 = vmul.f32 %v14824_v37, %v14824_v37  ;;  %v14835_v52 = vadd.f32 %v14705_v60, %v926_v44  ;;  %v1126_v55 = vadd.f32 %v1125_v49, %v14824_v37 }
 0x181   : > { %1056 = vst [vmem:[%s14692_s16 + $0x80] sm:$0xff] %v1024_v43  ;;  %v1025_v48 = vadd.f32 %v14689_v42, %v928_v47 }
 0x182   : > { %v1195_v57 = vadd.f32 %v1194_v53, %v1164_v50  ;;  %v1165_v58 = vmul.f32 %v14835_v52, %v14835_v52  ;;  %v1127_v5 = vadd.f32 %v1126_v55, %v14835_v52 }
 0x183   : > { %1057 = vst [vmem:[%s14692_s16 + $0x88] sm:$0xff] %v1025_v48 }
 0x184   : > { %v1196_v12 = vadd.f32 %v1195_v57, %v1165_v58 }
 0x185   : > { %v932_v56 = vpop.f32.mrb[40].mxu1 }
 0x186   : > { %v14842_v59 = vadd.f32 %v14705_v60, %v932_v56  ;;  %v934_v61 = vpop.f32.mrb[41].mxu1 }
 0x187   : > { %v1026_v2 = vadd.f32 %v14689_v42, %v934_v61  ;;  %v936_v3 = vpop.f32.mrb[42].mxu1 }
 0x188   : > { %v1166_v6 = vmul.f32 %v14842_v59, %v14842_v59  ;;  %v14849_v7 = vadd.f32 %v14705_v60, %v936_v3  ;;  %v938_v8 = vpop.f32.mrb[43].mxu1  ;;  %v1128_v13 = vadd.f32 %v1127_v5, %v14842_v59 }
 0x189   : > { %1058 = vst [vmem:[%s14692_s16 + $0x90] sm:$0xff] %v1026_v2  ;;  %v1027_v11 = vadd.f32 %v14689_v42, %v938_v8 }
 0x18a   : > { %v1197_v14 = vadd.f32 %v1196_v12, %v1166_v6  ;;  %v1167_v16 = vmul.f32 %v14849_v7, %v14849_v7  ;;  %v1129_v19 = vadd.f32 %v1128_v13, %v14849_v7 }
 0x18b   : > { %1059 = vst [vmem:[%s14692_s16 + $0x98] sm:$0xff] %v1027_v11 }
 0x18c   : > { %v1198_v26 = vadd.f32 %v1197_v14, %v1167_v16 }
 0x18d   : > { %v942_v18 = vpop.f32.mrb[44].mxu1 }
 0x18e   : > { %v14859_v20 = vadd.f32 %v14705_v60, %v942_v18  ;;  %v944_v22 = vpop.f32.mrb[45].mxu1 }
 0x18f   : > { %v1028_v23 = vadd.f32 %v14689_v42, %v944_v22  ;;  %v946_v25 = vpop.f32.mrb[46].mxu1 }
 0x190   : > { %v1130_v28 = vadd.f32 %v1129_v19, %v14859_v20  ;;  %v1168_v29 = vmul.f32 %v14859_v20, %v14859_v20  ;;  %v14866_v30 = vadd.f32 %v14705_v60, %v946_v25  ;;  %v948_v31 = vpop.f32.mrb[47].mxu1  ;;  %v13723_v25 = vld [vmem:[#allocation4 + $0x40] sm:$0xff]  }
 0x191   : > { %1060 = vst [vmem:[%s14692_s16 + $0xa0] sm:$0xff] %v1028_v23  ;;  %v1029_v33 = vadd.f32 %v14689_v42, %v948_v31  ;;  %12483 = vmatprep.subr.bf16.mxu0 %v13723_v25 }
 0x192   : > { %v1199_v35 = vadd.f32 %v1198_v26, %v1168_v29  ;;  %v1131_v36 = vadd.f32 %v1130_v28, %v14866_v30  ;;  %v1169_v41 = vmul.f32 %v14866_v30, %v14866_v30  ;;  %12484 = vmatpush3.bf16.msra.mxu0 %v13723_v25 }
 0x193   : > { %1061 = vst [vmem:[%s14692_s16 + $0xa8] sm:$0xff] %v1029_v33 }
 0x194   : > { %v1200_v43 = vadd.f32 %v1199_v35, %v1169_v41 }
 0x195   : > { %v952_v44 = vpop.f32.mrb[48].mxu1 }
 0x196   : > { %v14875_v45 = vadd.f32 %v14705_v60, %v952_v44  ;;  %v954_v46 = vpop.f32.mrb[49].mxu1 }
 0x197   : > { %v1030_v47 = vadd.f32 %v14689_v42, %v954_v46  ;;  %v956_v48 = vpop.f32.mrb[50].mxu1 }
 0x198   : > { %v1132_v49 = vadd.f32 %v1131_v36, %v14875_v45  ;;  %v1170_v50 = vmul.f32 %v14875_v45, %v14875_v45  ;;  %v14882_v53 = vadd.f32 %v14705_v60, %v956_v48  ;;  %v958_v55 = vpop.f32.mrb[51].mxu1  ;;  %v13725_v36 = vld [vmem:[#allocation4 + $0x48] sm:$0xff]  }
 0x199   : > { %1062 = vst [vmem:[%s14692_s16 + $0xb0] sm:$0xff] %v1030_v47  ;;  %v1031_v56 = vadd.f32 %v14689_v42, %v958_v55  ;;  %12485 = vmatprep.subr.bf16.mxu0 %v13725_v36  ;;  %v13727_v55 = vld [vmem:[#allocation4 + $0x50] sm:$0xff]  }
 0x19a   : > { %v1201_v57 = vadd.f32 %v1200_v43, %v1170_v50  ;;  %v1133_v58 = vadd.f32 %v1132_v49, %v14882_v53  ;;  %v1171_v61 = vmul.f32 %v14882_v53, %v14882_v53  ;;  %12486 = vmatpush3.bf16.msra.mxu0 %v13725_v36 }
 0x19b   : > { %1063 = vst [vmem:[%s14692_s16 + $0xb8] sm:$0xff] %v1031_v56  ;;  %12487 = vmatprep.subr.bf16.mxu0 %v13727_v55 }
 0x19c   : > { %v1202_v2 = vadd.f32 %v1201_v57, %v1171_v61  ;;  %v13724_v57 = vld [vmem:[#allocation4 + $0x100] sm:$0xff]  }
 0x19d   : > { %v962_v3 = vpop.f32.mrb[52].mxu1  ;;  %12611 = vmatprep.subr.bf16.mxu1 %v13724_v57 }
 0x19e   : > { %v14891_v5 = vadd.f32 %v14705_v60, %v962_v3  ;;  %v964_v6 = vpop.f32.mrb[53].mxu1  ;;  %12488 = vmatpush3.bf16.msra.mxu0 %v13727_v55  ;;  %12612 = vmatpush3.bf16.msra.mxu1 %v13724_v57  ;;  %v13730_v55 = vld [vmem:[#allocation4 + $0x118] sm:$0xff]  }
 0x19f   : > { %v1032_v8 = vadd.f32 %v14689_v42, %v964_v6  ;;  %v966_v11 = vpop.f32.mrb[54].mxu1 }
 0x1a0   : > { %v1134_v12 = vadd.f32 %v1133_v58, %v14891_v5  ;;  %v1172_v13 = vmul.f32 %v14891_v5, %v14891_v5  ;;  %v14898_v14 = vadd.f32 %v14705_v60, %v966_v11  ;;  %v968_v16 = vpop.f32.mrb[55].mxu1 }
 0x1a1   : > { %1064 = vst [vmem:[%s14692_s16 + $0xc0] sm:$0xff] %v1032_v8  ;;  %v1033_v18 = vadd.f32 %v14689_v42, %v968_v16  ;;  %v13729_v8 = vld [vmem:[#allocation4 + $0x58] sm:$0xff]  }
 0x1a2   : > { %v1203_v19 = vadd.f32 %v1202_v2, %v1172_v13  ;;  %v1135_v22 = vadd.f32 %v1134_v12, %v14898_v14  ;;  %v1173_v23 = vmul.f32 %v14898_v14, %v14898_v14  ;;  %12489 = vmatprep.subr.bf16.mxu0 %v13729_v8 }
 0x1a3   : > { %1065 = vst [vmem:[%s14692_s16 + $0xc8] sm:$0xff] %v1033_v18  ;;  %v13726_v18 = vld [vmem:[#allocation4 + $0x108] sm:$0xff]   ;;  %12490 = vmatpush3.bf16.msra.mxu0 %v13729_v8  ;;  %v13732_v8 = vld [vmem:[#allocation4 + $0x120] sm:$0xff]  }
 0x1a4   : > { %v1204_v26 = vadd.f32 %v1203_v19, %v1173_v23  ;;  %12613 = vmatprep.subr.bf16.mxu1 %v13726_v18 }
 0x1a5   : > { %v972_v28 = vpop.f32.mrb[56].mxu1  ;;  %12614 = vmatpush3.bf16.msra.mxu1 %v13726_v18 }
 0x1a6   : > { %v14907_v29 = vadd.f32 %v14705_v60, %v972_v28  ;;  %v974_v31 = vpop.f32.mrb[57].mxu1 }
 0x1a7   : > { %v1034_v33 = vadd.f32 %v14689_v42, %v974_v31  ;;  %v976_v35 = vpop.f32.mrb[58].mxu1  ;;  %v13728_v31 = vld [vmem:[#allocation4 + $0x110] sm:$0xff]  }
 0x1a8   : > { %v1136_v41 = vadd.f32 %v1135_v22, %v14907_v29  ;;  %v1174_v43 = vmul.f32 %v14907_v29, %v14907_v29  ;;  %v14914_v44 = vadd.f32 %v14705_v60, %v976_v35  ;;  %v978_v46 = vpop.f32.mrb[59].mxu1  ;;  %12615 = vmatprep.subr.bf16.mxu1 %v13728_v31 }
 0x1a9   : > { %1066 = vst [vmem:[%s14692_s16 + $0xd0] sm:$0xff] %v1034_v33  ;;  %v1035_v47 = vadd.f32 %v14689_v42, %v978_v46  ;;  %12616 = vmatpush3.bf16.msra.mxu1 %v13728_v31  ;;  %v13733_v46 = vld [vmem:[#allocation4 + $0x68] sm:$0xff]   ;;  %v13736_v31 = vld [vmem:[#allocation4 + $0x130] sm:$0xff]  }
 0x1aa   : > { %v1205_v48 = vadd.f32 %v1204_v26, %v1174_v43  ;;  %v1137_v49 = vadd.f32 %v1136_v41, %v14914_v44  ;;  %v1175_v50 = vmul.f32 %v14914_v44, %v14914_v44  ;;  %v13731_v26 = vld [vmem:[#allocation4 + $0x60] sm:$0xff]   ;;  %12617 = vmatprep.subr.bf16.mxu1 %v13730_v55 }
 0x1ab   : > { %1067 = vst [vmem:[%s14692_s16 + $0xd8] sm:$0xff] %v1035_v47  ;;  %12491 = vmatprep.subr.bf16.mxu0 %v13731_v26 }
 0x1ac   : > { %v1206_v56 = vadd.f32 %v1205_v48, %v1175_v50  ;;  %12492 = vmatpush3.bf16.msra.mxu0 %v13731_v26 }
 0x1ad   : > { %v982_v58 = vpop.f32.mrb[60].mxu1  ;;  %12493 = vmatprep.subr.bf16.mxu0 %v13733_v46  ;;  %12618 = vmatpush3.bf16.msra.mxu1 %v13730_v55 }
 0x1ae   : > { %v14923_v61 = vadd.f32 %v14705_v60, %v982_v58  ;;  %v984_v2 = vpop.f32.mrb[61].mxu1  ;;  %12619 = vmatprep.subr.bf16.mxu1 %v13732_v8 }
 0x1af   : > { %v1036_v3 = vadd.f32 %v14689_v42, %v984_v2  ;;  %v986_v6 = vpop.f32.mrb[62].mxu1 }
 0x1b0   : > { %v1138_v11 = vadd.f32 %v1137_v49, %v14923_v61  ;;  %v1176_v12 = vmul.f32 %v14923_v61, %v14923_v61  ;;  %v14930_v13 = vadd.f32 %v14705_v60, %v986_v6  ;;  %v988_v16 = vpop.f32.mrb[63].mxu1  ;;  %12494 = vmatpush3.bf16.msra.mxu0 %v13733_v46  ;;  %v13738_v46 = vld [vmem:[#allocation4 + $0x138] sm:$0xff]  }
 0x1b1   : > { %1068 = vst [vmem:[%s14692_s16 + $0xe0] sm:$0xff] %v1036_v3  ;;  %v1037_v19 = vadd.f32 %v14689_v42, %v988_v16  ;;  %v13735_v3 = vld [vmem:[#allocation4 + $0x70] sm:$0xff]   ;;  %12620 = vmatpush3.bf16.msra.mxu1 %v13732_v8 }
 0x1b2   : > { %v1207_v22 = vadd.f32 %v1206_v56, %v1176_v12  ;;  %v1139_v23 = vadd.f32 %v1138_v11, %v14930_v13  ;;  %v1177_v25 = vmul.f32 %v14930_v13, %v14930_v13  ;;  %12495 = vmatprep.subr.bf16.mxu0 %v13735_v3  ;;  %v535_v8 = vld [vmem:[%s18555_s7] sm:$0x1] }
 0x1b3   : > { %1069 = vst [vmem:[%s14692_s16 + $0xe8] sm:$0xff] %v1037_v19  ;;  %v13734_v19 = vld [vmem:[#allocation4 + $0x128] sm:$0xff]  }
 0x1b4   : > { %v1208_v28 = vadd.f32 %v1207_v22, %v1177_v25  ;;  %12496 = vmatpush3.bf16.msra.mxu0 %v13735_v3  ;;  %v1945_v22 = vld [vmem:[#allocation2] sm:$0xf0]  ;;  %v18573_v25 = vrot.slane %v14676_v38, 4  ;;  %12621 = vmatprep.subr.bf16.mxu1 %v13734_v19 }
 0x1b5   : > { %v992_v33 = vpop.f32.mrb[64].mxu1  ;;  %12622 = vmatpush3.bf16.msra.mxu1 %v13734_v19  ;;  %v607_v19 = vadd.f32 %v14681_v40, %v535_v8  ;;  %v1920_v40 = vld [vmem:[#allocation2] sm:$0xf8] }
 0x1b6   : > { %v14939_v35 = vadd.f32 %v14705_v60, %v992_v33  ;;  %v994_v36 = vpop.f32.mrb[65].mxu1  ;;  %v14955_v33 = vld [vmem:[#allocation4] sm:$0xff]   ;;  %12623 = vmatprep.subr.bf16.mxu1 %v13736_v31 }
 0x1b7   : > { %v1038_v41 = vadd.f32 %v14689_v42, %v994_v36  ;;  %v996_v43 = vpop.f32.mrb[66].mxu1 }
 0x1b8   : > { %v1140_v47 = vadd.f32 %v1139_v23, %v14939_v35  ;;  %v1178_v48 = vmul.f32 %v14939_v35, %v14939_v35  ;;  %v14946_v49 = vadd.f32 %v14705_v60, %v996_v43  ;;  %v998_v50 = vpop.f32.mrb[67].mxu1  ;;  %v1973_v23 = vrot.slane %v1945_v22, 4 }
 0x1b9   : > { %1070 = vst [vmem:[%s14692_s16 + $0xf0] sm:$0xff] %v1038_v41  ;;  %v1039_v56 = vadd.f32 %v14689_v42, %v998_v50  ;;  %v13737_v42 = vld [vmem:[#allocation4 + $0x78] sm:$0xff]   ;;  %v1264_v50 = vlaneseq  ;;  %12624 = vmatpush3.bf16.msra.mxu1 %v13736_v31 }
 0x1ba   : > { %v1209_v57 = vadd.f32 %v1208_v28, %v1178_v48  ;;  %v1141_v58 = vadd.f32 %v1140_v47, %v14946_v49  ;;  %v1179_v2 = vmul.f32 %v14946_v49, %v14946_v49  ;;  %12497 = vmatprep.subr.bf16.mxu0 %v13737_v42  ;;  %v1975_v36 = vsel %vm1972_vm4, %v1973_v23, %v18573_v25  ;;  %v15062_v25 = vld [vmem:[%s18553_s5] ss:$0 sm:$0xff] }
 0x1bb   : > { %1071 = vst [vmem:[%s14692_s16 + $0xf8] sm:$0xff] %v1039_v56  ;;  %12498 = vmatpush3.bf16.msra.mxu0 %v13737_v42  ;;  %12499 = vmatprep.mubr.bf16.mxu0 %v1975_v36  ;;  %v14973_v42 = vld [vmem:[#allocation2] sm:$0xff] }
 0x1bc   : > { %v1142_v6 = vrot.slane %v1141_v58, 4  ;;  %v1210_v60 = vadd.f32 %v1209_v57, %v1179_v2  ;;  %12515 = vmatprep.subr.bf16.mxu0 %v14955_v33  ;;  %12625 = vmatprep.subr.bf16.mxu1 %v13738_v46  ;;  %v14963_v57 = vld [vmem:[#allocation4 + $0x180] sm:$0xff]   ;;  %18687 = vst [vmem:[#allocation14_spill] sm:$0xff] %v14973_v42 }
 0x1bd   : > { %12626 = vmatpush3.bf16.msra.mxu1 %v13738_v46 }
 0x1be   : > { %v1143_v11 = vadd.f32 %v1142_v6, %v1141_v58  ;;  %v1211_v12 = vrot.slane %v1210_v60, 4  ;;  %v1265_v6 = vshrl.u32 %v1264_v50, 7  ;;  %12675 = vmatprep.subr.bf16.mxu1 %v14963_v57 }
 0x1c0   : > { %v1144_v16 = vrot.slane %v1143_v11, 2  ;;  %v1212_v18 = vadd.f32 %v1211_v12, %v1210_v60  ;;  %v1266_v12 = vsub.s32 0, %v1265_v6 }
 0x1c2   : > { %v1145_v26 = vadd.f32 %v1144_v16, %v1143_v11  ;;  %v1213_v28 = vrot.slane %v1212_v18, 2  ;;  %v18571_v16 = vshrl.u32 %v14973_v42, 16  ;;  %v15004_v6 = vrot.slane %v607_v19, %v1266_v12 }
 0x1c4   : > { %v1146_v41 = vrot.slane %v1145_v26, 1  ;;  %v1214_v43 = vadd.f32 %v1213_v28, %v1212_v18  ;;  %v18572_v18 = vshll.u32 %v14973_v42, 16  ;;  %v2155_v50 = vrot.slane %v18571_v16, 3 }
 0x1c6   : > { %v1147_v47 = vadd.f32 %v1146_v41, %v1145_v26  ;;  %v1215_v48 = vrot.slane %v1214_v43, 1 }
 0x1c8   : > { %v1216_v55 = vadd.f32 %v1215_v48, %v1214_v43  ;;  %v14961_v56 = vmul.f32 0.00390625, %v1147_v47 }
 0x1ca   : > { %v1218_v58 = vmul.f32 0.00390625, %v1216_v55  ;;  %v1219_v2 = vmul.f32 %v14961_v56, %v14961_v56  ;;  %v1667_v3 = vsub.f32 %v14946_v49, %v14961_v56  ;;  %v1526_v22 = vsub.f32 %v14859_v20, %v14961_v56 }
 0x1cb   : > { %v1527_v23 = vsub.f32 %v14866_v30, %v14961_v56  ;;  %v1554_v26 = vsub.f32 %v14875_v45, %v14961_v56  ;;  %v1555_v28 = vsub.f32 %v14882_v53, %v14961_v56  ;;  %v1582_v31 = vsub.f32 %v14891_v5, %v14961_v56 }
 0x1cc   : > { %v1220_v60 = vsub.f32 %v1218_v58, %v1219_v2  ;;  %v2158_v55 = vrot.slane %v18572_v18, 4  ;;  %v2145_v58 = vshrl.u32 %v1920_v40, 16  ;;  %v2148_v2 = vshll.u32 %v1920_v40, 16 }
 0x1cd   : > { %v1231_v8 = vsub.f32 %v14710_v62, %v14961_v56  ;;  %v1275_v16 = vsub.f32 %v14729_v10, %v14961_v56  ;;  %v1302_v18 = vsub.f32 %v14735_v15, %v14961_v56  ;;  %v1330_v62 = vsub.f32 %v14749_v27, %v14961_v56 }
 0x1ce   : > { %v1221_v11 = vmax.f32 %v1220_v60, 0.0  ;;  %v1230_v60 = vsub.f32 %v14714_v63, %v14961_v56  ;;  %v15018_v40 = vrot.slane %v2145_v58, 3  ;;  %v15020_v12 = vrot.slane %v2148_v2, 4 }
 0x1cf   : > { %v1303_v63 = vsub.f32 %v14744_v21, %v14961_v56  ;;  %v1358_v19 = vsub.f32 %v14764_v39, %v14961_v56  ;;  %v1359_v10 = vsub.f32 %v14775_v51, %v14961_v56  ;;  %v1386_v15 = vsub.f32 %v14780_v54, %v14961_v56  ;;  %v15049_v54 = vld [vmem:[%s18552_s4] ss:$0 sm:$0xff] }
 0x1d0   : > { %v1222_v49 = vadd.f32 1e-05, %v1221_v11  ;;  %v1274_v11 = vsub.f32 %v14717_v0, %v14961_v56  ;;  %v1331_v0 = vsub.f32 %v14760_v34, %v14961_v56  ;;  %v1414_v21 = vsub.f32 %v14795_v9, %v14961_v56 }
 0x1d1   : > { %v1415_v27 = vsub.f32 %v14804_v17, %v14961_v56  ;;  %v1442_v34 = vsub.f32 %v14809_v24, %v14961_v56  ;;  %v1443_v39 = vsub.f32 %v14820_v32, %v14961_v56  ;;  %v1470_v51 = vsub.f32 %v14824_v37, %v14961_v56 }
 0x1d2   : > { %14015 = vrsqrt.f32 %v1222_v49  ;;  %v15012_v49 = vor.u32 %v2158_v55, %v2155_v50  ;;  %v1387_v50 = vsub.f32 %v14789_v4, %v14961_v56  ;;  %v1471_v4 = vsub.f32 %v14835_v52, %v14961_v56 }
 0x1d3   : > { %v1498_v9 = vsub.f32 %v14842_v59, %v14961_v56  ;;  %v1499_v17 = vsub.f32 %v14849_v7, %v14961_v56  ;;  %v18689_v30 = vsub.f32 %v14898_v14, %v14961_v56  ;;  %v18690_v45 = vsub.f32 %v14907_v29, %v14961_v56 }
 0x1d4   : > { %18688 = vst [vmem:[#allocation15_spill] sm:$0xff] %v15012_v49  ;;  %v18691_v53 = vsub.f32 %v14914_v44, %v14961_v56  ;;  %v18692_v5 = vsub.f32 %v14923_v61, %v14961_v56  ;;  %v18693_v14 = vsub.f32 %v14930_v13, %v14961_v56  ;;  %v18694_v29 = vsub.f32 %v14939_v35, %v14961_v56 }
 0x1dc   : > { %v14016_v55 = vpop.eup %14015 }
 0x1dd   : > { %v1669_v32 = vmul.f32 %v14016_v55, %v1667_v3  ;;  %v1232_v37 = vmul.f32 %v14016_v55, %v1230_v60  ;;  %v1233_v58 = vmul.f32 %v14016_v55, %v1231_v8  ;;  %v1276_v2 = vmul.f32 %v14016_v55, %v1274_v11 }
 0x1de   : > { %v1277_v1 = vmul.f32 %v14016_v55, %v1275_v16  ;;  %v1304_v52 = vmul.f32 %v14016_v55, %v1302_v18  ;;  %v1305_v48 = vmul.f32 %v14016_v55, %v1303_v63  ;;  %v1332_v47 = vmul.f32 %v14016_v55, %v1330_v62 }
 0x1df   : > { %v1671_v59 = vmul.f32 %v15049_v54, %v1669_v32  ;;  %v1333_v46 = vmul.f32 %v14016_v55, %v1331_v0  ;;  %v1360_v7 = vmul.f32 %v14016_v55, %v1358_v19  ;;  %v1361_v43 = vmul.f32 %v14016_v55, %v1359_v10 }
 0x1e0   : > { %v1388_v41 = vmul.f32 %v14016_v55, %v1386_v15  ;;  %v1389_v24 = vmul.f32 %v14016_v55, %v1387_v50  ;;  %v1416_v3 = vmul.f32 %v14016_v55, %v1414_v21  ;;  %v1417_v60 = vmul.f32 %v14016_v55, %v1415_v27 }
 0x1e1   : > { %v15066_v8 = vadd.f32 %v15062_v25, %v1671_v59  ;;  %v15068_v11 = vmul.f32 %v14016_v55, %v1442_v34  ;;  %v15070_v36 = vmul.f32 %v14016_v55, %v1443_v39  ;;  %v15072_v16 = vmul.f32 %v14016_v55, %v1470_v51 }
 0x1e2   : > { %v15074_v18 = vmul.f32 %v14016_v55, %v1471_v4  ;;  %v15076_v63 = vmul.f32 %v14016_v55, %v1498_v9  ;;  %v15078_v62 = vmul.f32 %v14016_v55, %v1499_v17  ;;  %v15083_v0 = vmul.f32 %v14016_v55, %v1526_v22 }
 0x1e3   : > { %v11560_v19 = vmul.f32 -1.442695, %v15066_v8  ;;  %v15089_v10 = vmul.f32 %v14016_v55, %v1527_v23  ;;  %v15094_v15 = vmul.f32 %v14016_v55, %v1554_v26  ;;  %v15099_v50 = vmul.f32 %v14016_v55, %v1555_v28 }
 0x1e4   : > { %v15104_v20 = vmul.f32 %v14016_v55, %v1582_v31  ;;  %v15109_v22 = vmul.f32 %v14016_v55, %v18689_v30  ;;  %v15114_v23 = vmul.f32 %v14016_v55, %v18690_v45  ;;  %v15119_v26 = vmul.f32 %v14016_v55, %v18691_v53 }
 0x1e5   : > { %14017 = vpow2.f32 %v11560_v19  ;;  %v15124_v28 = vmul.f32 %v14016_v55, %v18692_v5  ;;  %v15129_v31 = vmul.f32 %v14016_v55, %v18693_v14  ;;  %v15134_v21 = vmul.f32 %v14016_v55, %v18694_v29 }
 0x1e6   : > { %v1240_v44 = vmul.f32 %v15049_v54, %v1232_v37  ;;  %v1241_v27 = vmul.f32 %v15049_v54, %v1233_v58  ;;  %v1278_v34 = vmul.f32 %v15049_v54, %v1276_v2  ;;  %v1279_v61 = vmul.f32 %v15049_v54, %v1277_v1 }
 0x1e7   : > { %v1306_v39 = vmul.f32 %v15049_v54, %v1304_v52  ;;  %v1307_v51 = vmul.f32 %v15049_v54, %v1305_v48  ;;  %v1334_v13 = vmul.f32 %v15049_v54, %v1332_v47  ;;  %v1335_v4 = vmul.f32 %v15049_v54, %v1333_v46 }
 0x1e8   : > { %v15145_v35 = vadd.f32 %v15062_v25, %v1240_v44  ;;  %v15148_v56 = vadd.f32 %v15062_v25, %v1241_v27  ;;  %v15151_v55 = vadd.f32 %v15062_v25, %v1278_v34  ;;  %v15154_v9 = vadd.f32 %v15062_v25, %v1279_v61 }
 0x1e9   : > { %v15157_v1 = vadd.f32 %v15062_v25, %v1306_v39  ;;  %v15160_v48 = vadd.f32 %v15062_v25, %v1307_v51  ;;  %v15163_v46 = vadd.f32 %v15062_v25, %v1334_v13  ;;  %v15166_v47 = vadd.f32 %v15062_v25, %v1335_v4 }
 0x1ea   : > { %v11529_v17 = vmul.f32 -1.442695, %v15145_v35  ;;  %v11530_v32 = vmul.f32 -1.442695, %v15148_v56  ;;  %v11531_v37 = vmul.f32 -1.442695, %v15151_v55  ;;  %v1362_v58 = vmul.f32 %v15049_v54, %v1360_v7 }
 0x1eb   : > { %v11532_v2 = vmul.f32 -1.442695, %v15154_v9  ;;  %v11533_v52 = vmul.f32 -1.442695, %v15157_v1  ;;  %v1363_v59 = vmul.f32 %v15049_v54, %v1361_v43  ;;  %v18695_v19 = vor.u32 %v15020_v12, %v15018_v40 }
 0x1ec   : > { %14019 = vpow2.f32 %v11529_v17  ;;  %v11534_v45 = vmul.f32 -1.442695, %v15160_v48  ;;  %v11535_v53 = vmul.f32 -1.442695, %v15163_v46  ;;  %v15185_v7 = vadd.f32 %v15062_v25, %v1362_v58 }
 0x1ed   : > { %v15180_v30 = vsel %vm2143_vm5, %v18695_v19, %v15012_v49  ;;  %14021 = vpow2.f32 %v11530_v32  ;;  %v15188_v5 = vadd.f32 %v15062_v25, %v1363_v59  ;;  %v1390_v43 = vmul.f32 %v15049_v54, %v1388_v41 }
 0x1ee   : > { %v1391_v14 = vmul.f32 %v15049_v54, %v1389_v24  ;;  %14023 = vpow2.f32 %v11531_v37  ;;  %v11536_v40 = vmul.f32 -1.442695, %v15166_v47  ;;  %v1418_v12 = vmul.f32 %v15049_v54, %v1416_v3 }
 0x1ef   : > { %v1419_v29 = vmul.f32 %v15049_v54, %v1417_v60  ;;  %v14018_v44 = vpop.eup %14017  ;;  %14025 = vpow2.f32 %v11532_v2  ;;  %v11537_v27 = vmul.f32 -1.442695, %v15185_v7  ;;  %v15197_v34 = vadd.f32 %v15062_v25, %v1390_v43 }
 0x1f0   : > { %v15200_v61 = vadd.f32 %v15062_v25, %v1391_v14  ;;  %v1681_v41 = vadd.f32 1.0, %v14018_v44  ;;  %14027 = vpow2.f32 %v11533_v52  ;;  %v11538_v24 = vmul.f32 -1.442695, %v15188_v5 }
 0x1f1   : > { %v15204_v39 = vadd.f32 %v15062_v25, %v1418_v12  ;;  %14029 = vpow2.f32 %v11534_v45  ;;  %v11539_v3 = vmul.f32 -1.442695, %v15197_v34  ;;  %v15208_v60 = vadd.f32 %v15062_v25, %v1419_v29 }
 0x1f2   : > { %v1446_v51 = vmul.f32 %v15049_v54, %v15068_v11  ;;  %14031 = vrcp.f32 %v1681_v41  ;;  %v11540_v13 = vmul.f32 -1.442695, %v15200_v61  ;;  %v1447_v17 = vmul.f32 %v15049_v54, %v15070_v36 }
 0x1f3   : > { %v11541_v4 = vmul.f32 -1.442695, %v15204_v39  ;;  %14033 = vpow2.f32 %v11535_v53  ;;  %v1474_v37 = vmul.f32 %v15049_v54, %v15072_v16  ;;  %v1475_v58 = vmul.f32 %v15049_v54, %v15074_v18 }
 0x1f4   : > { %v15217_v32 = vadd.f32 %v15062_v25, %v1446_v51  ;;  %14035 = vpow2.f32 %v11536_v40  ;;  %v15224_v11 = vadd.f32 %v15062_v25, %v1447_v17  ;;  %v1502_v2 = vmul.f32 %v15049_v54, %v15076_v63 }
 0x1f5   : > { %v1503_v36 = vmul.f32 %v15049_v54, %v15078_v62  ;;  %14037 = vpow2.f32 %v11537_v27  ;;  %v15231_v52 = vmul.f32 -1.442695, %v15208_v60  ;;  %v15234_v59 = vadd.f32 %v15062_v25, %v1474_v37 }
 0x1f6   : > { %v15237_v16 = vadd.f32 %v15062_v25, %v1475_v58  ;;  %v14020_v18 = vpop.eup %14019  ;;  %14039 = vpow2.f32 %v11538_v24  ;;  %v15240_v19 = vmul.f32 -1.442695, %v15217_v32  ;;  %v15243_v63 = vmul.f32 -1.442695, %v15224_v11 }
 0x1f7   : > { %v15246_v62 = vadd.f32 %v15062_v25, %v1502_v2  ;;  %v14022_v45 = vpop.eup %14021  ;;  %v1256_v53 = vadd.f32 1.0, %v14020_v18  ;;  %14041 = vpow2.f32 %v11539_v3  ;;  %v15249_v43 = vmul.f32 -1.442695, %v15234_v59 }
 0x1f8   : > { %v15252_v14 = vadd.f32 %v15062_v25, %v1503_v36  ;;  %v14024_v40 = vpop.eup %14023  ;;  %v1257_v12 = vadd.f32 1.0, %v14022_v45  ;;  %14043 = vpow2.f32 %v11540_v13  ;;  %v15255_v29 = vmul.f32 -1.442695, %v15237_v16 }
 0x1f9   : > { %v15258_v44 = vmul.f32 -1.442695, %v15246_v62  ;;  %v14026_v27 = vpop.eup %14025  ;;  %14045 = vrcp.f32 %v1256_v53  ;;  %v1288_v41 = vadd.f32 1.0, %v14024_v40  ;;  %v1530_v24 = vmul.f32 %v15049_v54, %v15083_v0 }
 0x1fa   : > { %v1531_v3 = vmul.f32 %v15049_v54, %v15089_v10  ;;  %v14028_v51 = vpop.eup %14027  ;;  %14047 = vrcp.f32 %v1257_v12  ;;  %v1289_v17 = vadd.f32 1.0, %v14026_v27  ;;  %v1558_v13 = vmul.f32 %v15049_v54, %v15094_v15 }
 0x1fb   : > { %v1559_v37 = vmul.f32 %v15049_v54, %v15099_v50  ;;  %v14030_v58 = vpop.eup %14029  ;;  %14049 = vrcp.f32 %v1288_v41  ;;  %v1316_v2 = vadd.f32 1.0, %v14028_v51  ;;  %v15269_v36 = vadd.f32 %v15062_v25, %v1530_v24 }
 0x1fc   : > { %v15272_v0 = vadd.f32 %v15062_v25, %v1531_v3  ;;  %v14032_v18 = vpop.eup %14031  ;;  %14051 = vrcp.f32 %v1289_v17  ;;  %v1317_v10 = vadd.f32 1.0, %v14030_v58  ;;  %v15275_v45 = vmul.f32 -1.442695, %v15252_v14 }
 0x1fd   : > { %v15278_v15 = vadd.f32 %v15062_v25, %v1558_v13  ;;  %v14034_v53 = vpop.eup %14033  ;;  %v1687_v50 = vmul.f32 %v14032_v18, %v15066_v8  ;;  %14053 = vrcp.f32 %v1316_v2  ;;  %v15282_v40 = vmul.f32 -1.442695, %v15269_v36 }
 0x1fe   : > { %v15285_v12 = vadd.f32 %v15062_v25, %v1559_v37  ;;  %v14036_v27 = vpop.eup %14035  ;;  %14055 = vrcp.f32 %v1317_v10  ;;  %v1344_v41 = vadd.f32 1.0, %v14034_v53  ;;  %v15288_v24 = vmul.f32 -1.442695, %v15272_v0 }
 0x1ff   : > { %v15291_v3 = vmul.f32 -1.442695, %v15278_v15  ;;  %v14038_v51 = vpop.eup %14037  ;;  %v1689_v17 = vadd.f32 %v1687_v50, %v15004_v6  ;;  %v1345_v8 = vadd.f32 1.0, %v14036_v27  ;;  %14057 = vpow2.f32 %v11541_v4 }
 0x200   : > { %v1586_v13 = vmul.f32 %v15049_v54, %v15104_v20  ;;  %v14040_v58 = vpop.eup %14039  ;;  %14059 = vrcp.f32 %v1344_v41  ;;  %v1372_v37 = vadd.f32 1.0, %v14038_v51  ;;  %v1587_v2 = vmul.f32 %v15049_v54, %v15109_v22 }
 0x201   : > { %v1614_v18 = vmul.f32 %v15049_v54, %v15114_v23  ;;  %v14042_v10 = vpop.eup %14041  ;;  %v18696_v53 = vmov 0.0   ;;  %14061 = vrcp.f32 %v1345_v8  ;;  %v1373_v49 = vadd.f32 1.0, %v14040_v58 }
 0x202   : > { %v1691_v42 = vpack.c.bf16 %v18696_v53, %v1689_v17  ;;  %v15302_v50 = vadd.f32 %v15062_v25, %v1586_v13  ;;  %v14044_v4 = vpop.eup %14043  ;;  %14063 = vrcp.f32 %v1372_v37  ;;  %v1400_v20 = vadd.f32 1.0, %v14042_v10 }
 0x203   : > { %v15305_v27 = vadd.f32 %v15062_v25, %v1587_v2  ;;  %v1615_v22 = vmul.f32 %v15049_v54, %v15119_v26  ;;  %v14046_v41 = vpop.eup %14045  ;;  %14065 = vrcp.f32 %v1373_v49  ;;  %v1401_v23 = vadd.f32 1.0, %v14044_v4 }
 0x204   : > { %1693 = vst [vmem:[#allocation2 + $0x108] sm:$0xff] %v1691_v42  ;;  %v15310_v51 = vmul.f32 -1.442695, %v15285_v12  ;;  %v15313_v17 = vadd.f32 %v15062_v25, %v1614_v18  ;;  %v14048_v8 = vpop.eup %14047  ;;  %v1262_v13 = vmul.f32 %v14046_v41, %v15145_v35  ;;  %14067 = vrcp.f32 %v1400_v20 }
 0x205   : > { %v15317_v58 = vmul.f32 -1.442695, %v15302_v50  ;;  %v15320_v37 = vmul.f32 -1.442695, %v15305_v27  ;;  %v14050_v26 = vpop.eup %14049  ;;  %v1263_v42 = vmul.f32 %v14048_v8, %v15148_v56  ;;  %14069 = vrcp.f32 %v1401_v23 }
 0x206   : > { %v15324_v49 = vadd.f32 %v15062_v25, %v1615_v22  ;;  %v15327_v2 = vmul.f32 -1.442695, %v15313_v17  ;;  %v14052_v18 = vpop.eup %14051  ;;  %v1268_v35 = vadd.f32 %v15004_v6, %v1262_v13  ;;  %v1294_v10 = vmul.f32 %v14050_v26, %v15151_v55 }
 0x207   : > { %14071 = vpow2.f32 %v15231_v52  ;;  %v1642_v4 = vmul.f32 %v15049_v54, %v15124_v28  ;;  %v14054_v20 = vpop.eup %14053  ;;  %v1269_v56 = vadd.f32 %v15004_v6, %v1263_v42  ;;  %v1295_v41 = vmul.f32 %v14052_v18, %v15154_v9 }
 0x208   : > { %14073 = vpow2.f32 %v15240_v19  ;;  %v1643_v22 = vmul.f32 %v15049_v54, %v15129_v31  ;;  %v14056_v23 = vpop.eup %14055  ;;  %v15340_v8 = vpack.c.bf16 %v1268_v35, %v18696_v53  ;;  %v1296_v55 = vadd.f32 %v1294_v10, %v15004_v6 }
 0x209   : > { %v1322_v52 = vmul.f32 %v14054_v20, %v15157_v1  ;;  %14075 = vpow2.f32 %v15243_v63  ;;  %v14058_v28 = vpop.eup %14057  ;;  %v15346_v13 = vpack.c.bf16 %v18696_v53, %v1269_v56  ;;  %v1297_v9 = vadd.f32 %v1295_v41, %v15004_v6 }
 0x20a   : > { %v1323_v19 = vmul.f32 %v14056_v23, %v15160_v48  ;;  %14077 = vpow2.f32 %v15249_v43  ;;  %v14060_v31 = vpop.eup %14059  ;;  %1272 = vst [vmem:[#allocation2 + $0x10] sm:$0xff] %v15340_v8  ;;  %v15353_v26 = vpack.c.bf16 %v1296_v55, %v18696_v53  ;;  %v1428_v42 = vadd.f32 1.0, %v14058_v28 }
 0x20b   : > { %v1324_v1 = vadd.f32 %v1322_v52, %v15004_v6  ;;  %14079 = vpow2.f32 %v15255_v29  ;;  %v14062_v63 = vpop.eup %14061  ;;  %v15358_v18 = vpack.c.bf16 %v18696_v53, %v1297_v9  ;;  %v1350_v48 = vmul.f32 %v14060_v31, %v15163_v46 }
 0x20c   : > { %v1325_v35 = vadd.f32 %v1323_v19, %v15004_v6  ;;  %14081 = vpow2.f32 %v15258_v44  ;;  %v14064_v43 = vpop.eup %14063  ;;  %1300 = vst [vmem:[#allocation2 + $0x20] sm:$0xff] %v15353_v26  ;;  %v1351_v20 = vmul.f32 %v14062_v63, %v15166_v47  ;;  %v15369_v29 = vadd.f32 %v15062_v25, %v1642_v4 }
 0x20d   : > { %v15365_v10 = vpack.c.bf16 %v1324_v1, %v18696_v53  ;;  %14083 = vrcp.f32 %v1428_v42  ;;  %v14066_v56 = vpop.eup %14065  ;;  %1301 = vst [vmem:[#allocation2 + $0x28] sm:$0xff] %v15358_v18  ;;  %v1352_v46 = vadd.f32 %v1350_v48, %v15004_v6  ;;  %v1378_v44 = vmul.f32 %v14064_v43, %v15185_v7 }
 0x20e   : > { %v15373_v41 = vpack.c.bf16 %v18696_v53, %v1325_v35  ;;  %14085 = vpow2.f32 %v15275_v45  ;;  %v14068_v23 = vpop.eup %14067  ;;  %v1353_v47 = vadd.f32 %v1351_v20, %v15004_v6  ;;  %v1379_v4 = vmul.f32 %v14066_v56, %v15188_v5 }
 0x20f   : > { %1328 = vst [vmem:[#allocation2 + $0x30] sm:$0xff] %v15365_v10  ;;  %14087 = vpow2.f32 %v15282_v40  ;;  %v15383_v55 = vadd.f32 %v15062_v25, %v1643_v22  ;;  %v14070_v52 = vpop.eup %14069  ;;  %v15387_v28 = vpack.c.bf16 %v1352_v46, %v18696_v53  ;;  %v1380_v7 = vadd.f32 %v1378_v44, %v15004_v6 }
 0x210   : > { %1329 = vst [vmem:[#allocation2 + $0x38] sm:$0xff] %v15373_v41  ;;  %v1406_v45 = vmul.f32 %v14068_v23, %v15197_v34  ;;  %14089 = vpow2.f32 %v15288_v24  ;;  %v15393_v5 = vpack.c.bf16 %v18696_v53, %v1353_v47  ;;  %v1381_v40 = vadd.f32 %v1379_v4, %v15004_v6 }
 0x211   : > { %v14072_v9 = vpop.eup %14071  ;;  %v1407_v22 = vmul.f32 %v14070_v52, %v15200_v61  ;;  %14091 = vpow2.f32 %v15291_v3  ;;  %1356 = vst [vmem:[#allocation2 + $0x40] sm:$0xff] %v15387_v28  ;;  %v1382_v31 = vpack.c.bf16 %v1380_v7, %v18696_v53  ;;  %v15408_v43 = vmul.f32 -1.442695, %v15324_v49  ;;  %v2885_v4 = vld [vmem:[#allocation2 + $0x10] sm:$0xf0] }
 0x212   : > { %v14074_v19 = vpop.eup %14073  ;;  %v1408_v1 = vadd.f32 %v1406_v45, %v15004_v6  ;;  %v1429_v34 = vadd.f32 1.0, %v14072_v9  ;;  %14093 = vpow2.f32 %v15310_v51  ;;  %1357 = vst [vmem:[#allocation2 + $0x48] sm:$0xff] %v15393_v5  ;;  %v1383_v42 = vpack.c.bf16 %v18696_v53, %v1381_v40  ;;  %v13741_v40 = vld [vmem:[#allocation4 + $0x8] sm:$0xff]  }
 0x213   : > { %v14076_v24 = vpop.eup %14075  ;;  %v1409_v63 = vadd.f32 %v1407_v22, %v15004_v6  ;;  %v1456_v61 = vadd.f32 1.0, %v14074_v19  ;;  %14095 = vpow2.f32 %v15317_v58  ;;  %1384 = vst [vmem:[#allocation2 + $0x50] sm:$0xff] %v1382_v31  ;;  %v15412_v46 = vmul.f32 -1.442695, %v15369_v29 }
 0x214   : > { %v14078_v3 = vpop.eup %14077  ;;  %v1410_v35 = vpack.c.bf16 %v1408_v1, %v18696_v53  ;;  %14097 = vrcp.f32 %v1429_v34  ;;  %v1457_v48 = vadd.f32 1.0, %v14076_v24  ;;  %1385 = vst [vmem:[#allocation2 + $0x58] sm:$0xff] %v1383_v42  ;;  %v1670_v23 = vmul.f32 %v15049_v54, %v15134_v21 }
 0x215   : > { %v14080_v51 = vpop.eup %14079  ;;  %v1411_v20 = vpack.c.bf16 %v18696_v53, %v1409_v63  ;;  %14099 = vrcp.f32 %v1456_v61  ;;  %v1484_v56 = vadd.f32 1.0, %v14078_v3  ;;  %v1976_v47 = vrot.slane %v15340_v8, 4 }
 0x216   : > { %v14082_v44 = vpop.eup %14081  ;;  %1412 = vst [vmem:[#allocation2 + $0x60] sm:$0xff] %v1410_v35  ;;  %14101 = vrcp.f32 %v1457_v48  ;;  %v1485_v58 = vadd.f32 1.0, %v14080_v51  ;;  %v15418_v45 = vmul.f32 -1.442695, %v15383_v55  ;;  %v2162_v9 = vshrl.u32 %v15340_v8, 16  ;;  %v13743_v51 = vld [vmem:[#allocation4 + $0x10] sm:$0xff]  }
 0x217   : > { %v14084_v52 = vpop.eup %14083  ;;  %1413 = vst [vmem:[#allocation2 + $0x68] sm:$0xff] %v1411_v20  ;;  %14103 = vrcp.f32 %v1484_v56  ;;  %v1512_v7 = vadd.f32 1.0, %v14082_v44  ;;  %v15423_v31 = vadd.f32 %v15062_v25, %v1670_v23  ;;  %v18697_v54 = vrot.slane %v14676_v38, 4 }
 0x218   : > { %v14086_v22 = vpop.eup %14085  ;;  %v1434_v19 = vmul.f32 %v14084_v52, %v15204_v39  ;;  %14105 = vrcp.f32 %v1485_v58  ;;  %v2912_v24 = vrot.slane %v2885_v4, 4  ;;  %v2913_v42 = vrot.slane %v15346_v13, 4  ;;  %v13742_v4 = vld [vmem:[#allocation4 + $0x188] sm:$0xff]  }
 0x219   : > { %v1977_v21 = vsel %vm1972_vm4, %v18697_v54, %v1976_v47  ;;  %v14088_v1 = vpop.eup %14087  ;;  %v1513_v34 = vadd.f32 1.0, %v14086_v22  ;;  %14107 = vrcp.f32 %v1512_v7  ;;  %v15432_v25 = vmul.f32 -1.442695, %v15423_v31 }
 0x21a   : > { %12500 = vmatmul.mubr.bf16.vlgmr.msra.gmra.mrb[0].mxu0 %v1977_v21  ;;  %v14090_v63 = vpop.eup %14089  ;;  %v1436_v61 = vadd.f32 %v1434_v19, %v15004_v6  ;;  %v1540_v3 = vadd.f32 1.0, %v14088_v1  ;;  %14109 = vpow2.f32 %v15320_v37  ;;  %v2914_v35 = vsel %vm1972_vm4, %v2912_v24, %v2913_v42  ;;  %v13745_v24 = vld [vmem:[#allocation4 + $0x18] sm:$0xff]  }
 0x21b   : > { %12516 = vmatpush3.bf16.msra.mxu0 %v14955_v33  ;;  %v14092_v38 = vpop.eup %14091  ;;  %14111 = vrcp.f32 %v1513_v34  ;;  %v1541_v39 = vadd.f32 1.0, %v14090_v63  ;;  %v1979_v48 = vsel %vm1972_vm4, %v1976_v47, %v2913_v42  ;;  %12627 = vmatprep.mubr.bf16.mxu1 %v2914_v35  ;;  %v2915_v37 = vrot.slane %v15353_v26, 4 }
 0x21c   : > { %12517 = vmatprep.subr.bf16.mxu0 %v13741_v40  ;;  %v14094_v20 = vpop.eup %14093  ;;  %v1438_v56 = vpack.c.bf16 %v1436_v61, %v18696_v53  ;;  %14113 = vrcp.f32 %v1540_v3  ;;  %v1568_v44 = vadd.f32 1.0, %v14092_v38  ;;  %12503 = vmatprep.mubr.bf16.mxu0 %v1979_v48  ;;  %v2917_v23 = vrot.slane %v15358_v18, 4 }
 0x21d   : > { %v14096_v58 = vpop.eup %14095  ;;  %14115 = vrcp.f32 %v1541_v39  ;;  %v1569_v33 = vadd.f32 1.0, %v14094_v20  ;;  %v2919_v52 = vrot.slane %v15365_v10, 4  ;;  %v2916_v22 = vsel %vm1972_vm4, %v2913_v42, %v2915_v37 }
 0x21e   : > { %v14098_v47 = vpop.eup %14097  ;;  %1440 = vst [vmem:[#allocation2 + $0x70] sm:$0xff] %v1438_v56  ;;  %14117 = vrcp.f32 %v1568_v44  ;;  %v1596_v7 = vadd.f32 1.0, %v14096_v58  ;;  %v15443_v19 = vrot.slane %v15373_v41, 4  ;;  %12628 = vmatmul.mubr.bf16.vlgmr.msra.gmra.mrb[68].mxu1 %v2916_v22  ;;  %v2918_v1 = vsel %vm1972_vm4, %v2915_v37, %v2917_v23  ;;  %v13747_v44 = vld [vmem:[#allocation4 + $0x20] sm:$0xff]   ;;  %v15476_v58 = vld [vmem:[#allocation2 + $0x40] sm:$0xf] }
 0x21f   : > { %12518 = vmatpush3.bf16.msra.mxu0 %v13741_v40  ;;  %v14100_v54 = vpop.eup %14099  ;;  %v1435_v21 = vmul.f32 %v14098_v47, %v15208_v60  ;;  %14119 = vrcp.f32 %v1569_v33  ;;  %v15448_v34 = vsel %vm1972_vm4, %v2917_v23, %v2919_v52  ;;  %12631 = vmatprep.mubr.bf16.mxu1 %v2918_v1  ;;  %v2923_v60 = vrot.slane %v15387_v28, 4 }
 0x220   : > { %12519 = vmatprep.subr.bf16.mxu0 %v13743_v51  ;;  %v14102_v63 = vpop.eup %14101  ;;  %v1462_v61 = vmul.f32 %v14100_v54, %v15217_v32  ;;  %14121 = vrcp.f32 %v1596_v7  ;;  %12676 = vmatpush3.bf16.msra.mxu1 %v14963_v57  ;;  %v15454_v40 = vsel %vm1972_vm4, %v2919_v52, %v15443_v19  ;;  %v13744_v32 = vld [vmem:[#allocation4 + $0x190] sm:$0xff]   ;;  %v2925_v39 = vrot.slane %v15393_v5, 4  ;;  %v13746_v52 = vld [vmem:[#allocation4 + $0x198] sm:$0xff]  }
 0x221   : > { %v14104_v42 = vpop.eup %14103  ;;  %v1437_v3 = vadd.f32 %v1435_v21, %v15004_v6  ;;  %v1463_v38 = vmul.f32 %v14102_v63, %v15224_v11  ;;  %14123 = vpow2.f32 %v15327_v2  ;;  %12677 = vmatprep.subr.bf16.mxu1 %v13742_v4  ;;  %v15466_v28 = vsel %vm1972_vm4, %v15443_v19, %v2923_v60  ;;  %v3330_v54 = vld [vmem:[#allocation2 + $0x20] sm:$0xf8] }
 0x222   : > { %12504 = vmatmul.mubr.bf16.gmra.mrb[4].mxu0 %v2916_v22  ;;  %v14106_v35 = vpop.eup %14105  ;;  %v1464_v57 = vadd.f32 %v1462_v61, %v15004_v6  ;;  %v1490_v48 = vmul.f32 %v14104_v42, %v15234_v59  ;;  %14125 = vpow2.f32 %v15408_v43  ;;  %v15487_v7 = vsel %vm1972_vm4, %v2923_v60, %v2925_v39  ;;  %v15489_v22 = vld [vmem:[#allocation2 + $0x50] sm:$0xf] }
 0x223   : > { %12520 = vmatpush3.bf16.msra.mxu0 %v13743_v51  ;;  %12507 = vmatprep.mubr.bf16.mxu0 %v2918_v1  ;;  %v14108_v11 = vpop.eup %14107  ;;  %v1439_v2 = vpack.c.bf16 %v18696_v53, %v1437_v3  ;;  %v1465_v20 = vadd.f32 %v1463_v38, %v15004_v6  ;;  %v1491_v56 = vmul.f32 %v14106_v35, %v15237_v16  ;;  %14127 = vpow2.f32 %v15412_v46 }
 0x224   : > { %12521 = vmatprep.subr.bf16.mxu0 %v13745_v24  ;;  %v14110_v59 = vpop.eup %14109  ;;  %v1466_v43 = vpack.c.bf16 %v1464_v57, %v18696_v53  ;;  %v1492_v51 = vadd.f32 %v1490_v48, %v15004_v6  ;;  %v1518_v37 = vmul.f32 %v14108_v11, %v15246_v62  ;;  %14129 = vpow2.f32 %v15418_v45  ;;  %12678 = vmatpush3.bf16.msra.mxu1 %v13742_v4  ;;  %v13748_v57 = vld [vmem:[#allocation4 + $0x1a0] sm:$0xff]  }
 0x225   : > { %v14112_v33 = vpop.eup %14111  ;;  %1441 = vst [vmem:[#allocation2 + $0x78] sm:$0xff] %v1439_v2  ;;  %v1467_v16 = vpack.c.bf16 %v18696_v53, %v1465_v20  ;;  %v1493_v46 = vadd.f32 %v1491_v56, %v15004_v6  ;;  %v1597_v23 = vadd.f32 1.0, %v14110_v59  ;;  %14131 = vpow2.f32 %v15432_v25  ;;  %12679 = vmatprep.subr.bf16.mxu1 %v13744_v32 }
 0x226   : > { %v14114_v47 = vpop.eup %14113  ;;  %1468 = vst [vmem:[#allocation2 + $0x80] sm:$0xff] %v1466_v43  ;;  %v1494_v62 = vpack.c.bf16 %v1492_v51, %v18696_v53  ;;  %v1519_v45 = vmul.f32 %v14112_v33, %v15252_v14  ;;  %v1520_v4 = vadd.f32 %v1518_v37, %v15004_v6  ;;  %12632 = vmatmul.mubr.bf16.gmra.mrb[72].mxu1 %v15448_v34  ;;  %v13749_v14 = vld [vmem:[#allocation4 + $0x28] sm:$0xff]   ;;  %v2165_v3 = vshll.u32 %v15340_v8, 16  ;;  %v13751_v51 = vld [vmem:[#allocation4 + $0x30] sm:$0xff]  }
 0x227   : > { %12522 = vmatpush3.bf16.msra.mxu0 %v13745_v24  ;;  %v14116_v25 = vpop.eup %14115  ;;  %1469 = vst [vmem:[#allocation2 + $0x88] sm:$0xff] %v1467_v16  ;;  %v1495_v21 = vpack.c.bf16 %v18696_v53, %v1493_v46  ;;  %v1546_v1 = vmul.f32 %v14114_v47, %v15269_v36  ;;  %14133 = vrcp.f32 %v1597_v23  ;;  %v1988_v24 = vrot.slane %v15476_v58, 4  ;;  %12635 = vmatprep.mubr.bf16.mxu1 %v15454_v40 }
 0x228   : > { %12523 = vmatprep.subr.bf16.mxu0 %v13747_v44  ;;  %v14118_v63 = vpop.eup %14117  ;;  %1496 = vst [vmem:[#allocation2 + $0x90] sm:$0xff] %v1494_v62  ;;  %v1521_v61 = vadd.f32 %v1519_v45, %v15004_v6  ;;  %v1522_v60 = vpack.c.bf16 %v1520_v4, %v18696_v53  ;;  %v1547_v42 = vmul.f32 %v14116_v25, %v15272_v0  ;;  %v2927_v48 = vrot.slane %v15489_v22, 4  ;;  %v13750_v62 = vld [vmem:[#allocation4 + $0x1a8] sm:$0xff]  }
 0x229   : > { %12680 = vmatpush3.bf16.msra.mxu1 %v13744_v32  ;;  %v14120_v36 = vpop.eup %14119  ;;  %1497 = vst [vmem:[#allocation2 + $0x98] sm:$0xff] %v1495_v21  ;;  %v1548_v38 = vadd.f32 %v1546_v1, %v15004_v6  ;;  %v1574_v35 = vmul.f32 %v14118_v63, %v15278_v15  ;;  %v3357_v11 = vshrl.u32 %v3330_v54, 16  ;;  %v3360_v56 = vshll.u32 %v3330_v54, 16  ;;  %v13753_v63 = vld [vmem:[#allocation4 + $0x38] sm:$0xff]  }
 0x22a   : > { %12681 = vmatprep.subr.bf16.mxu1 %v13746_v52  ;;  %12508 = vmatmul.mubr.bf16.gmra.mrb[8].mxu0 %v15448_v34  ;;  %v14122_v2 = vpop.eup %14121  ;;  %v1523_v0 = vpack.c.bf16 %v18696_v53, %v1521_v61  ;;  %1524 = vst [vmem:[#allocation2 + $0xa0] sm:$0xff] %v1522_v60  ;;  %v1549_v20 = vadd.f32 %v1547_v42, %v15004_v6  ;;  %v3368_v60 = vshll.u32 %v15358_v18, 16  ;;  %v15528_v42 = vld [vmem:[#allocation2 + $0x30] sm:$0xff] }
 0x22b   : > { %v1575_v32 = vmul.f32 %v14120_v36, %v15285_v12  ;;  %12524 = vmatpush3.bf16.msra.mxu0 %v13747_v44  ;;  %12511 = vmatprep.mubr.bf16.mxu0 %v15454_v40  ;;  %v14124_v15 = vpop.eup %14123  ;;  %v1550_v59 = vpack.c.bf16 %v1548_v38, %v18696_v53  ;;  %v1576_v34 = vadd.f32 %v1574_v35, %v15004_v6  ;;  %v15515_v16 = vrot.slane %v3357_v11, 3 }
 0x22c   : > { %v1602_v43 = vmul.f32 %v14122_v2, %v15302_v50  ;;  %12525 = vmatprep.subr.bf16.mxu0 %v13749_v14  ;;  %v1989_v37 = vsel %vm1972_vm4, %v15443_v19, %v1988_v24  ;;  %v14126_v33 = vpop.eup %14125  ;;  %1525 = vst [vmem:[#allocation2 + $0xa8] sm:$0xff] %v1523_v0  ;;  %v1551_v12 = vpack.c.bf16 %v18696_v53, %v1549_v20  ;;  %v1624_v40 = vadd.f32 1.0, %v14124_v15  ;;  %v13755_v20 = vld [vmem:[#allocation4 + $0x80] sm:$0xff]  }
 0x22d   : > { %v1577_v44 = vadd.f32 %v1575_v32, %v15004_v6  ;;  %12682 = vmatpush3.bf16.msra.mxu1 %v13746_v52  ;;  %v14128_v46 = vpop.eup %14127  ;;  %1552 = vst [vmem:[#allocation2 + $0xb0] sm:$0xff] %v1550_v59  ;;  %v1578_v23 = vpack.c.bf16 %v1576_v34, %v18696_v53  ;;  %v1625_v47 = vadd.f32 1.0, %v14126_v33  ;;  %v3362_v19 = vrot.slane %v3360_v56, 4 }
 0x22e   : > { %v1604_v50 = vadd.f32 %v1602_v43, %v15004_v6  ;;  %12683 = vmatprep.subr.bf16.mxu1 %v13748_v57  ;;  %v14130_v45 = vpop.eup %14129  ;;  %1553 = vst [vmem:[#allocation2 + $0xb8] sm:$0xff] %v1551_v12  ;;  %14135 = vrcp.f32 %v1624_v40  ;;  %v1652_v54 = vadd.f32 1.0, %v14128_v46  ;;  %v3365_v52 = vshrl.u32 %v15358_v18, 16  ;;  %12636 = vmatmul.mubr.bf16.gmra.mrb[76].mxu1 %v15466_v28  ;;  %v13752_v28 = vld [vmem:[#allocation4 + $0x1b0] sm:$0xff]  }
 0x22f   : > { %v1579_v4 = vpack.c.bf16 %v18696_v53, %v1577_v44  ;;  %12526 = vmatpush3.bf16.msra.mxu0 %v13749_v14  ;;  %v14132_v25 = vpop.eup %14131  ;;  %1580 = vst [vmem:[#allocation2 + $0xc0] sm:$0xff] %v1578_v23  ;;  %14137 = vrcp.f32 %v1625_v47  ;;  %v1653_v1 = vadd.f32 1.0, %v14130_v45  ;;  %v3363_v24 = vor.u32 %v3362_v19, %v15515_v16  ;;  %12639 = vmatprep.mubr.bf16.mxu1 %v15487_v7  ;;  %v15562_v40 = vld [vmem:[#allocation2 + $0x40] sm:$0xff]  ;;  %v15575_v19 = vld [vmem:[#allocation2 + $0x48] sm:$0xff] }
 0x230   : > { %v1606_v21 = vpack.c.bf16 %v1604_v50, %v18696_v53  ;;  %12527 = vmatprep.subr.bf16.mxu0 %v13751_v51  ;;  %14139 = vrcp.f32 %v1652_v54  ;;  %v1680_v61 = vadd.f32 1.0, %v14132_v25  ;;  %v3367_v14 = vrot.slane %v3365_v52, 3  ;;  %v13757_v50 = vld [vmem:[#allocation4 + $0x88] sm:$0xff]  }
 0x231   : > { %1581 = vst [vmem:[#allocation2 + $0xc8] sm:$0xff] %v1579_v4  ;;  %12684 = vmatpush3.bf16.msra.mxu1 %v13748_v57  ;;  %v14134_v36 = vpop.eup %14133  ;;  %14141 = vrcp.f32 %v1653_v1  ;;  %v2164_v38 = vrot.slane %v2162_v9, 3  ;;  %v2167_v7 = vrot.slane %v2165_v3, 4  ;;  %v2171_v35 = vshrl.u32 %v15346_v13, 16  ;;  %v15535_v57 = vld [vmem:[#allocation2 + $0x38] sm:$0xff] }
 0x232   : > { %1608 = vst [vmem:[#allocation2 + $0xd0] sm:$0xff] %v1606_v21  ;;  %12685 = vmatprep.subr.bf16.mxu1 %v13750_v62  ;;  %12512 = vmatmul.mubr.bf16.gmra.mrb[12].mxu0 %v1989_v37  ;;  %v1603_v11 = vmul.f32 %v14134_v36, %v15305_v27  ;;  %14143 = vrcp.f32 %v1680_v61  ;;  %v3370_v2 = vrot.slane %v3368_v60, 4  ;;  %v2174_v0 = vshll.u32 %v15346_v13, 16  ;;  %v13754_v37 = vld [vmem:[#allocation4 + $0x1b8] sm:$0xff]   ;;  %v18698_v4 = vld [vmem:[#allocation15_spill] sm:$0xff]  ;;  %v13756_v61 = vld [vmem:[#allocation4 + $0x200] sm:$0xff]  }
 0x233   : > { %12528 = vmatpush3.bf16.msra.mxu0 %v13751_v51  ;;  %12531 = vmatprep.mubr.bf16.mxu0 %v15180_v30  ;;  %v2168_v32 = vor.u32 %v2167_v7, %v2164_v38  ;;  %v2173_v56 = vrot.slane %v2171_v35, 3  ;;  %v3374_v15 = vshrl.u32 %v15528_v42, 16  ;;  %v3377_v59 = vshll.u32 %v15528_v42, 16 }
 0x234   : > { %12529 = vmatprep.subr.bf16.mxu0 %v13753_v63  ;;  %v1605_v27 = vadd.f32 %v1603_v11, %v15004_v6  ;;  %v15547_v34 = vor.u32 %v3370_v2, %v3367_v14  ;;  %v2176_v30 = vrot.slane %v2174_v0, 4  ;;  %v3383_v43 = vshrl.u32 %v15535_v57, 16 }
 0x235   : > { %12686 = vmatpush3.bf16.msra.mxu1 %v13750_v62  ;;  %v2928_v51 = vsel %vm1972_vm4, %v2925_v39, %v2927_v48  ;;  %v3376_v33 = vrot.slane %v3374_v15, 3  ;;  %v3379_v12 = vrot.slane %v3377_v59, 4  ;;  %v3386_v44 = vshll.u32 %v15535_v57, 16  ;;  %v13775_v57 = vld [vmem:[#allocation4 + $0xd0] sm:$0xff]  }
 0x236   : > { %12687 = vmatprep.subr.bf16.mxu1 %v13752_v28  ;;  %v1607_v16 = vpack.c.bf16 %v18696_v53, %v1605_v27  ;;  %v3372_v46 = vsel %vm2143_vm5, %v3363_v24, %v15547_v34  ;;  %v15567_v5 = vor.u32 %v2176_v30, %v2173_v56  ;;  %v3385_v39 = vrot.slane %v3383_v43, 3  ;;  %12640 = vmatmul.mubr.bf16.gmra.mrb[80].mxu1 %v2928_v51  ;;  %v13759_v27 = vld [vmem:[#allocation4 + $0x90] sm:$0xff]  }
 0x237   : > { %12530 = vmatpush3.bf16.msra.mxu0 %v13753_v63  ;;  %v3380_v48 = vor.u32 %v3379_v12, %v3376_v33  ;;  %v3388_v23 = vrot.slane %v3386_v44, 4  ;;  %v2180_v47 = vshrl.u32 %v15353_v26, 16  ;;  %v2183_v62 = vshll.u32 %v15353_v26, 16  ;;  %12691 = vmatprep.mubr.bf16.mxu1 %v3372_v46 }
 0x238   : > { %12547 = vmatprep.subr.bf16.mxu0 %v13755_v20  ;;  %v14136_v45 = vpop.eup %14135  ;;  %1609 = vst [vmem:[#allocation2 + $0xd8] sm:$0xff] %v1607_v16  ;;  %v2169_v54 = vsel %vm2143_vm5, %v18698_v4, %v2168_v32  ;;  %v2178_v25 = vsel %vm2143_vm5, %v2168_v32, %v15567_v5  ;;  %v3392_v21 = vshrl.u32 %v15562_v40, 16  ;;  %v18585_v1 = vshll.u32 %v15562_v40, 16 }
 0x239   : > { %12688 = vmatpush3.bf16.msra.mxu1 %v13752_v28  ;;  %v14138_v24 = vpop.eup %14137  ;;  %v1630_v63 = vmul.f32 %v14136_v45, %v15313_v17  ;;  %v15584_v14 = vor.u32 %v3388_v23, %v3385_v39  ;;  %v2182_v36 = vrot.slane %v2180_v47, 3  ;;  %v3381_v7 = vsel %vm2143_vm5, %v15547_v34, %v3380_v48  ;;  %v13758_v23 = vld [vmem:[#allocation4 + $0x208] sm:$0xff]  }
 0x23a   : > { %12689 = vmatprep.subr.bf16.mxu1 %v13754_v37  ;;  %12532 = vmatmul.mubr.bf16.vlgmr.msra.gmra.mrb[16].mxu0 %v2169_v54  ;;  %v14140_v28 = vpop.eup %14139  ;;  %v1631_v38 = vmul.f32 %v14138_v24, %v15324_v49  ;;  %v2185_v11 = vrot.slane %v2183_v62, 4  ;;  %v18584_v17 = vshrl.u32 %v15575_v19, 16  ;;  %v3394_v49 = vrot.slane %v3392_v21, 3 }
 0x23b   : > { %12548 = vmatpush3.bf16.msra.mxu0 %v13755_v20  ;;  %12535 = vmatprep.mubr.bf16.mxu0 %v2178_v25  ;;  %v14142_v2 = vpop.eup %14141  ;;  %v1632_v32 = vadd.f32 %v1630_v63, %v15004_v6  ;;  %v1658_v56 = vmul.f32 %v14140_v28, %v15369_v29  ;;  %v3397_v20 = vrot.slane %v18585_v1, 4  ;;  %v3390_v12 = vsel %vm2143_vm5, %v3380_v48, %v15584_v14  ;;  %v15616_v48 = vld [vmem:[#allocation2 + $0x50] sm:$0xff]  ;;  %v13761_v63 = vld [vmem:[#allocation4 + $0x98] sm:$0xff]  }
 0x23c   : > { %12549 = vmatprep.subr.bf16.mxu0 %v13757_v50  ;;  %v14144_v30 = vpop.eup %14143  ;;  %v1633_v51 = vadd.f32 %v1631_v38, %v15004_v6  ;;  %v1659_v33 = vmul.f32 %v14142_v2, %v15383_v55  ;;  %v2186_v16 = vor.u32 %v2185_v11, %v2182_v36  ;;  %v18583_v45 = vshll.u32 %v15575_v19, 16  ;;  %v15626_v2 = vld [vmem:[#allocation2 + $0x58] sm:$0xff] }
 0x23d   : > { %12690 = vmatpush3.bf16.msra.mxu1 %v13754_v37  ;;  %v1634_v29 = vpack.c.bf16 %v1632_v32, %v18696_v53  ;;  %v1660_v46 = vadd.f32 %v1658_v56, %v15004_v6  ;;  %v1686_v39 = vmul.f32 %v14144_v30, %v15423_v31  ;;  %v3403_v37 = vrot.slane %v18584_v17, 3  ;;  %v13760_v32 = vld [vmem:[#allocation4 + $0x210] sm:$0xff]   ;;  %v13764_v17 = vld [vmem:[#allocation4 + $0x220] sm:$0xff]  }
 0x23e   : > { %12739 = vmatprep.subr.bf16.mxu1 %v13756_v61  ;;  %v1635_v4 = vpack.c.bf16 %v18696_v53, %v1633_v51  ;;  %v1661_v54 = vadd.f32 %v1659_v33, %v15004_v6  ;;  %v15612_v55 = vsel %vm2143_vm5, %v15567_v5, %v2186_v16  ;;  %v3398_v24 = vor.u32 %v3397_v20, %v3394_v49  ;;  %v13763_v33 = vld [vmem:[#allocation4 + $0xa0] sm:$0xff]  }
 0x23f   : > { %12550 = vmatpush3.bf16.msra.mxu0 %v13757_v50  ;;  %1636 = vst [vmem:[#allocation2 + $0xe0] sm:$0xff] %v1634_v29  ;;  %v1662_v31 = vpack.c.bf16 %v1660_v46, %v18696_v53  ;;  %v1688_v25 = vadd.f32 %v1686_v39, %v15004_v6  ;;  %v3406_v50 = vrot.slane %v18583_v45, 4  ;;  %v2198_v28 = vshrl.u32 %v15365_v10, 16  ;;  %v18699_v39 = vld [vmem:[#allocation14_spill] sm:$0xff] }
 0x240   : > { %12692 = vmatmul.mubr.bf16.vlgmr.msra.gmra.mrb[84].mxu1 %v3381_v7  ;;  %12551 = vmatprep.subr.bf16.mxu0 %v13759_v27  ;;  %1637 = vst [vmem:[#allocation2 + $0xe8] sm:$0xff] %v1635_v4  ;;  %v1663_v36 = vpack.c.bf16 %v18696_v53, %v1661_v54  ;;  %v2201_v38 = vshll.u32 %v15365_v10, 16  ;;  %v2207_v11 = vshrl.u32 %v15373_v41, 16  ;;  %v15632_v7 = vsel %vm2143_vm5, %v2186_v16, %v15547_v34 }
 0x241   : > { %12695 = vmatprep.mubr.bf16.mxu1 %v3390_v12  ;;  %12740 = vmatpush3.bf16.msra.mxu1 %v13756_v61  ;;  %1664 = vst [vmem:[#allocation2 + $0xf0] sm:$0xff] %v1662_v31  ;;  %v1690_v6 = vpack.c.bf16 %v1688_v25, %v18696_v53  ;;  %v2210_v61 = vshll.u32 %v15373_v41, 16  ;;  %v18582_v56 = vshrl.u32 %v15616_v48, 16  ;;  %v2200_v49 = vrot.slane %v2198_v28, 3  ;;  %v13762_v31 = vld [vmem:[#allocation4 + $0x218] sm:$0xff]  }
 0x242   : > { %12741 = vmatprep.subr.bf16.mxu1 %v13758_v23  ;;  %12536 = vmatmul.mubr.bf16.gmra.mrb[20].mxu0 %v15612_v55  ;;  %1665 = vst [vmem:[#allocation2 + $0xf8] sm:$0xff] %v1663_v36  ;;  %v2203_v53 = vrot.slane %v2201_v38, 4  ;;  %v2209_v20 = vrot.slane %v2207_v11, 3  ;;  %v18580_v30 = vshll.u32 %v15616_v48, 16  ;;  %v15644_v51 = vor.u32 %v3406_v50, %v3403_v37 }
 0x243   : > { %12552 = vmatpush3.bf16.msra.mxu0 %v13759_v27  ;;  %12539 = vmatprep.mubr.bf16.mxu0 %v15632_v7  ;;  %1692 = vst [vmem:[#allocation2 + $0x100] sm:$0xff] %v1690_v6  ;;  %v2212_v27 = vrot.slane %v2210_v61, 4  ;;  %v18579_v12 = vshrl.u32 %v15626_v2, 16  ;;  %v18581_v29 = vshll.u32 %v15626_v2, 16  ;;  %v2216_v46 = vshrl.u32 %v15476_v58, 16 }
 0x244   : > { %12553 = vmatprep.subr.bf16.mxu0 %v13761_v63  ;;  %v2204_v16 = vor.u32 %v2203_v53, %v2200_v49  ;;  %v18700_v4 = vshrl.u32 %v18699_v39, 16  ;;  %v3412_v25 = vrot.slane %v18582_v56, 3  ;;  %v3415_v50 = vrot.slane %v18580_v30, 4  ;;  %v15666_v53 = vld [vmem:[#allocation2 + $0x60] sm:$0xf] }
 0x245   : > { %12742 = vmatpush3.bf16.msra.mxu1 %v13758_v23  ;;  %v15653_v37 = vor.u32 %v2212_v27, %v2209_v20  ;;  %v2219_v23 = vshll.u32 %v15476_v58, 16  ;;  %v3399_v36 = vsel %vm2143_vm5, %v15584_v14, %v3398_v24  ;;  %v3421_v6 = vrot.slane %v18579_v12, 3  ;;  %v14277_v20 = vld [vmem:[#allocation2] sm:$0xf0]  ;;  %v13765_v14 = vld [vmem:[#allocation4 + $0xa8] sm:$0xff]  }
 0x246   : > { %v2404_v54 = vrot.slane %v18700_v4, 4  ;;  %12743 = vmatprep.subr.bf16.mxu1 %v13760_v32  ;;  %v3424_v49 = vrot.slane %v18581_v29, 4  ;;  %v2397_v27 = vshrl.u32 %v14277_v20, 16  ;;  %v3408_v4 = vsel %vm2143_vm5, %v3398_v24, %v15644_v51 }
 0x247   : > { %12554 = vmatpush3.bf16.msra.mxu0 %v13761_v63  ;;  %v15672_v58 = vsel %vm2143_vm5, %v2204_v16, %v15653_v37  ;;  %v15674_v63 = vld [vmem:[#allocation2 + $0x20] sm:$0xf0]  ;;  %v2400_v12 = vshll.u32 %v14277_v20, 16  ;;  %v18701_v30 = vshll.u32 %v18699_v39, 16  ;;  %v2218_v56 = vrot.slane %v2216_v46, 3 }
 0x248   : > { %12696 = vmatmul.mubr.bf16.gmra.mrb[88].mxu1 %v3399_v36  ;;  %12555 = vmatprep.subr.bf16.mxu0 %v13763_v33  ;;  %v15680_v36 = vsel %vm2143_vm5, %v15547_v34, %v2204_v16  ;;  %v2221_v24 = vrot.slane %v2219_v23, 4  ;;  %v3416_v45 = vor.u32 %v3415_v50, %v3412_v25  ;;  %v3428_v1 = vshrl.u32 %v15666_v53, 16  ;;  %v13767_v16 = vld [vmem:[#allocation4 + $0xb0] sm:$0xff]  }
 0x249   : > { %v2405_v29 = vrot.slane %v18701_v30, 5  ;;  %12699 = vmatprep.mubr.bf16.mxu1 %v3408_v4  ;;  %12744 = vmatpush3.bf16.msra.mxu1 %v13760_v32  ;;  %v15685_v39 = vor.u32 %v3424_v49, %v3421_v6  ;;  %v3431_v32 = vshll.u32 %v15666_v53, 16  ;;  %v3837_v30 = vshrl.u32 %v15674_v63, 16 }
 0x24a   : > { %12745 = vmatprep.subr.bf16.mxu1 %v13762_v31  ;;  %12540 = vmatmul.mubr.bf16.gmra.mrb[24].mxu0 %v15680_v36  ;;  %v2399_v34 = vrot.slane %v2397_v27, 4  ;;  %v3840_v46 = vshll.u32 %v15674_v63, 16  ;;  %v2402_v23 = vrot.slane %v2400_v12, 5  ;;  %v2222_v50 = vor.u32 %v2221_v24, %v2218_v56  ;;  %v13766_v27 = vld [vmem:[#allocation4 + $0x228] sm:$0xff]  }
 0x24b   : > { %12556 = vmatpush3.bf16.msra.mxu0 %v13763_v33  ;;  %12543 = vmatprep.mubr.bf16.mxu0 %v15672_v58  ;;  %v15690_v25 = vor.u32 %v2405_v29, %v2404_v54  ;;  %v2408_v33 = vrot.slane %v2162_v9, 4  ;;  %v2409_v6 = vrot.slane %v2165_v3, 5  ;;  %v2412_v49 = vrot.slane %v2171_v35, 4 }
 0x24c   : > { %12557 = vmatprep.subr.bf16.mxu0 %v13765_v14  ;;  %v15700_v20 = vsel %vm2143_vm5, %v15644_v51, %v3416_v45  ;;  %v3430_v12 = vrot.slane %v3428_v1, 3  ;;  %v2403_v29 = vor.u32 %v2402_v23, %v2399_v34  ;;  %v2413_v56 = vrot.slane %v2174_v0, 5  ;;  %v13771_v34 = vld [vmem:[#allocation4 + $0xc0] sm:$0xff]  }
 0x24d   : > { %12746 = vmatpush3.bf16.msra.mxu1 %v13762_v31  ;;  %v15706_v9 = vsel %vm2143_vm5, %v3416_v45, %v15685_v39  ;;  %v3433_v8 = vrot.slane %v3431_v32, 4  ;;  %v3839_v3 = vrot.slane %v3837_v30, 4  ;;  %v2410_v54 = vor.u32 %v2409_v6, %v2408_v33  ;;  %v13769_v31 = vld [vmem:[#allocation4 + $0xb8] sm:$0xff]   ;;  %v13773_v6 = vld [vmem:[#allocation4 + $0xc8] sm:$0xff]  }
 0x24e   : > { %12747 = vmatprep.subr.bf16.mxu1 %v13764_v17  ;;  %v3842_v35 = vrot.slane %v3840_v46, 5  ;;  %v2407_v1 = vsel %vm2395_vm6, %v2403_v29, %v15690_v25  ;;  %v15711_v4 = vor.u32 %v2413_v56, %v2412_v49  ;;  %v2416_v13 = vrot.slane %v2180_v47, 4 }
 0x24f   : > { %12558 = vmatpush3.bf16.msra.mxu0 %v13765_v14  ;;  %v2223_v0 = vsel %vm2143_vm5, %v15653_v37, %v2222_v50  ;;  %v2417_v45 = vrot.slane %v2183_v62, 5  ;;  %v13768_v14 = vld [vmem:[#allocation4 + $0x230] sm:$0xff]   ;;  %v3844_v24 = vrot.slane %v3365_v52, 4  ;;  %v3845_v32 = vrot.slane %v3368_v60, 5 }
 0x250   : > { %12700 = vmatmul.mubr.bf16.gmra.mrb[92].mxu1 %v15700_v20  ;;  %12559 = vmatprep.subr.bf16.mxu0 %v13767_v16  ;;  %v2415_v47 = vsel %vm2395_vm6, %v2410_v54, %v15711_v4  ;;  %v2424_v26 = vrot.slane %v2198_v28, 4  ;;  %v3843_v62 = vor.u32 %v3842_v35, %v3839_v3  ;;  %v2425_v46 = vrot.slane %v2201_v38, 5  ;;  %v13770_v28 = vld [vmem:[#allocation4 + $0x238] sm:$0xff]  }
 0x251   : > { %12703 = vmatprep.mubr.bf16.mxu1 %v15706_v9  ;;  %12748 = vmatpush3.bf16.msra.mxu1 %v13764_v17  ;;  %v3434_v17 = vor.u32 %v3433_v8, %v3430_v12  ;;  %v2418_v30 = vor.u32 %v2417_v45, %v2416_v13  ;;  %v2428_v18 = vrot.slane %v2207_v11, 4  ;;  %v2429_v60 = vrot.slane %v2210_v61, 5 }
 0x252   : > { %12749 = vmatprep.subr.bf16.mxu1 %v13766_v27  ;;  %12544 = vmatmul.mubr.bf16.gmra.mrb[28].mxu0 %v2223_v0  ;;  %v15740_v23 = vor.u32 %v2425_v46, %v2424_v26  ;;  %v3848_v38 = vrot.slane %v3374_v15, 4  ;;  %v3849_v11 = vrot.slane %v3377_v59, 5  ;;  %v3852_v61 = vrot.slane %v3383_v43, 4  ;;  %v13772_v59 = vld [vmem:[#allocation4] sm:$0xff]  }
 0x253   : > { %12560 = vmatpush3.bf16.msra.mxu0 %v13767_v16  ;;  %12563 = vmatprep.mubr.bf16.mxu0 %v2407_v1  ;;  %v15734_v52 = vsel %vm2395_vm6, %v15711_v4, %v2418_v30  ;;  %v15738_v16 = vor.u32 %v3845_v32, %v3844_v24  ;;  %v3435_v10 = vsel %vm2143_vm5, %v15685_v39, %v3434_v17  ;;  %v3853_v33 = vrot.slane %v3386_v44, 5  ;;  %v13774_v44 = vld [vmem:[#allocation4 + $0x8] sm:$0xff]   ;;  %v2377_v1 = vld [vmem:[#allocation2 + $0x40] sm:$0x1f]  ;;  %v2610_v0 = vld [vmem:[#allocation2 + $0x10] sm:$0xf8] }
 0x254   : > { %12561 = vmatprep.subr.bf16.mxu0 %v13769_v31  ;;  %v15748_v50 = vor.u32 %v2429_v60, %v2428_v18  ;;  %v2411_v42 = vsel %vm2395_vm6, %v15690_v25, %v2410_v54  ;;  %v3850_v43 = vor.u32 %v3849_v11, %v3848_v38  ;;  %v18702_v12 = vshll.u32 %v15562_v40, 16  ;;  %v13778_v32 = vld [vmem:[#allocation4 + $0x18] sm:$0xff]   ;;  %v13781_v11 = vld [vmem:[#allocation4 + $0xe8] sm:$0xff]  }
 0x255   : > { %12750 = vmatpush3.bf16.msra.mxu1 %v13766_v27  ;;  %v3847_v41 = vsel %vm2395_vm6, %v3843_v62, %v15738_v16  ;;  %v3854_v49 = vor.u32 %v3853_v33, %v3852_v61  ;;  %v3856_v27 = vrot.slane %v3392_v21, 4  ;;  %v18703_v8 = vshrl.u32 %v15575_v19, 16  ;;  %v13776_v21 = vld [vmem:[#allocation4 + $0x10] sm:$0xff]  }
 0x256   : > { %12751 = vmatprep.subr.bf16.mxu1 %v13768_v14  ;;  %v15761_v15 = vsel %vm2395_vm6, %v15740_v23, %v15748_v50  ;;  %v3851_v25 = vsel %vm2395_vm6, %v15738_v16, %v3850_v43  ;;  %v3857_v29 = vrot.slane %v18702_v12, 5  ;;  %v18704_v54 = vshll.u32 %v15575_v19, 16  ;;  %v13779_v19 = vld [vmem:[#allocation4 + $0xe0] sm:$0xff]  }
 0x257   : > { %12562 = vmatpush3.bf16.msra.mxu0 %v13769_v31  ;;  %v3855_v56 = vsel %vm2395_vm6, %v3850_v43, %v3854_v49  ;;  %v3860_v3 = vrot.slane %v18703_v8, 4  ;;  %v13777_v31 = vld [vmem:[#allocation4 + $0xd8] sm:$0xff]   ;;  %v15777_v40 = vsel %vm2395_vm6, %v2418_v30, %v15738_v16  ;;  %v2436_v24 = vshll.u32 %v2377_v1, 16 }
 0x258   : > { %12704 = vmatmul.mubr.bf16.gmra.mrb[96].mxu1 %v3435_v10  ;;  %12579 = vmatprep.subr.bf16.mxu0 %v13771_v34  ;;  %v3861_v35 = vrot.slane %v18704_v54, 5  ;;  %v3858_v13 = vor.u32 %v3857_v29, %v3856_v27  ;;  %v2640_v17 = vshll.u32 %v2610_v0, 16  ;;  %v18705_v26 = vshrl.u32 %v15616_v48, 16 }
 0x259   : > { %12752 = vmatpush3.bf16.msra.mxu1 %v13768_v14  ;;  %12755 = vmatprep.mubr.bf16.mxu1 %v3847_v41  ;;  %v2433_v14 = vshrl.u32 %v2377_v1, 16  ;;  %v18707_v60 = vshrl.u32 %v15626_v2, 16  ;;  %v18708_v10 = vshll.u32 %v15626_v2, 16  ;;  %v3818_v41 = vld [vmem:[#allocation2 + $0x60] sm:$0x1f]  ;;  %v15796_v61 = vsel %vm2395_vm6, %v15738_v16, %v15740_v23 }
 0x25a   : > { %12753 = vmatprep.subr.bf16.mxu1 %v13770_v28  ;;  %12564 = vmatmul.mubr.bf16.vlgmr.msra.gmra.mrb[32].mxu0 %v2411_v42  ;;  %v15780_v45 = vor.u32 %v3861_v35, %v3860_v3  ;;  %v3859_v30 = vsel %vm2395_vm6, %v3854_v49, %v3858_v13  ;;  %v3864_v62 = vrot.slane %v18705_v26, 4  ;;  %v4196_v42 = vld [vmem:[#allocation2 + $0x40] sm:$0xf8]  ;;  %v2642_v49 = vrot.slane %v2640_v17, 4  ;;  %v13786_v17 = vld [vmem:[#allocation4 + $0x38] sm:$0xff]  }
 0x25b   : > { %12580 = vmatpush3.bf16.msra.mxu0 %v13771_v34  ;;  %12567 = vmatprep.mubr.bf16.mxu0 %v2415_v47  ;;  %v2637_v47 = vshrl.u32 %v2610_v0, 16  ;;  %v18706_v34 = vshll.u32 %v15616_v48, 16  ;;  %v3869_v38 = vrot.slane %v18708_v10, 5  ;;  %v2435_v33 = vrot.slane %v2433_v14, 4  ;;  %v13783_v16 = vld [vmem:[#allocation4 + $0xf0] sm:$0xff]  }
 0x25c   : > { %12581 = vmatprep.subr.bf16.mxu0 %v13773_v6  ;;  %v3863_v18 = vsel %vm2395_vm6, %v3858_v13, %v15780_v45  ;;  %v4418_v23 = vshrl.u32 %v4196_v42, 16  ;;  %v4421_v12 = vshll.u32 %v4196_v42, 16  ;;  %v13785_v13 = vld [vmem:[#allocation4 + $0xf8] sm:$0xff]   ;;  %v13784_v14 = vld [vmem:[#allocation4 + $0x30] sm:$0xff]   ;;  %v18587_v42 = vrot.slane %v15616_v48, 4 }
 0x25d   : > { %12754 = vmatpush3.bf16.msra.mxu1 %v13770_v28  ;;  %v3865_v46 = vrot.slane %v18706_v34, 5  ;;  %v3868_v28 = vrot.slane %v18707_v60, 4  ;;  %v2639_v43 = vrot.slane %v2637_v47, 3  ;;  %v13787_v47 = vld [vmem:[#allocation4 + $0x140] sm:$0xff]   ;;  %v15818_v26 = vld [vmem:[#allocation2 + $0x60] sm:$0xff]  ;;  %v15822_v34 = vld [vmem:[#allocation2 + $0x68] sm:$0xff] }
 0x25e   : > { %12803 = vmatprep.subr.bf16.mxu1 %v13772_v59  ;;  %v4423_v1 = vrot.slane %v4421_v12, 4  ;;  %v4456_v60 = vshll.u32 %v15818_v26, 16  ;;  %v15830_v10 = vld [vmem:[#allocation2 + $0x40] sm:$0xff]  ;;  %v13793_v12 = vld [vmem:[#allocation4 + $0x158] sm:$0xff]  }
 0x25f   : > { %12582 = vmatpush3.bf16.msra.mxu0 %v13773_v6  ;;  %v2438_v6 = vrot.slane %v2436_v24, 5  ;;  %v15800_v27 = vor.u32 %v3869_v38, %v3868_v28  ;;  %v2643_v8 = vor.u32 %v2642_v49, %v2639_v43  ;;  %v4462_v28 = vshrl.u32 %v15822_v34, 16  ;;  %v15843_v49 = vld [vmem:[#allocation2 + $0x78] sm:$0xff] }
 0x260   : > { %12756 = vmatmul.mubr.bf16.vlgmr.msra.gmra.mrb[100].mxu1 %v3851_v25  ;;  %12583 = vmatprep.subr.bf16.mxu0 %v13775_v57  ;;  %v3876_v25 = vshll.u32 %v3818_v41, 16  ;;  %v2690_v38 = vshrl.u32 %v15830_v10, 16 }
 0x261   : > { %12759 = vmatprep.mubr.bf16.mxu1 %v3855_v56  ;;  %12804 = vmatpush3.bf16.msra.mxu1 %v13772_v59  ;;  %v13780_v59 = vld [vmem:[#allocation4 + $0x20] sm:$0xff]   ;;  %v2439_v29 = vor.u32 %v2438_v6, %v2435_v33  ;;  %v13782_v56 = vld [vmem:[#allocation4 + $0x28] sm:$0xff]  }
 0x262   : > { %12805 = vmatprep.subr.bf16.mxu1 %v13774_v44  ;;  %12568 = vmatmul.mubr.bf16.gmra.mrb[36].mxu0 %v15734_v52  ;;  %v3878_v35 = vrot.slane %v3876_v25, 5  ;;  %v15838_v6 = vld [vmem:[#allocation2 + $0x70] sm:$0xff]  ;;  %v4464_v25 = vrot.slane %v4462_v28, 3 }
 0x263   : > { %12584 = vmatpush3.bf16.msra.mxu0 %v13775_v57  ;;  %12571 = vmatprep.mubr.bf16.mxu0 %v15777_v40  ;;  %v3866_v57 = vor.u32 %v3865_v46, %v3864_v62  ;;  %v2440_v0 = vsel %vm2395_vm6, %v15748_v50, %v2439_v29  ;;  %v13789_v62 = vld [vmem:[#allocation4 + $0x148] sm:$0xff]   ;;  %v13788_v46 = vld [vmem:[#allocation4 + $0xc0] sm:$0xff]   ;;  %v4471_v29 = vshrl.u32 %v15838_v6, 16 }
 0x264   : > { %12585 = vmatprep.subr.bf16.mxu0 %v13777_v31 }
 0x265   : > { %12806 = vmatpush3.bf16.msra.mxu1 %v13774_v44  ;;  %v3873_v44 = vshrl.u32 %v3818_v41, 16  ;;  %v15804_v3 = vsel %vm2395_vm6, %v15780_v45, %v3866_v57  ;;  %v15834_v41 = vld [vmem:[#allocation2 + $0x48] sm:$0xff] }
 0x266   : > { %12807 = vmatprep.subr.bf16.mxu1 %v13776_v21  ;;  %v2699_v33 = vshrl.u32 %v15834_v41, 16 }
 0x267   : > { %12586 = vmatpush3.bf16.msra.mxu0 %v13777_v31  ;;  %v3875_v54 = vrot.slane %v3873_v44, 4  ;;  %v15809_v31 = vsel %vm2395_vm6, %v3866_v57, %v15800_v27  ;;  %v15846_v57 = vrot.slane %v15626_v2, 4  ;;  %v4458_v44 = vrot.slane %v4456_v60, 4 }
 0x268   : > { %12760 = vmatmul.mubr.bf16.gmra.mrb[104].mxu1 %v3859_v30  ;;  %12587 = vmatprep.subr.bf16.mxu0 %v13779_v19 }
 0x269   : > { %12763 = vmatprep.mubr.bf16.mxu1 %v3863_v18  ;;  %12808 = vmatpush3.bf16.msra.mxu1 %v13776_v21  ;;  %v4420_v21 = vrot.slane %v4418_v23, 3  ;;  %v3879_v24 = vor.u32 %v3878_v35, %v3875_v54  ;;  %v4453_v18 = vshrl.u32 %v15818_v26, 16  ;;  %v2692_v23 = vrot.slane %v2690_v38, 3 }
 0x26a   : > { %12809 = vmatprep.subr.bf16.mxu1 %v13778_v32  ;;  %12572 = vmatmul.mubr.bf16.gmra.mrb[40].mxu0 %v15796_v61  ;;  %v4474_v35 = vshll.u32 %v15838_v6, 16 }
 0x26b   : > { %12588 = vmatpush3.bf16.msra.mxu0 %v13779_v19  ;;  %12575 = vmatprep.mubr.bf16.mxu0 %v15761_v15  ;;  %v2652_v19 = vsel %vm2143_vm5, %v2643_v8, %v15567_v5  ;;  %v3880_v30 = vsel %vm2395_vm6, %v15800_v27, %v3879_v24  ;;  %v4455_v43 = vrot.slane %v4453_v18, 3  ;;  %v3647_v8 = vrot.slane %v15666_v53, 4 }
 0x26c   : > { %12589 = vmatprep.subr.bf16.mxu0 %v13781_v11  ;;  %v4473_v24 = vrot.slane %v4471_v29, 3 }
 0x26d   : > { %12810 = vmatpush3.bf16.msra.mxu1 %v13778_v32  ;;  %v4424_v32 = vor.u32 %v4423_v1, %v4420_v21  ;;  %v4480_v21 = vshrl.u32 %v15843_v49, 16  ;;  %v13792_v1 = vld [vmem:[#allocation4 + $0xd0] sm:$0xff]   ;;  %v15878_v53 = vsel %vm1972_vm4, %v15846_v57, %v3647_v8 }
 0x26e   : > { %12811 = vmatprep.subr.bf16.mxu1 %v13780_v59 }
 0x26f   : > { %12590 = vmatpush3.bf16.msra.mxu0 %v13781_v11  ;;  %v4433_v5 = vsel %vm2143_vm5, %v4424_v32, %v15644_v51  ;;  %v4465_v51 = vshll.u32 %v15822_v34, 16  ;;  %v13791_v11 = vld [vmem:[#allocation4 + $0x150] sm:$0xff]   ;;  %v18586_v32 = vrot.slane %v15818_v26, 4 }
 0x270   : > { %12764 = vmatmul.mubr.bf16.gmra.mrb[108].mxu1 %v15804_v3  ;;  %12591 = vmatprep.subr.bf16.mxu0 %v13783_v16 }
 0x271   : > { %12767 = vmatprep.mubr.bf16.mxu1 %v15809_v31  ;;  %12812 = vmatpush3.bf16.msra.mxu1 %v13780_v59  ;;  %v13790_v59 = vld [vmem:[#allocation4 + $0xc8] sm:$0xff]  }
 0x272   : > { %12813 = vmatprep.subr.bf16.mxu1 %v13782_v56  ;;  %12576 = vmatmul.mubr.bf16.gmra.mrb[44].mxu0 %v2440_v0 }
 0x273   : > { %12592 = vmatpush3.bf16.msra.mxu0 %v13783_v16  ;;  %12595 = vmatprep.mubr.bf16.mxu0 %v2652_v19  ;;  %v4467_v16 = vrot.slane %v4465_v51, 4  ;;  %v13795_v19 = vld [vmem:[#allocation4 + $0x160] sm:$0xff]  }
 0x274   : > { %12593 = vmatprep.subr.bf16.mxu0 %v13785_v13 }
 0x275   : > { %12814 = vmatpush3.bf16.msra.mxu1 %v13782_v56  ;;  %v15864_v56 = vsel %vm1972_vm4, %v18587_v42, %v15846_v57  ;;  %v4468_v0 = vor.u32 %v4467_v16, %v4464_v25  ;;  %v13797_v25 = vld [vmem:[#allocation4 + $0x168] sm:$0xff]   ;;  %v15908_v16 = vld [vmem:[#allocation2 + $0x80] sm:$0xf] }
 0x276   : > { %12815 = vmatprep.subr.bf16.mxu1 %v13784_v14 }
 0x277   : > { %12594 = vmatpush3.bf16.msra.mxu0 %v13785_v13  ;;  %v4483_v13 = vshll.u32 %v15843_v49, 16 }
 0x278   : > { %12768 = vmatmul.mubr.bf16.gmra.mrb[112].mxu1 %v3880_v30  ;;  %12643 = vmatprep.subr.bf16.mxu0 %v13787_v47  ;;  %v2711_v30 = vshll.u32 %v15489_v22, 16 }
 0x279   : > { %12816 = vmatpush3.bf16.msra.mxu1 %v13784_v14  ;;  %12819 = vmatprep.mubr.bf16.mxu1 %v4433_v5  ;;  %v13794_v5 = vld [vmem:[#allocation4 + $0xd8] sm:$0xff]  }
 0x27a   : > { %12817 = vmatprep.subr.bf16.mxu1 %v13786_v17  ;;  %12596 = vmatmul.mubr.bf16.vlgmr.msra.gmra.mrb[48].mxu0 %v15612_v55  ;;  %v2693_v55 = vshll.u32 %v15830_v10, 16  ;;  %v13811_v10 = vld [vmem:[#allocation4 + $0x1e0] sm:$0xff]  }
 0x27b   : > { %12644 = vmatpush3.bf16.msra.mxu0 %v13787_v47  ;;  %12599 = vmatprep.mubr.bf16.mxu0 %v15632_v7  ;;  %v18588_v7 = vshll.u32 %v15834_v41, 16 }
 0x27c   : > { %12645 = vmatprep.subr.bf16.mxu0 %v13789_v62  ;;  %v2695_v2 = vrot.slane %v2693_v55, 4 }
 0x27d   : > { %12818 = vmatpush3.bf16.msra.mxu1 %v13786_v17  ;;  %v2704_v54 = vrot.slane %v18588_v7, 4  ;;  %v4476_v17 = vrot.slane %v4474_v35, 4  ;;  %v13799_v7 = vld [vmem:[#allocation4 + $0x170] sm:$0xff]  }
 0x27e   : > { %12867 = vmatprep.subr.bf16.mxu1 %v13788_v46  ;;  %v2696_v14 = vor.u32 %v2695_v2, %v2692_v23 }
 0x27f   : > { %12646 = vmatpush3.bf16.msra.mxu0 %v13789_v62  ;;  %v4485_v62 = vrot.slane %v4483_v13, 4 }
 0x280   : > { %12820 = vmatmul.mubr.bf16.vlgmr.msra.gmra.mrb[116].mxu1 %v15700_v20  ;;  %12647 = vmatprep.subr.bf16.mxu0 %v13791_v11  ;;  %v2701_v20 = vrot.slane %v2699_v33, 3  ;;  %v2697_v23 = vsel %vm2143_vm5, %v15653_v37, %v2696_v14  ;;  %v4492_v37 = vshll.u32 %v15908_v16, 16 }
 0x281   : > { %12823 = vmatprep.mubr.bf16.mxu1 %v15706_v9  ;;  %12868 = vmatpush3.bf16.msra.mxu1 %v13788_v46  ;;  %v4459_v9 = vor.u32 %v4458_v44, %v4455_v43  ;;  %v14280_v46 = vld [vmem:[#allocation2 + $0x10] sm:$0xf0] }
 0x282   : > { %12869 = vmatprep.subr.bf16.mxu1 %v13790_v59  ;;  %12600 = vmatmul.mubr.bf16.gmra.mrb[52].mxu0 %v15680_v36  ;;  %v2708_v36 = vshrl.u32 %v15489_v22, 16  ;;  %v15885_v47 = vor.u32 %v2704_v54, %v2701_v20  ;;  %v3120_v43 = vshll.u32 %v14280_v46, 16  ;;  %v4881_v20 = vld [vmem:[#allocation2 + $0x50] sm:$0xf8]  ;;  %v4477_v54 = vor.u32 %v4476_v17, %v4473_v24 }
 0x283   : > { %12648 = vmatpush3.bf16.msra.mxu0 %v13791_v11  ;;  %12603 = vmatprep.mubr.bf16.mxu0 %v15672_v58  ;;  %v4482_v58 = vrot.slane %v4480_v21, 3  ;;  %v3117_v11 = vshrl.u32 %v14280_v46, 16  ;;  %v15902_v44 = vsel %vm2143_vm5, %v15685_v39, %v4459_v9  ;;  %v15906_v22 = vsel %vm2143_vm5, %v4459_v9, %v4468_v0  ;;  %v13796_v9 = vld [vmem:[#allocation4 + $0xe0] sm:$0xff]  }
 0x284   : > { %12649 = vmatprep.subr.bf16.mxu0 %v13793_v12  ;;  %v2706_v2 = vsel %vm2143_vm5, %v2696_v14, %v15885_v47  ;;  %v2710_v8 = vrot.slane %v2708_v36, 3  ;;  %v3122_v42 = vrot.slane %v3120_v43, 5  ;;  %v4907_v14 = vshrl.u32 %v4881_v20, 16 }
 0x285   : > { %12870 = vmatpush3.bf16.msra.mxu1 %v13790_v59  ;;  %v15898_v59 = vsel %vm1972_vm4, %v15846_v57, %v18586_v32  ;;  %v15915_v46 = vor.u32 %v4485_v62, %v4482_v58  ;;  %v3119_v32 = vrot.slane %v3117_v11, 4  ;;  %v4910_v36 = vshll.u32 %v4881_v20, 16  ;;  %v13798_v11 = vld [vmem:[#allocation4 + $0xe8] sm:$0xff]   ;;  %v13800_v20 = vld [vmem:[#allocation4 + $0xf0] sm:$0xff]  }
 0x286   : > { %12871 = vmatprep.subr.bf16.mxu1 %v13792_v1  ;;  %v4687_v24 = vrot.slane %v4453_v18, 4  ;;  %v4688_v17 = vrot.slane %v4456_v60, 5  ;;  %v15926_v58 = vsel %vm2143_vm5, %v4468_v0, %v4477_v54  ;;  %v4692_v43 = vrot.slane %v4465_v51, 5 }
 0x287   : > { %12650 = vmatpush3.bf16.msra.mxu0 %v13793_v12  ;;  %v2713_v12 = vrot.slane %v2711_v30, 4  ;;  %v15930_v62 = vsel %vm2143_vm5, %v4477_v54, %v15915_v46  ;;  %v4909_v0 = vrot.slane %v4907_v14, 3  ;;  %v4696_v51 = vrot.slane %v4474_v35, 5 }
 0x288   : > { %12824 = vmatmul.mubr.bf16.gmra.mrb[120].mxu1 %v15902_v44  ;;  %12651 = vmatprep.subr.bf16.mxu0 %v13795_v19  ;;  %v15934_v60 = vor.u32 %v4688_v17, %v4687_v24  ;;  %v13805_v17 = vld [vmem:[#allocation4 + $0x1c8] sm:$0xff]  }
 0x289   : > { %12827 = vmatprep.mubr.bf16.mxu1 %v15906_v22  ;;  %12872 = vmatpush3.bf16.msra.mxu1 %v13792_v1  ;;  %v4489_v1 = vshrl.u32 %v15908_v16, 16  ;;  %v2714_v30 = vor.u32 %v2713_v12, %v2710_v8  ;;  %v13801_v8 = vld [vmem:[#allocation4 + $0x178] sm:$0xff]   ;;  %v15939_v12 = vld [vmem:[#allocation2 + $0x50] sm:$0xf0] }
 0x28a   : > { %12873 = vmatprep.subr.bf16.mxu1 %v13794_v5  ;;  %12604 = vmatmul.mubr.bf16.gmra.mrb[56].mxu0 %v2697_v23  ;;  %v4494_v23 = vrot.slane %v4492_v37, 4  ;;  %v13803_v37 = vld [vmem:[#allocation4 + $0x1c0] sm:$0xff]  }
 0x28b   : > { %12652 = vmatpush3.bf16.msra.mxu0 %v13795_v19  ;;  %12607 = vmatprep.mubr.bf16.mxu0 %v2706_v2  ;;  %v4691_v19 = vrot.slane %v4462_v28, 4  ;;  %v4491_v18 = vrot.slane %v4489_v1, 3  ;;  %v4695_v28 = vrot.slane %v4471_v29, 4  ;;  %v4912_v2 = vrot.slane %v4910_v36, 4 }
 0x28c   : > { %12653 = vmatprep.subr.bf16.mxu0 %v13797_v25  ;;  %v4699_v29 = vrot.slane %v4480_v21, 4  ;;  %v5181_v1 = vrot.slane %v15939_v12, 4 }
 0x28d   : > { %12874 = vmatpush3.bf16.msra.mxu1 %v13794_v5  ;;  %v3123_v5 = vor.u32 %v3122_v42, %v3119_v32  ;;  %v4693_v42 = vor.u32 %v4692_v43, %v4691_v19  ;;  %v2715_v32 = vsel %vm2143_vm5, %v15885_v47, %v2714_v30  ;;  %v4697_v35 = vor.u32 %v4696_v51, %v4695_v28  ;;  %v15976_v19 = vld [vmem:[#allocation2 + $0x88] sm:$0xff]  ;;  %v3098_v51 = vld [vmem:[#allocation2 + $0x50] sm:$0x1f] }
 0x28e   : > { %12875 = vmatprep.subr.bf16.mxu1 %v13796_v9  ;;  %v4495_v47 = vor.u32 %v4494_v23, %v4491_v18  ;;  %v4913_v21 = vor.u32 %v4912_v2, %v4909_v0  ;;  %v15964_v36 = vsel %vm1972_vm4, %v5181_v1, %v15846_v57  ;;  %v13804_v57 = vld [vmem:[#allocation4 + $0x140] sm:$0xff]   ;;  %v15981_v43 = vrot.slane %v15976_v19, 4  ;;  %v15983_v18 = vld [vmem:[#allocation2 + $0x80] sm:$0xff] }
 0x28f   : > { %12654 = vmatpush3.bf16.msra.mxu0 %v13797_v25  ;;  %v3127_v25 = vsel %vm2395_vm6, %v3123_v5, %v15711_v4  ;;  %v15952_v54 = vsel %vm2395_vm6, %v15934_v60, %v4693_v42  ;;  %v15958_v14 = vsel %vm2395_vm6, %v4693_v42, %v4697_v35  ;;  %v15978_v5 = vld [vmem:[#allocation2 + $0x90] sm:$0xf]  ;;  %v3144_v23 = vrot.slane %v2690_v38, 4 }
 0x290   : > { %12828 = vmatmul.mubr.bf16.gmra.mrb[124].mxu1 %v15926_v58  ;;  %12655 = vmatprep.subr.bf16.mxu0 %v13799_v7  ;;  %v4496_v30 = vsel %vm2143_vm5, %v15915_v46, %v4495_v47  ;;  %v4922_v24 = vsel %vm2143_vm5, %v4913_v21, %v15685_v39  ;;  %v13806_v39 = vld [vmem:[#allocation4 + $0x148] sm:$0xff]   ;;  %v3145_v28 = vrot.slane %v2693_v55, 5  ;;  %v3148_v0 = vrot.slane %v2699_v33, 4 }
 0x291   : > { %12831 = vmatprep.mubr.bf16.mxu1 %v15930_v62  ;;  %12876 = vmatpush3.bf16.msra.mxu1 %v13796_v9  ;;  %v4700_v9 = vrot.slane %v4483_v13, 5  ;;  %v13802_v13 = vld [vmem:[#allocation4 + $0xf8] sm:$0xff]   ;;  %v18709_v2 = vshll.u32 %v15834_v41, 16  ;;  %v4960_v42 = vshrl.u32 %v15983_v18, 16  ;;  %v4972_v55 = vshll.u32 %v15976_v19, 16  ;;  %v13813_v47 = vld [vmem:[#allocation4 + $0x1e8] sm:$0xff]  }
 0x292   : > { %12877 = vmatprep.subr.bf16.mxu1 %v13798_v11  ;;  %12608 = vmatmul.mubr.bf16.gmra.mrb[60].mxu0 %v2715_v32  ;;  %v3146_v41 = vor.u32 %v3145_v28, %v3144_v23  ;;  %v3153_v33 = vshrl.u32 %v3098_v51, 16  ;;  %v3156_v32 = vshll.u32 %v3098_v51, 16  ;;  %v13817_v51 = vld [vmem:[#allocation4 + $0x1f8] sm:$0xff]  }
 0x293   : > { %12656 = vmatpush3.bf16.msra.mxu0 %v13799_v7  ;;  %12659 = vmatprep.mubr.bf16.mxu0 %v3127_v25  ;;  %v15960_v4 = vor.u32 %v4700_v9, %v4699_v29  ;;  %v13810_v29 = vld [vmem:[#allocation4 + $0x158] sm:$0xff]   ;;  %v4974_v9 = vrot.slane %v4972_v55, 4 }
 0x294   : > { %12657 = vmatprep.subr.bf16.mxu0 %v13801_v8  ;;  %v3147_v1 = vsel %vm2395_vm6, %v15748_v50, %v3146_v41  ;;  %v3155_v21 = vrot.slane %v3153_v33, 4  ;;  %v5385_v50 = vshrl.u32 %v15939_v12, 16 }
 0x295   : > { %12878 = vmatpush3.bf16.msra.mxu1 %v13798_v11  ;;  %v15968_v7 = vsel %vm2395_vm6, %v4697_v35, %v15960_v4  ;;  %v13807_v11 = vld [vmem:[#allocation4 + $0x1d0] sm:$0xff]  }
 0x296   : > { %12879 = vmatprep.subr.bf16.mxu1 %v13800_v20 }
 0x297   : > { %12658 = vmatpush3.bf16.msra.mxu0 %v13801_v8  ;;  %v3149_v8 = vrot.slane %v18709_v2, 5  ;;  %v5387_v2 = vrot.slane %v5385_v50, 4  ;;  %v13823_v50 = vld [vmem:[#allocation4 + $0x50] sm:$0xff]  }
 0x298   : > { %12832 = vmatmul.mubr.bf16.gmra.mrb[128].mxu1 %v4496_v30  ;;  %12707 = vmatprep.subr.bf16.mxu0 %v13803_v37  ;;  %v13812_v30 = vld [vmem:[#allocation4 + $0x160] sm:$0xff]  }
 0x299   : > { %12880 = vmatpush3.bf16.msra.mxu1 %v13800_v20  ;;  %12883 = vmatprep.mubr.bf16.mxu1 %v4922_v24  ;;  %v3150_v25 = vor.u32 %v3149_v8, %v3148_v0  ;;  %v4962_v20 = vrot.slane %v4960_v42, 3  ;;  %v4978_v24 = vshrl.u32 %v15978_v5, 16 }
 0x29a   : > { %12881 = vmatprep.subr.bf16.mxu1 %v13802_v13  ;;  %12660 = vmatmul.mubr.bf16.vlgmr.msra.gmra.mrb[64].mxu0 %v15734_v52  ;;  %v13809_v52 = vld [vmem:[#allocation4 + $0x1d8] sm:$0xff]  }
 0x29b   : > { %12708 = vmatpush3.bf16.msra.mxu0 %v13803_v37  ;;  %12663 = vmatprep.mubr.bf16.mxu0 %v15777_v40  ;;  %v5196_v40 = vrot.slane %v15978_v5, 4  ;;  %v3158_v37 = vrot.slane %v3156_v32, 5  ;;  %v13819_v32 = vld [vmem:[#allocation4 + $0x40] sm:$0xff]  }
 0x29c   : > { %12709 = vmatprep.subr.bf16.mxu0 %v13805_v17 }
 0x29d   : > { %12882 = vmatpush3.bf16.msra.mxu1 %v13802_v13  ;;  %v16001_v38 = vsel %vm1972_vm4, %v15981_v43, %v5196_v40  ;;  %v3632_v40 = vrot.slane %v15674_v63, 4 }
 0x29e   : > { %12931 = vmatprep.subr.bf16.mxu1 %v13804_v57 }
 0x29f   : > { %12710 = vmatpush3.bf16.msra.mxu0 %v13805_v17  ;;  %v4981_v17 = vshll.u32 %v15978_v5, 16  ;;  %v4980_v5 = vrot.slane %v4978_v24, 3  ;;  %v13820_v24 = vld [vmem:[#allocation4 + $0x1c0] sm:$0xff]  }
 0x2a0   : > { %12884 = vmatmul.mubr.bf16.vlgmr.msra.gmra.mrb[132].mxu1 %v15902_v44  ;;  %12711 = vmatprep.subr.bf16.mxu0 %v13807_v11  ;;  %v13808_v44 = vld [vmem:[#allocation4 + $0x150] sm:$0xff]  }
 0x2a1   : > { %12887 = vmatprep.mubr.bf16.mxu1 %v15906_v22  ;;  %12932 = vmatpush3.bf16.msra.mxu1 %v13804_v57  ;;  %v4963_v22 = vshll.u32 %v15983_v18, 16  ;;  %v13815_v57 = vld [vmem:[#allocation4 + $0x1f0] sm:$0xff]   ;;  %v4983_v28 = vrot.slane %v4981_v17, 4  ;;  %v16049_v17 = vld [vmem:[#allocation2 + $0x98] sm:$0xff] }
 0x2a2   : > { %12933 = vmatprep.subr.bf16.mxu1 %v13806_v39  ;;  %12664 = vmatmul.mubr.bf16.gmra.mrb[68].mxu0 %v15796_v61  ;;  %v4969_v61 = vshrl.u32 %v15976_v19, 16  ;;  %v16070_v19 = vsel %vm2395_vm6, %v15800_v27, %v15934_v60 }
 0x2a3   : > { %12712 = vmatpush3.bf16.msra.mxu0 %v13807_v11  ;;  %12667 = vmatprep.mubr.bf16.mxu0 %v15761_v15  ;;  %v4965_v35 = vrot.slane %v4963_v22, 4  ;;  %v5388_v11 = vshll.u32 %v15939_v12, 16  ;;  %v14281_v12 = vld [vmem:[#allocation2 + $0x28] sm:$0xff] }
 0x2a4   : > { %12713 = vmatprep.subr.bf16.mxu0 %v13809_v52  ;;  %v4971_v15 = vrot.slane %v4969_v61, 3 }
 0x2a5   : > { %12934 = vmatpush3.bf16.msra.mxu1 %v13806_v39  ;;  %v16019_v13 = vor.u32 %v4965_v35, %v4962_v20  ;;  %v3159_v39 = vor.u32 %v3158_v37, %v3155_v21  ;;  %v5390_v8 = vrot.slane %v5388_v11, 5  ;;  %v13818_v35 = vld [vmem:[#allocation4 + $0x178] sm:$0xff]   ;;  %v16044_v37 = vld [vmem:[#allocation2 + $0x90] sm:$0xff] }
 0x2a6   : > { %12935 = vmatprep.subr.bf16.mxu1 %v13808_v44  ;;  %v6662_v11 = vshrl.u32 %v16044_v37, 16 }
 0x2a7   : > { %12714 = vmatpush3.bf16.msra.mxu0 %v13809_v52  ;;  %v13814_v52 = vld [vmem:[#allocation4 + $0x168] sm:$0xff]   ;;  %v4967_v23 = vsel %vm2143_vm5, %v15915_v46, %v16019_v13  ;;  %v3160_v63 = vsel %vm2395_vm6, %v3150_v25, %v3159_v39  ;;  %v5391_v33 = vor.u32 %v5390_v8, %v5387_v2  ;;  %v6665_v39 = vshll.u32 %v16044_v37, 16 }
 0x2a8   : > { %12888 = vmatmul.mubr.bf16.gmra.mrb[136].mxu1 %v15926_v58  ;;  %12715 = vmatprep.subr.bf16.mxu0 %v13811_v10  ;;  %v3151_v58 = vsel %vm2395_vm6, %v3146_v41, %v3150_v25  ;;  %v4984_v41 = vor.u32 %v4983_v28, %v4980_v5  ;;  %v6671_v5 = vshrl.u32 %v16049_v17, 16  ;;  %v6674_v28 = vshll.u32 %v16049_v17, 16 }
 0x2a9   : > { %12891 = vmatprep.mubr.bf16.mxu1 %v15930_v62  ;;  %12936 = vmatpush3.bf16.msra.mxu1 %v13808_v44  ;;  %v16023_v62 = vor.u32 %v4974_v9, %v4971_v15  ;;  %v3633_v44 = vrot.slane %v14281_v12, 4  ;;  %v14283_v15 = vld [vmem:[#allocation2 + $0x38] sm:$0xff] }
 0x2aa   : > { %12937 = vmatprep.subr.bf16.mxu1 %v13810_v29  ;;  %12668 = vmatmul.mubr.bf16.gmra.mrb[72].mxu0 %v3147_v1  ;;  %v3637_v9 = vrot.slane %v14283_v15, 4  ;;  %v13821_v1 = vld [vmem:[#allocation4 + $0x48] sm:$0xff]   ;;  %v6133_v60 = vrot.slane %v6671_v5, 4  ;;  %v13826_v15 = vld [vmem:[#allocation4 + $0x1d8] sm:$0xff]  }
 0x2ab   : > { %12716 = vmatpush3.bf16.msra.mxu0 %v13811_v10  ;;  %12671 = vmatprep.mubr.bf16.mxu0 %v3151_v58  ;;  %18710 = vst [vmem:[#allocation15_spill] sm:$0xff] %v16023_v62  ;;  %v16034_v0 = vsel %vm2143_vm5, %v16019_v13, %v16023_v62  ;;  %v3634_v46 = vsel %vm1972_vm4, %v3632_v40, %v3633_v44  ;;  %v13816_v10 = vld [vmem:[#allocation4 + $0x170] sm:$0xff]   ;;  %v6121_v58 = vrot.slane %v4960_v42, 4  ;;  %v6125_v42 = vrot.slane %v4969_v61, 4  ;;  %v13822_v12 = vld [vmem:[#allocation4 + $0x1c8] sm:$0xff]   ;;  %v13825_v61 = vld [vmem:[#allocation4 + $0x58] sm:$0xff]  }
 0x2ac   : > { %12717 = vmatprep.subr.bf16.mxu0 %v13813_v47  ;;  %v4985_v25 = vsel %vm2143_vm5, %v16023_v62, %v4984_v41  ;;  %v14284_v40 = vld [vmem:[#allocation2 + $0x40] sm:$0xff] }
 0x2ad   : > { %12938 = vmatpush3.bf16.msra.mxu1 %v13810_v29  ;;  %v14282_v29 = vld [vmem:[#allocation2 + $0x30] sm:$0xff]  ;;  %v13824_v41 = vld [vmem:[#allocation4 + $0x1d0] sm:$0xff]  }
 0x2ae   : > { %12939 = vmatprep.subr.bf16.mxu1 %v13812_v30  ;;  %v3635_v20 = vrot.slane %v14282_v29, 4  ;;  %v13827_v29 = vld [vmem:[#allocation4 + $0x60] sm:$0xff]  }
 0x2af   : > { %12718 = vmatpush3.bf16.msra.mxu0 %v13813_v47  ;;  %v5395_v47 = vsel %vm2395_vm6, %v5391_v33, %v15800_v27 }
 0x2b0   : > { %12892 = vmatmul.mubr.bf16.gmra.mrb[140].mxu1 %v4967_v23  ;;  %12719 = vmatprep.subr.bf16.mxu0 %v13815_v57  ;;  %v3636_v21 = vsel %vm1972_vm4, %v3633_v44, %v3635_v20  ;;  %v3639_v23 = vrot.slane %v14284_v40, 4  ;;  %v14285_v44 = vld [vmem:[#allocation2 + $0x48] sm:$0xff] }
 0x2b1   : > { %12895 = vmatprep.mubr.bf16.mxu1 %v16034_v0  ;;  %12940 = vmatpush3.bf16.msra.mxu1 %v13812_v30  ;;  %v3638_v30 = vsel %vm1972_vm4, %v3635_v20, %v3637_v9  ;;  %v16063_v2 = vrot.slane %v14285_v44, 4 }
 0x2b2   : > { %12941 = vmatprep.subr.bf16.mxu1 %v13814_v52  ;;  %12672 = vmatmul.mubr.bf16.gmra.mrb[76].mxu0 %v3160_v63  ;;  %v6130_v63 = vrot.slane %v6665_v39, 5  ;;  %v3640_v27 = vsel %vm1972_vm4, %v3637_v9, %v3639_v23  ;;  %v5367_v9 = vld [vmem:[#allocation2 + $0x90] sm:$0x1f] }
 0x2b3   : > { %12720 = vmatpush3.bf16.msra.mxu0 %v13815_v57  ;;  %12723 = vmatprep.mubr.bf16.mxu0 %v3634_v46  ;;  %v6122_v57 = vrot.slane %v4963_v22, 5  ;;  %v6134_v46 = vrot.slane %v6674_v28, 5 }
 0x2b4   : > { %12721 = vmatprep.subr.bf16.mxu0 %v13817_v51 }
 0x2b5   : > { %12942 = vmatpush3.bf16.msra.mxu1 %v13814_v52  ;;  %v6126_v52 = vrot.slane %v4972_v55, 5  ;;  %v16061_v22 = vor.u32 %v6122_v57, %v6121_v58  ;;  %v16110_v58 = vld [vmem:[#allocation2 + $0xa0] sm:$0xff]  ;;  %v16113_v57 = vld [vmem:[#allocation2 + $0xa8] sm:$0xff] }
 0x2b6   : > { %12943 = vmatprep.subr.bf16.mxu1 %v13816_v10  ;;  %v18590_v40 = vshrl.u32 %v16110_v58, 16  ;;  %v18589_v44 = vshll.u32 %v16110_v58, 16 }
 0x2b7   : > { %12722 = vmatpush3.bf16.msra.mxu0 %v13817_v51  ;;  %18711 = vst [vmem:[#allocation14_spill] sm:$0xff] %v16061_v22  ;;  %v16065_v8 = vor.u32 %v6126_v52, %v6125_v42  ;;  %v6129_v51 = vrot.slane %v6662_v11, 4  ;;  %v16117_v52 = vld [vmem:[#allocation2 + $0xb0] sm:$0xff] }
 0x2b8   : > { %12896 = vmatmul.mubr.bf16.gmra.mrb[144].mxu1 %v4985_v25  ;;  %12771 = vmatprep.subr.bf16.mxu0 %v13819_v32  ;;  %v13829_v25 = vld [vmem:[#allocation4 + $0x68] sm:$0xff]  }
 0x2b9   : > { %12944 = vmatpush3.bf16.msra.mxu1 %v13816_v10  ;;  %12947 = vmatprep.mubr.bf16.mxu1 %v5395_v47  ;;  %v16076_v55 = vsel %vm2395_vm6, %v16061_v22, %v16065_v8  ;;  %v3642_v10 = vsel %vm1972_vm4, %v3639_v23, %v16063_v2  ;;  %v6131_v33 = vor.u32 %v6130_v63, %v6129_v51  ;;  %v18716_v47 = vrot.slane %v15616_v48, 4  ;;  %v13831_v48 = vld [vmem:[#allocation4 + $0x70] sm:$0xff]  }
 0x2ba   : > { %12945 = vmatprep.subr.bf16.mxu1 %v13818_v35  ;;  %12724 = vmatmul.mubr.bf16.vlgmr.msra.gmra.mrb[80].mxu0 %v3636_v21  ;;  %18712 = vst [vmem:[#allocation16_spill] sm:$0xff] %v16076_v55  ;;  %v16108_v21 = vld [vmem:[#allocation2 + $0x40] sm:$0xf0]  ;;  %v6664_v23 = vrot.slane %v6662_v11, 3  ;;  %v6667_v51 = vrot.slane %v6665_v39, 4  ;;  %v6673_v63 = vrot.slane %v6671_v5, 3 }
 0x2bb   : > { %12772 = vmatpush3.bf16.msra.mxu0 %v13819_v32  ;;  %12727 = vmatprep.mubr.bf16.mxu0 %v3638_v30  ;;  %v16090_v32 = vor.u32 %v6134_v46, %v6133_v60  ;;  %v16094_v20 = vsel %vm2395_vm6, %v16065_v8, %v6131_v33  ;;  %v13828_v30 = vld [vmem:[#allocation4 + $0x1e0] sm:$0xff]   ;;  %v4247_v42 = vrot.slane %v16108_v21, 4  ;;  %v13830_v60 = vld [vmem:[#allocation4 + $0x1e8] sm:$0xff]   ;;  %v18595_v46 = vshll.u32 %v16113_v57, 16  ;;  %v5872_v5 = vld [vmem:[#allocation2 + $0x60] sm:$0xf0] }
 0x2bc   : > { %12773 = vmatprep.subr.bf16.mxu0 %v13821_v1  ;;  %18714 = vst [vmem:[#allocation18_spill] sm:$0xff] %v16094_v20  ;;  %v6668_v39 = vor.u32 %v6667_v51, %v6664_v23 }
 0x2bd   : > { %12946 = vmatpush3.bf16.msra.mxu1 %v13818_v35  ;;  %18713 = vst [vmem:[#allocation17_spill] sm:$0xff] %v16090_v32  ;;  %v16098_v35 = vsel %vm2395_vm6, %v6131_v33, %v16090_v32  ;;  %v18594_v33 = vshrl.u32 %v16117_v52, 16  ;;  %v4249_v51 = vsel %vm1972_vm4, %v4247_v42, %v16063_v2 }
 0x2be   : > { %12995 = vmatprep.subr.bf16.mxu1 %v13820_v24  ;;  %18715 = vst [vmem:[#allocation19_spill] sm:$0xff] %v16098_v35 }
 0x2bf   : > { %12774 = vmatpush3.bf16.msra.mxu0 %v13821_v1  ;;  %v16106_v1 = vsel %vm1972_vm4, %v16063_v2, %v18716_v47  ;;  %v6700_v2 = vrot.slane %v18594_v33, 3 }
 0x2c0   : > { %12948 = vmatmul.mubr.bf16.vlgmr.msra.gmra.mrb[148].mxu1 %v16070_v19  ;;  %12775 = vmatprep.subr.bf16.mxu0 %v13823_v50 }
 0x2c1   : > { %12951 = vmatprep.mubr.bf16.mxu1 %v15952_v54  ;;  %12996 = vmatpush3.bf16.msra.mxu1 %v13820_v24  ;;  %v5421_v24 = vshrl.u32 %v5367_v9, 16 }
 0x2c2   : > { %12997 = vmatprep.subr.bf16.mxu1 %v13822_v12  ;;  %12728 = vmatmul.mubr.bf16.gmra.mrb[84].mxu0 %v3640_v27  ;;  %v5415_v27 = vsel %vm2395_vm6, %v15960_v4, %v16061_v22 }
 0x2c3   : > { %12776 = vmatpush3.bf16.msra.mxu0 %v13823_v50  ;;  %12731 = vmatprep.mubr.bf16.mxu0 %v3642_v10  ;;  %v5424_v50 = vshll.u32 %v5367_v9, 16  ;;  %v5423_v11 = vrot.slane %v5421_v24, 4  ;;  %v6676_v10 = vrot.slane %v6674_v28, 4  ;;  %v6682_v24 = vrot.slane %v18590_v40, 3 }
 0x2c4   : > { %12777 = vmatprep.subr.bf16.mxu0 %v13825_v61 }
 0x2c5   : > { %12998 = vmatpush3.bf16.msra.mxu1 %v13822_v12  ;;  %v16122_v12 = vld [vmem:[#allocation2 + $0xb8] sm:$0xff]  ;;  %v16139_v47 = vor.u32 %v6676_v10, %v6673_v63  ;;  %v13832_v63 = vld [vmem:[#allocation4 + $0x1f0] sm:$0xff]  }
 0x2c6   : > { %12999 = vmatprep.subr.bf16.mxu1 %v13824_v41  ;;  %v18592_v9 = vshrl.u32 %v16122_v12, 16 }
 0x2c7   : > { %12778 = vmatpush3.bf16.msra.mxu0 %v13825_v61  ;;  %v18591_v61 = vshrl.u32 %v16113_v57, 16  ;;  %18717 = vst [vmem:[#allocation20_spill] sm:$0xff] %v16139_v47 }
 0x2c8   : > { %12952 = vmatmul.mubr.bf16.gmra.mrb[152].mxu1 %v15958_v14  ;;  %12779 = vmatprep.subr.bf16.mxu0 %v13827_v29 }
 0x2c9   : > { %12955 = vmatprep.mubr.bf16.mxu1 %v15968_v7  ;;  %13000 = vmatpush3.bf16.msra.mxu1 %v13824_v41  ;;  %v5426_v41 = vrot.slane %v5424_v50, 5  ;;  %v6685_v50 = vrot.slane %v18589_v44, 4  ;;  %v6691_v23 = vrot.slane %v18591_v61, 3  ;;  %v5898_v44 = vrot.slane %v5872_v5, 4 }
 0x2ca   : > { %13001 = vmatprep.subr.bf16.mxu1 %v13826_v15  ;;  %12732 = vmatmul.mubr.bf16.gmra.mrb[88].mxu0 %v16106_v1  ;;  %v5899_v61 = vrot.slane %v15822_v34, 4 }
 0x2cb   : > { %12780 = vmatpush3.bf16.msra.mxu0 %v13827_v29  ;;  %12735 = vmatprep.mubr.bf16.mxu0 %v15864_v56  ;;  %v13833_v29 = vld [vmem:[#allocation4 + $0x78] sm:$0xff]   ;;  %v5427_v10 = vor.u32 %v5426_v41, %v5423_v11  ;;  %v6686_v40 = vor.u32 %v6685_v50, %v6682_v24  ;;  %v18719_v11 = vshll.u32 %v16122_v12, 16 }
 0x2cc   : > { %12781 = vmatprep.subr.bf16.mxu0 %v13829_v25  ;;  %v13834_v41 = vld [vmem:[#allocation4 + $0x1f8] sm:$0xff]  }
 0x2cd   : > { %13002 = vmatpush3.bf16.msra.mxu1 %v13826_v15  ;;  %v18593_v15 = vshll.u32 %v16117_v52, 16  ;;  %v6712_v34 = vrot.slane %v18719_v11, 4  ;;  %v5428_v50 = vsel %vm2395_vm6, %v16065_v8, %v5427_v10  ;;  %v16194_v10 = vrot.slane %v15843_v49, 4  ;;  %v13842_v11 = vld [vmem:[#allocation4 + $0x58] sm:$0xff]  }
 0x2ce   : > { %13003 = vmatprep.subr.bf16.mxu1 %v13828_v30  ;;  %v18724_v49 = vrot.slane %v15818_v26, 4 }
 0x2cf   : > { %12782 = vmatpush3.bf16.msra.mxu0 %v13829_v25  ;;  %v16147_v25 = vsel %vm2143_vm5, %v16023_v62, %v6668_v39  ;;  %v6703_v42 = vrot.slane %v18593_v15, 4  ;;  %v18734_v62 = vshrl.u32 %v16110_v58, 16 }
 0x2d0   : > { %12956 = vmatmul.mubr.bf16.gmra.mrb[156].mxu1 %v5415_v27  ;;  %12783 = vmatprep.subr.bf16.mxu0 %v13831_v48  ;;  %v6694_v27 = vrot.slane %v18595_v46, 4 }
 0x2d1   : > { %12959 = vmatprep.mubr.bf16.mxu1 %v16076_v55  ;;  %13004 = vmatpush3.bf16.msra.mxu1 %v13828_v30  ;;  %v16158_v30 = vsel %vm2143_vm5, %v6668_v39, %v16139_v47  ;;  %v16169_v39 = vsel %vm2143_vm5, %v16139_v47, %v6686_v40  ;;  %v6704_v24 = vor.u32 %v6703_v42, %v6700_v2  ;;  %v5905_v42 = vrot.slane %v15983_v18, 4  ;;  %v13845_v18 = vld [vmem:[#allocation4 + $0xa8] sm:$0xff]  }
 0x2d2   : > { %13005 = vmatprep.subr.bf16.mxu1 %v13830_v60  ;;  %12736 = vmatmul.mubr.bf16.gmra.mrb[92].mxu0 %v15878_v53  ;;  %v13835_v53 = vld [vmem:[#allocation4 + $0x80] sm:$0xff]   ;;  %v6695_v28 = vor.u32 %v6694_v27, %v6691_v23  ;;  %18718 = vst [vmem:[#allocation21_spill] sm:$0xff] %v16169_v39  ;;  %v5900_v23 = vsel %vm1972_vm4, %v5898_v44, %v5899_v61  ;;  %v5901_v44 = vrot.slane %v15838_v6, 4  ;;  %v13841_v6 = vld [vmem:[#allocation4 + $0x98] sm:$0xff]  }
 0x2d3   : > { %12784 = vmatpush3.bf16.msra.mxu0 %v13831_v48  ;;  %12787 = vmatprep.mubr.bf16.mxu0 %v4249_v51  ;;  %v6709_v48 = vrot.slane %v18592_v9, 3  ;;  %v13837_v51 = vld [vmem:[#allocation4 + $0x88] sm:$0xff]   ;;  %v16217_v26 = vsel %vm1972_vm4, %v16194_v10, %v5905_v42  ;;  %v13859_v9 = vld [vmem:[#allocation4 + $0x120] sm:$0xff]  }
 0x2d4   : > { %12785 = vmatprep.subr.bf16.mxu0 %v13833_v29  ;;  %v16176_v5 = vsel %vm2143_vm5, %v6686_v40, %v6695_v28  ;;  %v16184_v27 = vsel %vm2143_vm5, %v6695_v28, %v6704_v24  ;;  %v13839_v28 = vld [vmem:[#allocation4 + $0x90] sm:$0xff]   ;;  %v16197_v2 = vsel %vm1972_vm4, %v5899_v61, %v5901_v44 }
 0x2d5   : > { %13006 = vmatpush3.bf16.msra.mxu1 %v13830_v60  ;;  %18720 = vst [vmem:[#allocation22_spill] sm:$0xff] %v16176_v5  ;;  %v16180_v60 = vor.u32 %v6712_v34, %v6709_v48  ;;  %18722 = vst [vmem:[#allocation24_spill] sm:$0xff] %v16184_v27  ;;  %v13843_v48 = vld [vmem:[#allocation4 + $0xa0] sm:$0xff]   ;;  %v4668_v34 = vshrl.u32 %v16108_v21, 16 }
 0x2d6   : > { %13007 = vmatprep.subr.bf16.mxu1 %v13832_v63 }
 0x2d7   : > { %12786 = vmatpush3.bf16.msra.mxu0 %v13833_v29  ;;  %18721 = vst [vmem:[#allocation23_spill] sm:$0xff] %v16180_v60  ;;  %v16188_v40 = vsel %vm2143_vm5, %v6704_v24, %v16180_v60  ;;  %v13836_v29 = vld [vmem:[#allocation4 + $0x40] sm:$0xff]   ;;  %v4670_v24 = vrot.slane %v4668_v34, 4  ;;  %v16244_v34 = vld [vmem:[#allocation2 + $0x80] sm:$0xf0] }
 0x2d8   : > { %12960 = vmatmul.mubr.bf16.gmra.mrb[160].mxu1 %v5428_v50  ;;  %12835 = vmatprep.subr.bf16.mxu0 %v13835_v53  ;;  %18723 = vst [vmem:[#allocation25_spill] sm:$0xff] %v16188_v40  ;;  %v6895_v46 = vshrl.u32 %v16244_v34, 16  ;;  %v6898_v60 = vshll.u32 %v16244_v34, 16  ;;  %v6431_v40 = vld [vmem:[#allocation2 + $0xc0] sm:$0xf] }
 0x2d9   : > { %13008 = vmatpush3.bf16.msra.mxu1 %v13832_v63  ;;  %13011 = vmatprep.mubr.bf16.mxu1 %v5900_v23  ;;  %v13838_v63 = vld [vmem:[#allocation4 + $0x48] sm:$0xff]   ;;  %v5909_v23 = vrot.slane %v16044_v37, 4 }
 0x2da   : > { %13009 = vmatprep.subr.bf16.mxu1 %v13834_v41  ;;  %12788 = vmatmul.mubr.bf16.vlgmr.msra.gmra.mrb[96].mxu0 %v16106_v1  ;;  %v16202_v1 = vsel %vm1972_vm4, %v5901_v44, %v16194_v10  ;;  %v6897_v5 = vrot.slane %v6895_v46, 4  ;;  %v6900_v39 = vrot.slane %v6898_v60, 5 }
 0x2db   : > { %12836 = vmatpush3.bf16.msra.mxu0 %v13835_v53  ;;  %12791 = vmatprep.mubr.bf16.mxu0 %v15864_v56  ;;  %v16209_v56 = vsel %vm1972_vm4, %v18724_v49, %v5899_v61  ;;  %v13840_v53 = vld [vmem:[#allocation4 + $0x50] sm:$0xff]   ;;  %v16222_v61 = vsel %vm1972_vm4, %v5905_v42, %v15981_v43 }
 0x2dc   : > { %12837 = vmatprep.subr.bf16.mxu0 %v13837_v51 }
 0x2dd   : > { %13010 = vmatpush3.bf16.msra.mxu1 %v13834_v41  ;;  %v4671_v41 = vshll.u32 %v16108_v21, 16  ;;  %v13844_v21 = vld [vmem:[#allocation4 + $0x60] sm:$0xff]  }
 0x2de   : > { %13059 = vmatprep.subr.bf16.mxu1 %v13836_v29 }
 0x2df   : > { %12838 = vmatpush3.bf16.msra.mxu0 %v13837_v51  ;;  %v4673_v50 = vrot.slane %v4671_v41, 5  ;;  %v16229_v51 = vrot.slane %v16049_v17, 4 }
 0x2e0   : > { %13012 = vmatmul.mubr.bf16.vlgmr.msra.gmra.mrb[164].mxu1 %v16197_v2  ;;  %12839 = vmatprep.subr.bf16.mxu0 %v13839_v28 }
 0x2e1   : > { %13015 = vmatprep.mubr.bf16.mxu1 %v16202_v1  ;;  %13060 = vmatpush3.bf16.msra.mxu1 %v13836_v29  ;;  %v13847_v29 = vld [vmem:[#allocation4 + $0xb0] sm:$0xff]   ;;  %v4674_v49 = vor.u32 %v4673_v50, %v4670_v24  ;;  %v5912_v37 = vsel %vm1972_vm4, %v5909_v23, %v16229_v51 }
 0x2e2   : > { %13061 = vmatprep.subr.bf16.mxu1 %v13838_v63  ;;  %12792 = vmatmul.mubr.bf16.gmra.mrb[100].mxu0 %v15898_v59 }
 0x2e3   : > { %12840 = vmatpush3.bf16.msra.mxu0 %v13839_v28  ;;  %12795 = vmatprep.mubr.bf16.mxu0 %v16209_v56  ;;  %v4262_v28 = vrot.slane %v15908_v16, 4  ;;  %v13849_v16 = vld [vmem:[#allocation4 + $0xb8] sm:$0xff]   ;;  %v4678_v41 = vsel %vm2395_vm6, %v4674_v49, %v15780_v45 }
 0x2e4   : > { %12841 = vmatprep.subr.bf16.mxu0 %v13841_v6  ;;  %v13850_v45 = vld [vmem:[#allocation4 + $0x78] sm:$0xff]  }
 0x2e5   : > { %13062 = vmatpush3.bf16.msra.mxu1 %v13838_v63 }
 0x2e6   : > { %13063 = vmatprep.subr.bf16.mxu1 %v13840_v53 }
 0x2e7   : > { %12842 = vmatpush3.bf16.msra.mxu0 %v13841_v6  ;;  %v13846_v6 = vld [vmem:[#allocation4 + $0x68] sm:$0xff]  }
 0x2e8   : > { %13016 = vmatmul.mubr.bf16.gmra.mrb[168].mxu1 %v16217_v26  ;;  %12843 = vmatprep.subr.bf16.mxu0 %v13843_v48 }
 0x2e9   : > { %13019 = vmatprep.mubr.bf16.mxu1 %v16222_v61  ;;  %13064 = vmatpush3.bf16.msra.mxu1 %v13840_v53  ;;  %v5910_v53 = vsel %vm1972_vm4, %v15981_v43, %v5909_v23 }
 0x2ea   : > { %13065 = vmatprep.subr.bf16.mxu1 %v13842_v11  ;;  %12796 = vmatmul.mubr.bf16.gmra.mrb[104].mxu0 %v16197_v2 }
 0x2eb   : > { %12844 = vmatpush3.bf16.msra.mxu0 %v13843_v48  ;;  %12799 = vmatprep.mubr.bf16.mxu0 %v16202_v1  ;;  %v16240_v48 = vld [vmem:[#allocation2 + $0xa0] sm:$0xf] }
 0x2ec   : > { %12845 = vmatprep.subr.bf16.mxu0 %v13845_v18  ;;  %v5913_v50 = vrot.slane %v16240_v48, 4 }
 0x2ed   : > { %13066 = vmatpush3.bf16.msra.mxu1 %v13842_v11  ;;  %v12501_v44 = vpop.f32.mrb[0].mxu0  ;;  %v4263_v11 = vsel %vm1972_vm4, %v16194_v10, %v4262_v28 }
 0x2ee   : > { %13067 = vmatprep.subr.bf16.mxu1 %v13844_v21  ;;  %v16232_v63 = vpop.f32.mrb[1].mxu0  ;;  %v13851_v44 = vld [vmem:[#allocation4 + $0x100] sm:$0xff]  }
 0x2ef   : > { %12846 = vmatpush3.bf16.msra.mxu0 %v13845_v18  ;;  %v12502_v42 = vpop.f32.mrb[2].mxu0  ;;  %v13848_v18 = vld [vmem:[#allocation4 + $0x70] sm:$0xff]  }
 0x2f0   : > { %13020 = vmatmul.mubr.bf16.gmra.mrb[172].mxu1 %v5910_v53  ;;  %v16238_v17 = vpop.f32.mrb[3].mxu0  ;;  %12847 = vmatprep.subr.bf16.mxu0 %v13847_v29 }
 0x2f1   : > { %13023 = vmatprep.mubr.bf16.mxu1 %v5912_v37  ;;  %13068 = vmatpush3.bf16.msra.mxu1 %v13844_v21  ;;  %v12629_v24 = vpop.f32.mrb[68].mxu1  ;;  %v6474_v21 = vrot.slane %v16244_v34, 4  ;;  %v13862_v34 = vld [vmem:[#allocation4 + $0xa8] sm:$0xff]  }
 0x2f2   : > { %13069 = vmatprep.subr.bf16.mxu1 %v13846_v6  ;;  %12800 = vmatmul.mubr.bf16.gmra.mrb[108].mxu0 %v4263_v11  ;;  %v16249_v23 = vpop.f32.mrb[69].mxu1 }
 0x2f3   : > { %12848 = vmatpush3.bf16.msra.mxu0 %v13847_v29  ;;  %12851 = vmatprep.mubr.bf16.mxu0 %v4678_v41  ;;  %18725 = vst [vmem:[#allocation26_spill] sm:$0xff] %v16249_v23  ;;  %v12630_v10 = vpop.f32.mrb[70].mxu1  ;;  %v5914_v29 = vsel %vm1972_vm4, %v16229_v51, %v5913_v50  ;;  %v6476_v41 = vsel %vm1972_vm4, %v6474_v21, %v15981_v43  ;;  %v13855_v50 = vld [vmem:[#allocation4 + $0x110] sm:$0xff]  }
 0x2f4   : > { %12849 = vmatprep.subr.bf16.mxu0 %v13849_v16  ;;  %v16252_v42 = vpop.f32.mrb[71].mxu1  ;;  %v13852_v10 = vld [vmem:[#allocation4 + $0x80] sm:$0xff]  }
 0x2f5   : > { %13070 = vmatpush3.bf16.msra.mxu1 %v13846_v6  ;;  %v12505_v28 = vpop.f32.mrb[4].mxu0  ;;  %18726 = vst [vmem:[#allocation27_spill] sm:$0xff] %v16252_v42  ;;  %v13853_v6 = vld [vmem:[#allocation4 + $0x108] sm:$0xff]  }
 0x2f6   : > { %13071 = vmatprep.subr.bf16.mxu1 %v13848_v18  ;;  %v16254_v11 = vpop.f32.mrb[5].mxu0 }
 0x2f7   : > { %12850 = vmatpush3.bf16.msra.mxu0 %v13849_v16  ;;  %v12506_v49 = vpop.f32.mrb[6].mxu0 }
 0x2f8   : > { %13024 = vmatmul.mubr.bf16.gmra.mrb[176].mxu1 %v5914_v29  ;;  %v16260_v24 = vpop.f32.mrb[7].mxu0  ;;  %12899 = vmatprep.subr.bf16.mxu0 %v13851_v44  ;;  %v13854_v49 = vld [vmem:[#allocation4 + $0x88] sm:$0xff]  }
 0x2f9   : > { %13072 = vmatpush3.bf16.msra.mxu1 %v13848_v18  ;;  %13075 = vmatprep.mubr.bf16.mxu1 %v6476_v41  ;;  %v12633_v28 = vpop.f32.mrb[72].mxu1 }
 0x2fa   : > { %13073 = vmatprep.subr.bf16.mxu1 %v13850_v45  ;;  %12852 = vmatmul.mubr.bf16.vlgmr.msra.gmra.mrb[112].mxu0 %v15804_v3  ;;  %v16264_v16 = vpop.f32.mrb[73].mxu1 }
 0x2fb   : > { %12900 = vmatpush3.bf16.msra.mxu0 %v13851_v44  ;;  %12855 = vmatprep.mubr.bf16.mxu0 %v15809_v31  ;;  %18727 = vst [vmem:[#allocation28_spill] sm:$0xff] %v16264_v16  ;;  %v12634_v29 = vpop.f32.mrb[74].mxu1  ;;  %v13857_v31 = vld [vmem:[#allocation4 + $0x118] sm:$0xff]   ;;  %v4650_v44 = vld [vmem:[#allocation2 + $0x80] sm:$0x1f] }
 0x2fc   : > { %12901 = vmatprep.subr.bf16.mxu0 %v13853_v6  ;;  %v16266_v21 = vpop.f32.mrb[75].mxu1  ;;  %v6481_v29 = vrot.slane %v16110_v58, 4 }
 0x2fd   : > { %13074 = vmatpush3.bf16.msra.mxu1 %v13850_v45  ;;  %v12509_v43 = vpop.f32.mrb[8].mxu0  ;;  %18728 = vst [vmem:[#allocation29_spill] sm:$0xff] %v16266_v21  ;;  %v13856_v45 = vld [vmem:[#allocation4 + $0x90] sm:$0xff]  }
 0x2fe   : > { %13123 = vmatprep.subr.bf16.mxu1 %v13852_v10  ;;  %v16268_v18 = vpop.f32.mrb[9].mxu0  ;;  %v4707_v43 = vshll.u32 %v4650_v44, 16 }
 0x2ff   : > { %12902 = vmatpush3.bf16.msra.mxu0 %v13853_v6  ;;  %v12510_v3 = vpop.f32.mrb[10].mxu0  ;;  %v4704_v6 = vshrl.u32 %v4650_v44, 16 }
 0x300   : > { %13076 = vmatmul.mubr.bf16.vlgmr.msra.gmra.mrb[180].mxu1 %v5910_v53  ;;  %v16270_v41 = vpop.f32.mrb[11].mxu0  ;;  %12903 = vmatprep.subr.bf16.mxu0 %v13855_v50  ;;  %v6483_v3 = vrot.slane %v16113_v57, 4  ;;  %v4709_v33 = vrot.slane %v4707_v43, 5  ;;  %v16299_v43 = vrot.slane %v16122_v12, 4 }
 0x301   : > { %13079 = vmatprep.mubr.bf16.mxu1 %v5912_v37  ;;  %13124 = vmatpush3.bf16.msra.mxu1 %v13852_v10  ;;  %v12637_v28 = vpop.f32.mrb[76].mxu1 }
 0x302   : > { %13125 = vmatprep.subr.bf16.mxu1 %v13854_v49  ;;  %12856 = vmatmul.mubr.bf16.gmra.mrb[116].mxu0 %v16070_v19  ;;  %v16275_v53 = vpop.f32.mrb[77].mxu1  ;;  %v4706_v28 = vrot.slane %v4704_v6, 4  ;;  %18731 = vst [vmem:[#allocation32_spill] sm:$0xff] %v16299_v43 }
 0x303   : > { %12904 = vmatpush3.bf16.msra.mxu0 %v13855_v50  ;;  %12859 = vmatprep.mubr.bf16.mxu0 %v15952_v54  ;;  %18729 = vst [vmem:[#allocation30_spill] sm:$0xff] %v16275_v53  ;;  %v12638_v37 = vpop.f32.mrb[78].mxu1  ;;  %v13858_v50 = vld [vmem:[#allocation4 + $0x98] sm:$0xff]   ;;  %v16284_v54 = vsel %vm1972_vm4, %v16229_v51, %v6481_v29  ;;  %v18737_v53 = vshll.u32 %v16113_v57, 16 }
 0x304   : > { %12905 = vmatprep.subr.bf16.mxu0 %v13857_v31  ;;  %v16278_v15 = vpop.f32.mrb[79].mxu1  ;;  %v16288_v37 = vsel %vm1972_vm4, %v6481_v29, %v6483_v3  ;;  %v6485_v29 = vrot.slane %v16117_v52, 4 }
 0x305   : > { %13126 = vmatpush3.bf16.msra.mxu1 %v13854_v49  ;;  %v12513_v10 = vpop.f32.mrb[12].mxu0  ;;  %18730 = vst [vmem:[#allocation31_spill] sm:$0xff] %v16278_v15  ;;  %v6914_v15 = vrot.slane %v18734_v62, 4  ;;  %v6919_v46 = vrot.slane %v18737_v53, 5  ;;  %v6901_v53 = vor.u32 %v6900_v39, %v6897_v5 }
 0x306   : > { %13127 = vmatprep.subr.bf16.mxu1 %v13856_v45  ;;  %v16280_v19 = vpop.f32.mrb[13].mxu0  ;;  %v13861_v10 = vld [vmem:[#allocation4 + $0x128] sm:$0xff]   ;;  %v16314_v60 = vsel %vm1972_vm4, %v6483_v3, %v6485_v29  ;;  %v13865_v3 = vld [vmem:[#allocation4 + $0x138] sm:$0xff]  }
 0x307   : > { %12906 = vmatpush3.bf16.msra.mxu0 %v13857_v31  ;;  %v12514_v44 = vpop.f32.mrb[14].mxu0  ;;  %v13860_v31 = vld [vmem:[#allocation4 + $0xa0] sm:$0xff]  }
 0x308   : > { %13080 = vmatmul.mubr.bf16.gmra.mrb[184].mxu1 %v16284_v54  ;;  %v16290_v49 = vpop.f32.mrb[15].mxu0  ;;  %12907 = vmatprep.subr.bf16.mxu0 %v13859_v9  ;;  %v4710_v44 = vor.u32 %v4709_v33, %v4706_v28  ;;  %v18735_v33 = vshll.u32 %v16110_v58, 16 }
 0x309   : > { %13083 = vmatprep.mubr.bf16.mxu1 %v16288_v37  ;;  %13128 = vmatpush3.bf16.msra.mxu1 %v13856_v45  ;;  %v12641_v6 = vpop.f32.mrb[80].mxu1  ;;  %v13863_v45 = vld [vmem:[#allocation4 + $0x130] sm:$0xff]  }
 0x30a   : > { %13129 = vmatprep.subr.bf16.mxu1 %v13858_v50  ;;  %12860 = vmatmul.mubr.bf16.gmra.mrb[120].mxu0 %v15958_v14  ;;  %v16301_v27 = vpop.f32.mrb[81].mxu1  ;;  %v6915_v28 = vrot.slane %v18735_v33, 5  ;;  %v16334_v33 = vld [vmem:[#allocation2 + $0x60] sm:$0xf8] }
 0x30b   : > { %12908 = vmatpush3.bf16.msra.mxu0 %v13859_v9  ;;  %12863 = vmatprep.mubr.bf16.mxu0 %v15968_v7  ;;  %18732 = vst [vmem:[#allocation33_spill] sm:$0xff] %v16301_v27  ;;  %v12642_v14 = vpop.f32.mrb[82].mxu1  ;;  %v18736_v27 = vshrl.u32 %v16113_v57, 16  ;;  %v4711_v57 = vsel %vm2395_vm6, %v15960_v4, %v4710_v44  ;;  %v13864_v4 = vld [vmem:[#allocation4 + $0xb0] sm:$0xff]   ;;  %v13867_v44 = vld [vmem:[#allocation4 + $0x180] sm:$0xff]  }
 0x30c   : > { %12909 = vmatprep.subr.bf16.mxu0 %v13861_v10  ;;  %v16303_v9 = vpop.f32.mrb[83].mxu1 }
 0x30d   : > { %13130 = vmatpush3.bf16.msra.mxu1 %v13858_v50  ;;  %v12533_v6 = vpop.f32.mrb[16].mxu0  ;;  %18733 = vst [vmem:[#allocation34_spill] sm:$0xff] %v16303_v9  ;;  %v6918_v55 = vrot.slane %v18736_v27, 4  ;;  %v16318_v50 = vsel %vm1972_vm4, %v6485_v29, %v16299_v43  ;;  %v6489_v27 = vrot.slane %v6431_v40, 4  ;;  %v6916_v40 = vor.u32 %v6915_v28, %v6914_v15  ;;  %v16346_v15 = vld [vmem:[#allocation2 + $0xe8] sm:$0xff] }
 0x30e   : > { %13131 = vmatprep.subr.bf16.mxu1 %v13860_v31  ;;  %v2314_v7 = vpop.f32.mrb[17].mxu0  ;;  %v18739_v6 = vshll.u32 %v16117_v52, 16  ;;  %18744 = vst [vmem:[#allocation37_spill] sm:$0xff] %v16346_v15 }
 0x30f   : > { %v16321_v14 = vadd.f32 %v2314_v7, %v16232_v63  ;;  %12910 = vmatpush3.bf16.msra.mxu0 %v13861_v10  ;;  %v12534_v62 = vpop.f32.mrb[18].mxu0  ;;  %v18738_v63 = vshrl.u32 %v16117_v52, 16  ;;  %v6920_v39 = vor.u32 %v6919_v46, %v6918_v55  ;;  %v18742_v52 = vshrl.u32 %v16122_v12, 16 }
 0x310   : > { %13084 = vmatmul.mubr.bf16.gmra.mrb[188].mxu1 %v16314_v60  ;;  %v2317_v58 = vpop.f32.mrb[19].mxu0  ;;  %12911 = vmatprep.subr.bf16.mxu0 %v13863_v45  ;;  %v6923_v7 = vrot.slane %v18739_v6, 5  ;;  %v16354_v6 = vld [vmem:[#allocation2 + $0xc8] sm:$0xff] }
 0x311   : > { %13087 = vmatprep.mubr.bf16.mxu1 %v16318_v50  ;;  %13132 = vmatpush3.bf16.msra.mxu1 %v13860_v31  ;;  %v16328_v29 = vadd.f32 %v2317_v58, %v16238_v17  ;;  %v6922_v10 = vrot.slane %v18738_v63, 4  ;;  %v16337_v31 = vld [vmem:[#allocation2 + $0xe0] sm:$0xff]  ;;  %v6926_v62 = vrot.slane %v18742_v52, 4  ;;  %v18743_v58 = vshll.u32 %v16122_v12, 16  ;;  %18745 = vst [vmem:[#allocation38_spill] sm:$0xff] %v16354_v6  ;;  %v13866_v52 = vld [vmem:[#allocation4 + $0xb8] sm:$0xff]  }
 0x312   : > { %13133 = vmatprep.subr.bf16.mxu1 %v13862_v34  ;;  %12864 = vmatmul.mubr.bf16.gmra.mrb[124].mxu0 %v4711_v57  ;;  %18740 = vst [vmem:[#allocation35_spill] sm:$0xff] %v16337_v31  ;;  %v5624_v57 = vshrl.u32 %v16334_v33, 16 }
 0x313   : > { %v12693_v5 = vpop.f32.mrb[84].mxu1  ;;  %12912 = vmatpush3.bf16.msra.mxu0 %v13863_v45  ;;  %12915 = vmatprep.mubr.bf16.mxu0 %v15964_v36  ;;  %v6927_v63 = vrot.slane %v18743_v58, 5  ;;  %v6490_v36 = vsel %vm1972_vm4, %v16299_v43, %v6489_v27  ;;  %v6905_v45 = vsel %vm2395_vm6, %v6901_v53, %v16065_v8  ;;  %v16352_v46 = vor.u32 %v6923_v7, %v6922_v10  ;;  %v16365_v27 = vld [vmem:[#allocation2 + $0xf0] sm:$0xff]  ;;  %v16367_v8 = vld [vmem:[#allocation2 + $0xf8] sm:$0xff] }
 0x314   : > { %v16339_v17 = vpop.f32.mrb[85].mxu1  ;;  %12913 = vmatprep.subr.bf16.mxu0 %v13865_v3  ;;  %v16360_v58 = vsel %vm2395_vm6, %v16090_v32, %v6916_v40  ;;  %18747 = vst [vmem:[#allocation40_spill] sm:$0xff] %v16365_v27  ;;  %18748 = vst [vmem:[#allocation41_spill] sm:$0xff] %v16367_v8  ;;  %v5627_v7 = vshll.u32 %v16334_v33, 16  ;;  %v16379_v9 = vrot.slane %v5624_v57, 3  ;;  %v13868_v57 = vld [vmem:[#allocation4 + $0x100] sm:$0xff]  }
 0x315   : > { %18741 = vst [vmem:[#allocation36_spill] sm:$0xff] %v16339_v17  ;;  %v12694_v55 = vpop.f32.mrb[86].mxu1  ;;  %13134 = vmatpush3.bf16.msra.mxu1 %v13862_v34  ;;  %v12537_v28 = vpop.f32.mrb[20].mxu0  ;;  %v16363_v34 = vsel %vm2395_vm6, %v6916_v40, %v6920_v39  ;;  %v13869_v17 = vld [vmem:[#allocation4 + $0x188] sm:$0xff]   ;;  %v16377_v32 = vor.u32 %v6927_v63, %v6926_v62 }
 0x316   : > { %v16356_v5 = vpop.f32.mrb[87].mxu1  ;;  %13135 = vmatprep.subr.bf16.mxu1 %v13864_v4  ;;  %v2330_v12 = vpop.f32.mrb[21].mxu0  ;;  %v8658_v55 = vld [vmem:[#allocation2 + $0x100] sm:$0xf]  ;;  %v16374_v28 = vrot.slane %v16337_v31, 4  ;;  %v16423_v62 = vrot.slane %v5627_v7, 4 }
 0x317   : > { %18746 = vst [vmem:[#allocation39_spill] sm:$0xff] %v16356_v5  ;;  %v16370_v53 = vadd.f32 %v2330_v12, %v16254_v11  ;;  %12914 = vmatpush3.bf16.msra.mxu0 %v13865_v3  ;;  %v12538_v10 = vpop.f32.mrb[22].mxu0  ;;  %v8710_v5 = vrot.slane %v16346_v15, 4  ;;  %v16388_v12 = vsel %vm2395_vm6, %v6920_v39, %v16352_v46  ;;  %v8712_v39 = vrot.slane %v16365_v27, 4  ;;  %v13871_v11 = vld [vmem:[#allocation4 + $0x190] sm:$0xff]  }
 0x318   : > { %18749 = vst [vmem:[#allocation42_spill] sm:$0xff] %v16374_v28  ;;  %13088 = vmatmul.mubr.bf16.gmra.mrb[192].mxu1 %v6490_v36  ;;  %v2333_v40 = vpop.f32.mrb[23].mxu0  ;;  %12963 = vmatprep.subr.bf16.mxu0 %v13867_v44  ;;  %v16390_v36 = vld [vmem:[#allocation2 + $0x68] sm:$0xff]  ;;  %v16395_v10 = vld [vmem:[#allocation2 + $0xc0] sm:$0x1f] }
 0x319   : > { %13136 = vmatpush3.bf16.msra.mxu1 %v13864_v4  ;;  %13139 = vmatprep.mubr.bf16.mxu1 %v6905_v45  ;;  %v16384_v33 = vadd.f32 %v2333_v40, %v16260_v24  ;;  %v16400_v24 = vsel %vm1972_vm4, %v16374_v28, %v8710_v5  ;;  %v16404_v45 = vrot.slane %v16367_v8, 4  ;;  %v8716_v4 = vrot.slane %v8658_v55, 4 }
 0x31a   : > { %13137 = vmatprep.subr.bf16.mxu1 %v13866_v52  ;;  %12916 = vmatmul.mubr.bf16.vlgmr.msra.gmra.mrb[128].mxu0 %v15898_v59  ;;  %18750 = vst [vmem:[#allocation43_spill] sm:$0xff] %v16400_v24  ;;  %v16413_v24 = vsel %vm1972_vm4, %v8710_v5, %v8712_v39  ;;  %v18755_v59 = vshll.u32 %v16354_v6, 16 }
 0x31b   : > { %v12697_v40 = vpop.f32.mrb[88].mxu1  ;;  %12964 = vmatpush3.bf16.msra.mxu0 %v13867_v44  ;;  %12919 = vmatprep.mubr.bf16.mxu0 %v16209_v56  ;;  %18752 = vst [vmem:[#allocation45_spill] sm:$0xff] %v16413_v24  ;;  %v18754_v56 = vshrl.u32 %v16354_v6, 16  ;;  %v16427_v24 = vld [vmem:[#allocation2 + $0x100] sm:$0xff] }
 0x31c   : > { %v16410_v3 = vpop.f32.mrb[89].mxu1  ;;  %12965 = vmatprep.subr.bf16.mxu0 %v13869_v17  ;;  %v16417_v40 = vsel %vm1972_vm4, %v8712_v39, %v16404_v45  ;;  %v9130_v63 = vrot.slane %v18755_v59, 5  ;;  %v16431_v39 = vsel %vm1972_vm4, %v16404_v45, %v8716_v4  ;;  %v13870_v59 = vld [vmem:[#allocation4 + $0x108] sm:$0xff]   ;;  %v16443_v4 = vld [vmem:[#allocation2 + $0x90] sm:$0xf0] }
 0x31d   : > { %18751 = vst [vmem:[#allocation44_spill] sm:$0xff] %v16410_v3  ;;  %18753 = vst [vmem:[#allocation46_spill] sm:$0xff] %v16417_v40  ;;  %v9129_v44 = vrot.slane %v18754_v56, 4  ;;  %v12698_v22 = vpop.f32.mrb[90].mxu1  ;;  %13138 = vmatpush3.bf16.msra.mxu1 %v13866_v52  ;;  %v12541_v55 = vpop.f32.mrb[24].mxu0  ;;  %v6931_v3 = vshrl.u32 %v16395_v10, 16 }
 0x31e   : > { %18756 = vst [vmem:[#allocation47_spill] sm:$0xff] %v16431_v39  ;;  %v16433_v40 = vpop.f32.mrb[91].mxu1  ;;  %13187 = vmatprep.subr.bf16.mxu1 %v13868_v57  ;;  %v2346_v56 = vpop.f32.mrb[25].mxu0  ;;  %v6934_v22 = vshll.u32 %v16395_v10, 16  ;;  %v18760_v10 = vshll.u32 %v16337_v31, 16  ;;  %v16466_v52 = vld [vmem:[#allocation2 + $0x108] sm:$0xff] }
 0x31f   : > { %18757 = vst [vmem:[#allocation48_spill] sm:$0xff] %v16433_v40  ;;  %v16438_v55 = vor.u32 %v9130_v63, %v9129_v44  ;;  %v16441_v5 = vadd.f32 %v2346_v56, %v16268_v18  ;;  %12966 = vmatpush3.bf16.msra.mxu0 %v13869_v17  ;;  %v12542_v6 = vpop.f32.mrb[26].mxu0  ;;  %v18759_v40 = vshrl.u32 %v16337_v31, 16  ;;  %v13873_v63 = vld [vmem:[#allocation4 + $0x198] sm:$0xff]   ;;  %v16454_v18 = vsel %vm2395_vm6, %v16352_v46, %v16377_v32 }
 0x320   : > { %v9142_v16 = vrot.slane %v18760_v10, 5  ;;  %13140 = vmatmul.mubr.bf16.vlgmr.msra.gmra.mrb[196].mxu1 %v16094_v20  ;;  %v2349_v7 = vpop.f32.mrb[27].mxu0  ;;  %12967 = vmatprep.subr.bf16.mxu0 %v13871_v11  ;;  %v18761_v17 = vshrl.u32 %v16390_v36, 16  ;;  %v18762_v44 = vshrl.u32 %v16346_v15, 16  ;;  %v16469_v46 = vrot.slane %v16427_v24, 4 }
 0x321   : > { %18758 = vst [vmem:[#allocation49_spill] sm:$0xff] %v16438_v55  ;;  %v9141_v21 = vrot.slane %v18759_v40, 4  ;;  %v18763_v40 = vshll.u32 %v16346_v15, 16  ;;  %13143 = vmatprep.mubr.bf16.mxu1 %v16098_v35  ;;  %13188 = vmatpush3.bf16.msra.mxu1 %v13868_v57  ;;  %v16464_v10 = vadd.f32 %v2349_v7, %v16270_v41  ;;  %v9609_v55 = vld [vmem:[#allocation2 + $0xd0] sm:$0xf0]  ;;  %v18767_v57 = vshll.u32 %v16390_v36, 16 }
 0x322   : > { %v5634_v6 = vrot.slane %v18761_v17, 3  ;;  %v9145_v56 = vrot.slane %v18762_v44, 4  ;;  %18764 = vst [vmem:[#allocation50_spill] sm:$0xff] %v16469_v46  ;;  %v18766_v17 = vshrl.u32 %v16365_v27, 16  ;;  %13189 = vmatprep.subr.bf16.mxu1 %v13870_v59  ;;  %12920 = vmatmul.mubr.bf16.gmra.mrb[132].mxu0 %v16197_v2  ;;  %v7408_v41 = vrot.slane %v16443_v4, 4  ;;  %v9336_v7 = vld [vmem:[#allocation2 + $0xd8] sm:$0xff] }
 0x323   : > { %v9146_v39 = vrot.slane %v18763_v40, 5  ;;  %v16471_v31 = vor.u32 %v9142_v16, %v9141_v21  ;;  %v13872_v40 = vld [vmem:[#allocation4 + $0x110] sm:$0xff]   ;;  %v5637_v15 = vrot.slane %v18767_v57, 4  ;;  %v18768_v20 = vshll.u32 %v16365_v27, 16  ;;  %v12701_v23 = vpop.f32.mrb[92].mxu1  ;;  %12968 = vmatpush3.bf16.msra.mxu0 %v13871_v11  ;;  %12923 = vmatprep.mubr.bf16.mxu0 %v16202_v1 }
 0x324   : > { %v9149_v44 = vrot.slane %v18766_v17, 4  ;;  %v16484_v21 = vrot.slane %v6931_v3, 4  ;;  %v9343_v2 = vld [vmem:[#allocation2 + $0x110] sm:$0xf]  ;;  %v18769_v17 = vshrl.u32 %v16367_v8, 16  ;;  %v18770_v4 = vshll.u32 %v16367_v8, 16  ;;  %12969 = vmatprep.subr.bf16.mxu0 %v13873_v63 }
 0x325   : > { %18765 = vst [vmem:[#allocation51_spill] sm:$0xff] %v16471_v31  ;;  %v9147_v35 = vor.u32 %v9146_v39, %v9145_v56  ;;  %v9150_v42 = vrot.slane %v18768_v20, 5  ;;  %v16490_v39 = vpop.f32.mrb[93].mxu1  ;;  %v13875_v20 = vld [vmem:[#allocation4 + $0x1a0] sm:$0xff]   ;;  %v16493_v23 = vrot.slane %v16466_v52, 4  ;;  %v9635_v3 = vrot.slane %v9609_v55, 4  ;;  %13190 = vmatpush3.bf16.msra.mxu1 %v13870_v59 }
 0x326   : > { %v9153_v57 = vrot.slane %v18769_v17, 4  ;;  %v9154_v47 = vrot.slane %v18770_v4, 5  ;;  %18771 = vst [vmem:[#allocation52_spill] sm:$0xff] %v16490_v39  ;;  %v12702_v56 = vpop.f32.mrb[94].mxu1  ;;  %v12545_v16 = vpop.f32.mrb[28].mxu0  ;;  %v16499_v17 = vrot.slane %v6934_v22, 5  ;;  %v16508_v39 = vsel %vm1972_vm4, %v16404_v45, %v16469_v46  ;;  %13191 = vmatprep.subr.bf16.mxu1 %v13872_v40 }
 0x327   : > { %18772 = vst [vmem:[#allocation53_spill] sm:$0xff] %v16493_v23  ;;  %v16497_v1 = vsel %vm2395_vm6, %v16471_v31, %v9147_v35  ;;  %v9151_v11 = vor.u32 %v9150_v42, %v9149_v44  ;;  %v16501_v8 = vld [vmem:[#allocation2 + $0xe8] sm:$0xff]  ;;  %v9636_v27 = vrot.slane %v9336_v7, 4  ;;  %18775 = vst [vmem:[#allocation56_spill] sm:$0xff] %v16508_v39  ;;  %v16510_v43 = vpop.f32.mrb[95].mxu1  ;;  %v2362_v42 = vpop.f32.mrb[29].mxu0  ;;  %v16512_v44 = vor.u32 %v5637_v15, %v5634_v6 }
 0x328   : > { %18773 = vst [vmem:[#allocation54_spill] sm:$0xff] %v16497_v1  ;;  %v16503_v4 = vor.u32 %v9154_v47, %v9153_v57  ;;  %v13874_v55 = vld [vmem:[#allocation4 + $0x118] sm:$0xff]   ;;  %v16514_v59 = vld [vmem:[#allocation2 + $0x70] sm:$0xff]  ;;  %v9650_v7 = vrot.slane %v9343_v2, 4  ;;  %v16523_v45 = vadd.f32 %v2362_v42, %v16280_v19  ;;  %12970 = vmatpush3.bf16.msra.mxu0 %v13873_v63  ;;  %v12546_v57 = vpop.f32.mrb[30].mxu0  ;;  %v16525_v56 = vld [vmem:[#allocation2 + $0xf8] sm:$0xff]  ;;  %13144 = vmatmul.mubr.bf16.gmra.mrb[200].mxu1 %v16360_v58 }
 0x329   : > { %v16517_v16 = vld [vmem:[#allocation2 + $0xf0] sm:$0xff]  ;;  %v16520_v47 = vsel %vm2395_vm6, %v9147_v35, %v9151_v11  ;;  %v16532_v6 = vsel %vm1972_vm4, %v9635_v3, %v9636_v27  ;;  %v16536_v22 = vsel %vm1972_vm4, %v9636_v27, %v16374_v28  ;;  %v2365_v35 = vpop.f32.mrb[31].mxu0  ;;  %12971 = vmatprep.subr.bf16.mxu0 %v13875_v20  ;;  %v13877_v19 = vld [vmem:[#allocation4 + $0x1a8] sm:$0xff]   ;;  %v16541_v63 = vsel %vm1972_vm4, %v7408_v41, %v16229_v51 }
 0x32a   : > { %18774 = vst [vmem:[#allocation55_spill] sm:$0xff] %v16503_v4  ;;  %18776 = vst [vmem:[#allocation57_spill] sm:$0xff] %v16520_v47  ;;  %v16529_v15 = vsel %vm2395_vm6, %v9151_v11, %v16503_v4  ;;  %v16544_v11 = vld [vmem:[#allocation2 + $0x78] sm:$0xff]  ;;  %v16549_v42 = vsel %vm1972_vm4, %v16493_v23, %v9650_v7  ;;  %13147 = vmatprep.mubr.bf16.mxu1 %v16363_v34  ;;  %13192 = vmatpush3.bf16.msra.mxu1 %v13872_v40  ;;  %v18619_v27 = vshrl.u32 %v16501_v8, 16  ;;  %v13876_v57 = vld [vmem:[#allocation4 + $0x120] sm:$0xff]  }
 0x32b   : > { %18777 = vst [vmem:[#allocation58_spill] sm:$0xff] %v16529_v15  ;;  %18778 = vst [vmem:[#allocation59_spill] sm:$0xff] %v16532_v6  ;;  %v16553_v58 = vadd.f32 %v2365_v35, %v16290_v49  ;;  %v18620_v51 = vshll.u32 %v16501_v8, 16  ;;  %v18621_v41 = vshrl.u32 %v16517_v16, 16  ;;  %13193 = vmatprep.subr.bf16.mxu1 %v13874_v55  ;;  %12924 = vmatmul.mubr.bf16.gmra.mrb[136].mxu0 %v16217_v26  ;;  %v18781_v3 = vshrl.u32 %v16514_v59, 16  ;;  %v12705_v35 = vpop.f32.mrb[96].mxu1 }
 0x32c   : > { %18779 = vst [vmem:[#allocation60_spill] sm:$0xff] %v16536_v22  ;;  %18780 = vst [vmem:[#allocation61_spill] sm:$0xff] %v16549_v42  ;;  %v18628_v40 = vshrl.u32 %v16525_v56, 16  ;;  %12972 = vmatpush3.bf16.msra.mxu0 %v13875_v20  ;;  %12927 = vmatprep.mubr.bf16.mxu0 %v16222_v61  ;;  %v10088_v2 = vrot.slane %v18619_v27, 3  ;;  %v16575_v42 = vpop.f32.mrb[97].mxu1  ;;  %v13879_v49 = vld [vmem:[#allocation4 + $0x1b0] sm:$0xff]  }
 0x32d   : > { %v16563_v34 = vrot.slane %v18781_v3, 3  ;;  %v10091_v26 = vrot.slane %v18620_v51, 4  ;;  %v10097_v7 = vrot.slane %v18621_v41, 3  ;;  %v18627_v3 = vshll.u32 %v16525_v56, 16  ;;  %12973 = vmatprep.subr.bf16.mxu0 %v13877_v19  ;;  %v12706_v51 = vpop.f32.mrb[98].mxu1  ;;  %v12565_v22 = vpop.f32.mrb[32].mxu0 }
 0x32e   : > { %v18782_v20 = vshll.u32 %v16517_v16, 16  ;;  %v10106_v27 = vrot.slane %v18628_v40, 3  ;;  %v18632_v39 = vshrl.u32 %v16427_v24, 16  ;;  %13194 = vmatpush3.bf16.msra.mxu1 %v13874_v55  ;;  %v16589_v46 = vpop.f32.mrb[99].mxu1  ;;  %v13878_v28 = vld [vmem:[#allocation4 + $0x128] sm:$0xff]   ;;  %v18784_v51 = vor.u32 %v16423_v62, %v16379_v9 }
 0x32f   : > { %v16583_v41 = vor.u32 %v10091_v26, %v10088_v2  ;;  %v10109_v6 = vrot.slane %v18627_v3, 4  ;;  %13195 = vmatprep.subr.bf16.mxu1 %v13876_v57  ;;  %v18633_v26 = vshll.u32 %v16466_v52, 16  ;;  %v18785_v35 = vshll.u32 %v16514_v59, 16  ;;  %v10326_v4 = vld [vmem:[#allocation2 + $0xe0] sm:$0xf0] }
 0x330   : > { %v10100_v61 = vrot.slane %v18782_v20, 4  ;;  %v2531_v20 = vpop.f32.mrb[33].mxu0  ;;  %v5639_v55 = vsel %vm2143_vm5, %v18784_v51, %v16512_v44  ;;  %v10115_v2 = vrot.slane %v18632_v39, 3  ;;  %12974 = vmatpush3.bf16.msra.mxu0 %v13877_v19  ;;  %v18786_v9 = vshll.u32 %v16427_v24, 16  ;;  %13148 = vmatmul.mubr.bf16.gmra.mrb[204].mxu1 %v16388_v12 }
 0x331   : > { %18783 = vst [vmem:[#allocation62_spill] sm:$0xff] %v16583_v41  ;;  %v16600_v3 = vadd.f32 %v2531_v20, %v16321_v14  ;;  %v12566_v40 = vpop.f32.mrb[34].mxu0  ;;  %v5646_v23 = vrot.slane %v18785_v35, 4  ;;  %v10110_v15 = vor.u32 %v10109_v6, %v10106_v27  ;;  %12975 = vmatprep.subr.bf16.mxu0 %v13879_v49  ;;  %v18787_v51 = vshrl.u32 %v16544_v11, 16  ;;  %13151 = vmatprep.mubr.bf16.mxu1 %v16454_v18 }
 0x332   : > { %v10101_v22 = vor.u32 %v10100_v61, %v10097_v7  ;;  %v10118_v62 = vrot.slane %v18786_v9, 4  ;;  %v2534_v7 = vpop.f32.mrb[35].mxu0  ;;  %v13881_v61 = vld [vmem:[#allocation4 + $0x1b8] sm:$0xff]   ;;  %v18789_v19 = vshrl.u32 %v16466_v52, 16  ;;  %v10127_v6 = vrot.slane %v18633_v26, 4  ;;  %13196 = vmatpush3.bf16.msra.mxu1 %v13876_v57 }
 0x333   : > { %v5652_v39 = vrot.slane %v18787_v51, 3  ;;  %v16619_v12 = vadd.f32 %v2534_v7, %v16328_v29  ;;  %v18790_v27 = vshll.u32 %v16544_v11, 16  ;;  %13197 = vmatprep.subr.bf16.mxu1 %v13878_v28  ;;  %12928 = vmatmul.mubr.bf16.gmra.mrb[140].mxu0 %v16001_v38  ;;  %v13880_v51 = vld [vmem:[#allocation4 + $0x130] sm:$0xff]   ;;  %v10556_v26 = vshrl.u32 %v10326_v4, 16  ;;  %v12757_v29 = vpop.f32.mrb[100].mxu1 }
 0x334   : > { %v16611_v14 = vsel %vm2143_vm5, %v16583_v41, %v10101_v22  ;;  %v10124_v40 = vrot.slane %v18789_v19, 3  ;;  %v16624_v20 = vsel %vm2143_vm5, %v10101_v22, %v10110_v15  ;;  %v10119_v9 = vor.u32 %v10118_v62, %v10115_v2  ;;  %12976 = vmatpush3.bf16.msra.mxu0 %v13879_v49  ;;  %12979 = vmatprep.mubr.bf16.mxu0 %v5639_v55 }
 0x335   : > { %18788 = vst [vmem:[#allocation63_spill] sm:$0xff] %v16611_v14  ;;  %v5655_v35 = vrot.slane %v18790_v27, 4  ;;  %18791 = vst [vmem:[#allocation64_spill] sm:$0xff] %v16624_v20  ;;  %v10559_v14 = vshll.u32 %v10326_v4, 16  ;;  %v18793_v18 = vshrl.u32 %v16501_v8, 16  ;;  %v5647_v7 = vor.u32 %v5646_v23, %v16563_v34  ;;  %12977 = vmatprep.subr.bf16.mxu0 %v13881_v61  ;;  %v13883_v4 = vld [vmem:[#allocation4 + $0x200] sm:$0xff]  }
 0x336   : > { %v16627_v19 = vor.u32 %v10127_v6, %v10124_v40  ;;  %v16633_v22 = vsel %vm2143_vm5, %v10110_v15, %v10119_v9  ;;  %v18795_v2 = vshll.u32 %v16501_v8, 16  ;;  %v18796_v38 = vshrl.u32 %v16517_v16, 16  ;;  %v16639_v6 = vpop.f32.mrb[101].mxu1  ;;  %13198 = vmatpush3.bf16.msra.mxu1 %v13878_v28  ;;  %v12569_v8 = vpop.f32.mrb[36].mxu0 }
 0x337   : > { %v10563_v57 = vrot.slane %v18793_v18, 4  ;;  %18794 = vst [vmem:[#allocation66_spill] sm:$0xff] %v16633_v22  ;;  %v10558_v49 = vrot.slane %v10556_v26, 4  ;;  %v10561_v55 = vrot.slane %v10559_v14, 5  ;;  %v18798_v23 = vshll.u32 %v16517_v16, 16  ;;  %v12758_v34 = vpop.f32.mrb[102].mxu1  ;;  %13199 = vmatprep.subr.bf16.mxu1 %v13880_v51 }
 0x338   : > { %18792 = vst [vmem:[#allocation65_spill] sm:$0xff] %v16627_v19  ;;  %v10564_v62 = vrot.slane %v18795_v2, 5  ;;  %v10567_v40 = vrot.slane %v18796_v38, 4  ;;  %v16643_v27 = vsel %vm2143_vm5, %v10119_v9, %v16627_v19  ;;  %v5656_v18 = vor.u32 %v5655_v35, %v5652_v39  ;;  %v16651_v41 = vpop.f32.mrb[103].mxu1  ;;  %v2547_v9 = vpop.f32.mrb[37].mxu0  ;;  %v13882_v26 = vld [vmem:[#allocation4 + $0x138] sm:$0xff]   ;;  %12978 = vmatpush3.bf16.msra.mxu0 %v13881_v61 }
 0x339   : > { %18797 = vst [vmem:[#allocation67_spill] sm:$0xff] %v16643_v27  ;;  %v10568_v15 = vrot.slane %v18798_v23, 5  ;;  %v18799_v2 = vshrl.u32 %v16525_v56, 16  ;;  %v18800_v22 = vshll.u32 %v16525_v56, 16  ;;  %v10562_v14 = vor.u32 %v10561_v55, %v10558_v49  ;;  %13027 = vmatprep.subr.bf16.mxu0 %v13883_v4  ;;  %v13908_v27 = vld [vmem:[#allocation4 + $0x220] sm:$0xff]  }
 0x33a   : > { %v10565_v29 = vor.u32 %v10564_v62, %v10563_v57  ;;  %v18801_v16 = vshrl.u32 %v16427_v24, 16  ;;  %v18802_v28 = vshll.u32 %v16427_v24, 16  ;;  %v18803_v35 = vor.u32 %v16499_v17, %v16484_v21  ;;  %v13885_v24 = vld [vmem:[#allocation4 + $0x208] sm:$0xff]   ;;  %13200 = vmatpush3.bf16.msra.mxu1 %v13880_v51 }
 0x33b   : > { %v10571_v38 = vrot.slane %v18799_v2, 4  ;;  %v10572_v20 = vrot.slane %v18800_v22, 5  ;;  %v10569_v19 = vor.u32 %v10568_v15, %v10567_v40  ;;  %v16663_v57 = vadd.f32 %v2547_v9, %v16370_v53  ;;  %v12570_v22 = vpop.f32.mrb[38].mxu0  ;;  %13201 = vmatprep.subr.bf16.mxu1 %v13882_v26 }
 0x33c   : > { %v10575_v23 = vrot.slane %v18801_v16, 4  ;;  %v10576_v39 = vrot.slane %v18802_v28, 5  ;;  %v6938_v56 = vsel %vm2395_vm6, %v16377_v32, %v18803_v35  ;;  %v18804_v40 = vshrl.u32 %v16466_v52, 16  ;;  %v2550_v55 = vpop.f32.mrb[39].mxu0  ;;  %v13889_v28 = vld [vmem:[#allocation4 + $0x218] sm:$0xff]  }
 0x33d   : > { %v10573_v62 = vor.u32 %v10572_v20, %v10571_v38  ;;  %13152 = vmatmul.mubr.bf16.gmra.mrb[208].mxu1 %v6938_v56  ;;  %v16668_v15 = vsel %vm2395_vm6, %v10562_v14, %v10565_v29  ;;  %v16671_v21 = vsel %vm2395_vm6, %v10565_v29, %v10569_v19  ;;  %v18807_v53 = vshll.u32 %v16466_v52, 16  ;;  %v13884_v29 = vld [vmem:[#allocation4 + $0x180] sm:$0xff]   ;;  %v13886_v14 = vld [vmem:[#allocation4 + $0x188] sm:$0xff]  }
 0x33e   : > { %v10579_v49 = vrot.slane %v18804_v40, 4  ;;  %18805 = vst [vmem:[#allocation68_spill] sm:$0xff] %v16668_v15  ;;  %18806 = vst [vmem:[#allocation69_spill] sm:$0xff] %v16671_v21  ;;  %v10577_v32 = vor.u32 %v10576_v39, %v10575_v23  ;;  %13203 = vmatprep.mubr.bf16.mxu1 %v16541_v63  ;;  %v16677_v61 = vadd.f32 %v2550_v55, %v16384_v33  ;;  %v12761_v63 = vpop.f32.mrb[104].mxu1  ;;  %13202 = vmatpush3.bf16.msra.mxu1 %v13882_v26  ;;  %v13891_v56 = vld [vmem:[#allocation4 + $0x220] sm:$0xff]   ;;  %v13909_v21 = vld [vmem:[#allocation4 + $0x28] sm:$0xff]  }
 0x33f   : > { %v10580_v17 = vrot.slane %v18807_v53, 5  ;;  %v5648_v20 = vsel %vm2143_vm5, %v16512_v44, %v5647_v7  ;;  %v16682_v34 = vsel %vm2395_vm6, %v10569_v19, %v10573_v62  ;;  %v5657_v8 = vsel %vm2143_vm5, %v5647_v7, %v5656_v18  ;;  %v16690_v33 = vpop.f32.mrb[105].mxu1  ;;  %v13887_v44 = vld [vmem:[#allocation4 + $0x210] sm:$0xff]   ;;  %v12573_v7 = vpop.f32.mrb[40].mxu0  ;;  %13251 = vmatprep.subr.bf16.mxu1 %v13884_v29 }
 0x340   : > { %18808 = vst [vmem:[#allocation70_spill] sm:$0xff] %v16682_v34  ;;  %12980 = vmatmul.mubr.bf16.vlgmr.msra.gmra.mrb[144].mxu0 %v5648_v20  ;;  %v16686_v52 = vsel %vm2395_vm6, %v10573_v62, %v10577_v32  ;;  %v12762_v2 = vpop.f32.mrb[106].mxu1  ;;  %v2563_v9 = vpop.f32.mrb[41].mxu0  ;;  %v5666_v39 = vsel %vm2143_vm5, %v5656_v18, %v16019_v13  ;;  %v5698_v22 = vshll.u32 %v16240_v48, 16  ;;  %v13890_v18 = vld [vmem:[#allocation4 + $0x198] sm:$0xff]  }
 0x341   : > { %18809 = vst [vmem:[#allocation71_spill] sm:$0xff] %v16686_v52  ;;  %v16688_v51 = vor.u32 %v10580_v17, %v10579_v49  ;;  %13028 = vmatpush3.bf16.msra.mxu0 %v13883_v4  ;;  %12983 = vmatprep.mubr.bf16.mxu0 %v5657_v8  ;;  %v16696_v38 = vpop.f32.mrb[107].mxu1  ;;  %v16699_v16 = vadd.f32 %v2563_v9, %v16441_v5  ;;  %v12574_v4 = vpop.f32.mrb[42].mxu0  ;;  %v13888_v5 = vld [vmem:[#allocation4 + $0x190] sm:$0xff]   ;;  %v16721_v20 = vld [vmem:[#allocation2 + $0xc8] sm:$0xff]  ;;  %v13893_v8 = vld [vmem:[#allocation4 + $0x228] sm:$0xff]  }
 0x342   : > { %13029 = vmatprep.subr.bf16.mxu0 %v13885_v24  ;;  %v2566_v23 = vpop.f32.mrb[43].mxu0  ;;  %v14289_v49 = vld [vmem:[#allocation2 + $0x60] sm:$0xf0]  ;;  %v5700_v63 = vrot.slane %v5698_v22, 4  ;;  %v18812_v9 = vshrl.u32 %v16390_v36, 16  ;;  %v18813_v4 = vshll.u32 %v16390_v36, 16 }
 0x343   : > { %18810 = vst [vmem:[#allocation72_spill] sm:$0xff] %v16688_v51  ;;  %v16694_v19 = vsel %vm2395_vm6, %v10577_v32, %v16688_v51  ;;  %v16704_v26 = vadd.f32 %v2566_v23, %v16464_v10  ;;  %v12765_v35 = vpop.f32.mrb[108].mxu1  ;;  %v6102_v55 = vshrl.u32 %v14289_v49, 16  ;;  %v7825_v53 = vld [vmem:[#allocation2 + $0xa0] sm:$0xf8] }
 0x344   : > { %18811 = vst [vmem:[#allocation73_spill] sm:$0xff] %v16694_v19  ;;  %v16719_v17 = vld [vmem:[#allocation2 + $0xc0] sm:$0xff]  ;;  %v6110_v23 = vrot.slane %v18813_v4, 5  ;;  %v7854_v22 = vshll.u32 %v7825_v53, 16 }
 0x345   : > { %13030 = vmatpush3.bf16.msra.mxu0 %v13885_v24  ;;  %13204 = vmatmul.mubr.bf16.vlgmr.msra.gmra.mrb[212].mxu1 %v16284_v54  ;;  %v16709_v54 = vpop.f32.mrb[109].mxu1  ;;  %v12577_v62 = vpop.f32.mrb[44].mxu0  ;;  %v6105_v24 = vshll.u32 %v14289_v49, 16  ;;  %v6104_v2 = vrot.slane %v6102_v55, 4  ;;  %v13895_v35 = vld [vmem:[#allocation4 + $0x230] sm:$0xff]   ;;  %v13894_v55 = vld [vmem:[#allocation4 + $0x1a8] sm:$0xff]  }
 0x346   : > { %13031 = vmatprep.subr.bf16.mxu0 %v13887_v44  ;;  %13207 = vmatprep.mubr.bf16.mxu1 %v16288_v37  ;;  %v5695_v37 = vshrl.u32 %v16240_v48, 16  ;;  %v12766_v10 = vpop.f32.mrb[110].mxu1  ;;  %v2579_v13 = vpop.f32.mrb[45].mxu0 }
 0x347   : > { %13252 = vmatpush3.bf16.msra.mxu1 %v13884_v29  ;;  %v16713_v40 = vpop.f32.mrb[111].mxu1  ;;  %v12578_v32 = vpop.f32.mrb[46].mxu0  ;;  %v6107_v7 = vrot.slane %v6105_v24, 5 }
 0x348   : > { %13253 = vmatprep.subr.bf16.mxu1 %v13886_v14  ;;  %12984 = vmatmul.mubr.bf16.gmra.mrb[148].mxu0 %v5666_v39  ;;  %v2582_v48 = vpop.f32.mrb[47].mxu0  ;;  %v5697_v29 = vrot.slane %v5695_v37, 3  ;;  %v7851_v39 = vshrl.u32 %v7825_v53, 16 }
 0x349   : > { %13032 = vmatpush3.bf16.msra.mxu0 %v13887_v44  ;;  %12987 = vmatprep.mubr.bf16.mxu0 %v16034_v0  ;;  %v16716_v0 = vadd.f32 %v2579_v13, %v16523_v45  ;;  %v16725_v45 = vadd.f32 %v2582_v48, %v16553_v58  ;;  %v16727_v44 = vld [vmem:[#allocation2 + $0xa8] sm:$0xff]  ;;  %v7421_v58 = vrot.slane %v16721_v20, 4  ;;  %v6108_v24 = vor.u32 %v6107_v7, %v6104_v2  ;;  %v18814_v48 = vld [vmem:[#allocation32_spill] sm:$0xff] }
 0x34a   : > { %13033 = vmatprep.subr.bf16.mxu0 %v13889_v28  ;;  %v5701_v37 = vor.u32 %v5700_v63, %v5697_v29  ;;  %v18637_v10 = vshrl.u32 %v16727_v44, 16  ;;  %v18636_v36 = vshll.u32 %v16727_v44, 16  ;;  %v16751_v63 = vld [vmem:[#allocation2 + $0xd0] sm:$0xf]  ;;  %v7853_v4 = vrot.slane %v7851_v39, 3  ;;  %v18815_v2 = vld [vmem:[#allocation20_spill] sm:$0xff] }
 0x34b   : > { %13254 = vmatpush3.bf16.msra.mxu1 %v13886_v14  ;;  %v6109_v14 = vrot.slane %v18812_v9, 4  ;;  %v18816_v39 = vshrl.u32 %v16514_v59, 16 }
 0x34c   : > { %13255 = vmatprep.subr.bf16.mxu1 %v13888_v5  ;;  %v5702_v7 = vsel %vm2143_vm5, %v18815_v2, %v5701_v37 }
 0x34d   : > { %13034 = vmatpush3.bf16.msra.mxu0 %v13889_v28  ;;  %13208 = vmatmul.mubr.bf16.gmra.mrb[216].mxu1 %v16314_v60  ;;  %v13892_v60 = vld [vmem:[#allocation4 + $0x1a0] sm:$0xff]   ;;  %v12769_v28 = vpop.f32.mrb[112].mxu1  ;;  %v16743_v32 = vor.u32 %v6110_v23, %v6109_v14  ;;  %v7856_v14 = vrot.slane %v7854_v22, 4  ;;  %v7861_v23 = vrot.slane %v18637_v10, 3  ;;  %v16766_v22 = vld [vmem:[#allocation2 + $0xb8] sm:$0xff] }
 0x34e   : > { %13035 = vmatprep.subr.bf16.mxu0 %v13891_v56  ;;  %13211 = vmatprep.mubr.bf16.mxu1 %v16318_v50  ;;  %v7419_v50 = vrot.slane %v16719_v17, 4 }
 0x34f   : > { %13256 = vmatpush3.bf16.msra.mxu1 %v13888_v5  ;;  %v16737_v5 = vpop.f32.mrb[113].mxu1 }
 0x350   : > { %13257 = vmatprep.subr.bf16.mxu1 %v13890_v18  ;;  %12988 = vmatmul.mubr.bf16.gmra.mrb[152].mxu0 %v16147_v25  ;;  %v12770_v62 = vpop.f32.mrb[114].mxu1  ;;  %v7420_v9 = vsel %vm1972_vm4, %v18814_v48, %v7419_v50  ;;  %v7422_v53 = vsel %vm1972_vm4, %v7419_v50, %v7421_v58  ;;  %v7864_v50 = vrot.slane %v18636_v36, 4  ;;  %v18818_v48 = vld [vmem:[#allocation26_spill] sm:$0xff]  ;;  %v7857_v36 = vor.u32 %v7856_v14, %v7853_v4 }
 0x351   : > { %13036 = vmatpush3.bf16.msra.mxu0 %v13891_v56  ;;  %12991 = vmatprep.mubr.bf16.mxu0 %v16158_v30  ;;  %v12597_v56 = vpop.f32.mrb[48].mxu0  ;;  %v16741_v13 = vpop.f32.mrb[115].mxu1  ;;  %v13897_v62 = vld [vmem:[#allocation4 + $0x238] sm:$0xff]  }
 0x352   : > { %13037 = vmatprep.subr.bf16.mxu0 %v13893_v8  ;;  %v2806_v49 = vpop.f32.mrb[49].mxu0  ;;  %v6113_v56 = vrot.slane %v18816_v39, 4  ;;  %v7865_v10 = vor.u32 %v7864_v50, %v7861_v23 }
 0x353   : > { %13258 = vmatpush3.bf16.msra.mxu1 %v13890_v18  ;;  %v2869_v29 = vadd.f32 %v2806_v49, %v16600_v3  ;;  %v12598_v18 = vpop.f32.mrb[50].mxu0  ;;  %v16759_v3 = vld [vmem:[#allocation2 + $0xb0] sm:$0xff]  ;;  %v18817_v49 = vshll.u32 %v16514_v59, 16  ;;  %v12821_v39 = vpop.f32.mrb[116].mxu1  ;;  %v7423_v59 = vrot.slane %v16751_v63, 4 }
 0x354   : > { %13259 = vmatprep.subr.bf16.mxu1 %v13892_v60  ;;  %v2809_v28 = vpop.f32.mrb[51].mxu0  ;;  %v6112_v18 = vsel %vm2395_vm6, %v6108_v24, %v16743_v32  ;;  %v16783_v24 = vpop.f32.mrb[117].mxu1  ;;  %v18822_v50 = vshrl.u32 %v16759_v3, 16 }
 0x355   : > { %13038 = vmatpush3.bf16.msra.mxu0 %v13893_v8  ;;  %13212 = vmatmul.mubr.bf16.gmra.mrb[220].mxu1 %v7420_v9  ;;  %v2870_v8 = vadd.f32 %v2809_v28, %v16619_v12  ;;  %v6114_v37 = vrot.slane %v18817_v49, 5  ;;  %v16769_v9 = vadd.f32 %v18818_v48, %v2869_v29  ;;  %v18820_v28 = vshll.u32 %v16544_v11, 16 }
 0x356   : > { %13039 = vmatprep.subr.bf16.mxu0 %v13895_v35  ;;  %13215 = vmatprep.mubr.bf16.mxu1 %v7422_v53  ;;  %v13896_v53 = vld [vmem:[#allocation4 + $0x1b0] sm:$0xff]   ;;  %v7424_v4 = vsel %vm1972_vm4, %v7421_v58, %v7423_v59 }
 0x357   : > { %13260 = vmatpush3.bf16.msra.mxu1 %v13892_v60  ;;  %v18819_v60 = vshrl.u32 %v16544_v11, 16  ;;  %v6118_v2 = vrot.slane %v18820_v28, 5  ;;  %v18643_v11 = vshrl.u32 %v16766_v22, 16  ;;  %v12601_v28 = vpop.f32.mrb[52].mxu0  ;;  %v6115_v39 = vor.u32 %v6114_v37, %v6113_v56  ;;  %v18824_v59 = vld [vmem:[#allocation28_spill] sm:$0xff] }
 0x358   : > { %13261 = vmatprep.subr.bf16.mxu1 %v13894_v55  ;;  %12992 = vmatmul.mubr.bf16.gmra.mrb[156].mxu0 %v5702_v7  ;;  %v18821_v7 = vld [vmem:[#allocation27_spill] sm:$0xff]  ;;  %v2822_v49 = vpop.f32.mrb[53].mxu0  ;;  %v7866_v37 = vsel %vm2143_vm5, %v7857_v36, %v7865_v10 }
 0x359   : > { %v6117_v12 = vrot.slane %v18819_v60, 4  ;;  %13040 = vmatpush3.bf16.msra.mxu0 %v13895_v35  ;;  %13043 = vmatprep.mubr.bf16.mxu0 %v6112_v18  ;;  %v16781_v48 = vadd.f32 %v18821_v7, %v2870_v8  ;;  %v13899_v60 = vld [vmem:[#allocation4] sm:$0xff]   ;;  %v18638_v35 = vshll.u32 %v16766_v22, 16  ;;  %v12822_v18 = vpop.f32.mrb[118].mxu1  ;;  %v13898_v8 = vld [vmem:[#allocation4 + $0x1b8] sm:$0xff]   ;;  %v2873_v14 = vadd.f32 %v2822_v49, %v16663_v57  ;;  %v12602_v23 = vpop.f32.mrb[54].mxu0 }
 0x35a   : > { %13041 = vmatprep.subr.bf16.mxu0 %v13897_v62  ;;  %v16787_v29 = vpop.f32.mrb[119].mxu1  ;;  %v7870_v18 = vrot.slane %v18822_v50, 3  ;;  %v2825_v28 = vpop.f32.mrb[55].mxu0  ;;  %v13901_v57 = vld [vmem:[#allocation4 + $0x8] sm:$0xff]  }
 0x35b   : > { %13262 = vmatpush3.bf16.msra.mxu1 %v13894_v55  ;;  %v6119_v7 = vor.u32 %v6118_v2, %v6117_v12  ;;  %v18823_v55 = vshll.u32 %v16759_v3, 16  ;;  %v7879_v12 = vrot.slane %v18643_v11, 3  ;;  %v7882_v58 = vrot.slane %v18638_v35, 4  ;;  %v12825_v23 = vpop.f32.mrb[120].mxu1  ;;  %v6084_v11 = vld [vmem:[#allocation2 + $0xa0] sm:$0x1f] }
 0x35c   : > { %13263 = vmatprep.subr.bf16.mxu1 %v13896_v53  ;;  %v6116_v2 = vsel %vm2395_vm6, %v16743_v32, %v6115_v39  ;;  %v16806_v49 = vadd.f32 %v18824_v59, %v2873_v14  ;;  %v16814_v32 = vpop.f32.mrb[121].mxu1 }
 0x35d   : > { %13042 = vmatpush3.bf16.msra.mxu0 %v13897_v62  ;;  %v7873_v56 = vrot.slane %v18823_v55, 4  ;;  %13216 = vmatmul.mubr.bf16.gmra.mrb[224].mxu1 %v7424_v4  ;;  %v2874_v62 = vadd.f32 %v2825_v28, %v16677_v61  ;;  %v6120_v36 = vsel %vm2395_vm6, %v6115_v39, %v6119_v7  ;;  %v13900_v4 = vld [vmem:[#allocation4 + $0x200] sm:$0xff]   ;;  %v18639_v55 = vshll.u32 %v16719_v17, 16  ;;  %v18825_v61 = vld [vmem:[#allocation29_spill] sm:$0xff]  ;;  %v13903_v28 = vld [vmem:[#allocation4 + $0x10] sm:$0xff]  }
 0x35e   : > { %13091 = vmatprep.subr.bf16.mxu0 %v13899_v60  ;;  %13267 = vmatprep.mubr.bf16.mxu1 %v7866_v37  ;;  %v16816_v14 = vor.u32 %v7882_v58, %v7879_v12  ;;  %v18641_v39 = vshrl.u32 %v16721_v20, 16 }
 0x35f   : > { %13264 = vmatpush3.bf16.msra.mxu1 %v13896_v53  ;;  %v7874_v50 = vor.u32 %v7873_v56, %v7870_v18  ;;  %v18640_v53 = vshrl.u32 %v16719_v17, 16  ;;  %v16812_v37 = vadd.f32 %v18825_v61, %v2874_v62  ;;  %v12605_v18 = vpop.f32.mrb[56].mxu0  ;;  %v16822_v62 = vld [vmem:[#allocation2 + $0xd0] sm:$0xff] }
 0x360   : > { %13265 = vmatprep.subr.bf16.mxu1 %v13898_v8  ;;  %13044 = vmatmul.mubr.bf16.vlgmr.msra.gmra.mrb[160].mxu0 %v6116_v2  ;;  %v18642_v2 = vshll.u32 %v16721_v20, 16  ;;  %v2838_v59 = vpop.f32.mrb[57].mxu0  ;;  %v7897_v35 = vrot.slane %v18641_v39, 3  ;;  %v13904_v39 = vld [vmem:[#allocation4 + $0x210] sm:$0xff]  }
 0x361   : > { %13092 = vmatpush3.bf16.msra.mxu0 %v13899_v60  ;;  %13047 = vmatprep.mubr.bf16.mxu0 %v6120_v36  ;;  %v12826_v60 = vpop.f32.mrb[122].mxu1  ;;  %v13902_v36 = vld [vmem:[#allocation4 + $0x208] sm:$0xff]   ;;  %v7875_v23 = vsel %vm2143_vm5, %v7865_v10, %v7874_v50  ;;  %v2877_v12 = vadd.f32 %v2838_v59, %v16699_v16  ;;  %v12606_v58 = vpop.f32.mrb[58].mxu0  ;;  %v7888_v61 = vrot.slane %v18640_v53, 3  ;;  %v13905_v10 = vld [vmem:[#allocation4 + $0x18] sm:$0xff]  }
 0x362   : > { %13093 = vmatprep.subr.bf16.mxu0 %v13901_v57  ;;  %v16820_v56 = vpop.f32.mrb[123].mxu1  ;;  %v7884_v60 = vsel %vm2143_vm5, %v7874_v50, %v16816_v14  ;;  %v2841_v18 = vpop.f32.mrb[59].mxu0  ;;  %v7900_v16 = vrot.slane %v18642_v2, 4  ;;  %v18826_v58 = vld [vmem:[#allocation14_spill] sm:$0xff]  ;;  %v18645_v50 = vshrl.u32 %v16822_v62, 16 }
 0x363   : > { %13266 = vmatpush3.bf16.msra.mxu1 %v13898_v8  ;;  %v7891_v8 = vrot.slane %v18639_v55, 4  ;;  %v2878_v59 = vadd.f32 %v2841_v18, %v16704_v26  ;;  %v18827_v55 = vld [vmem:[#allocation30_spill] sm:$0xff]  ;;  %v12829_v51 = vpop.f32.mrb[124].mxu1  ;;  %v6423_v18 = vld [vmem:[#allocation2 + $0x80] sm:$0xf8] }
 0x364   : > { %13315 = vmatprep.subr.bf16.mxu1 %v13900_v4  ;;  %v16843_v53 = vadd.f32 %v18827_v55, %v2877_v12  ;;  %v16854_v12 = vpop.f32.mrb[125].mxu1  ;;  %v13907_v2 = vld [vmem:[#allocation4 + $0x20] sm:$0xff]  }
 0x365   : > { %13094 = vmatpush3.bf16.msra.mxu0 %v13901_v57  ;;  %v16836_v57 = vld [vmem:[#allocation2 + $0xd8] sm:$0xff]  ;;  %v12830_v51 = vpop.f32.mrb[126].mxu1 }
 0x366   : > { %13268 = vmatmul.mubr.bf16.vlgmr.msra.gmra.mrb[228].mxu1 %v7875_v23  ;;  %13095 = vmatprep.subr.bf16.mxu0 %v13903_v28  ;;  %v6124_v23 = vsel %vm2395_vm6, %v6119_v7, %v18826_v58  ;;  %v18829_v58 = vld [vmem:[#allocation31_spill] sm:$0xff]  ;;  %v16860_v26 = vpop.f32.mrb[127].mxu1  ;;  %v18833_v52 = vshll.u32 %v16836_v57, 16 }
 0x367   : > { %13271 = vmatprep.mubr.bf16.mxu1 %v7884_v60  ;;  %13316 = vmatpush3.bf16.msra.mxu1 %v13900_v4  ;;  %v18828_v60 = vld [vmem:[#allocation16_spill] sm:$0xff]  ;;  %v16847_v4 = vor.u32 %v7891_v8, %v7888_v61  ;;  %v16852_v55 = vadd.f32 %v18829_v58, %v2878_v59  ;;  %v7906_v61 = vrot.slane %v18645_v50, 3  ;;  %v6138_v8 = vshrl.u32 %v6084_v11, 16  ;;  %18830 = vst [vmem:[#allocation32_spill] sm:$0xff] %v16860_v26  ;;  %v13906_v59 = vld [vmem:[#allocation4 + $0x218] sm:$0xff]   ;;  %v18836_v26 = vld [vmem:[#allocation19_spill] sm:$0xff] }
 0x368   : > { %13317 = vmatprep.subr.bf16.mxu1 %v13902_v36  ;;  %13048 = vmatmul.mubr.bf16.gmra.mrb[164].mxu0 %v6124_v23  ;;  %v16856_v23 = vor.u32 %v7900_v16, %v7897_v35  ;;  %v18831_v58 = vshll.u32 %v16822_v62, 16  ;;  %v6645_v35 = vshrl.u32 %v6423_v18, 16  ;;  %v6648_v16 = vshll.u32 %v6423_v18, 16 }
 0x369   : > { %13096 = vmatpush3.bf16.msra.mxu0 %v13903_v28  ;;  %13051 = vmatprep.mubr.bf16.mxu0 %v18828_v60  ;;  %v12609_v28 = vpop.f32.mrb[60].mxu0  ;;  %v6141_v60 = vshll.u32 %v6084_v11, 16  ;;  %v18832_v11 = vshrl.u32 %v16836_v57, 16  ;;  %v7918_v34 = vrot.slane %v18833_v52, 4 }
 0x36a   : > { %13097 = vmatprep.subr.bf16.mxu0 %v13905_v10  ;;  %v2854_v7 = vpop.f32.mrb[61].mxu0  ;;  %v7909_v19 = vrot.slane %v18831_v58, 4  ;;  %v16875_v58 = vsel %vm2143_vm5, %v16847_v4, %v16856_v23  ;;  %v6647_v47 = vrot.slane %v6645_v35, 3  ;;  %v6650_v1 = vrot.slane %v6648_v16, 4 }
 0x36b   : > { %13318 = vmatpush3.bf16.msra.mxu1 %v13902_v36  ;;  %v7893_v36 = vsel %vm2143_vm5, %v16816_v14, %v16847_v4  ;;  %v2881_v51 = vadd.f32 %v2854_v7, %v16716_v0  ;;  %v12610_v28 = vpop.f32.mrb[62].mxu0  ;;  %v7915_v50 = vrot.slane %v18832_v11, 3  ;;  %v7833_v14 = vld [vmem:[#allocation2 + $0xe0] sm:$0xf]  ;;  %v6143_v7 = vrot.slane %v6141_v60, 5  ;;  %v18834_v11 = vld [vmem:[#allocation33_spill] sm:$0xff] }
 0x36c   : > { %13319 = vmatprep.subr.bf16.mxu1 %v13904_v39  ;;  %v2857_v18 = vpop.f32.mrb[63].mxu0  ;;  %v8099_v28 = vld [vmem:[#allocation2 + $0xa0] sm:$0xf0]  ;;  %v16883_v15 = vor.u32 %v7909_v19, %v7906_v61  ;;  %v12833_v31 = vpop.f32.mrb[128].mxu1  ;;  %v18837_v60 = vld [vmem:[#allocation34_spill] sm:$0xff]  ;;  %v6651_v16 = vor.u32 %v6650_v1, %v6647_v47  ;;  %v18841_v1 = vshll.u32 %v16727_v44, 16 }
 0x36d   : > { %13098 = vmatpush3.bf16.msra.mxu0 %v13905_v10  ;;  %v2882_v0 = vadd.f32 %v2857_v18, %v16725_v45  ;;  %v6140_v10 = vrot.slane %v6138_v8, 4  ;;  %v16880_v52 = vadd.f32 %v18834_v11, %v2881_v51  ;;  %v7922_v45 = vshrl.u32 %v7833_v14, 16  ;;  %v16891_v51 = vpop.f32.mrb[129].mxu1  ;;  %v13911_v11 = vld [vmem:[#allocation4 + $0x30] sm:$0xff]   ;;  %v12661_v35 = vpop.f32.mrb[64].mxu0 }
 0x36e   : > { %13272 = vmatmul.mubr.bf16.gmra.mrb[232].mxu1 %v7893_v36  ;;  %13099 = vmatprep.subr.bf16.mxu0 %v13907_v2  ;;  %v18835_v36 = vld [vmem:[#allocation18_spill] sm:$0xff]  ;;  %v7925_v8 = vshll.u32 %v7833_v14, 16  ;;  %18838 = vst [vmem:[#allocation20_spill] sm:$0xff] %v16891_v51  ;;  %v8329_v19 = vshrl.u32 %v8099_v28, 16  ;;  %v8332_v61 = vshll.u32 %v8099_v28, 16  ;;  %v18840_v35 = vshrl.u32 %v16727_v44, 16 }
 0x36f   : > { %13275 = vmatprep.mubr.bf16.mxu1 %v16875_v58  ;;  %13320 = vmatpush3.bf16.msra.mxu1 %v13904_v39  ;;  %v16886_v39 = vor.u32 %v7918_v34, %v7915_v50  ;;  %v16889_v18 = vadd.f32 %v18837_v60, %v2882_v0  ;;  %v6144_v31 = vor.u32 %v6143_v7, %v6140_v10  ;;  %v3251_v50 = vpop.f32.mrb[65].mxu0  ;;  %v7924_v10 = vrot.slane %v7922_v45, 3  ;;  %v13913_v51 = vld [vmem:[#allocation4 + $0x38] sm:$0xff]  }
 0x370   : > { %13321 = vmatprep.subr.bf16.mxu1 %v13906_v59  ;;  %13052 = vmatmul.mubr.bf16.gmra.mrb[168].mxu0 %v18835_v36  ;;  %v12834_v36 = vpop.f32.mrb[130].mxu1  ;;  %v7911_v34 = vsel %vm2143_vm5, %v16856_v23, %v16883_v15  ;;  %v3314_v0 = vadd.f32 %v3251_v50, %v16769_v9  ;;  %v7927_v7 = vrot.slane %v7925_v8, 4  ;;  %v8331_v60 = vrot.slane %v8329_v19, 4  ;;  %v18842_v9 = vld [vmem:[#allocation17_spill] sm:$0xff]  ;;  %v18843_v8 = vld [vmem:[#allocation36_spill] sm:$0xff]  ;;  %v18844_v19 = vld [vmem:[#allocation15_spill] sm:$0xff] }
 0x371   : > { %13100 = vmatpush3.bf16.msra.mxu0 %v13907_v2  ;;  %13055 = vmatprep.mubr.bf16.mxu0 %v18836_v26  ;;  %v16893_v2 = vpop.f32.mrb[131].mxu1  ;;  %v13910_v26 = vld [vmem:[#allocation4 + $0x228] sm:$0xff]   ;;  %v16901_v14 = vsel %vm2143_vm5, %v16883_v15, %v16886_v39  ;;  %v8334_v36 = vrot.slane %v8332_v61, 5  ;;  %v8337_v47 = vrot.slane %v18841_v1, 5  ;;  %v6145_v45 = vsel %vm2395_vm6, %v18842_v9, %v6144_v31  ;;  %v13912_v50 = vld [vmem:[#allocation4 + $0x230] sm:$0xff]  }
 0x372   : > { %13101 = vmatprep.subr.bf16.mxu0 %v13909_v21  ;;  %18839 = vst [vmem:[#allocation26_spill] sm:$0xff] %v16893_v2  ;;  %v8336_v2 = vrot.slane %v18840_v35, 4  ;;  %v6660_v61 = vsel %vm2143_vm5, %v6651_v16, %v18844_v19  ;;  %v18845_v35 = vld [vmem:[#allocation39_spill] sm:$0xff]  ;;  %v18850_v19 = vshrl.u32 %v16766_v22, 16 }
 0x373   : > { %13322 = vmatpush3.bf16.msra.mxu1 %v13906_v59  ;;  %v12662_v59 = vpop.f32.mrb[66].mxu0  ;;  %v12885_v44 = vpop.f32.mrb[132].mxu1 }
 0x374   : > { %13323 = vmatprep.subr.bf16.mxu1 %v13908_v27  ;;  %v3254_v28 = vpop.f32.mrb[67].mxu0  ;;  %v7928_v59 = vor.u32 %v7927_v7, %v7924_v10  ;;  %v8338_v31 = vor.u32 %v8337_v47, %v8336_v2  ;;  %v18851_v44 = vshll.u32 %v16766_v22, 16 }
 0x375   : > { %13102 = vmatpush3.bf16.msra.mxu0 %v13909_v21  ;;  %v3315_v21 = vadd.f32 %v3254_v28, %v16781_v48  ;;  %v16920_v48 = vpop.f32.mrb[133].mxu1  ;;  %v8335_v28 = vor.u32 %v8334_v36, %v8331_v60  ;;  %v12665_v9 = vpop.f32.mrb[68].mxu0  ;;  %v18848_v60 = vshrl.u32 %v16759_v3, 16  ;;  %v18849_v36 = vshll.u32 %v16759_v3, 16  ;;  %v13916_v3 = vld [vmem:[#allocation4] sm:$0xff]  }
 0x376   : > { %13276 = vmatmul.mubr.bf16.gmra.mrb[236].mxu1 %v7911_v34  ;;  %13103 = vmatprep.subr.bf16.mxu0 %v13911_v11  ;;  %v16913_v34 = vadd.f32 %v18843_v8, %v3314_v0  ;;  %18846 = vst [vmem:[#allocation27_spill] sm:$0xff] %v16920_v48  ;;  %v13915_v0 = vld [vmem:[#allocation4 + $0xc0] sm:$0xff]   ;;  %v12886_v1 = vpop.f32.mrb[134].mxu1  ;;  %v3267_v16 = vpop.f32.mrb[69].mxu0  ;;  %v13914_v8 = vld [vmem:[#allocation4 + $0x238] sm:$0xff]  }
 0x377   : > { %13279 = vmatprep.mubr.bf16.mxu1 %v16901_v14  ;;  %13324 = vmatpush3.bf16.msra.mxu1 %v13908_v27  ;;  %v16918_v27 = vadd.f32 %v18845_v35, %v3315_v21  ;;  %v3318_v10 = vadd.f32 %v3267_v16, %v16806_v49  ;;  %v12666_v7 = vpop.f32.mrb[70].mxu0  ;;  %v8340_v2 = vrot.slane %v18848_v60, 4  ;;  %v8341_v47 = vrot.slane %v18849_v36, 5  ;;  %v13917_v49 = vld [vmem:[#allocation4 + $0xc8] sm:$0xff]   ;;  %v18852_v35 = vld [vmem:[#allocation44_spill] sm:$0xff] }
 0x378   : > { %13325 = vmatprep.subr.bf16.mxu1 %v13910_v26  ;;  %13056 = vmatmul.mubr.bf16.gmra.mrb[172].mxu0 %v6145_v45  ;;  %v16922_v45 = vpop.f32.mrb[135].mxu1  ;;  %v3270_v21 = vpop.f32.mrb[71].mxu0  ;;  %v18853_v16 = vld [vmem:[#allocation48_spill] sm:$0xff]  ;;  %v18855_v60 = vshrl.u32 %v16719_v17, 16  ;;  %v18856_v36 = vshll.u32 %v16719_v17, 16 }
 0x379   : > { %13104 = vmatpush3.bf16.msra.mxu0 %v13911_v11  ;;  %13107 = vmatprep.mubr.bf16.mxu0 %v6660_v61  ;;  %18847 = vst [vmem:[#allocation28_spill] sm:$0xff] %v16922_v45  ;;  %v7929_v11 = vsel %vm2143_vm5, %v16886_v39, %v7928_v59  ;;  %v8344_v61 = vrot.slane %v18850_v19, 4  ;;  %v8345_v59 = vrot.slane %v18851_v44, 5  ;;  %v16938_v1 = vadd.f32 %v18852_v35, %v3318_v10  ;;  %v13921_v35 = vld [vmem:[#allocation4 + $0xd8] sm:$0xff]  }
 0x37a   : > { %13105 = vmatprep.subr.bf16.mxu0 %v13913_v51  ;;  %v8342_v9 = vor.u32 %v8341_v47, %v8340_v2  ;;  %v13918_v2 = vld [vmem:[#allocation4 + $0x8] sm:$0xff]   ;;  %v18858_v47 = vshrl.u32 %v16721_v20, 16  ;;  %v18859_v19 = vshll.u32 %v16721_v20, 16  ;;  %v18860_v20 = vld [vmem:[#allocation52_spill] sm:$0xff] }
 0x37b   : > { %13326 = vmatpush3.bf16.msra.mxu1 %v13910_v26  ;;  %v8339_v26 = vsel %vm2395_vm6, %v8335_v28, %v8338_v31  ;;  %v12889_v28 = vpop.f32.mrb[136].mxu1 }
 0x37c   : > { %13327 = vmatprep.subr.bf16.mxu1 %v13912_v50  ;;  %v7108_v28 = vld [vmem:[#allocation2 + $0x90] sm:$0xf8] }
 0x37d   : > { %13106 = vmatpush3.bf16.msra.mxu0 %v13913_v51  ;;  %v3319_v51 = vadd.f32 %v3270_v21, %v16812_v37  ;;  %v13919_v37 = vld [vmem:[#allocation4 + $0xd0] sm:$0xff]   ;;  %v12669_v10 = vpop.f32.mrb[72].mxu0  ;;  %v8352_v21 = vrot.slane %v18858_v47, 4 }
 0x37e   : > { %13280 = vmatmul.mubr.bf16.gmra.mrb[240].mxu1 %v7929_v11  ;;  %13155 = vmatprep.subr.bf16.mxu0 %v13915_v0  ;;  %v16945_v11 = vpop.f32.mrb[137].mxu1 }
 0x37f   : > { %13328 = vmatpush3.bf16.msra.mxu1 %v13912_v50  ;;  %13331 = vmatprep.mubr.bf16.mxu1 %v8339_v26  ;;  %v16943_v22 = vadd.f32 %v18853_v16, %v3319_v51  ;;  %18854 = vst [vmem:[#allocation29_spill] sm:$0xff] %v16945_v11  ;;  %v8346_v50 = vor.u32 %v8345_v59, %v8344_v61  ;;  %v12890_v7 = vpop.f32.mrb[138].mxu1  ;;  %v8353_v61 = vrot.slane %v18859_v19, 5  ;;  %v7134_v19 = vshrl.u32 %v7108_v28, 16 }
 0x380   : > { %13329 = vmatprep.subr.bf16.mxu1 %v13914_v8  ;;  %13108 = vmatmul.mubr.bf16.vlgmr.msra.gmra.mrb[176].mxu0 %v16147_v25  ;;  %v8348_v25 = vrot.slane %v18855_v60, 4  ;;  %v16951_v26 = vpop.f32.mrb[139].mxu1 }
 0x381   : > { %13156 = vmatpush3.bf16.msra.mxu0 %v13915_v0  ;;  %13111 = vmatprep.mubr.bf16.mxu0 %v16158_v30  ;;  %v8349_v0 = vrot.slane %v18856_v36, 5  ;;  %18857 = vst [vmem:[#allocation14_spill] sm:$0xff] %v16951_v26  ;;  %v3283_v30 = vpop.f32.mrb[73].mxu0  ;;  %v8347_v17 = vsel %vm2395_vm6, %v8342_v9, %v8346_v50  ;;  %v18864_v36 = vshll.u32 %v16822_v62, 16  ;;  %v13925_v26 = vld [vmem:[#allocation4 + $0xe8] sm:$0xff]  }
 0x382   : > { %13157 = vmatprep.subr.bf16.mxu0 %v13917_v49  ;;  %v3322_v44 = vadd.f32 %v3283_v30, %v16843_v53  ;;  %v12670_v59 = vpop.f32.mrb[74].mxu0  ;;  %v18861_v53 = vld [vmem:[#allocation21_spill] sm:$0xff] }
 0x383   : > { %13330 = vmatpush3.bf16.msra.mxu1 %v13914_v8  ;;  %v8343_v8 = vsel %vm2395_vm6, %v8338_v31, %v8342_v9  ;;  %v3286_v51 = vpop.f32.mrb[75].mxu0  ;;  %v16961_v7 = vor.u32 %v8349_v0, %v8348_v25  ;;  %v13920_v31 = vld [vmem:[#allocation4 + $0x10] sm:$0xff]   ;;  %v18863_v9 = vshrl.u32 %v16822_v62, 16  ;;  %v8357_v30 = vrot.slane %v18864_v36, 5  ;;  %v18865_v25 = vld [vmem:[#allocation22_spill] sm:$0xff]  ;;  %v16979_v59 = vld [vmem:[#allocation2 + $0x98] sm:$0xff] }
 0x384   : > { %13379 = vmatprep.subr.bf16.mxu1 %v13916_v3  ;;  %v3323_v16 = vadd.f32 %v3286_v51, %v16852_v55  ;;  %v16964_v10 = vadd.f32 %v18860_v20, %v3322_v44  ;;  %v12893_v55 = vpop.f32.mrb[140].mxu1  ;;  %v8311_v51 = vld [vmem:[#allocation2 + $0xe0] sm:$0x1f]  ;;  %v17003_v62 = vrot.slane %v7134_v19, 3 }
 0x385   : > { %13158 = vmatpush3.bf16.msra.mxu0 %v13917_v49  ;;  %v16967_v49 = vor.u32 %v8353_v61, %v8352_v21  ;;  %v8356_v60 = vrot.slane %v18863_v9, 4  ;;  %v16977_v21 = vpop.f32.mrb[141].mxu1  ;;  %v13923_v61 = vld [vmem:[#allocation4 + $0xe0] sm:$0xff]   ;;  %v8351_v20 = vsel %vm2395_vm6, %v8346_v50, %v16961_v7  ;;  %v13922_v55 = vld [vmem:[#allocation4 + $0x18] sm:$0xff]   ;;  %v8368_v11 = vshll.u32 %v8311_v51, 16 }
 0x386   : > { %13332 = vmatmul.mubr.bf16.vlgmr.msra.gmra.mrb[244].mxu1 %v8343_v8  ;;  %13159 = vmatprep.subr.bf16.mxu0 %v13919_v37  ;;  %v7137_v8 = vshll.u32 %v7108_v28, 16  ;;  %v16975_v44 = vadd.f32 %v16510_v43, %v3323_v16  ;;  %18866 = vst [vmem:[#allocation16_spill] sm:$0xff] %v16977_v21  ;;  %v12673_v28 = vpop.f32.mrb[76].mxu0  ;;  %v18867_v43 = vshrl.u32 %v16836_v57, 16 }
 0x387   : > { %13335 = vmatprep.mubr.bf16.mxu1 %v8347_v17  ;;  %13380 = vmatpush3.bf16.msra.mxu1 %v13916_v3  ;;  %18862 = vst [vmem:[#allocation30_spill] sm:$0xff] %v16967_v49  ;;  %v14290_v3 = vld [vmem:[#allocation2 + $0xc0] sm:$0xf]  ;;  %v16992_v36 = vsel %vm2395_vm6, %v16961_v7, %v16967_v49 }
 0x388   : > { %13381 = vmatprep.subr.bf16.mxu1 %v13918_v2  ;;  %13112 = vmatmul.mubr.bf16.gmra.mrb[180].mxu0 %v18861_v53  ;;  %v6716_v47 = vshrl.u32 %v14290_v3, 16  ;;  %v6719_v0 = vshll.u32 %v14290_v3, 16  ;;  %v8360_v16 = vrot.slane %v18867_v43, 4  ;;  %v8650_v53 = vld [vmem:[#allocation2 + $0xc0] sm:$0xf8]  ;;  %v3299_v3 = vpop.f32.mrb[77].mxu0 }
 0x389   : > { %13160 = vmatpush3.bf16.msra.mxu0 %v13919_v37  ;;  %13115 = vmatprep.mubr.bf16.mxu0 %v18865_v25  ;;  %v12894_v37 = vpop.f32.mrb[142].mxu1  ;;  %v16994_v25 = vor.u32 %v8357_v30, %v8356_v60  ;;  %v3326_v28 = vadd.f32 %v3299_v3, %v16880_v52  ;;  %v12674_v43 = vpop.f32.mrb[78].mxu0  ;;  %v18871_v60 = vshrl.u32 %v16979_v59, 16 }
 0x38a   : > { %13161 = vmatprep.subr.bf16.mxu0 %v13921_v35  ;;  %v16987_v9 = vpop.f32.mrb[143].mxu1  ;;  %v16998_v37 = vrot.slane %v6716_v47, 3  ;;  %v17001_v17 = vrot.slane %v6719_v0, 4  ;;  %v3302_v21 = vpop.f32.mrb[79].mxu0  ;;  %v8875_v0 = vshll.u32 %v8650_v53, 16 }
 0x38b   : > { %13382 = vmatpush3.bf16.msra.mxu1 %v13918_v2  ;;  %18868 = vst [vmem:[#allocation31_spill] sm:$0xff] %v16987_v9  ;;  %18869 = vst [vmem:[#allocation33_spill] sm:$0xff] %v16994_v25  ;;  %v18870_v2 = vshll.u32 %v16836_v57, 16  ;;  %v7139_v9 = vrot.slane %v7137_v8, 4  ;;  %v7144_v30 = vrot.slane %v18871_v60, 3  ;;  %v18872_v57 = vshll.u32 %v16979_v59, 16 }
 0x38c   : > { %13383 = vmatprep.subr.bf16.mxu1 %v13920_v31  ;;  %v3327_v52 = vadd.f32 %v3302_v21, %v16889_v18  ;;  %v17012_v19 = vadd.f32 %v16575_v42, %v3326_v28  ;;  %v18873_v8 = vld [vmem:[#allocation24_spill] sm:$0xff]  ;;  %v12897_v43 = vpop.f32.mrb[144].mxu1  ;;  %v18874_v60 = vld [vmem:[#allocation25_spill] sm:$0xff] }
 0x38d   : > { %v8361_v50 = vrot.slane %v18870_v2, 5  ;;  %13162 = vmatpush3.bf16.msra.mxu0 %v13921_v35  ;;  %v7147_v47 = vrot.slane %v18872_v57, 4  ;;  %v8365_v2 = vshrl.u32 %v8311_v51, 16  ;;  %v8872_v35 = vshrl.u32 %v8650_v53, 16  ;;  %v17018_v51 = vld [vmem:[#allocation2 + $0xa0] sm:$0xff]  ;;  %v17025_v42 = vpop.f32.mrb[145].mxu1 }
 0x38e   : > { %13336 = vmatmul.mubr.bf16.gmra.mrb[248].mxu1 %v8351_v20  ;;  %13163 = vmatprep.subr.bf16.mxu0 %v13923_v61  ;;  %v13924_v20 = vld [vmem:[#allocation4 + $0x20] sm:$0xff]   ;;  %v17023_v21 = vadd.f32 %v16589_v46, %v3327_v52  ;;  %18875 = vst [vmem:[#allocation18_spill] sm:$0xff] %v17025_v42  ;;  %v13927_v53 = vld [vmem:[#allocation4 + $0xf0] sm:$0xff]   ;;  %v12898_v57 = vpop.f32.mrb[146].mxu1  ;;  %v8370_v52 = vrot.slane %v8368_v11, 5 }
 0x38f   : > { %13339 = vmatprep.mubr.bf16.mxu1 %v16992_v36  ;;  %13384 = vmatpush3.bf16.msra.mxu1 %v13920_v31  ;;  %v17015_v3 = vor.u32 %v8361_v50, %v8360_v16  ;;  %v18651_v31 = vshrl.u32 %v17018_v51, 16  ;;  %v8359_v16 = vsel %vm2395_vm6, %v16967_v49, %v16994_v25  ;;  %v7140_v50 = vor.u32 %v7139_v9, %v17003_v62  ;;  %v17039_v18 = vpop.f32.mrb[147].mxu1  ;;  %v13926_v9 = vld [vmem:[#allocation4 + $0x28] sm:$0xff]  }
 0x390   : > { %13385 = vmatprep.subr.bf16.mxu1 %v13922_v55  ;;  %13116 = vmatmul.mubr.bf16.gmra.mrb[184].mxu0 %v18873_v8  ;;  %v17033_v28 = vor.u32 %v7147_v47, %v7144_v30  ;;  %v12725_v8 = vpop.f32.mrb[80].mxu0  ;;  %v8367_v46 = vrot.slane %v8365_v2, 4  ;;  %v17035_v43 = vrot.slane %v8872_v35, 3  ;;  %18876 = vst [vmem:[#allocation19_spill] sm:$0xff] %v17039_v18  ;;  %v17048_v47 = vld [vmem:[#allocation2 + $0xa8] sm:$0xff]  ;;  %v18881_v18 = vshll.u32 %v17018_v51, 16 }
 0x391   : > { %13164 = vmatpush3.bf16.msra.mxu0 %v13923_v61  ;;  %13119 = vmatprep.mubr.bf16.mxu0 %v18874_v60  ;;  %v6722_v61 = vor.u32 %v17001_v17, %v16998_v37  ;;  %v17037_v60 = vrot.slane %v8875_v0, 4  ;;  %v17044_v17 = vsel %vm2395_vm6, %v16994_v25, %v17015_v3  ;;  %v3739_v62 = vpop.f32.mrb[81].mxu0  ;;  %v18878_v37 = vld [vmem:[#allocation38_spill] sm:$0xff]  ;;  %v7153_v25 = vrot.slane %v18651_v31, 3 }
 0x392   : > { %13165 = vmatprep.subr.bf16.mxu0 %v13925_v26  ;;  %18877 = vst [vmem:[#allocation34_spill] sm:$0xff] %v17044_v17  ;;  %v18879_v30 = vshrl.u32 %v18878_v37, 16  ;;  %v3802_v35 = vadd.f32 %v3739_v62, %v16913_v34  ;;  %v12726_v0 = vpop.f32.mrb[82].mxu0  ;;  %v18880_v57 = vshll.u32 %v18878_v37, 16  ;;  %v7156_v42 = vrot.slane %v18881_v18, 4  ;;  %v18882_v34 = vld [vmem:[#allocation23_spill] sm:$0xff] }
 0x393   : > { %13386 = vmatpush3.bf16.msra.mxu1 %v13922_v55  ;;  %v3742_v2 = vpop.f32.mrb[83].mxu0  ;;  %v7149_v62 = vsel %vm2143_vm5, %v7140_v50, %v17033_v28  ;;  %v13929_v37 = vld [vmem:[#allocation4 + $0xf8] sm:$0xff]   ;;  %v17068_v0 = vld [vmem:[#allocation2 + $0xb0] sm:$0xff]  ;;  %v8371_v11 = vor.u32 %v8370_v52, %v8367_v46  ;;  %v18883_v50 = vshrl.u32 %v17048_v47, 16  ;;  %v18884_v45 = vshll.u32 %v17048_v47, 16 }
 0x394   : > { %13387 = vmatprep.subr.bf16.mxu1 %v13924_v20  ;;  %v8882_v55 = vrot.slane %v18879_v30, 3  ;;  %v8885_v8 = vrot.slane %v18880_v57, 4  ;;  %v17062_v30 = vld [vmem:[%s18558_s10] ss:$0 sm:$0xff]  ;;  %v3803_v31 = vadd.f32 %v3742_v2, %v16918_v27  ;;  %v18885_v57 = vld [vmem:[#allocation35_spill] sm:$0xff]  ;;  %v12949_v27 = vpop.f32.mrb[148].mxu1  ;;  %v8878_v52 = vor.u32 %v17037_v60, %v17035_v43 }
 0x395   : > { %13166 = vmatpush3.bf16.msra.mxu0 %v13925_v26  ;;  %v6723_v26 = vsel %vm2143_vm5, %v18882_v34, %v6722_v61  ;;  %v13928_v61 = vld [vmem:[#allocation4 + $0x30] sm:$0xff]   ;;  %v7162_v34 = vrot.slane %v18883_v50, 3  ;;  %v7165_v48 = vrot.slane %v18884_v45, 4  ;;  %v18886_v49 = vshrl.u32 %v18885_v57, 16  ;;  %v17089_v2 = vpop.f32.mrb[149].mxu1 }
 0x396   : > { %13340 = vmatmul.mubr.bf16.gmra.mrb[252].mxu1 %v8359_v16  ;;  %13167 = vmatprep.subr.bf16.mxu0 %v13927_v53  ;;  %v4034_v16 = vadd.f32 %v16639_v6, %v3802_v35  ;;  %v4035_v46 = vadd.f32 %v16651_v41, %v3803_v31  ;;  %v8886_v45 = vor.u32 %v8885_v8, %v8882_v55  ;;  %v13931_v35 = vld [vmem:[#allocation4 + $0x140] sm:$0xff]   ;;  %v12950_v41 = vpop.f32.mrb[150].mxu1  ;;  %v17104_v8 = vld [vmem:[#allocation2 + $0xb8] sm:$0xff] }
 0x397   : > { %13343 = vmatprep.mubr.bf16.mxu1 %v17044_v17  ;;  %13388 = vmatpush3.bf16.msra.mxu1 %v13924_v20  ;;  %v8909_v18 = vrot.slane %v18886_v49, 3  ;;  %v18887_v17 = vshll.u32 %v18885_v57, 16  ;;  %v7157_v49 = vor.u32 %v7156_v42, %v7153_v25  ;;  %v18890_v57 = vshll.u32 %v17068_v0, 16  ;;  %v17100_v43 = vpop.f32.mrb[151].mxu1  ;;  %v13930_v25 = vld [vmem:[#allocation4 + $0x38] sm:$0xff]  }
 0x398   : > { %13389 = vmatprep.subr.bf16.mxu1 %v13926_v9  ;;  %13120 = vmatmul.mubr.bf16.gmra.mrb[188].mxu0 %v6723_v26  ;;  %v17084_v6 = vadd.f32 %v17062_v30, %v4034_v16  ;;  %v18889_v26 = vshrl.u32 %v17068_v0, 16  ;;  %v17096_v50 = vadd.f32 %v17062_v30, %v4035_v46  ;;  %v8372_v31 = vsel %vm2395_vm6, %v17015_v3, %v8371_v11 }
 0x399   : > { %v8912_v20 = vrot.slane %v18887_v17, 4  ;;  %13168 = vmatpush3.bf16.msra.mxu0 %v13927_v53  ;;  %13171 = vmatprep.mubr.bf16.mxu0 %v7149_v62  ;;  %v7174_v16 = vrot.slane %v18890_v57, 4  ;;  %v12729_v53 = vpop.f32.mrb[84].mxu0  ;;  %v7166_v42 = vor.u32 %v7165_v48, %v7162_v34  ;;  %v13933_v57 = vld [vmem:[#allocation4 + $0x148] sm:$0xff]  }
 0x39a   : > { %18888 = vst [vmem:[#allocation17_spill] sm:$0xff] %v17084_v6  ;;  %13169 = vmatprep.subr.bf16.mxu0 %v13929_v37  ;;  %v7171_v17 = vrot.slane %v18889_v26, 3  ;;  %18891 = vst [vmem:[#allocation36_spill] sm:$0xff] %v17096_v50  ;;  %v3755_v60 = vpop.f32.mrb[85].mxu0  ;;  %v4120_v11 = vadd.f32 %v17096_v50, %v17084_v6  ;;  %v4143_v46 = vmul.f32 %v17096_v50, %v17096_v50  ;;  %v14312_v50 = vld [vmem:[#allocation2 + $0xc8] sm:$0xff] }
 0x39b   : > { %13390 = vmatpush3.bf16.msra.mxu1 %v13926_v9  ;;  %v17102_v55 = vor.u32 %v8912_v20, %v8909_v18  ;;  %v4142_v9 = vmul.f32 %v17084_v6, %v17084_v6  ;;  %v3806_v26 = vadd.f32 %v3755_v60, %v16938_v1  ;;  %v12730_v48 = vpop.f32.mrb[86].mxu0  ;;  %v8887_v18 = vsel %vm2143_vm5, %v8878_v52, %v8886_v45  ;;  %v13932_v52 = vld [vmem:[#allocation4 + $0xc0] sm:$0xff]  }
 0x39c   : > { %13391 = vmatprep.subr.bf16.mxu1 %v13928_v61  ;;  %v3758_v34 = vpop.f32.mrb[87].mxu0  ;;  %v7158_v20 = vsel %vm2143_vm5, %v17033_v28, %v7157_v49  ;;  %v7175_v41 = vor.u32 %v7174_v16, %v7171_v17  ;;  %v8896_v1 = vsel %vm2143_vm5, %v8886_v45, %v16883_v15  ;;  %v18893_v17 = vshll.u32 %v17104_v8, 16  ;;  %v18895_v45 = vld [vmem:[#allocation37_spill] sm:$0xff] }
 0x39d   : > { %13170 = vmatpush3.bf16.msra.mxu0 %v13929_v37  ;;  %v4158_v53 = vadd.f32 %v4143_v46, %v4142_v9  ;;  %v4038_v27 = vadd.f32 %v16690_v33, %v3806_v26  ;;  %v3807_v62 = vadd.f32 %v3758_v34, %v16943_v22  ;;  %v7167_v37 = vsel %vm2143_vm5, %v7157_v49, %v7166_v42  ;;  %v12953_v33 = vpop.f32.mrb[152].mxu1  ;;  %v13935_v46 = vld [vmem:[#allocation4 + $0x150] sm:$0xff]   ;;  %v13934_v34 = vld [vmem:[#allocation4 + $0xc8] sm:$0xff]  }
 0x39e   : > { %13344 = vmatmul.mubr.bf16.gmra.mrb[0].mxu1 %v8372_v31  ;;  %13219 = vmatprep.subr.bf16.mxu0 %v13931_v35  ;;  %v18892_v31 = vshrl.u32 %v17104_v8, 16  ;;  %v7183_v16 = vrot.slane %v18893_v17, 4  ;;  %v17134_v15 = vsel %vm2143_vm5, %v16886_v39, %v17102_v55  ;;  %v18896_v49 = vshrl.u32 %v18895_v45, 16  ;;  %v17138_v9 = vpop.f32.mrb[153].mxu1 }
 0x39f   : > { %13392 = vmatpush3.bf16.msra.mxu1 %v13928_v61  ;;  %13395 = vmatprep.mubr.bf16.mxu1 %v8887_v18  ;;  %v17128_v61 = vadd.f32 %v17062_v30, %v4038_v27  ;;  %v4039_v22 = vadd.f32 %v16696_v38, %v3807_v62  ;;  %v12733_v62 = vpop.f32.mrb[88].mxu0  ;;  %v7176_v39 = vsel %vm2143_vm5, %v7166_v42, %v7175_v41 }
 0x3a0   : > { %13393 = vmatprep.subr.bf16.mxu1 %v13930_v25  ;;  %13172 = vmatmul.mubr.bf16.vlgmr.msra.gmra.mrb[192].mxu0 %v7158_v20  ;;  %v7180_v28 = vrot.slane %v18892_v31, 3  ;;  %v8918_v60 = vrot.slane %v18896_v49, 3  ;;  %v3771_v18 = vpop.f32.mrb[89].mxu0  ;;  %v18899_v31 = vld [vmem:[#allocation40_spill] sm:$0xff] }
 0x3a1   : > { %18894 = vst [vmem:[#allocation15_spill] sm:$0xff] %v17128_v61  ;;  %13220 = vmatpush3.bf16.msra.mxu0 %v13931_v35  ;;  %13175 = vmatprep.mubr.bf16.mxu0 %v7167_v37  ;;  %v4123_v27 = vadd.f32 %v4120_v11, %v17128_v61  ;;  %v4146_v26 = vmul.f32 %v17128_v61, %v17128_v61  ;;  %v12954_v35 = vpop.f32.mrb[154].mxu1  ;;  %v18898_v11 = vshll.u32 %v18895_v45, 16  ;;  %v18900_v17 = vshrl.u32 %v18899_v31, 16  ;;  %v13937_v45 = vld [vmem:[#allocation4 + $0x158] sm:$0xff]  }
 0x3a2   : > { %13221 = vmatprep.subr.bf16.mxu0 %v13933_v57  ;;  %v17144_v38 = vadd.f32 %v17062_v30, %v4039_v22  ;;  %v17147_v48 = vpop.f32.mrb[155].mxu1  ;;  %v17149_v20 = vor.u32 %v7183_v16, %v7180_v28  ;;  %v18901_v22 = vshll.u32 %v18899_v31, 16  ;;  %v3810_v62 = vadd.f32 %v3771_v18, %v16964_v10  ;;  %v12734_v28 = vpop.f32.mrb[90].mxu0  ;;  %v13936_v10 = vld [vmem:[#allocation4 + $0xd0] sm:$0xff]  }
 0x3a3   : > { %13394 = vmatpush3.bf16.msra.mxu1 %v13930_v25  ;;  %v8921_v37 = vrot.slane %v18898_v11, 4  ;;  %v8927_v33 = vrot.slane %v18900_v17, 3  ;;  %v4161_v25 = vadd.f32 %v4158_v53, %v4146_v26  ;;  %v3774_v16 = vpop.f32.mrb[91].mxu0  ;;  %v7208_v26 = vshll.u32 %v16751_v63, 16 }
 0x3a4   : > { %18897 = vst [vmem:[#allocation39_spill] sm:$0xff] %v17144_v38  ;;  %13443 = vmatprep.subr.bf16.mxu1 %v13932_v52  ;;  %v8930_v49 = vrot.slane %v18901_v22, 4  ;;  %v4124_v35 = vadd.f32 %v4123_v27, %v17144_v38  ;;  %v4147_v42 = vmul.f32 %v17144_v38, %v17144_v38  ;;  %v4042_v31 = vadd.f32 %v16709_v54, %v3810_v62  ;;  %v17180_v22 = vld [vmem:[#allocation2 + $0x100] sm:$0xf]  ;;  %v14297_v62 = vld [vmem:[#allocation2 + $0x90] sm:$0xf0] }
 0x3a5   : > { %13222 = vmatpush3.bf16.msra.mxu0 %v13933_v57  ;;  %v3811_v53 = vadd.f32 %v3774_v16, %v16975_v44  ;;  %v7185_v27 = vsel %vm2143_vm5, %v7175_v41, %v17149_v20  ;;  %v8922_v57 = vor.u32 %v8921_v37, %v8918_v60  ;;  %v18903_v44 = vld [vmem:[#allocation41_spill] sm:$0xff]  ;;  %v13939_v60 = vld [vmem:[#allocation4 + $0x160] sm:$0xff]   ;;  %v7612_v28 = vshrl.u32 %v14297_v62, 16 }
 0x3a6   : > { %13396 = vmatmul.mubr.bf16.vlgmr.msra.gmra.mrb[4].mxu1 %v8896_v1  ;;  %13223 = vmatprep.subr.bf16.mxu0 %v13935_v46  ;;  %v4162_v11 = vadd.f32 %v4161_v25, %v4147_v42  ;;  %v7205_v1 = vshrl.u32 %v16751_v63, 16  ;;  %v17169_v18 = vadd.f32 %v17062_v30, %v4042_v31  ;;  %v17172_v54 = vor.u32 %v8930_v49, %v8927_v33  ;;  %v12737_v42 = vpop.f32.mrb[92].mxu0 }
 0x3a7   : > { %13399 = vmatprep.mubr.bf16.mxu1 %v16901_v14  ;;  %13444 = vmatpush3.bf16.msra.mxu1 %v13932_v52  ;;  %v12957_v14 = vpop.f32.mrb[156].mxu1  ;;  %v4043_v52 = vadd.f32 %v16713_v40, %v3811_v53  ;;  %v18905_v37 = vshll.u32 %v18903_v44, 16  ;;  %v8943_v25 = vshrl.u32 %v17180_v22, 16  ;;  %v17193_v31 = vsel %vm2143_vm5, %v17102_v55, %v8922_v57  ;;  %v3787_v53 = vpop.f32.mrb[93].mxu0 }
 0x3a8   : > { %13445 = vmatprep.subr.bf16.mxu1 %v13934_v34  ;;  %13176 = vmatmul.mubr.bf16.gmra.mrb[196].mxu0 %v7176_v39  ;;  %18902 = vst [vmem:[#allocation44_spill] sm:$0xff] %v17169_v18  ;;  %v18904_v39 = vshrl.u32 %v18903_v44, 16  ;;  %v17176_v41 = vpop.f32.mrb[157].mxu1  ;;  %v4127_v40 = vadd.f32 %v4124_v35, %v17169_v18  ;;  %v13938_v35 = vld [vmem:[#allocation4 + $0xd8] sm:$0xff]   ;;  %v7210_v14 = vrot.slane %v7208_v26, 4  ;;  %v7615_v44 = vshll.u32 %v14297_v62, 16 }
 0x3a9   : > { %13224 = vmatpush3.bf16.msra.mxu0 %v13935_v46  ;;  %13179 = vmatprep.mubr.bf16.mxu0 %v7185_v27  ;;  %v8939_v63 = vrot.slane %v18905_v37, 4  ;;  %v4150_v46 = vmul.f32 %v17169_v18, %v17169_v18  ;;  %v17187_v33 = vadd.f32 %v17062_v30, %v4043_v52  ;;  %v12958_v49 = vpop.f32.mrb[158].mxu1  ;;  %v7207_v27 = vrot.slane %v7205_v1, 3  ;;  %v9335_v62 = vld [vmem:[#allocation2 + $0xd0] sm:$0xf8] }
 0x3aa   : > { %v8936_v17 = vrot.slane %v18904_v39, 3  ;;  %13225 = vmatprep.subr.bf16.mxu0 %v13937_v45  ;;  %v17189_v16 = vpop.f32.mrb[159].mxu1  ;;  %v3814_v37 = vadd.f32 %v3787_v53, %v17012_v19  ;;  %v12738_v49 = vpop.f32.mrb[94].mxu0  ;;  %v7194_v1 = vsel %vm2143_vm5, %v17149_v20, %v16847_v4  ;;  %v13940_v53 = vld [vmem:[#allocation4 + $0xe0] sm:$0xff]   ;;  %v7617_v20 = vrot.slane %v7615_v44, 5 }
 0x3ab   : > { %18906 = vst [vmem:[#allocation48_spill] sm:$0xff] %v17187_v33  ;;  %13446 = vmatpush3.bf16.msra.mxu1 %v13934_v34  ;;  %v4165_v39 = vadd.f32 %v4162_v11, %v4150_v46  ;;  %v4128_v52 = vadd.f32 %v4127_v40, %v17187_v33  ;;  %v4151_v34 = vmul.f32 %v17187_v33, %v17187_v33  ;;  %v3790_v42 = vpop.f32.mrb[95].mxu0  ;;  %v8946_v11 = vshll.u32 %v17180_v22, 16  ;;  %v13941_v40 = vld [vmem:[#allocation4 + $0x168] sm:$0xff]  }
 0x3ac   : > { %13447 = vmatprep.subr.bf16.mxu1 %v13936_v10  ;;  %v17203_v26 = vor.u32 %v8939_v63, %v8936_v17  ;;  %v4046_v19 = vadd.f32 %v16737_v5, %v3814_v37  ;;  %v7211_v4 = vor.u32 %v7210_v14, %v7207_v27  ;;  %v18907_v17 = vshrl.u32 %v16979_v59, 16  ;;  %v17228_v37 = vld [vmem:[#allocation2 + $0xd8] sm:$0xff] }
 0x3ad   : > { %13226 = vmatpush3.bf16.msra.mxu0 %v13937_v45  ;;  %v4166_v46 = vadd.f32 %v4165_v39, %v4151_v34  ;;  %v3815_v45 = vadd.f32 %v3790_v42, %v17023_v21  ;;  %v18908_v22 = vshll.u32 %v16979_v59, 16  ;;  %v12961_v21 = vpop.f32.mrb[160].mxu1  ;;  %v17224_v27 = vrot.slane %v8943_v25, 3  ;;  %v13943_v59 = vld [vmem:[#allocation4 + $0x170] sm:$0xff]   ;;  %v13973_v33 = vld [vmem:[#allocation4 + $0x68] sm:$0xff]  }
 0x3ae   : > { %13400 = vmatmul.mubr.bf16.gmra.mrb[8].mxu1 %v17134_v15  ;;  %13227 = vmatprep.subr.bf16.mxu0 %v13939_v60  ;;  %v17209_v15 = vrot.slane %v7612_v28, 4  ;;  %v7619_v63 = vrot.slane %v18907_v17, 4  ;;  %v17220_v5 = vadd.f32 %v17062_v30, %v4046_v19  ;;  %v17226_v14 = vpop.f32.mrb[161].mxu1  ;;  %v9361_v44 = vshrl.u32 %v9335_v62, 16 }
 0x3af   : > { %13403 = vmatprep.mubr.bf16.mxu1 %v17193_v31  ;;  %13448 = vmatpush3.bf16.msra.mxu1 %v13936_v10  ;;  %v7620_v39 = vrot.slane %v18908_v22, 5  ;;  %v17217_v10 = vsel %vm2143_vm5, %v8922_v57, %v17172_v54  ;;  %v4047_v28 = vadd.f32 %v16741_v13, %v3815_v45  ;;  %v9364_v34 = vshll.u32 %v9335_v62, 16 }
 0x3b0   : > { %13449 = vmatprep.subr.bf16.mxu1 %v13938_v35  ;;  %13180 = vmatmul.mubr.bf16.gmra.mrb[200].mxu0 %v7194_v1  ;;  %18909 = vst [vmem:[#allocation52_spill] sm:$0xff] %v17220_v5  ;;  %v18659_v57 = vshrl.u32 %v17228_v37, 16  ;;  %v18654_v49 = vshll.u32 %v17228_v37, 16  ;;  %v4131_v42 = vadd.f32 %v4128_v52, %v17220_v5  ;;  %v4154_v13 = vmul.f32 %v17220_v5, %v17220_v5  ;;  %v12789_v1 = vpop.f32.mrb[96].mxu0  ;;  %v13942_v52 = vld [vmem:[#allocation4 + $0xe8] sm:$0xff]  }
 0x3b1   : > { %13228 = vmatpush3.bf16.msra.mxu0 %v13939_v60  ;;  %13183 = vmatprep.mubr.bf16.mxu0 %v16875_v58  ;;  %v17236_v58 = vadd.f32 %v17062_v30, %v4047_v28  ;;  %v12962_v60 = vpop.f32.mrb[162].mxu1  ;;  %v8948_v25 = vrot.slane %v8946_v11, 4  ;;  %v17243_v45 = vsel %vm2143_vm5, %v17172_v54, %v17203_v26  ;;  %v4354_v62 = vpop.f32.mrb[97].mxu0  ;;  %v7212_v17 = vsel %vm2143_vm5, %v16856_v23, %v7211_v4 }
 0x3b2   : > { %13229 = vmatprep.subr.bf16.mxu0 %v13941_v40  ;;  %v17238_v19 = vpop.f32.mrb[163].mxu1  ;;  %v7618_v30 = vor.u32 %v7617_v20, %v17209_v15  ;;  %v7621_v22 = vor.u32 %v7620_v39, %v7619_v63  ;;  %v4169_v21 = vadd.f32 %v4166_v46, %v4154_v13  ;;  %v17254_v28 = vadd.f32 %v16783_v24, %v4354_v62  ;;  %v12790_v54 = vpop.f32.mrb[98].mxu0  ;;  %v13945_v20 = vld [vmem:[#allocation4 + $0x178] sm:$0xff]   ;;  %v13944_v13 = vld [vmem:[#allocation4 + $0xf0] sm:$0xff]  }
 0x3b3   : > { %18910 = vst [vmem:[#allocation21_spill] sm:$0xff] %v17236_v58  ;;  %13450 = vmatpush3.bf16.msra.mxu1 %v13938_v35  ;;  %v17249_v35 = vadd.f32 %v4131_v42, %v17236_v58  ;;  %v4155_v11 = vmul.f32 %v17236_v58, %v17236_v58  ;;  %v4357_v60 = vpop.f32.mrb[99].mxu0  ;;  %v9363_v23 = vrot.slane %v9361_v44, 3  ;;  %v9366_v4 = vrot.slane %v9364_v34, 4 }
 0x3b4   : > { %13451 = vmatprep.subr.bf16.mxu1 %v13940_v53  ;;  %v9371_v46 = vrot.slane %v18659_v57, 3  ;;  %v9374_v15 = vrot.slane %v18654_v49, 4  ;;  %v17265_v24 = vadd.f32 %v16787_v29, %v4357_v60  ;;  %v18912_v44 = vshll.u32 %v17018_v51, 16 }
 0x3b5   : > { %13230 = vmatpush3.bf16.msra.mxu0 %v13941_v40  ;;  %v17261_v63 = vadd.f32 %v4169_v21, %v4155_v11  ;;  %v18911_v40 = vshrl.u32 %v17018_v51, 16  ;;  %v7622_v42 = vsel %vm2395_vm6, %v7618_v30, %v7621_v22  ;;  %v18913_v1 = vshrl.u32 %v17048_v47, 16  ;;  %v13013_v11 = vpop.f32.mrb[164].mxu1  ;;  %v12793_v30 = vpop.f32.mrb[100].mxu0 }
 0x3b6   : > { %13404 = vmatmul.mubr.bf16.gmra.mrb[12].mxu1 %v17217_v10  ;;  %13231 = vmatprep.subr.bf16.mxu0 %v13943_v59  ;;  %v7624_v34 = vrot.slane %v18912_v44, 5  ;;  %v18914_v21 = vshll.u32 %v17048_v47, 16  ;;  %v8949_v29 = vor.u32 %v8948_v25, %v17224_v27  ;;  %v17277_v54 = vpop.f32.mrb[165].mxu1  ;;  %v9367_v51 = vor.u32 %v9366_v4, %v9363_v23  ;;  %v4370_v47 = vpop.f32.mrb[101].mxu0  ;;  %v13949_v4 = vld [vmem:[#allocation4 + $0x1c8] sm:$0xff]  }
 0x3b7   : > { %13407 = vmatprep.mubr.bf16.mxu1 %v17243_v45  ;;  %13452 = vmatpush3.bf16.msra.mxu1 %v13940_v53  ;;  %v7623_v39 = vrot.slane %v18911_v40, 4  ;;  %v7627_v62 = vrot.slane %v18913_v1, 4  ;;  %v9375_v60 = vor.u32 %v9374_v15, %v9371_v46  ;;  %v13014_v40 = vpop.f32.mrb[166].mxu1  ;;  %v13946_v1 = vld [vmem:[#allocation4 + $0xf8] sm:$0xff]   ;;  %v12794_v25 = vpop.f32.mrb[102].mxu0 }
 0x3b8   : > { %13453 = vmatprep.subr.bf16.mxu1 %v13942_v52  ;;  %13184 = vmatmul.mubr.bf16.gmra.mrb[204].mxu0 %v7212_v17  ;;  %v7628_v53 = vrot.slane %v18914_v21, 5  ;;  %v13947_v17 = vld [vmem:[#allocation4 + $0x1c0] sm:$0xff]   ;;  %v17279_v49 = vpop.f32.mrb[167].mxu1  ;;  %v8950_v27 = vsel %vm2143_vm5, %v17203_v26, %v8949_v29  ;;  %v18918_v29 = vshll.u32 %v17104_v8, 16 }
 0x3b9   : > { %13232 = vmatpush3.bf16.msra.mxu0 %v13943_v59  ;;  %13235 = vmatprep.mubr.bf16.mxu0 %v7622_v42  ;;  %v7625_v44 = vor.u32 %v7624_v34, %v7623_v39  ;;  %v17284_v59 = vadd.f32 %v16814_v32, %v4370_v47  ;;  %v9376_v23 = vsel %vm2143_vm5, %v9367_v51, %v9375_v60  ;;  %v18915_v39 = vshrl.u32 %v17068_v0, 16  ;;  %v13951_v51 = vld [vmem:[#allocation4 + $0x1d0] sm:$0xff]  }
 0x3ba   : > { %13233 = vmatprep.subr.bf16.mxu0 %v13945_v20  ;;  %v7629_v21 = vor.u32 %v7628_v53, %v7627_v62  ;;  %v18916_v32 = vshll.u32 %v17068_v0, 16  ;;  %v13948_v62 = vld [vmem:[#allocation4 + $0x140] sm:$0xff]   ;;  %v18917_v53 = vshrl.u32 %v17104_v8, 16  ;;  %v9385_v8 = vsel %vm2143_vm5, %v9375_v60, %v17102_v55 }
 0x3bb   : > { %13454 = vmatpush3.bf16.msra.mxu1 %v13942_v52  ;;  %v4373_v52 = vpop.f32.mrb[103].mxu0  ;;  %v7626_v15 = vsel %vm2395_vm6, %v7621_v22, %v7625_v44  ;;  %v7631_v34 = vrot.slane %v18915_v39, 4  ;;  %v13017_v11 = vpop.f32.mrb[168].mxu1  ;;  %v7594_v60 = vld [vmem:[#allocation2 + $0xd0] sm:$0x1f] }
 0x3bc   : > { %13455 = vmatprep.subr.bf16.mxu1 %v13944_v13  ;;  %v17288_v46 = vadd.f32 %v16820_v56, %v4373_v52  ;;  %v7630_v42 = vsel %vm2395_vm6, %v7625_v44, %v7629_v21  ;;  %v7636_v56 = vrot.slane %v18918_v29, 5  ;;  %v17300_v22 = vpop.f32.mrb[169].mxu1  ;;  %v7648_v11 = vshrl.u32 %v7594_v60, 16 }
 0x3bd   : > { %13234 = vmatpush3.bf16.msra.mxu0 %v13945_v20  ;;  %v7632_v20 = vrot.slane %v18916_v32, 5  ;;  %v13018_v0 = vpop.f32.mrb[170].mxu1  ;;  %v12797_v40 = vpop.f32.mrb[104].mxu0  ;;  %v17315_v32 = vld [vmem:[#allocation2 + $0x100] sm:$0xff] }
 0x3be   : > { %13408 = vmatmul.mubr.bf16.gmra.mrb[16].mxu1 %v8950_v27  ;;  %13283 = vmatprep.subr.bf16.mxu0 %v13947_v17  ;;  %v17302_v47 = vpop.f32.mrb[171].mxu1  ;;  %v4386_v44 = vpop.f32.mrb[105].mxu0  ;;  %v13950_v27 = vld [vmem:[#allocation4 + $0x148] sm:$0xff]  }
 0x3bf   : > { %13456 = vmatpush3.bf16.msra.mxu1 %v13944_v13  ;;  %13459 = vmatprep.mubr.bf16.mxu1 %v9376_v23  ;;  %v7635_v13 = vrot.slane %v18917_v53, 4  ;;  %v7633_v30 = vor.u32 %v7632_v20, %v7631_v34  ;;  %v12798_v23 = vpop.f32.mrb[106].mxu0  ;;  %v18658_v20 = vshrl.u32 %v17315_v32, 16 }
 0x3c0   : > { %13457 = vmatprep.subr.bf16.mxu1 %v13946_v1  ;;  %13236 = vmatmul.mubr.bf16.vlgmr.msra.gmra.mrb[208].mxu0 %v7626_v15  ;;  %v4389_v52 = vpop.f32.mrb[107].mxu0  ;;  %v18919_v15 = vld [vmem:[#allocation32_spill] sm:$0xff] }
 0x3c1   : > { %13284 = vmatpush3.bf16.msra.mxu0 %v13947_v17  ;;  %13239 = vmatprep.mubr.bf16.mxu0 %v7630_v42  ;;  %v7637_v25 = vor.u32 %v7636_v56, %v7635_v13  ;;  %v17307_v17 = vadd.f32 %v16854_v12, %v4386_v44  ;;  %v17311_v39 = vadd.f32 %v18919_v15, %v4389_v52  ;;  %v13952_v12 = vld [vmem:[#allocation4 + $0x150] sm:$0xff]   ;;  %v9416_v44 = vrot.slane %v18658_v20, 3 }
 0x3c2   : > { %13285 = vmatprep.subr.bf16.mxu0 %v13949_v4  ;;  %v7634_v34 = vsel %vm2395_vm6, %v7629_v21, %v7633_v30  ;;  %v17321_v21 = vld [vmem:[#allocation2 + $0x108] sm:$0xff]  ;;  %v18920_v23 = vld [vmem:[#allocation20_spill] sm:$0xff] }
 0x3c3   : > { %13458 = vmatpush3.bf16.msra.mxu1 %v13946_v1  ;;  %v13953_v1 = vld [vmem:[#allocation4 + $0x1d8] sm:$0xff]   ;;  %v7638_v55 = vsel %vm2395_vm6, %v7633_v30, %v7637_v25  ;;  %v18655_v53 = vshrl.u32 %v17321_v21, 16  ;;  %v18657_v13 = vshll.u32 %v17321_v21, 16 }
 0x3c4   : > { %13507 = vmatprep.subr.bf16.mxu1 %v13948_v62  ;;  %v13954_v30 = vld [vmem:[#allocation4 + $0x158] sm:$0xff]  }
 0x3c5   : > { %13286 = vmatpush3.bf16.msra.mxu0 %v13949_v4  ;;  %v13021_v4 = vpop.f32.mrb[172].mxu1  ;;  %v12801_v56 = vpop.f32.mrb[108].mxu0 }
 0x3c6   : > { %13460 = vmatmul.mubr.bf16.vlgmr.msra.gmra.mrb[20].mxu1 %v9385_v8  ;;  %13287 = vmatprep.subr.bf16.mxu0 %v13951_v51  ;;  %v17319_v42 = vpop.f32.mrb[173].mxu1  ;;  %v4402_v40 = vpop.f32.mrb[109].mxu0  ;;  %v18921_v4 = vld [vmem:[#allocation26_spill] sm:$0xff]  ;;  %v7650_v56 = vrot.slane %v7648_v11, 4 }
 0x3c7   : > { %13463 = vmatprep.mubr.bf16.mxu1 %v17193_v31  ;;  %13508 = vmatpush3.bf16.msra.mxu1 %v13948_v62  ;;  %v18656_v31 = vshll.u32 %v17315_v32, 16  ;;  %v13955_v62 = vld [vmem:[#allocation4 + $0x1e0] sm:$0xff]   ;;  %v13022_v29 = vpop.f32.mrb[174].mxu1  ;;  %v17332_v52 = vadd.f32 %v18920_v23, %v4402_v40  ;;  %v12802_v15 = vpop.f32.mrb[110].mxu0 }
 0x3c8   : > { %13509 = vmatprep.subr.bf16.mxu1 %v13950_v27  ;;  %13240 = vmatmul.mubr.bf16.gmra.mrb[212].mxu0 %v7634_v34  ;;  %v17325_v0 = vpop.f32.mrb[175].mxu1  ;;  %v9425_v34 = vrot.slane %v18655_v53, 3  ;;  %v13956_v40 = vld [vmem:[#allocation4 + $0x160] sm:$0xff]  }
 0x3c9   : > { %13288 = vmatpush3.bf16.msra.mxu0 %v13951_v51  ;;  %13243 = vmatprep.mubr.bf16.mxu0 %v7638_v55  ;;  %v7651_v51 = vshll.u32 %v7594_v60, 16  ;;  %v9419_v8 = vrot.slane %v18656_v31, 4  ;;  %v9428_v55 = vrot.slane %v18657_v13, 4  ;;  %v13957_v60 = vld [vmem:[#allocation4 + $0x1e8] sm:$0xff]   ;;  %v14301_v23 = vld [vmem:[#allocation2 + $0x110] sm:$0xf] }
 0x3ca   : > { %13289 = vmatprep.subr.bf16.mxu0 %v13953_v1  ;;  %v9432_v15 = vshrl.u32 %v14301_v23, 16 }
 0x3cb   : > { %13510 = vmatpush3.bf16.msra.mxu1 %v13950_v27  ;;  %v4405_v27 = vpop.f32.mrb[111].mxu0  ;;  %v9420_v53 = vor.u32 %v9419_v8, %v9416_v44  ;;  %v13025_v31 = vpop.f32.mrb[176].mxu1  ;;  %v14303_v44 = vld [vmem:[#allocation2 + $0xa0] sm:$0xf0] }
 0x3cc   : > { %13511 = vmatprep.subr.bf16.mxu1 %v13952_v12  ;;  %v17341_v29 = vadd.f32 %v18921_v4, %v4405_v27  ;;  %v17348_v27 = vor.u32 %v9428_v55, %v9425_v34  ;;  %v13959_v4 = vld [vmem:[#allocation4 + $0x1f0] sm:$0xff]   ;;  %v9434_v31 = vrot.slane %v9432_v15, 3  ;;  %v8125_v8 = vrot.slane %v14303_v44, 4 }
 0x3cd   : > { %13290 = vmatpush3.bf16.msra.mxu0 %v13953_v1  ;;  %v7642_v1 = vsel %vm2395_vm6, %v7637_v25, %v16961_v7  ;;  %v14302_v7 = vld [vmem:[#allocation2 + $0xd0] sm:$0xf0]  ;;  %v9421_v55 = vsel %vm2143_vm5, %v17203_v26, %v9420_v53  ;;  %v13961_v26 = vld [vmem:[#allocation4 + $0x1f8] sm:$0xff]  }
 0x3ce   : > { %13464 = vmatmul.mubr.bf16.gmra.mrb[24].mxu1 %v17217_v10  ;;  %13291 = vmatprep.subr.bf16.mxu0 %v13955_v62  ;;  %v7653_v10 = vrot.slane %v7651_v51, 5  ;;  %v9839_v25 = vshrl.u32 %v14302_v7, 16  ;;  %v9842_v11 = vshll.u32 %v14302_v7, 16  ;;  %v9430_v15 = vsel %vm2143_vm5, %v9420_v53, %v17348_v27 }
 0x3cf   : > { %13467 = vmatprep.mubr.bf16.mxu1 %v17243_v45  ;;  %13512 = vmatpush3.bf16.msra.mxu1 %v13952_v12  ;;  %v9435_v45 = vshll.u32 %v14301_v23, 16  ;;  %v17346_v12 = vpop.f32.mrb[177].mxu1  ;;  %v14304_v23 = vld [vmem:[#allocation2 + $0xa8] sm:$0xff] }
 0x3d0   : > { %13513 = vmatprep.subr.bf16.mxu1 %v13954_v30  ;;  %13244 = vmatmul.mubr.bf16.gmra.mrb[216].mxu0 %v7642_v1  ;;  %v13026_v51 = vpop.f32.mrb[178].mxu1  ;;  %v12853_v1 = vpop.f32.mrb[112].mxu0  ;;  %v7654_v13 = vor.u32 %v7653_v10, %v7650_v56  ;;  %v8126_v34 = vrot.slane %v14304_v23, 4  ;;  %v18922_v56 = vshrl.u32 %v17228_v37, 16  ;;  %v9844_v44 = vrot.slane %v9842_v11, 5 }
 0x3d1   : > { %13292 = vmatpush3.bf16.msra.mxu0 %v13955_v62  ;;  %13247 = vmatprep.mubr.bf16.mxu0 %v16992_v36  ;;  %v17350_v20 = vpop.f32.mrb[179].mxu1  ;;  %v4802_v62 = vpop.f32.mrb[113].mxu0  ;;  %v13958_v36 = vld [vmem:[#allocation4 + $0x168] sm:$0xff]   ;;  %v9437_v57 = vrot.slane %v9435_v45, 4  ;;  %v9841_v1 = vrot.slane %v9839_v25, 4  ;;  %v18923_v23 = vshll.u32 %v17228_v37, 16 }
 0x3d2   : > { %13293 = vmatprep.subr.bf16.mxu0 %v13957_v60  ;;  %v4865_v7 = vadd.f32 %v4802_v62, %v17254_v28  ;;  %v9846_v10 = vrot.slane %v18922_v56, 4  ;;  %v18925_v62 = vld [vmem:[#allocation27_spill] sm:$0xff]  ;;  %v8127_v53 = vsel %vm1972_vm4, %v8125_v8, %v8126_v34  ;;  %v13960_v25 = vld [vmem:[#allocation4 + $0x170] sm:$0xff]  }
 0x3d3   : > { %13514 = vmatpush3.bf16.msra.mxu1 %v13954_v30  ;;  %v12854_v30 = vpop.f32.mrb[114].mxu0  ;;  %v9847_v58 = vrot.slane %v18923_v23, 5  ;;  %v9438_v11 = vor.u32 %v9437_v57, %v9434_v31  ;;  %v18926_v37 = vld [vmem:[#allocation28_spill] sm:$0xff]  ;;  %v14305_v23 = vld [vmem:[#allocation2 + $0xb0] sm:$0xff]  ;;  %v14306_v31 = vld [vmem:[#allocation2 + $0xb8] sm:$0xff] }
 0x3d4   : > { %13515 = vmatprep.subr.bf16.mxu1 %v13956_v40  ;;  %v4805_v51 = vpop.f32.mrb[115].mxu0  ;;  %v13077_v30 = vpop.f32.mrb[180].mxu1 }
 0x3d5   : > { %13294 = vmatpush3.bf16.msra.mxu0 %v13957_v60  ;;  %v4866_v28 = vadd.f32 %v4805_v51, %v17265_v24  ;;  %v18924_v60 = vld [vmem:[#allocation30_spill] sm:$0xff]  ;;  %v9845_v24 = vor.u32 %v9844_v44, %v9841_v1  ;;  %v12857_v51 = vpop.f32.mrb[116].mxu0  ;;  %v13965_v44 = vld [vmem:[#allocation4 + $0x48] sm:$0xff]   ;;  %v18927_v30 = vld [vmem:[#allocation29_spill] sm:$0xff] }
 0x3d6   : > { %13468 = vmatmul.mubr.bf16.gmra.mrb[28].mxu1 %v9421_v55  ;;  %13295 = vmatprep.subr.bf16.mxu0 %v13959_v4  ;;  %v7655_v45 = vsel %vm2395_vm6, %v18924_v60, %v7654_v13  ;;  %v17365_v55 = vadd.f32 %v18925_v62, %v4865_v7  ;;  %v13963_v13 = vld [vmem:[#allocation4 + $0x40] sm:$0xff]   ;;  %v8128_v60 = vrot.slane %v14305_v23, 4  ;;  %v4818_v57 = vpop.f32.mrb[117].mxu0  ;;  %v14307_v51 = vld [vmem:[#allocation2 + $0xc0] sm:$0xff] }
 0x3d7   : > { %13471 = vmatprep.mubr.bf16.mxu1 %v9430_v15  ;;  %13516 = vmatpush3.bf16.msra.mxu1 %v13956_v40  ;;  %v17369_v56 = vadd.f32 %v18926_v37, %v4866_v28  ;;  %v17371_v40 = vpop.f32.mrb[181].mxu1  ;;  %v9848_v15 = vor.u32 %v9847_v58, %v9846_v10  ;;  %v9439_v28 = vsel %vm2143_vm5, %v17348_v27, %v9438_v11  ;;  %v12858_v58 = vpop.f32.mrb[118].mxu0  ;;  %v13964_v27 = vld [vmem:[#allocation4 + $0x1c0] sm:$0xff]   ;;  %v8132_v23 = vrot.slane %v14307_v51, 4 }
 0x3d8   : > { %13517 = vmatprep.subr.bf16.mxu1 %v13958_v36  ;;  %13248 = vmatmul.mubr.bf16.gmra.mrb[220].mxu0 %v7655_v45  ;;  %v13078_v7 = vpop.f32.mrb[182].mxu1  ;;  %v8130_v45 = vrot.slane %v14306_v31, 4  ;;  %v4869_v1 = vadd.f32 %v4818_v57, %v17284_v59  ;;  %v4821_v10 = vpop.f32.mrb[119].mxu0  ;;  %v18928_v11 = vld [vmem:[#allocation14_spill] sm:$0xff]  ;;  %v13966_v31 = vld [vmem:[#allocation4 + $0x1c8] sm:$0xff]  }
 0x3d9   : > { %13296 = vmatpush3.bf16.msra.mxu0 %v13959_v4  ;;  %13299 = vmatprep.mubr.bf16.mxu0 %v8127_v53  ;;  %v17373_v8 = vpop.f32.mrb[183].mxu1  ;;  %v13962_v4 = vld [vmem:[#allocation4 + $0x178] sm:$0xff]   ;;  %v4870_v62 = vadd.f32 %v4821_v10, %v17288_v46  ;;  %v8129_v53 = vsel %vm1972_vm4, %v8126_v34, %v8128_v60  ;;  %v13967_v46 = vld [vmem:[#allocation4 + $0x50] sm:$0xff]  }
 0x3da   : > { %13297 = vmatprep.subr.bf16.mxu0 %v13961_v26  ;;  %v17382_v37 = vadd.f32 %v18927_v30, %v4869_v1  ;;  %v8131_v59 = vsel %vm1972_vm4, %v8128_v60, %v8130_v45  ;;  %v18929_v1 = vld [vmem:[#allocation51_spill] sm:$0xff] }
 0x3db   : > { %13518 = vmatpush3.bf16.msra.mxu1 %v13958_v36  ;;  %v9849_v36 = vsel %vm2395_vm6, %v9845_v24, %v9848_v15  ;;  %v17386_v24 = vadd.f32 %v18928_v11, %v4870_v62  ;;  %v9853_v58 = vsel %vm2395_vm6, %v9848_v15, %v18929_v1  ;;  %v13968_v15 = vld [vmem:[#allocation4 + $0x1d0] sm:$0xff]  }
 0x3dc   : > { %13519 = vmatprep.subr.bf16.mxu1 %v13960_v25 }
 0x3dd   : > { %13298 = vmatpush3.bf16.msra.mxu0 %v13961_v26  ;;  %v13081_v26 = vpop.f32.mrb[184].mxu1  ;;  %v12861_v34 = vpop.f32.mrb[120].mxu0 }
 0x3de   : > { %13472 = vmatmul.mubr.bf16.gmra.mrb[32].mxu1 %v9439_v28  ;;  %13347 = vmatprep.subr.bf16.mxu0 %v13963_v13  ;;  %v4834_v60 = vpop.f32.mrb[121].mxu0  ;;  %v14308_v28 = vld [vmem:[#allocation2 + $0xc8] sm:$0xff]  ;;  %v18931_v26 = vld [vmem:[#allocation16_spill] sm:$0xff] }
 0x3df   : > { %13520 = vmatpush3.bf16.msra.mxu1 %v13960_v25  ;;  %13523 = vmatprep.mubr.bf16.mxu1 %v9849_v36  ;;  %v17388_v25 = vpop.f32.mrb[185].mxu1  ;;  %v4873_v36 = vadd.f32 %v4834_v60, %v17307_v17  ;;  %v12862_v10 = vpop.f32.mrb[122].mxu0  ;;  %v14309_v60 = vld [vmem:[#allocation2 + $0xd0] sm:$0xff] }
 0x3e0   : > { %13521 = vmatprep.subr.bf16.mxu1 %v13962_v4  ;;  %13300 = vmatmul.mubr.bf16.vlgmr.msra.gmra.mrb[224].mxu0 %v8129_v53  ;;  %v13082_v7 = vpop.f32.mrb[186].mxu1  ;;  %v4837_v62 = vpop.f32.mrb[123].mxu0  ;;  %v18930_v53 = vld [vmem:[#allocation54_spill] sm:$0xff] }
 0x3e1   : > { %13348 = vmatpush3.bf16.msra.mxu0 %v13963_v13  ;;  %13303 = vmatprep.mubr.bf16.mxu0 %v8131_v59  ;;  %v17390_v57 = vpop.f32.mrb[187].mxu1  ;;  %v8134_v13 = vrot.slane %v14308_v28, 4  ;;  %v4874_v30 = vadd.f32 %v4837_v62, %v17311_v39  ;;  %v8133_v59 = vsel %vm1972_vm4, %v8130_v45, %v8132_v23  ;;  %v17399_v11 = vadd.f32 %v18931_v26, %v4873_v36  ;;  %v18932_v7 = vld [vmem:[#allocation31_spill] sm:$0xff]  ;;  %v13971_v39 = vld [vmem:[#allocation4 + $0x60] sm:$0xff]   ;;  %v13970_v36 = vld [vmem:[#allocation4 + $0x1d8] sm:$0xff]  }
 0x3e2   : > { %13349 = vmatprep.subr.bf16.mxu0 %v13965_v44  ;;  %v17407_v28 = vrot.slane %v14309_v60, 4  ;;  %v18933_v62 = vshrl.u32 %v17315_v32, 16 }
 0x3e3   : > { %13522 = vmatpush3.bf16.msra.mxu1 %v13962_v4  ;;  %v13969_v4 = vld [vmem:[#allocation4 + $0x58] sm:$0xff]   ;;  %v8135_v17 = vsel %vm1972_vm4, %v8132_v23, %v8134_v13  ;;  %v17403_v34 = vadd.f32 %v18932_v7, %v4874_v30 }
 0x3e4   : > { %13571 = vmatprep.subr.bf16.mxu1 %v13964_v27  ;;  %v9866_v30 = vrot.slane %v18933_v62, 4  ;;  %v18938_v62 = vld [vmem:[#allocation58_spill] sm:$0xff] }
 0x3e5   : > { %13350 = vmatpush3.bf16.msra.mxu0 %v13965_v44  ;;  %v13085_v44 = vpop.f32.mrb[188].mxu1  ;;  %v12865_v45 = vpop.f32.mrb[124].mxu0 }
 0x3e6   : > { %13524 = vmatmul.mubr.bf16.vlgmr.msra.gmra.mrb[36].mxu1 %v9853_v58  ;;  %13351 = vmatprep.subr.bf16.mxu0 %v13967_v46  ;;  %v17405_v51 = vpop.f32.mrb[189].mxu1  ;;  %v4850_v23 = vpop.f32.mrb[125].mxu0  ;;  %v18935_v44 = vld [vmem:[#allocation57_spill] sm:$0xff]  ;;  %v18936_v45 = vshrl.u32 %v17321_v21, 16 }
 0x3e7   : > { %13527 = vmatprep.mubr.bf16.mxu1 %v18930_v53  ;;  %13572 = vmatpush3.bf16.msra.mxu1 %v13964_v27  ;;  %v13086_v27 = vpop.f32.mrb[190].mxu1 }
 0x3e8   : > { %13573 = vmatprep.subr.bf16.mxu1 %v13966_v31  ;;  %13304 = vmatmul.mubr.bf16.gmra.mrb[228].mxu0 %v8133_v59  ;;  %v17409_v58 = vpop.f32.mrb[191].mxu1  ;;  %v18934_v59 = vshll.u32 %v17315_v32, 16  ;;  %v9821_v27 = vld [vmem:[#allocation2 + $0x110] sm:$0x1f]  ;;  %v9870_v60 = vrot.slane %v18936_v45, 4 }
 0x3e9   : > { %13352 = vmatpush3.bf16.msra.mxu0 %v13967_v46  ;;  %13307 = vmatprep.mubr.bf16.mxu0 %v8135_v17  ;;  %v14310_v46 = vld [vmem:[#allocation2 + $0xd8] sm:$0xff]  ;;  %v12866_v17 = vpop.f32.mrb[126].mxu0 }
 0x3ea   : > { %13353 = vmatprep.subr.bf16.mxu0 %v13969_v4  ;;  %v17411_v10 = vrot.slane %v14310_v46, 4  ;;  %v9867_v26 = vrot.slane %v18934_v59, 5  ;;  %v4853_v7 = vpop.f32.mrb[127].mxu0  ;;  %v18937_v46 = vshll.u32 %v17321_v21, 16  ;;  %v13972_v21 = vld [vmem:[#allocation4 + $0x1e0] sm:$0xff]  }
 0x3eb   : > { %13574 = vmatpush3.bf16.msra.mxu1 %v13966_v31  ;;  %v4877_v31 = vadd.f32 %v4850_v23, %v17332_v52  ;;  %v4878_v32 = vadd.f32 %v4853_v7, %v17341_v29  ;;  %v8137_v52 = vsel %vm1972_vm4, %v8134_v13, %v17407_v28  ;;  %v13089_v45 = vpop.f32.mrb[192].mxu1  ;;  %v9875_v29 = vshrl.u32 %v9821_v27, 16  ;;  %v17436_v7 = vld [vmem:[#allocation2 + $0xc0] sm:$0xf0]  ;;  %v18940_v13 = vld [vmem:[#allocation19_spill] sm:$0xff] }
 0x3ec   : > { %13575 = vmatprep.subr.bf16.mxu1 %v13968_v15  ;;  %v9871_v5 = vrot.slane %v18937_v46, 5  ;;  %v17433_v59 = vsel %vm1972_vm4, %v17407_v28, %v17411_v10  ;;  %v9868_v17 = vor.u32 %v9867_v26, %v9866_v30  ;;  %v17441_v46 = vpop.f32.mrb[193].mxu1  ;;  %v14311_v30 = vld [vmem:[#allocation2 + $0xe0] sm:$0xf]  ;;  %v8701_v61 = vrot.slane %v17436_v7, 4 }
 0x3ed   : > { %13354 = vmatpush3.bf16.msra.mxu0 %v13969_v4  ;;  %v18939_v4 = vld [vmem:[#allocation18_spill] sm:$0xff]  ;;  %18941 = vst [vmem:[#allocation22_spill] sm:$0xff] %v17441_v46  ;;  %v13090_v18 = vpop.f32.mrb[194].mxu1  ;;  %v12917_v38 = vpop.f32.mrb[128].mxu0  ;;  %v8140_v26 = vrot.slane %v14311_v30, 4 }
 0x3ee   : > { %13528 = vmatmul.mubr.bf16.gmra.mrb[40].mxu1 %v18935_v44  ;;  %13355 = vmatprep.subr.bf16.mxu0 %v13971_v39  ;;  %v17428_v23 = vadd.f32 %v18939_v4, %v4877_v31  ;;  %v17439_v31 = vadd.f32 %v18940_v13, %v4878_v32  ;;  %v13975_v4 = vld [vmem:[#allocation4 + $0x70] sm:$0xff]   ;;  %v5288_v45 = vpop.f32.mrb[129].mxu0  ;;  %v8702_v32 = vrot.slane %v14312_v50, 4  ;;  %v18943_v13 = vld [vmem:[#allocation55_spill] sm:$0xff] }
 0x3ef   : > { %13531 = vmatprep.mubr.bf16.mxu1 %v18938_v62  ;;  %13576 = vmatpush3.bf16.msra.mxu1 %v13968_v15  ;;  %v9878_v15 = vshll.u32 %v9821_v27, 16  ;;  %v13974_v27 = vld [vmem:[#allocation4 + $0x1e8] sm:$0xff]   ;;  %v9869_v6 = vsel %vm2395_vm6, %v18943_v13, %v9868_v17  ;;  %v5351_v18 = vadd.f32 %v5288_v45, %v17365_v55  ;;  %v12918_v38 = vpop.f32.mrb[130].mxu0  ;;  %v8141_v50 = vsel %vm1972_vm4, %v17411_v10, %v8140_v26  ;;  %v14314_v26 = vld [vmem:[#allocation2 + $0xe8] sm:$0xff] }
 0x3f0   : > { %13577 = vmatprep.subr.bf16.mxu1 %v13970_v36  ;;  %13308 = vmatmul.mubr.bf16.gmra.mrb[232].mxu0 %v8137_v52  ;;  %v9872_v52 = vor.u32 %v9871_v5, %v9870_v60  ;;  %v9877_v5 = vrot.slane %v9875_v29, 4  ;;  %v5291_v30 = vpop.f32.mrb[131].mxu0  ;;  %v10353_v38 = vrot.slane %v14314_v26, 4 }
 0x3f1   : > { %13356 = vmatpush3.bf16.msra.mxu0 %v13971_v39  ;;  %13311 = vmatprep.mubr.bf16.mxu0 %v17433_v59  ;;  %v17443_v39 = vpop.f32.mrb[195].mxu1  ;;  %v9880_v60 = vrot.slane %v9878_v15, 5  ;;  %v5352_v46 = vadd.f32 %v5291_v30, %v17369_v56  ;;  %v17454_v29 = vadd.f32 %v17089_v2, %v5351_v18  ;;  %v14313_v56 = vld [vmem:[#allocation2 + $0xe0] sm:$0xf0]  ;;  %v13979_v2 = vld [vmem:[#allocation4 + $0x80] sm:$0xff]  }
 0x3f2   : > { %13357 = vmatprep.subr.bf16.mxu0 %v13973_v33  ;;  %18942 = vst [vmem:[#allocation24_spill] sm:$0xff] %v17443_v39  ;;  %v13977_v39 = vld [vmem:[#allocation4 + $0x78] sm:$0xff]   ;;  %v10352_v45 = vrot.slane %v14313_v56, 4 }
 0x3f3   : > { %13578 = vmatpush3.bf16.msra.mxu1 %v13970_v36  ;;  %v9873_v36 = vsel %vm2395_vm6, %v9868_v17, %v9872_v52  ;;  %v9881_v55 = vor.u32 %v9880_v60, %v9877_v5  ;;  %v13141_v17 = vpop.f32.mrb[196].mxu1  ;;  %v17458_v15 = vadd.f32 %v17100_v43, %v5352_v46 }
 0x3f4   : > { %13579 = vmatprep.subr.bf16.mxu1 %v13972_v21  ;;  %v10354_v30 = vsel %vm1972_vm4, %v10352_v45, %v10353_v38  ;;  %v8705_v17 = vsel %vm1972_vm4, %v8702_v32, %v17407_v28  ;;  %v13981_v28 = vld [vmem:[#allocation4 + $0x90] sm:$0xff]  }
 0x3f5   : > { %13358 = vmatpush3.bf16.msra.mxu0 %v13973_v33  ;;  %v8703_v33 = vsel %vm1972_vm4, %v8701_v61, %v8702_v32  ;;  %v9882_v60 = vsel %vm2395_vm6, %v9872_v52, %v9881_v55 }
 0x3f6   : > { %13532 = vmatmul.mubr.bf16.gmra.mrb[44].mxu1 %v9869_v6  ;;  %13359 = vmatprep.subr.bf16.mxu0 %v13975_v4  ;;  %v13976_v6 = vld [vmem:[#allocation4 + $0x1f0] sm:$0xff]  }
 0x3f7   : > { %13535 = vmatprep.mubr.bf16.mxu1 %v9873_v36  ;;  %13580 = vmatpush3.bf16.msra.mxu1 %v13972_v21  ;;  %v17460_v21 = vpop.f32.mrb[197].mxu1  ;;  %v12921_v36 = vpop.f32.mrb[132].mxu0 }
 0x3f8   : > { %13581 = vmatprep.subr.bf16.mxu1 %v13974_v27  ;;  %13312 = vmatmul.mubr.bf16.gmra.mrb[236].mxu0 %v8141_v50  ;;  %v13142_v18 = vpop.f32.mrb[198].mxu1  ;;  %v5304_v5 = vpop.f32.mrb[133].mxu0 }
 0x3f9   : > { %13360 = vmatpush3.bf16.msra.mxu0 %v13975_v4  ;;  %13363 = vmatprep.mubr.bf16.mxu0 %v8703_v33  ;;  %v17462_v61 = vpop.f32.mrb[199].mxu1  ;;  %v13978_v4 = vld [vmem:[#allocation4 + $0x1f8] sm:$0xff]   ;;  %v5355_v43 = vadd.f32 %v5304_v5, %v17382_v37  ;;  %v12922_v46 = vpop.f32.mrb[134].mxu0  ;;  %v13980_v33 = vld [vmem:[#allocation4 + $0x88] sm:$0xff]   ;;  %v14315_v37 = vld [vmem:[#allocation2 + $0xf0] sm:$0xff] }
 0x3fa   : > { %13361 = vmatprep.subr.bf16.mxu0 %v13977_v39  ;;  %v5307_v50 = vpop.f32.mrb[135].mxu0  ;;  %v10355_v52 = vrot.slane %v14315_v37, 4 }
 0x3fb   : > { %13582 = vmatpush3.bf16.msra.mxu1 %v13974_v27  ;;  %v5356_v27 = vadd.f32 %v5307_v50, %v17386_v24  ;;  %v17471_v56 = vadd.f32 %v17138_v9, %v5355_v43  ;;  %v14316_v24 = vld [vmem:[#allocation2 + $0xf8] sm:$0xff] }
 0x3fc   : > { %13583 = vmatprep.subr.bf16.mxu1 %v13976_v6  ;;  %v10357_v45 = vrot.slane %v14316_v24, 4  ;;  %v10356_v36 = vsel %vm1972_vm4, %v10353_v38, %v10355_v52  ;;  %v18945_v38 = vld [vmem:[#allocation43_spill] sm:$0xff] }
 0x3fd   : > { %13362 = vmatpush3.bf16.msra.mxu0 %v13977_v39  ;;  %v13145_v39 = vpop.f32.mrb[200].mxu1  ;;  %v17475_v55 = vadd.f32 %v17147_v48, %v5356_v27  ;;  %v13983_v27 = vld [vmem:[#allocation4 + $0xa0] sm:$0xff]  }
 0x3fe   : > { %13536 = vmatmul.mubr.bf16.gmra.mrb[48].mxu1 %v9882_v60  ;;  %13411 = vmatprep.subr.bf16.mxu0 %v13979_v2  ;;  %v12925_v9 = vpop.f32.mrb[136].mxu0  ;;  %v10358_v48 = vsel %vm1972_vm4, %v10355_v52, %v10357_v45  ;;  %v13982_v60 = vld [vmem:[#allocation4 + $0x98] sm:$0xff]   ;;  %v9125_v52 = vshll.u32 %v17436_v7, 16  ;;  %v18946_v39 = vld [vmem:[#allocation50_spill] sm:$0xff] }
 0x3ff   : > { %13584 = vmatpush3.bf16.msra.mxu1 %v13976_v6  ;;  %13587 = vmatprep.mubr.bf16.mxu1 %v10354_v30  ;;  %v17477_v6 = vpop.f32.mrb[201].mxu1  ;;  %v5320_v18 = vpop.f32.mrb[137].mxu0  ;;  %v10360_v24 = vsel %vm1972_vm4, %v10357_v45, %v18946_v39  ;;  %v18948_v45 = vld [vmem:[#allocation45_spill] sm:$0xff] }
 0x400   : > { %13585 = vmatprep.subr.bf16.mxu1 %v13978_v4  ;;  %13364 = vmatmul.mubr.bf16.vlgmr.msra.gmra.mrb[240].mxu0 %v8705_v17  ;;  %v13146_v32 = vpop.f32.mrb[202].mxu1 }
 0x401   : > { %13412 = vmatpush3.bf16.msra.mxu0 %v13979_v2  ;;  %13367 = vmatprep.mubr.bf16.mxu0 %v17433_v59  ;;  %v17479_v26 = vpop.f32.mrb[203].mxu1  ;;  %v5359_v2 = vadd.f32 %v5320_v18, %v17399_v11  ;;  %v12926_v59 = vpop.f32.mrb[138].mxu0  ;;  %v18947_v32 = vld [vmem:[#allocation53_spill] sm:$0xff] }
 0x402   : > { %13413 = vmatprep.subr.bf16.mxu0 %v13980_v33  ;;  %v5323_v5 = vpop.f32.mrb[139].mxu0  ;;  %v17507_v9 = vsel %vm1972_vm4, %v18946_v39, %v18947_v32  ;;  %v9127_v59 = vrot.slane %v9125_v52, 5  ;;  %v13986_v39 = vld [vmem:[#allocation4 + $0xb8] sm:$0xff]  }
 0x403   : > { %13586 = vmatpush3.bf16.msra.mxu1 %v13978_v4  ;;  %v5360_v43 = vadd.f32 %v5323_v5, %v17403_v34  ;;  %v18944_v4 = vld [vmem:[#allocation42_spill] sm:$0xff]  ;;  %v17489_v30 = vadd.f32 %v17176_v41, %v5359_v2  ;;  %v13149_v11 = vpop.f32.mrb[204].mxu1  ;;  %v9122_v41 = vshrl.u32 %v17436_v7, 16 }
 0x404   : > { %v8709_v46 = vsel %vm1972_vm4, %v17411_v10, %v18944_v4 }
 0x405   : > { %13414 = vmatpush3.bf16.msra.mxu0 %v13980_v33  ;;  %v17493_v50 = vadd.f32 %v17189_v16, %v5360_v43  ;;  %v17495_v33 = vpop.f32.mrb[205].mxu1  ;;  %v18949_v43 = vld [vmem:[#allocation46_spill] sm:$0xff] }
 0x406   : > { %13588 = vmatmul.mubr.bf16.vlgmr.msra.gmra.mrb[52].mxu1 %v10356_v36  ;;  %13415 = vmatprep.subr.bf16.mxu0 %v13981_v28  ;;  %v13150_v34 = vpop.f32.mrb[206].mxu1  ;;  %v12929_v17 = vpop.f32.mrb[140].mxu0  ;;  %v13984_v36 = vld [vmem:[#allocation4 + $0xa8] sm:$0xff]  }
 0x407   : > { %13591 = vmatprep.mubr.bf16.mxu1 %v10358_v48  ;;  %v17497_v37 = vpop.f32.mrb[207].mxu1  ;;  %v5336_v10 = vpop.f32.mrb[141].mxu0  ;;  %v17515_v48 = vld [vmem:[#allocation2] sm:$0xff] }
 0x408   : > { %13368 = vmatmul.mubr.bf16.gmra.mrb[244].mxu0 %v8709_v46  ;;  %v12930_v16 = vpop.f32.mrb[142].mxu0  ;;  %v10363_v5 = vrot.slane %v17515_v48, 4 }
 0x409   : > { %13416 = vmatpush3.bf16.msra.mxu0 %v13981_v28  ;;  %13371 = vmatprep.mubr.bf16.mxu0 %v18945_v38  ;;  %v5363_v28 = vadd.f32 %v5336_v10, %v17428_v23  ;;  %v5339_v18 = vpop.f32.mrb[143].mxu0  ;;  %v9124_v23 = vrot.slane %v9122_v41, 4 }
 0x40a   : > { %13417 = vmatprep.subr.bf16.mxu0 %v13982_v60  ;;  %v5364_v7 = vadd.f32 %v5339_v18, %v17439_v31  ;;  %v10364_v41 = vsel %vm1972_vm4, %v18947_v32, %v10363_v5  ;;  %v18951_v32 = vld [vmem:[#allocation49_spill] sm:$0xff] }
 0x40b   : > { %v17512_v2 = vadd.f32 %v17226_v14, %v5363_v28  ;;  %v13985_v14 = vld [vmem:[#allocation4 + $0xb0] sm:$0xff]   ;;  %v9128_v10 = vor.u32 %v9127_v59, %v9124_v23 }
 0x40c   : > { %v17520_v4 = vadd.f32 %v17238_v19, %v5364_v7  ;;  %v18950_v7 = vld [vmem:[#allocation47_spill] sm:$0xff] }
 0x40d   : > { %13418 = vmatpush3.bf16.msra.mxu0 %v13982_v60 }
 0x40e   : > { %13592 = vmatmul.mubr.bf16.gmra.mrb[56].mxu1 %v10360_v24  ;;  %13419 = vmatprep.subr.bf16.mxu0 %v13983_v27  ;;  %v17529_v24 = vld [vmem:[#allocation2 + $0x120] sm:$0xf] }
 0x40f   : > { %13595 = vmatprep.mubr.bf16.mxu1 %v17507_v9  ;;  %v10367_v18 = vrot.slane %v17529_v24, 4 }
 0x410   : > { %13372 = vmatmul.mubr.bf16.gmra.mrb[248].mxu0 %v18948_v45  ;;  %v13153_v60 = vpop.f32.mrb[208].mxu1 }
 0x411   : > { %13420 = vmatpush3.bf16.msra.mxu0 %v13983_v27  ;;  %13375 = vmatprep.mubr.bf16.mxu0 %v18949_v43  ;;  %v17522_v46 = vpop.f32.mrb[209].mxu1 }
 0x412   : > { %13421 = vmatprep.subr.bf16.mxu0 %v13984_v36  ;;  %v13154_v31 = vpop.f32.mrb[210].mxu1 }
 0x413   : > { %v12981_v11 = vpop.f32.mrb[144].mxu0  ;;  %v17524_v34 = vpop.f32.mrb[211].mxu1  ;;  %v10368_v31 = vsel %vm1972_vm4, %v10363_v5, %v10367_v18  ;;  %v18953_v18 = vld [vmem:[#allocation34_spill] sm:$0xff] }
 0x414   : > { %v5793_v17 = vpop.f32.mrb[145].mxu0 }
 0x415   : > { %v5856_v27 = vadd.f32 %v5793_v17, %v17454_v29  ;;  %13422 = vmatpush3.bf16.msra.mxu0 %v13984_v36  ;;  %v12982_v52 = vpop.f32.mrb[146].mxu0  ;;  %v9132_v29 = vsel %vm2395_vm6, %v9128_v10, %v18951_v32 }
 0x416   : > { %13596 = vmatmul.mubr.bf16.gmra.mrb[60].mxu1 %v10364_v41  ;;  %v5796_v19 = vpop.f32.mrb[147].mxu0  ;;  %13423 = vmatprep.subr.bf16.mxu0 %v13985_v14 }
 0x417   : > { %v5857_v28 = vadd.f32 %v5796_v19, %v17458_v15  ;;  %v17533_v16 = vadd.f32 %v17277_v54, %v5856_v27  ;;  %13599 = vmatprep.mubr.bf16.mxu1 %v10363_v5  ;;  %v13987_v15 = vld [vmem:[#allocation4 + $0x100] sm:$0xff]   ;;  %v13988_v27 = vld [vmem:[#allocation4 + $0x108] sm:$0xff]  }
 0x418   : > { %13376 = vmatmul.mubr.bf16.gmra.mrb[252].mxu0 %v18950_v7  ;;  %v13205_v36 = vpop.f32.mrb[212].mxu1  ;;  %v13989_v7 = vld [vmem:[#allocation4 + $0x110] sm:$0xff]  }
 0x419   : > { %13424 = vmatpush3.bf16.msra.mxu0 %v13985_v14  ;;  %13427 = vmatprep.mubr.bf16.mxu0 %v9132_v29  ;;  %v17540_v23 = vadd.f32 %v17279_v49, %v5857_v28  ;;  %v17542_v59 = vpop.f32.mrb[213].mxu1  ;;  %v18952_v49 = vld [vmem:[#allocation33_spill] sm:$0xff] }
 0x41a   : > { %13425 = vmatprep.subr.bf16.mxu0 %v13986_v39  ;;  %v13206_v54 = vpop.f32.mrb[214].mxu1  ;;  %v9136_v52 = vsel %vm2395_vm6, %v18951_v32, %v18952_v49 }
 0x41b   : > { %v12985_v60 = vpop.f32.mrb[148].mxu0  ;;  %v17545_v11 = vpop.f32.mrb[215].mxu1 }
 0x41c   : > { %v5809_v17 = vpop.f32.mrb[149].mxu0 }
 0x41d   : > { %v5860_v41 = vadd.f32 %v5809_v17, %v17471_v56  ;;  %13426 = vmatpush3.bf16.msra.mxu0 %v13986_v39  ;;  %v12986_v10 = vpop.f32.mrb[150].mxu0 }
 0x41e   : > { %v5812_v14 = vpop.f32.mrb[151].mxu0  ;;  %13475 = vmatprep.subr.bf16.mxu0 %v13987_v15  ;;  %13600 = vmatmul.mubr.bf16.gmra.mrb[64].mxu1 %v10368_v31 }
 0x41f   : > { %v5861_v19 = vadd.f32 %v5812_v14, %v17475_v55  ;;  %v17553_v28 = vadd.f32 %v17300_v22, %v5860_v41  ;;  %v9104_v41 = vld [vmem:[#allocation2 + $0x100] sm:$0x1f] }
 0x420   : > { %13428 = vmatmul.mubr.bf16.vlgmr.msra.gmra.mrb[0].mxu0 %v9136_v52  ;;  %v13209_v5 = vpop.f32.mrb[216].mxu1 }
 0x421   : > { %13476 = vmatpush3.bf16.msra.mxu0 %v13987_v15  ;;  %13431 = vmatprep.mubr.bf16.mxu0 %v18953_v18  ;;  %v17557_v56 = vadd.f32 %v17302_v47, %v5861_v19  ;;  %v17559_v39 = vpop.f32.mrb[217].mxu1  ;;  %v13990_v15 = vld [vmem:[#allocation4 + $0x118] sm:$0xff]   ;;  %v9144_v47 = vsel %vm2395_vm6, %v17015_v3, %v18929_v1  ;;  %v9158_v1 = vshrl.u32 %v9104_v41, 16 }
 0x422   : > { %13477 = vmatprep.subr.bf16.mxu0 %v13988_v27  ;;  %v13210_v29 = vpop.f32.mrb[218].mxu1 }
 0x423   : > { %v12989_v36 = vpop.f32.mrb[152].mxu0  ;;  %v17561_v32 = vpop.f32.mrb[219].mxu1 }
 0x424   : > { %v5825_v55 = vpop.f32.mrb[153].mxu0 }
 0x425   : > { %v5864_v22 = vadd.f32 %v5825_v55, %v17489_v30  ;;  %13478 = vmatpush3.bf16.msra.mxu0 %v13988_v27  ;;  %v12990_v54 = vpop.f32.mrb[154].mxu0  ;;  %v13991_v27 = vld [vmem:[#allocation4 + $0x120] sm:$0xff]  }
 0x426   : > { %v5828_v60 = vpop.f32.mrb[155].mxu0  ;;  %13479 = vmatprep.subr.bf16.mxu0 %v13989_v7  ;;  %v13993_v54 = vld [vmem:[#allocation4 + $0x130] sm:$0xff]  }
 0x427   : > { %v5865_v31 = vadd.f32 %v5828_v60, %v17493_v50  ;;  %v17569_v17 = vadd.f32 %v17319_v42, %v5864_v22  ;;  %v9161_v50 = vshll.u32 %v9104_v41, 16 }
 0x428   : > { %13432 = vmatmul.mubr.bf16.gmra.mrb[4].mxu0 %v9144_v47  ;;  %v13213_v10 = vpop.f32.mrb[220].mxu1 }
 0x429   : > { %13480 = vmatpush3.bf16.msra.mxu0 %v13989_v7  ;;  %13435 = vmatprep.mubr.bf16.mxu0 %v18930_v53  ;;  %v17573_v30 = vadd.f32 %v17325_v0, %v5865_v31  ;;  %v17575_v14 = vpop.f32.mrb[221].mxu1  ;;  %v13992_v53 = vld [vmem:[#allocation4 + $0x128] sm:$0xff]   ;;  %v9160_v7 = vrot.slane %v9158_v1, 4  ;;  %v9163_v29 = vrot.slane %v9161_v50, 5  ;;  %v17599_v10 = vld [vmem:[%s18558_s10] ss:$0 sm:$0xff] }
 0x42a   : > { %13481 = vmatprep.subr.bf16.mxu0 %v13990_v15  ;;  %v13214_v49 = vpop.f32.mrb[222].mxu1  ;;  %v18954_v1 = vld [vmem:[#allocation59_spill] sm:$0xff] }
 0x42b   : > { %v12993_v3 = vpop.f32.mrb[156].mxu0  ;;  %v17577_v52 = vpop.f32.mrb[223].mxu1 }
 0x42c   : > { %v5841_v42 = vpop.f32.mrb[157].mxu0 }
 0x42d   : > { %v5868_v19 = vadd.f32 %v5841_v42, %v17512_v2  ;;  %13482 = vmatpush3.bf16.msra.mxu0 %v13990_v15  ;;  %v12994_v5 = vpop.f32.mrb[158].mxu0 }
 0x42e   : > { %v5844_v18 = vpop.f32.mrb[159].mxu0  ;;  %13483 = vmatprep.subr.bf16.mxu0 %v13991_v27 }
 0x42f   : > { %v5869_v0 = vadd.f32 %v5844_v18, %v17520_v4  ;;  %v17582_v36 = vadd.f32 %v17346_v12, %v5868_v19  ;;  %v9164_v4 = vor.u32 %v9163_v29, %v9160_v7 }
 0x430   : > { %13436 = vmatmul.mubr.bf16.gmra.mrb[8].mxu0 %v18935_v44  ;;  %v13217_v55 = vpop.f32.mrb[224].mxu1 }
 0x431   : > { %13484 = vmatpush3.bf16.msra.mxu0 %v13991_v27  ;;  %13439 = vmatprep.mubr.bf16.mxu0 %v18938_v62  ;;  %v17587_v2 = vadd.f32 %v17350_v20, %v5869_v0  ;;  %v17589_v22 = vpop.f32.mrb[225].mxu1  ;;  %v13994_v62 = vld [vmem:[#allocation4 + $0x138] sm:$0xff]   ;;  %v9165_v20 = vsel %vm2395_vm6, %v18943_v13, %v9164_v4  ;;  %v13995_v13 = vld [vmem:[#allocation4 + $0x180] sm:$0xff]  }
 0x432   : > { %13485 = vmatprep.subr.bf16.mxu0 %v13992_v53  ;;  %v13218_v60 = vpop.f32.mrb[226].mxu1 }
 0x433   : > { %v13045_v15 = vpop.f32.mrb[160].mxu0  ;;  %v17591_v47 = vpop.f32.mrb[227].mxu1  ;;  %v13996_v60 = vld [vmem:[#allocation4 + $0x188] sm:$0xff]  }
 0x434   : > { %v6236_v12 = vpop.f32.mrb[161].mxu0 }
 0x435   : > { %v6299_v31 = vadd.f32 %v6236_v12, %v17533_v16  ;;  %13486 = vmatpush3.bf16.msra.mxu0 %v13992_v53  ;;  %v13046_v44 = vpop.f32.mrb[162].mxu0  ;;  %v18955_v12 = vld [vmem:[#allocation60_spill] sm:$0xff] }
 0x436   : > { %v6239_v41 = vpop.f32.mrb[163].mxu0  ;;  %13487 = vmatprep.subr.bf16.mxu0 %v13993_v54 }
 0x437   : > { %v17602_v27 = vadd.f32 %v17599_v10, %v6299_v31  ;;  %v6300_v49 = vadd.f32 %v6239_v41, %v17540_v23 }
 0x438   : > { %13440 = vmatmul.mubr.bf16.gmra.mrb[12].mxu0 %v9165_v20  ;;  %v13997_v20 = vld [vmem:[#allocation4 + $0x190] sm:$0xff]  }
 0x439   : > { %v13269_v16 = vpop.f32.mrb[228].mxu1  ;;  %v17606_v3 = vadd.f32 %v17599_v10, %v6300_v49  ;;  %13488 = vmatpush3.bf16.msra.mxu0 %v13993_v54  ;;  %13491 = vmatprep.mubr.bf16.mxu0 %v18954_v1  ;;  %v6369_v42 = vmul.f32 %v17602_v27, %v17602_v27 }
 0x43a   : > { %v17609_v50 = vpop.f32.mrb[229].mxu1  ;;  %13489 = vmatprep.subr.bf16.mxu0 %v13994_v62 }
 0x43b   : > { %v6347_v19 = vadd.f32 %v17606_v3, %v17602_v27  ;;  %v6370_v23 = vmul.f32 %v17606_v3, %v17606_v3  ;;  %v13270_v5 = vpop.f32.mrb[230].mxu1  ;;  %v13049_v18 = vpop.f32.mrb[164].mxu0 }
 0x43c   : > { %v17617_v53 = vpop.f32.mrb[231].mxu1  ;;  %v6252_v0 = vpop.f32.mrb[165].mxu0 }
 0x43d   : > { %v6385_v7 = vadd.f32 %v6370_v23, %v6369_v42  ;;  %v6303_v29 = vadd.f32 %v6252_v0, %v17553_v28  ;;  %13490 = vmatpush3.bf16.msra.mxu0 %v13994_v62  ;;  %v13050_v55 = vpop.f32.mrb[166].mxu0  ;;  %v13998_v0 = vld [vmem:[#allocation4 + $0x198] sm:$0xff]  }
 0x43e   : > { %v6255_v54 = vpop.f32.mrb[167].mxu0  ;;  %13539 = vmatprep.subr.bf16.mxu0 %v13995_v13  ;;  %v10052_v55 = vld [vmem:[#allocation2 + $0xe0] sm:$0xf8] }
 0x43f   : > { %v17621_v4 = vadd.f32 %v17599_v10, %v6303_v29  ;;  %v6304_v15 = vadd.f32 %v6255_v54, %v17557_v56 }
 0x440   : > { %13492 = vmatmul.mubr.bf16.vlgmr.msra.gmra.mrb[16].mxu0 %v18955_v12 }
 0x441   : > { %v6350_v31 = vadd.f32 %v6347_v19, %v17621_v4  ;;  %v6373_v44 = vmul.f32 %v17621_v4, %v17621_v4  ;;  %v13273_v41 = vpop.f32.mrb[232].mxu1  ;;  %v17629_v28 = vadd.f32 %v17599_v10, %v6304_v15  ;;  %13540 = vmatpush3.bf16.msra.mxu0 %v13995_v13  ;;  %13495 = vmatprep.mubr.bf16.mxu0 %v18945_v38 }
 0x442   : > { %v17632_v62 = vpop.f32.mrb[233].mxu1  ;;  %13541 = vmatprep.subr.bf16.mxu0 %v13996_v60  ;;  %v10078_v41 = vshrl.u32 %v10052_v55, 16 }
 0x443   : > { %v6388_v49 = vadd.f32 %v6385_v7, %v6373_v44  ;;  %v6351_v56 = vadd.f32 %v6350_v31, %v17629_v28  ;;  %v6374_v16 = vmul.f32 %v17629_v28, %v17629_v28  ;;  %v13274_v1 = vpop.f32.mrb[234].mxu1  ;;  %v13053_v42 = vpop.f32.mrb[168].mxu0  ;;  %v13999_v31 = vld [vmem:[#allocation4 + $0x1a0] sm:$0xff]  }
 0x444   : > { %v17637_v19 = vpop.f32.mrb[235].mxu1  ;;  %v6268_v23 = vpop.f32.mrb[169].mxu0  ;;  %v10081_v42 = vshll.u32 %v10052_v55, 16  ;;  %v18958_v55 = vld [vmem:[#allocation56_spill] sm:$0xff] }
 0x445   : > { %v6389_v5 = vadd.f32 %v6388_v49, %v6374_v16  ;;  %v6307_v13 = vadd.f32 %v6268_v23, %v17569_v17  ;;  %13542 = vmatpush3.bf16.msra.mxu0 %v13996_v60  ;;  %v13054_v38 = vpop.f32.mrb[170].mxu0  ;;  %v4135_v17 = vrot.slane %v17249_v35, 4  ;;  %v4173_v49 = vrot.slane %v17261_v63, 4 }
 0x446   : > { %v6271_v18 = vpop.f32.mrb[171].mxu0  ;;  %13543 = vmatprep.subr.bf16.mxu0 %v13997_v20 }
 0x447   : > { %v17641_v7 = vadd.f32 %v17599_v10, %v6307_v13  ;;  %v6308_v29 = vadd.f32 %v6271_v18, %v17573_v30  ;;  %v4136_v38 = vadd.f32 %v4135_v17, %v17249_v35  ;;  %v14000_v18 = vld [vmem:[#allocation4 + $0x1a8] sm:$0xff]  }
 0x448   : > { %13496 = vmatmul.mubr.bf16.gmra.mrb[20].mxu0 %v18948_v45 }
 0x449   : > { %v6377_v54 = vmul.f32 %v17641_v7, %v17641_v7  ;;  %v13277_v15 = vpop.f32.mrb[236].mxu1  ;;  %v17648_v12 = vadd.f32 %v17599_v10, %v6308_v29  ;;  %13544 = vmatpush3.bf16.msra.mxu0 %v13997_v20  ;;  %13499 = vmatprep.mubr.bf16.mxu0 %v18949_v43  ;;  %v6354_v30 = vadd.f32 %v6351_v56, %v17641_v7 }
 0x44a   : > { %v17652_v60 = vpop.f32.mrb[237].mxu1  ;;  %13545 = vmatprep.subr.bf16.mxu0 %v13998_v0  ;;  %v4174_v15 = vadd.f32 %v4173_v49, %v17261_v63  ;;  %v14001_v63 = vld [vmem:[#allocation4 + $0x1b0] sm:$0xff]  }
 0x44b   : > { %18956 = vst [vmem:[#allocation25_spill] sm:$0xff] %v17648_v12  ;;  %v13278_v45 = vpop.f32.mrb[238].mxu1  ;;  %v13057_v44 = vpop.f32.mrb[172].mxu0  ;;  %v6392_v16 = vadd.f32 %v6389_v5, %v6377_v54  ;;  %v6378_v1 = vmul.f32 %v17648_v12, %v17648_v12  ;;  %v6355_v29 = vadd.f32 %v6354_v30, %v17648_v12 }
 0x44c   : > { %v17658_v20 = vpop.f32.mrb[239].mxu1  ;;  %v6284_v43 = vpop.f32.mrb[173].mxu0 }
 0x44d   : > { %v6311_v23 = vadd.f32 %v6284_v43, %v17582_v36  ;;  %13546 = vmatpush3.bf16.msra.mxu0 %v13998_v0  ;;  %v13058_v13 = vpop.f32.mrb[174].mxu0  ;;  %v6393_v45 = vadd.f32 %v6392_v16, %v6378_v1  ;;  %v10080_v36 = vrot.slane %v10078_v41, 3  ;;  %v10083_v0 = vrot.slane %v10081_v42, 4 }
 0x44e   : > { %v6287_v56 = vpop.f32.mrb[175].mxu0  ;;  %13547 = vmatprep.subr.bf16.mxu0 %v13999_v31 }
 0x44f   : > { %v17664_v5 = vadd.f32 %v17599_v10, %v6311_v23  ;;  %v6312_v54 = vadd.f32 %v6287_v56, %v17587_v2  ;;  %v4137_v2 = vrot.slane %v4136_v38, 2  ;;  %v4175_v23 = vrot.slane %v4174_v15, 2 }
 0x450   : > { %13500 = vmatmul.mubr.bf16.gmra.mrb[24].mxu0 %v18958_v55 }
 0x451   : > { %18957 = vst [vmem:[#allocation38_spill] sm:$0xff] %v17664_v5  ;;  %v6358_v44 = vadd.f32 %v6355_v29, %v17664_v5  ;;  %v6381_v35 = vmul.f32 %v17664_v5, %v17664_v5  ;;  %v13281_v17 = vpop.f32.mrb[240].mxu1  ;;  %v17673_v30 = vadd.f32 %v17599_v10, %v6312_v54  ;;  %13548 = vmatpush3.bf16.msra.mxu0 %v13999_v31  ;;  %v18960_v5 = vld [vmem:[#allocation61_spill] sm:$0xff] }
 0x452   : > { %13503 = vmatprep.mubr.bf16.mxu0 %v17507_v9  ;;  %v17676_v43 = vpop.f32.mrb[241].mxu1  ;;  %13549 = vmatprep.subr.bf16.mxu0 %v14000_v18  ;;  %v10084_v31 = vor.u32 %v10083_v0, %v10080_v36  ;;  %v4138_v55 = vadd.f32 %v4137_v2, %v4136_v38  ;;  %v18961_v36 = vld [vmem:[#allocation62_spill] sm:$0xff] }
 0x453   : > { %18959 = vst [vmem:[#allocation23_spill] sm:$0xff] %v17673_v30  ;;  %v6396_v49 = vadd.f32 %v6393_v45, %v6381_v35  ;;  %v6359_v41 = vadd.f32 %v6358_v44, %v17673_v30  ;;  %v6382_v16 = vmul.f32 %v17673_v30, %v17673_v30  ;;  %v13282_v1 = vpop.f32.mrb[242].mxu1  ;;  %v13109_v42 = vpop.f32.mrb[176].mxu0  ;;  %v14002_v44 = vld [vmem:[#allocation4 + $0x1b8] sm:$0xff]   ;;  %v4176_v30 = vadd.f32 %v4175_v23, %v4174_v15 }
 0x454   : > { %v17681_v13 = vpop.f32.mrb[243].mxu1  ;;  %v6814_v10 = vpop.f32.mrb[177].mxu0  ;;  %v10093_v0 = vsel %vm2143_vm5, %v10084_v31, %v18961_v36  ;;  %v4139_v2 = vrot.slane %v4138_v55, 1 }
 0x455   : > { %v6362_v56 = vrot.slane %v6359_v41, 4  ;;  %v6397_v9 = vadd.f32 %v6396_v49, %v6382_v16  ;;  %v6815_v29 = vadd.f32 %v6814_v10, %v17371_v40  ;;  %13550 = vmatpush3.bf16.msra.mxu0 %v14000_v18  ;;  %v13110_v54 = vpop.f32.mrb[178].mxu0  ;;  %v4177_v23 = vrot.slane %v4176_v30, 1 }
 0x456   : > { %v6817_v45 = vpop.f32.mrb[179].mxu0  ;;  %13551 = vmatprep.subr.bf16.mxu0 %v14001_v63 }
 0x457   : > { %v6363_v35 = vadd.f32 %v6362_v56, %v6359_v41  ;;  %v6400_v17 = vrot.slane %v6397_v9, 4  ;;  %v6818_v1 = vadd.f32 %v6817_v45, %v17373_v8  ;;  %v17686_v42 = vadd.f32 %v17460_v21, %v6815_v29  ;;  %v14003_v8 = vld [vmem:[#allocation4 + $0x200] sm:$0xff]   ;;  %v14004_v45 = vld [vmem:[#allocation4 + $0x208] sm:$0xff]  }
 0x458   : > { %13504 = vmatmul.mubr.bf16.gmra.mrb[28].mxu0 %v18960_v5  ;;  %v4140_v29 = vadd.f32 %v4139_v2, %v4138_v55 }
 0x459   : > { %v6364_v40 = vrot.slane %v6363_v35, 2  ;;  %v6401_v18 = vadd.f32 %v6400_v17, %v6397_v9  ;;  %v13333_v49 = vpop.f32.mrb[244].mxu1  ;;  %13552 = vmatpush3.bf16.msra.mxu0 %v14001_v63  ;;  %13555 = vmatprep.mubr.bf16.mxu0 %v10093_v0  ;;  %v17692_v38 = vadd.f32 %v17462_v61, %v6818_v1  ;;  %v4178_v0 = vadd.f32 %v4177_v23, %v4176_v30 }
 0x45a   : > { %v17694_v41 = vpop.f32.mrb[245].mxu1  ;;  %13553 = vmatprep.subr.bf16.mxu0 %v14002_v44 }
 0x45b   : > { %v6365_v21 = vadd.f32 %v6364_v40, %v6363_v35  ;;  %v6402_v15 = vrot.slane %v6401_v18, 2  ;;  %v13334_v16 = vpop.f32.mrb[246].mxu1  ;;  %v13113_v5 = vpop.f32.mrb[180].mxu0  ;;  %v18962_v40 = vld [vmem:[#allocation63_spill] sm:$0xff] }
 0x45c   : > { %v17696_v10 = vpop.f32.mrb[247].mxu1  ;;  %v6830_v31 = vpop.f32.mrb[181].mxu0  ;;  %v10134_v16 = vshll.u32 %v17515_v48, 16 }
 0x45d   : > { %v6366_v56 = vrot.slane %v6365_v21, 1  ;;  %v6403_v9 = vadd.f32 %v6402_v15, %v6401_v18  ;;  %v6831_v63 = vadd.f32 %v6830_v31, %v17388_v25  ;;  %13554 = vmatpush3.bf16.msra.mxu0 %v14002_v44  ;;  %v13114_v61 = vpop.f32.mrb[182].mxu0  ;;  %v18963_v44 = vld [vmem:[#allocation64_spill] sm:$0xff]  ;;  %v10131_v15 = vshrl.u32 %v17515_v48, 16 }
 0x45e   : > { %v6833_v54 = vpop.f32.mrb[183].mxu0  ;;  %13603 = vmatprep.subr.bf16.mxu0 %v14003_v8  ;;  %v10136_v61 = vrot.slane %v10134_v16, 4 }
 0x45f   : > { %v6367_v17 = vadd.f32 %v6366_v56, %v6365_v21  ;;  %v6404_v1 = vrot.slane %v6403_v9, 1  ;;  %v6834_v35 = vadd.f32 %v6833_v54, %v17390_v57  ;;  %v17701_v36 = vadd.f32 %v17477_v6, %v6831_v63  ;;  %v14005_v57 = vld [vmem:[#allocation4 + $0x210] sm:$0xff]   ;;  %v14006_v56 = vld [vmem:[#allocation4 + $0x218] sm:$0xff]   ;;  %v18964_v54 = vld [vmem:[#allocation66_spill] sm:$0xff] }
 0x460   : > { %13556 = vmatmul.mubr.bf16.vlgmr.msra.gmra.mrb[32].mxu0 %v18962_v40  ;;  %v10133_v63 = vrot.slane %v10131_v15, 3 }
 0x461   : > { %v17704_v49 = vadd.f32 %v6367_v17, %v4140_v29  ;;  %v6405_v18 = vadd.f32 %v6404_v1, %v6403_v9  ;;  %v13337_v25 = vpop.f32.mrb[248].mxu1  ;;  %13604 = vmatpush3.bf16.msra.mxu0 %v14003_v8  ;;  %13559 = vmatprep.mubr.bf16.mxu0 %v18963_v44  ;;  %v17708_v55 = vadd.f32 %v17479_v26, %v6834_v35  ;;  %v10152_v1 = vshll.u32 %v17529_v24, 16 }
 0x462   : > { %v17710_v2 = vpop.f32.mrb[249].mxu1  ;;  %13605 = vmatprep.subr.bf16.mxu0 %v14004_v45 }
 0x463   : > { %v17712_v21 = vadd.f32 %v6405_v18, %v4178_v0  ;;  %v13338_v6 = vpop.f32.mrb[250].mxu1  ;;  %v13117_v30 = vpop.f32.mrb[184].mxu0  ;;  %v14007_v0 = vld [vmem:[#allocation4 + $0x220] sm:$0xff]  }
 0x464   : > { %v17716_v5 = vpop.f32.mrb[251].mxu1  ;;  %v6846_v8 = vpop.f32.mrb[185].mxu0 }
 0x465   : > { %v6847_v23 = vadd.f32 %v6846_v8, %v17405_v51  ;;  %13606 = vmatpush3.bf16.msra.mxu0 %v14004_v45  ;;  %v13118_v26 = vpop.f32.mrb[186].mxu0  ;;  %v18965_v51 = vld [vmem:[#allocation67_spill] sm:$0xff]  ;;  %v10149_v45 = vshrl.u32 %v17529_v24, 16 }
 0x466   : > { %v6849_v31 = vpop.f32.mrb[187].mxu0  ;;  %13607 = vmatprep.subr.bf16.mxu0 %v14005_v57  ;;  %v18967_v26 = vld [vmem:[#allocation65_spill] sm:$0xff] }
 0x467   : > { %v6850_v9 = vadd.f32 %v6849_v31, %v17409_v58  ;;  %v17725_v29 = vadd.f32 %v17495_v33, %v6847_v23  ;;  %v10137_v33 = vor.u32 %v10136_v61, %v10133_v63  ;;  %v10151_v8 = vrot.slane %v10149_v45, 3  ;;  %v14009_v45 = vld [vmem:[#allocation4 + $0x230] sm:$0xff]  }
 0x468   : > { %13560 = vmatmul.mubr.bf16.gmra.mrb[36].mxu0 %v18964_v54  ;;  %v10154_v23 = vrot.slane %v10152_v1, 4 }
 0x469   : > { %v13341_v17 = vpop.f32.mrb[252].mxu1  ;;  %13608 = vmatpush3.bf16.msra.mxu0 %v14005_v57  ;;  %13563 = vmatprep.mubr.bf16.mxu0 %v18965_v51  ;;  %v17732_v58 = vadd.f32 %v17497_v37, %v6850_v9  ;;  %v18966_v57 = vld [vmem:[#allocation22_spill] sm:$0xff]  ;;  %v14008_v37 = vld [vmem:[#allocation4 + $0x228] sm:$0xff]   ;;  %v10138_v31 = vsel %vm2143_vm5, %v18967_v26, %v10137_v33  ;;  %v18968_v9 = vld [vmem:[#allocation24_spill] sm:$0xff] }
 0x46a   : > { %v17734_v35 = vpop.f32.mrb[253].mxu1  ;;  %13609 = vmatprep.subr.bf16.mxu0 %v14006_v56  ;;  %v10155_v17 = vor.u32 %v10154_v23, %v10151_v8 }
 0x46b   : > { %v13342_v40 = vpop.f32.mrb[254].mxu1  ;;  %v13121_v18 = vpop.f32.mrb[188].mxu0 }
 0x46c   : > { %v17736_v25 = vpop.f32.mrb[255].mxu1  ;;  %v6862_v44 = vpop.f32.mrb[189].mxu0 }
 0x46d   : > { %v6863_v6 = vadd.f32 %v6862_v44, %v18966_v57  ;;  %13610 = vmatpush3.bf16.msra.mxu0 %v14006_v56  ;;  %v13122_v30 = vpop.f32.mrb[190].mxu0 }
 0x46e   : > { %v6865_v24 = vpop.f32.mrb[191].mxu0  ;;  %13611 = vmatprep.subr.bf16.mxu0 %v14007_v0  ;;  %v14010_v30 = vld [vmem:[#allocation4 + $0x238] sm:$0xff]  }
 0x46f   : > { %v6866_v54 = vadd.f32 %v6865_v24, %v18968_v9  ;;  %v17743_v63 = vadd.f32 %v17522_v46, %v6863_v6  ;;  %v18969_v24 = vld [vmem:[#allocation68_spill] sm:$0xff] }
 0x470   : > { %13564 = vmatmul.mubr.bf16.gmra.mrb[40].mxu0 %v10138_v31 }
 0x471   : > { %v13345_v61 = vpop.f32.mrb[0].mxu1  ;;  %13612 = vmatpush3.bf16.msra.mxu0 %v14007_v0  ;;  %13567 = vmatprep.mubr.bf16.mxu0 %v10137_v33  ;;  %v17746_v56 = vadd.f32 %v17524_v34, %v6866_v54  ;;  %v10156_v0 = vsel %vm2143_vm5, %v10137_v33, %v10155_v17 }
 0x472   : > { %v17748_v51 = vpop.f32.mrb[1].mxu1  ;;  %13613 = vmatprep.subr.bf16.mxu0 %v14008_v37 }
 0x473   : > { %v13346_v1 = vpop.f32.mrb[2].mxu1  ;;  %v13173_v40 = vpop.f32.mrb[192].mxu0 }
 0x474   : > { %v17750_v18 = vpop.f32.mrb[3].mxu1  ;;  %v7303_v44 = vpop.f32.mrb[193].mxu0  ;;  %v18971_v1 = vld [vmem:[#allocation70_spill] sm:$0xff] }
 0x475   : > { %v7366_v46 = vadd.f32 %v7303_v44, %v17686_v42  ;;  %13614 = vmatpush3.bf16.msra.mxu0 %v14008_v37  ;;  %v13174_v57 = vpop.f32.mrb[194].mxu0 }
 0x476   : > { %v7306_v6 = vpop.f32.mrb[195].mxu0  ;;  %13615 = vmatprep.subr.bf16.mxu0 %v14009_v45 }
 0x477   : > { %v7367_v34 = vadd.f32 %v7306_v6, %v17692_v38  ;;  %v17756_v8 = vadd.f32 %v17542_v59, %v7366_v46 }
 0x478   : > { %13568 = vmatmul.mubr.bf16.gmra.mrb[44].mxu0 %v10156_v0 }
 0x479   : > { %v13397_v23 = vpop.f32.mrb[4].mxu1  ;;  %13616 = vmatpush3.bf16.msra.mxu0 %v14009_v45  ;;  %13619 = vmatprep.mubr.bf16.mxu0 %v18969_v24  ;;  %v17760_v26 = vadd.f32 %v17545_v11, %v7367_v34  ;;  %v18970_v45 = vld [vmem:[#allocation69_spill] sm:$0xff]  ;;  %v10538_v34 = vld [vmem:[#allocation2 + $0x120] sm:$0x1f] }
 0x47a   : > { %v17762_v42 = vpop.f32.mrb[5].mxu1  ;;  %13617 = vmatprep.subr.bf16.mxu0 %v14010_v30  ;;  %v10583_v23 = vrot.slane %v10131_v15, 4 }
 0x47b   : > { %v13398_v33 = vpop.f32.mrb[6].mxu1  ;;  %v13177_v37 = vpop.f32.mrb[196].mxu0 }
 0x47c   : > { %v17764_v31 = vpop.f32.mrb[7].mxu1  ;;  %v7319_v9 = vpop.f32.mrb[197].mxu0  ;;  %v18972_v33 = vld [vmem:[#allocation71_spill] sm:$0xff] }
 0x47d   : > { %v7370_v38 = vadd.f32 %v7319_v9, %v17701_v36  ;;  %13618 = vmatpush3.bf16.msra.mxu0 %v14010_v30  ;;  %v13178_v59 = vpop.f32.mrb[198].mxu0  ;;  %v18973_v9 = vld [vmem:[#allocation73_spill] sm:$0xff] }
 0x47e   : > { %v7322_v54 = vpop.f32.mrb[199].mxu0 }
 0x47f   : > { %v7371_v61 = vadd.f32 %v7322_v54, %v17708_v55  ;;  %v7582_v17 = vadd.f32 %v17559_v39, %v7370_v38  ;;  %v10592_v38 = vshrl.u32 %v10538_v34, 16 }
 0x480   : > { %13620 = vmatmul.mubr.bf16.vlgmr.msra.gmra.mrb[48].mxu0 %v18970_v45 }
 0x481   : > { %v13401_v11 = vpop.f32.mrb[8].mxu1  ;;  %13623 = vmatprep.mubr.bf16.mxu0 %v18971_v1  ;;  %v7583_v40 = vadd.f32 %v17561_v32, %v7371_v61  ;;  %v10584_v32 = vrot.slane %v10134_v16, 5 }
 0x482   : > { %v17772_v44 = vpop.f32.mrb[9].mxu1  ;;  %v10594_v11 = vrot.slane %v10592_v38, 4 }
 0x483   : > { %v13402_v46 = vpop.f32.mrb[10].mxu1  ;;  %v13181_v57 = vpop.f32.mrb[200].mxu0  ;;  %v10585_v61 = vor.u32 %v10584_v32, %v10583_v23 }
 0x484   : > { %v17774_v0 = vpop.f32.mrb[11].mxu1  ;;  %v7335_v36 = vpop.f32.mrb[201].mxu0  ;;  %v18974_v57 = vld [vmem:[#allocation72_spill] sm:$0xff] }
 0x485   : > { %v7374_v6 = vadd.f32 %v7335_v36, %v17725_v29  ;;  %v13182_v30 = vpop.f32.mrb[202].mxu0  ;;  %v10595_v29 = vshll.u32 %v10538_v34, 16  ;;  %v10586_v36 = vsel %vm2395_vm6, %v18974_v57, %v10585_v61 }
 0x486   : > { %v7338_v55 = vpop.f32.mrb[203].mxu0 }
 0x487   : > { %v7375_v39 = vadd.f32 %v7338_v55, %v17732_v58  ;;  %v7586_v24 = vadd.f32 %v17575_v14, %v7374_v6  ;;  %v10597_v1 = vrot.slane %v10595_v29, 5 }
 0x488   : > { %13624 = vmatmul.mubr.bf16.gmra.mrb[52].mxu0 %v18972_v33 }
 0x489   : > { %v13405_v37 = vpop.f32.mrb[12].mxu1  ;;  %13627 = vmatprep.mubr.bf16.mxu0 %v18973_v9  ;;  %v7587_v59 = vadd.f32 %v17577_v52, %v7375_v39  ;;  %v10598_v55 = vor.u32 %v10597_v1, %v10594_v11 }
 0x48a   : > { %v17786_v54 = vpop.f32.mrb[13].mxu1 }
 0x48b   : > { %v13406_v58 = vpop.f32.mrb[14].mxu1  ;;  %v13185_v45 = vpop.f32.mrb[204].mxu0 }
 0x48c   : > { %v17788_v15 = vpop.f32.mrb[15].mxu1  ;;  %v7351_v48 = vpop.f32.mrb[205].mxu0 }
 0x48d   : > { %v7378_v16 = vadd.f32 %v7351_v48, %v17743_v63  ;;  %v13186_v14 = vpop.f32.mrb[206].mxu0 }
 0x48e   : > { %v7354_v46 = vpop.f32.mrb[207].mxu0 }
 0x48f   : > { %v7379_v6 = vadd.f32 %v7354_v46, %v17746_v56  ;;  %v7590_v52 = vadd.f32 %v17589_v22, %v7378_v16  ;;  %v10599_v56 = vsel %vm2395_vm6, %v10585_v61, %v10598_v55 }
 0x490   : > { %13628 = vmatmul.mubr.bf16.gmra.mrb[56].mxu0 %v10586_v36 }
 0x491   : > { %v13409_v30 = vpop.f32.mrb[16].mxu1  ;;  %13631 = vmatprep.mubr.bf16.mxu0 %v10585_v61  ;;  %v7591_v34 = vadd.f32 %v17591_v47, %v7379_v6 }
 0x492   : > { %v17796_v39 = vpop.f32.mrb[17].mxu1 }
 0x493   : > { %v13410_v63 = vpop.f32.mrb[18].mxu1  ;;  %v13237_v23 = vpop.f32.mrb[208].mxu0 }
 0x494   : > { %v17798_v32 = vpop.f32.mrb[19].mxu1  ;;  %v7746_v33 = vpop.f32.mrb[209].mxu0 }
 0x495   : > { %v7809_v37 = vadd.f32 %v7746_v33, %v17756_v8  ;;  %v13238_v9 = vpop.f32.mrb[210].mxu0 }
 0x496   : > { %v7749_v38 = vpop.f32.mrb[211].mxu0 }
 0x497   : > { %v7810_v22 = vadd.f32 %v7749_v38, %v17760_v26  ;;  %v8083_v29 = vadd.f32 %v17609_v50, %v7809_v37 }
 0x498   : > { %13632 = vmatmul.mubr.bf16.gmra.mrb[60].mxu0 %v10599_v56 }
 0x499   : > { %v13461_v58 = vpop.f32.mrb[20].mxu1  ;;  %v8084_v47 = vadd.f32 %v17617_v53, %v7810_v22 }
 0x49a   : > { %v17805_v45 = vpop.f32.mrb[21].mxu1 }
 0x49b   : > { %v13462_v48 = vpop.f32.mrb[22].mxu1  ;;  %v13241_v16 = vpop.f32.mrb[212].mxu0 }
 0x49c   : > { %v17807_v14 = vpop.f32.mrb[23].mxu1  ;;  %v7762_v11 = vpop.f32.mrb[213].mxu0 }
 0x49d   : > { %v7813_v8 = vadd.f32 %v7762_v11, %v7582_v17  ;;  %v13242_v1 = vpop.f32.mrb[214].mxu0 }
 0x49e   : > { %v7765_v46 = vpop.f32.mrb[215].mxu0 }
 0x49f   : > { %v7814_v61 = vadd.f32 %v7765_v46, %v7583_v40  ;;  %v8087_v57 = vadd.f32 %v17632_v62, %v7813_v8 }
 0x4a1   : > { %v13465_v26 = vpop.f32.mrb[24].mxu1  ;;  %v8088_v50 = vadd.f32 %v17637_v19, %v7814_v61 }
 0x4a2   : > { %v17811_v36 = vpop.f32.mrb[25].mxu1 }
 0x4a3   : > { %v13466_v6 = vpop.f32.mrb[26].mxu1  ;;  %v13245_v53 = vpop.f32.mrb[216].mxu0 }
 0x4a4   : > { %v17813_v30 = vpop.f32.mrb[27].mxu1  ;;  %v7778_v55 = vpop.f32.mrb[217].mxu0 }
 0x4a5   : > { %v7817_v63 = vadd.f32 %v7778_v55, %v7586_v24  ;;  %v13246_v23 = vpop.f32.mrb[218].mxu0 }
 0x4a6   : > { %v7781_v33 = vpop.f32.mrb[219].mxu0 }
 0x4a7   : > { %v7818_v37 = vadd.f32 %v7781_v33, %v7587_v59  ;;  %v8091_v17 = vadd.f32 %v17652_v60, %v7817_v63 }
 0x4a9   : > { %v13469_v9 = vpop.f32.mrb[28].mxu1  ;;  %v8092_v40 = vadd.f32 %v17658_v20, %v7818_v37 }
 0x4aa   : > { %v17817_v62 = vpop.f32.mrb[29].mxu1 }
 0x4ab   : > { %v13470_v56 = vpop.f32.mrb[30].mxu1  ;;  %v13249_v19 = vpop.f32.mrb[220].mxu0 }
 0x4ac   : > { %v17819_v38 = vpop.f32.mrb[31].mxu1  ;;  %v7794_v22 = vpop.f32.mrb[221].mxu0 }
 0x4ad   : > { %v7821_v58 = vadd.f32 %v7794_v22, %v7590_v52  ;;  %v13250_v48 = vpop.f32.mrb[222].mxu0 }
 0x4ae   : > { %v7797_v16 = vpop.f32.mrb[223].mxu0 }
 0x4af   : > { %v7822_v11 = vadd.f32 %v7797_v16, %v7591_v34  ;;  %v8095_v24 = vadd.f32 %v17676_v43, %v7821_v58 }
 0x4b1   : > { %v13473_v8 = vpop.f32.mrb[32].mxu1  ;;  %v8096_v59 = vadd.f32 %v17681_v13, %v7822_v11 }
 0x4b2   : > { %v17823_v60 = vpop.f32.mrb[33].mxu1 }
 0x4b3   : > { %v13474_v1 = vpop.f32.mrb[34].mxu1  ;;  %v13301_v20 = vpop.f32.mrb[224].mxu0 }
 0x4b4   : > { %v17825_v46 = vpop.f32.mrb[35].mxu1  ;;  %v8232_v61 = vpop.f32.mrb[225].mxu0 }
 0x4b5   : > { %v8295_v26 = vadd.f32 %v8232_v61, %v8083_v29  ;;  %v13302_v6 = vpop.f32.mrb[226].mxu0 }
 0x4b6   : > { %v8235_v53 = vpop.f32.mrb[227].mxu0 }
 0x4b7   : > { %v17828_v52 = vadd.f32 %v17694_v41, %v8295_v26  ;;  %v8296_v55 = vadd.f32 %v8235_v53, %v8084_v47 }
 0x4b9   : > { %v13525_v34 = vpop.f32.mrb[36].mxu1  ;;  %v17831_v43 = vadd.f32 %v17696_v10, %v8296_v55 }
 0x4ba   : > { %v17833_v63 = vpop.f32.mrb[37].mxu1 }
 0x4bb   : > { %v13526_v13 = vpop.f32.mrb[38].mxu1  ;;  %v13305_v23 = vpop.f32.mrb[228].mxu0 }
 0x4bc   : > { %v17835_v33 = vpop.f32.mrb[39].mxu1  ;;  %v8248_v37 = vpop.f32.mrb[229].mxu0 }
 0x4bd   : > { %v8299_v9 = vadd.f32 %v8248_v37, %v8087_v57  ;;  %v13306_v56 = vpop.f32.mrb[230].mxu0 }
 0x4be   : > { %v8251_v29 = vpop.f32.mrb[231].mxu0 }
 0x4bf   : > { %v17838_v19 = vadd.f32 %v17710_v2, %v8299_v9  ;;  %v8300_v41 = vadd.f32 %v8251_v29, %v8088_v50 }
 0x4c1   : > { %v13529_v22 = vpop.f32.mrb[40].mxu1  ;;  %v17841_v47 = vadd.f32 %v17716_v5, %v8300_v41 }
 0x4c2   : > { %v17843_v10 = vpop.f32.mrb[41].mxu1 }
 0x4c3   : > { %v13530_v58 = vpop.f32.mrb[42].mxu1  ;;  %v13309_v48 = vpop.f32.mrb[232].mxu0 }
 0x4c4   : > { %v17845_v16 = vpop.f32.mrb[43].mxu1  ;;  %v8264_v11 = vpop.f32.mrb[233].mxu0 }
 0x4c5   : > { %v8303_v8 = vadd.f32 %v8264_v11, %v8091_v17  ;;  %v13310_v1 = vpop.f32.mrb[234].mxu0 }
 0x4c6   : > { %v8267_v57 = vpop.f32.mrb[235].mxu0 }
 0x4c7   : > { %v17848_v20 = vadd.f32 %v17734_v35, %v8303_v8  ;;  %v8304_v2 = vadd.f32 %v8267_v57, %v8092_v40 }
 0x4c9   : > { %v13533_v61 = vpop.f32.mrb[44].mxu1  ;;  %v17851_v50 = vadd.f32 %v17736_v25, %v8304_v2 }
 0x4ca   : > { %v17853_v5 = vpop.f32.mrb[45].mxu1 }
 0x4cb   : > { %v13534_v26 = vpop.f32.mrb[46].mxu1  ;;  %v13313_v6 = vpop.f32.mrb[236].mxu0 }
 0x4cc   : > { %v17855_v53 = vpop.f32.mrb[47].mxu1  ;;  %v8280_v55 = vpop.f32.mrb[237].mxu0 }
 0x4cd   : > { %v8307_v34 = vadd.f32 %v8280_v55, %v8095_v24  ;;  %v13314_v13 = vpop.f32.mrb[238].mxu0 }
 0x4ce   : > { %v8283_v17 = vpop.f32.mrb[239].mxu0 }
 0x4cf   : > { %v17858_v23 = vadd.f32 %v17748_v51, %v8307_v34  ;;  %v8308_v35 = vadd.f32 %v8283_v17, %v8096_v59 }
 0x4d1   : > { %v13537_v37 = vpop.f32.mrb[48].mxu1  ;;  %v17861_v40 = vadd.f32 %v17750_v18, %v8308_v35 }
 0x4d2   : > { %v17863_v25 = vpop.f32.mrb[49].mxu1 }
 0x4d3   : > { %v13538_v9 = vpop.f32.mrb[50].mxu1  ;;  %v13365_v56 = vpop.f32.mrb[240].mxu0 }
 0x4d4   : > { %v17865_v29 = vpop.f32.mrb[51].mxu1  ;;  %v8808_v41 = vpop.f32.mrb[241].mxu0 }
 0x4d5   : > { %v9042_v22 = vadd.f32 %v17762_v42, %v8808_v41  ;;  %v13366_v24 = vpop.f32.mrb[242].mxu0 }
 0x4d6   : > { %v8811_v58 = vpop.f32.mrb[243].mxu0 }
 0x4d7   : > { %v9045_v48 = vadd.f32 %v17764_v31, %v8811_v58 }
 0x4d9   : > { %v13589_v51 = vpop.f32.mrb[52].mxu1 }
 0x4da   : > { %v17869_v11 = vpop.f32.mrb[53].mxu1 }
 0x4db   : > { %v13590_v59 = vpop.f32.mrb[54].mxu1  ;;  %v13369_v8 = vpop.f32.mrb[244].mxu0 }
 0x4dc   : > { %v17871_v18 = vpop.f32.mrb[55].mxu1  ;;  %v8824_v1 = vpop.f32.mrb[245].mxu0 }
 0x4dd   : > { %v9058_v57 = vadd.f32 %v17772_v44, %v8824_v1  ;;  %v13370_v2 = vpop.f32.mrb[246].mxu0 }
 0x4de   : > { %v8827_v61 = vpop.f32.mrb[247].mxu0 }
 0x4df   : > { %v9061_v26 = vadd.f32 %v17774_v0, %v8827_v61 }
 0x4e1   : > { %v13593_v6 = vpop.f32.mrb[56].mxu1 }
 0x4e2   : > { %v17875_v42 = vpop.f32.mrb[57].mxu1 }
 0x4e3   : > { %v13594_v55 = vpop.f32.mrb[58].mxu1  ;;  %v13373_v34 = vpop.f32.mrb[248].mxu0 }
 0x4e4   : > { %v17877_v31 = vpop.f32.mrb[59].mxu1  ;;  %v8840_v13 = vpop.f32.mrb[249].mxu0 }
 0x4e5   : > { %v9074_v17 = vadd.f32 %v17786_v54, %v8840_v13  ;;  %v13374_v35 = vpop.f32.mrb[250].mxu0 }
 0x4e6   : > { %v8843_v37 = vpop.f32.mrb[251].mxu0 }
 0x4e7   : > { %v9077_v9 = vadd.f32 %v17788_v15, %v8843_v37 }
 0x4e9   : > { %v13597_v56 = vpop.f32.mrb[60].mxu1 }
 0x4ea   : > { %v17881_v44 = vpop.f32.mrb[61].mxu1 }
 0x4eb   : > { %v13598_v41 = vpop.f32.mrb[62].mxu1  ;;  %v13377_v24 = vpop.f32.mrb[252].mxu0 }
 0x4ec   : > { %v17883_v0 = vpop.f32.mrb[63].mxu1  ;;  %v8856_v58 = vpop.f32.mrb[253].mxu0 }
 0x4ed   : > { %v9090_v51 = vadd.f32 %v17796_v39, %v8856_v58  ;;  %v13378_v59 = vpop.f32.mrb[254].mxu0 }
 0x4ee   : > { %v8859_v8 = vpop.f32.mrb[255].mxu0 }
 0x4ef   : > { %v9093_v1 = vadd.f32 %v17798_v32, %v8859_v8 }
 0x4f1   : > { %v13601_v2 = vpop.f32.mrb[64].mxu1 }
 0x4f2   : > { %v17887_v54 = vpop.f32.mrb[65].mxu1 }
 0x4f3   : > { %v13429_v61 = vpop.f32.mrb[0].mxu0  ;;  %v13602_v6 = vpop.f32.mrb[66].mxu1 }
 0x4f4   : > { %v9256_v15 = vpop.f32.mrb[1].mxu0  ;;  %v17889_v55 = vpop.f32.mrb[67].mxu1 }
 0x4f5   : > { %v9319_v34 = vadd.f32 %v9256_v15, %v9042_v22  ;;  %v13430_v13 = vpop.f32.mrb[2].mxu0 }
 0x4f6   : > { %v9259_v35 = vpop.f32.mrb[3].mxu0 }
 0x4f7   : > { %v9320_v37 = vadd.f32 %v9259_v35, %v9045_v48  ;;  %v9593_v56 = vadd.f32 %v17805_v45, %v9319_v34 }
 0x4f9   : > { %v9594_v39 = vadd.f32 %v17807_v14, %v9320_v37 }
 0x4fb   : > { %v13433_v41 = vpop.f32.mrb[4].mxu0 }
 0x4fc   : > { %v9272_v24 = vpop.f32.mrb[5].mxu0 }
 0x4fd   : > { %v9323_v58 = vadd.f32 %v9272_v24, %v9058_v57  ;;  %v13434_v32 = vpop.f32.mrb[6].mxu0 }
 0x4fe   : > { %v9275_v59 = vpop.f32.mrb[7].mxu0 }
 0x4ff   : > { %v9324_v8 = vadd.f32 %v9275_v59, %v9061_v26  ;;  %v9597_v2 = vadd.f32 %v17811_v36, %v9323_v58 }
 0x501   : > { %v9598_v61 = vadd.f32 %v17813_v30, %v9324_v8 }
 0x503   : > { %v13437_v6 = vpop.f32.mrb[8].mxu0 }
 0x504   : > { %v9288_v12 = vpop.f32.mrb[9].mxu0 }
 0x505   : > { %v9327_v22 = vadd.f32 %v9288_v12, %v9074_v17  ;;  %v13438_v15 = vpop.f32.mrb[10].mxu0 }
 0x506   : > { %v9291_v13 = vpop.f32.mrb[11].mxu0 }
 0x507   : > { %v9328_v48 = vadd.f32 %v9291_v13, %v9077_v9  ;;  %v9601_v45 = vadd.f32 %v17817_v62, %v9327_v22 }
 0x509   : > { %v9602_v14 = vadd.f32 %v17819_v38, %v9328_v48 }
 0x50b   : > { %v13441_v34 = vpop.f32.mrb[12].mxu0 }
 0x50c   : > { %v9304_v35 = vpop.f32.mrb[13].mxu0 }
 0x50d   : > { %v9331_v57 = vadd.f32 %v9304_v35, %v9090_v51  ;;  %v13442_v37 = vpop.f32.mrb[14].mxu0 }
 0x50e   : > { %v9307_v41 = vpop.f32.mrb[15].mxu0 }
 0x50f   : > { %v9332_v26 = vadd.f32 %v9307_v41, %v9093_v1  ;;  %v9605_v36 = vadd.f32 %v17823_v60, %v9331_v57 }
 0x511   : > { %v9606_v30 = vadd.f32 %v17825_v46, %v9332_v26 }
 0x513   : > { %v13493_v24 = vpop.f32.mrb[16].mxu0 }
 0x514   : > { %v9742_v58 = vpop.f32.mrb[17].mxu0 }
 0x515   : > { %v9805_v12 = vadd.f32 %v9742_v58, %v9593_v56  ;;  %v13494_v17 = vpop.f32.mrb[18].mxu0 }
 0x516   : > { %v9745_v32 = vpop.f32.mrb[19].mxu0 }
 0x517   : > { %v9806_v9 = vadd.f32 %v9745_v32, %v9594_v39  ;;  %v10036_v62 = vadd.f32 %v17833_v63, %v9805_v12 }
 0x519   : > { %v10037_v38 = vadd.f32 %v17835_v33, %v9806_v9 }
 0x51b   : > { %v13497_v59 = vpop.f32.mrb[20].mxu0 }
 0x51c   : > { %v9758_v8 = vpop.f32.mrb[21].mxu0 }
 0x51d   : > { %v9809_v51 = vadd.f32 %v9758_v8, %v9597_v2  ;;  %v13498_v6 = vpop.f32.mrb[22].mxu0 }
 0x51e   : > { %v9761_v22 = vpop.f32.mrb[23].mxu0 }
 0x51f   : > { %v9810_v1 = vadd.f32 %v9761_v22, %v9598_v61  ;;  %v10040_v60 = vadd.f32 %v17843_v10, %v9809_v51 }
 0x521   : > { %v10041_v46 = vadd.f32 %v17845_v16, %v9810_v1  ;;  %v17920_v1 = vld [vmem:[%s18558_s10] ss:$0 sm:$0xff] }
 0x523   : > { %v13501_v15 = vpop.f32.mrb[24].mxu0 }
 0x524   : > { %v9774_v13 = vpop.f32.mrb[25].mxu0 }
 0x525   : > { %v9813_v56 = vadd.f32 %v9774_v13, %v9601_v45  ;;  %v13502_v48 = vpop.f32.mrb[26].mxu0 }
 0x526   : > { %v9777_v34 = vpop.f32.mrb[27].mxu0 }
 0x527   : > { %v9814_v39 = vadd.f32 %v9777_v34, %v9602_v14  ;;  %v10044_v63 = vadd.f32 %v17853_v5, %v9813_v56 }
 0x529   : > { %v10045_v33 = vadd.f32 %v17855_v53, %v9814_v39 }
 0x52b   : > { %v13505_v35 = vpop.f32.mrb[28].mxu0 }
 0x52c   : > { %v9790_v57 = vpop.f32.mrb[29].mxu0 }
 0x52d   : > { %v9817_v2 = vadd.f32 %v9790_v57, %v9605_v36  ;;  %v13506_v37 = vpop.f32.mrb[30].mxu0 }
 0x52e   : > { %v9793_v41 = vpop.f32.mrb[31].mxu0 }
 0x52f   : > { %v9818_v61 = vadd.f32 %v9793_v41, %v9606_v30  ;;  %v10048_v10 = vadd.f32 %v17863_v25, %v9817_v2 }
 0x531   : > { %v10049_v16 = vadd.f32 %v17865_v29, %v9818_v61 }
 0x533   : > { %v13557_v26 = vpop.f32.mrb[32].mxu0 }
 0x534   : > { %v10247_v24 = vpop.f32.mrb[33].mxu0 }
 0x535   : > { %v10310_v45 = vadd.f32 %v10247_v24, %v10036_v62  ;;  %v13558_v58 = vpop.f32.mrb[34].mxu0 }
 0x536   : > { %v10250_v12 = vpop.f32.mrb[35].mxu0  ;;  %v17971_v58 = vadd.f32 %v17920_v1, %v17858_v23 }
 0x537   : > { %v10311_v14 = vadd.f32 %v10250_v12, %v10037_v38  ;;  %v10522_v5 = vadd.f32 %v17869_v11, %v10310_v45 }
 0x539   : > { %v10523_v53 = vadd.f32 %v17871_v18, %v10311_v14 }
 0x53b   : > { %v13561_v17 = vpop.f32.mrb[36].mxu0 }
 0x53c   : > { %v10263_v32 = vpop.f32.mrb[37].mxu0 }
 0x53d   : > { %v10314_v36 = vadd.f32 %v10263_v32, %v10040_v60  ;;  %v13562_v9 = vpop.f32.mrb[38].mxu0  ;;  %v17928_v60 = vadd.f32 %v17920_v1, %v17828_v52 }
 0x53e   : > { %v10266_v59 = vpop.f32.mrb[39].mxu0 }
 0x53f   : > { %v10315_v30 = vadd.f32 %v10266_v59, %v10041_v46  ;;  %v10526_v25 = vadd.f32 %v17875_v42, %v10314_v36  ;;  %v17924_v42 = vadd.f32 %v17920_v1, %v17831_v43  ;;  %v8596_v34 = vmul.f32 %v17928_v60, %v17928_v60 }
 0x540   : > { %v8608_v36 = vmul.f32 %v17971_v58, %v17971_v58 }
 0x541   : > { %v10527_v29 = vadd.f32 %v17877_v31, %v10315_v30  ;;  %v8597_v13 = vmul.f32 %v17924_v42, %v17924_v42  ;;  %v8574_v39 = vadd.f32 %v17924_v42, %v17928_v60  ;;  %v17990_v30 = vadd.f32 %v17920_v1, %v17861_v40 }
 0x543   : > { %v13565_v8 = vpop.f32.mrb[40].mxu0 }
 0x544   : > { %v10279_v51 = vpop.f32.mrb[41].mxu0 }
 0x545   : > { %v10318_v62 = vadd.f32 %v10279_v51, %v10044_v63  ;;  %v13566_v6 = vpop.f32.mrb[42].mxu0 }
 0x546   : > { %v10282_v22 = vpop.f32.mrb[43].mxu0 }
 0x547   : > { %v10319_v38 = vadd.f32 %v10282_v22, %v10045_v33  ;;  %v17912_v11 = vadd.f32 %v17881_v44, %v10318_v62  ;;  %v17932_v44 = vadd.f32 %v17920_v1, %v17838_v19  ;;  %v17945_v19 = vadd.f32 %v17920_v1, %v17841_v47 }
 0x548   : > { %v8612_v33 = vadd.f32 %v8597_v13, %v8596_v34 }
 0x549   : > { %v17915_v18 = vadd.f32 %v17883_v0, %v10319_v38  ;;  %v8600_v52 = vmul.f32 %v17932_v44, %v17932_v44  ;;  %v8577_v35 = vadd.f32 %v8574_v39, %v17932_v44  ;;  %v8601_v37 = vmul.f32 %v17945_v19, %v17945_v19 }
 0x54b   : > { %v13569_v31 = vpop.f32.mrb[44].mxu0  ;;  %v8615_v2 = vadd.f32 %v8612_v33, %v8600_v52 }
 0x54c   : > { %v10295_v0 = vpop.f32.mrb[45].mxu0 }
 0x54d   : > { %v10322_v46 = vadd.f32 %v10295_v0, %v10048_v10  ;;  %v13570_v15 = vpop.f32.mrb[46].mxu0  ;;  %v8616_v45 = vadd.f32 %v8615_v2, %v8601_v37 }
 0x54e   : > { %v10298_v56 = vpop.f32.mrb[47].mxu0  ;;  %v8609_v15 = vmul.f32 %v17990_v30, %v17990_v30 }
 0x54f   : > { %v10323_v48 = vadd.f32 %v10298_v56, %v10049_v16  ;;  %v17937_v43 = vadd.f32 %v17887_v54, %v10322_v46  ;;  %v17954_v54 = vadd.f32 %v17920_v1, %v17848_v20  ;;  %v8578_v20 = vadd.f32 %v8577_v35, %v17945_v19 }
 0x551   : > { %v17950_v63 = vadd.f32 %v17889_v55, %v10323_v48  ;;  %v8604_v10 = vmul.f32 %v17954_v54, %v17954_v54  ;;  %v17963_v55 = vadd.f32 %v17920_v1, %v17851_v50  ;;  %v8581_v12 = vadd.f32 %v8578_v20, %v17954_v54 }
 0x553   : > { %v13621_v57 = vpop.f32.mrb[48].mxu0  ;;  %v8605_v50 = vmul.f32 %v17963_v55, %v17963_v55  ;;  %v8582_v59 = vadd.f32 %v8581_v12, %v17963_v55 }
 0x554   : > { %v10690_v47 = vpop.f32.mrb[49].mxu0 }
 0x555   : > { %v10753_v41 = vadd.f32 %v10690_v47, %v10522_v5  ;;  %v13622_v61 = vpop.f32.mrb[50].mxu0  ;;  %v8619_v5 = vadd.f32 %v8616_v45, %v8604_v10  ;;  %v8585_v38 = vadd.f32 %v8582_v59, %v17971_v58 }
 0x556   : > { %v10693_v16 = vpop.f32.mrb[51].mxu0 }
 0x557   : > { %v17967_v26 = vadd.f32 %v17920_v1, %v10753_v41  ;;  %v10754_v24 = vadd.f32 %v10693_v16, %v10523_v53  ;;  %v8620_v6 = vadd.f32 %v8619_v5, %v8605_v50  ;;  %v8586_v56 = vadd.f32 %v8585_v38, %v17990_v30 }
 0x559   : > { %v17975_v14 = vadd.f32 %v17920_v1, %v10754_v24  ;;  %v10823_v17 = vmul.f32 %v17967_v26, %v17967_v26  ;;  %v8623_v46 = vadd.f32 %v8620_v6, %v8608_v36  ;;  %v8589_v47 = vrot.slane %v8586_v56, 4 }
 0x55b   : > { %v10801_v53 = vadd.f32 %v17975_v14, %v17967_v26  ;;  %v10824_v32 = vmul.f32 %v17975_v14, %v17975_v14  ;;  %v13625_v23 = vpop.f32.mrb[52].mxu0  ;;  %v8624_v33 = vadd.f32 %v8623_v46, %v8609_v15  ;;  %v8590_v45 = vadd.f32 %v8589_v47, %v8586_v56 }
 0x55c   : > { %v10706_v9 = vpop.f32.mrb[53].mxu0 }
 0x55d   : > { %v10839_v8 = vadd.f32 %v10824_v32, %v10823_v17  ;;  %v10757_v51 = vadd.f32 %v10706_v9, %v10526_v25  ;;  %v13626_v62 = vpop.f32.mrb[54].mxu0  ;;  %v8627_v10 = vrot.slane %v8624_v33, 4  ;;  %v8591_v9 = vrot.slane %v8590_v45, 2 }
 0x55e   : > { %v10709_v22 = vpop.f32.mrb[55].mxu0 }
 0x55f   : > { %v17994_v31 = vadd.f32 %v17920_v1, %v10757_v51  ;;  %v10758_v0 = vadd.f32 %v10709_v22, %v10527_v29  ;;  %v8592_v38 = vadd.f32 %v8591_v9, %v8590_v45  ;;  %v18979_v9 = vld [vmem:[#allocation44_spill] sm:$0xff] }
 0x561   : > { %v10804_v13 = vadd.f32 %v10801_v53, %v17994_v31  ;;  %v10827_v40 = vmul.f32 %v17994_v31, %v17994_v31  ;;  %v18002_v25 = vadd.f32 %v17920_v1, %v10758_v0  ;;  %v8628_v53 = vadd.f32 %v8627_v10, %v8624_v33 }
 0x563   : > { %v10842_v48 = vadd.f32 %v10839_v8, %v10827_v40  ;;  %v10805_v34 = vadd.f32 %v10804_v13, %v18002_v25  ;;  %v10828_v29 = vmul.f32 %v18002_v25, %v18002_v25  ;;  %v13629_v52 = vpop.f32.mrb[56].mxu0  ;;  %v8629_v51 = vrot.slane %v8628_v53, 2 }
 0x564   : > { %v10722_v39 = vpop.f32.mrb[57].mxu0 }
 0x565   : > { %v10843_v35 = vadd.f32 %v10842_v48, %v10828_v29  ;;  %v10761_v57 = vadd.f32 %v10722_v39, %v17912_v11  ;;  %v13630_v2 = vpop.f32.mrb[58].mxu0  ;;  %v8630_v15 = vadd.f32 %v8629_v51, %v8628_v53 }
 0x566   : > { %v10725_v37 = vpop.f32.mrb[59].mxu0 }
 0x567   : > { %v18010_v41 = vadd.f32 %v17920_v1, %v10761_v57  ;;  %v10762_v61 = vadd.f32 %v10725_v37, %v17915_v18 }
 0x569   : > { %v10808_v16 = vadd.f32 %v10805_v34, %v18010_v41  ;;  %v10831_v20 = vmul.f32 %v18010_v41, %v18010_v41  ;;  %v18017_v24 = vadd.f32 %v17920_v1, %v10762_v61  ;;  %v8631_v34 = vrot.slane %v8630_v15, 1 }
 0x56b   : > { %v10846_v12 = vadd.f32 %v10843_v35, %v10831_v20  ;;  %v10809_v11 = vadd.f32 %v10808_v16, %v18017_v24  ;;  %v10832_v5 = vmul.f32 %v18017_v24, %v18017_v24  ;;  %v13633_v50 = vpop.f32.mrb[60].mxu0  ;;  %v8632_v35 = vadd.f32 %v8631_v34, %v8630_v15 }
 0x56c   : > { %v10738_v17 = vpop.f32.mrb[61].mxu0 }
 0x56d   : > { %v10847_v18 = vadd.f32 %v10846_v12, %v10832_v5  ;;  %v10765_v32 = vadd.f32 %v10738_v17, %v17937_v43  ;;  %v13634_v23 = vpop.f32.mrb[62].mxu0  ;;  %v8633_v10 = vadd.f32 %v8632_v35, %v17712_v21  ;;  %v18975_v17 = vld [vmem:[#allocation17_spill] sm:$0xff]  ;;  %v18977_v21 = vld [vmem:[#allocation15_spill] sm:$0xff] }
 0x56e   : > { %v10741_v36 = vpop.f32.mrb[63].mxu0  ;;  %v18978_v23 = vld [vmem:[#allocation39_spill] sm:$0xff] }
 0x56f   : > { %v18024_v59 = vadd.f32 %v17920_v1, %v10765_v32  ;;  %v10766_v8 = vadd.f32 %v10741_v36, %v17950_v63  ;;  %v8593_v63 = vrot.slane %v8592_v38, 1 }
 0x571   : > { %v10812_v62 = vadd.f32 %v10809_v11, %v18024_v59  ;;  %v10835_v6 = vmul.f32 %v18024_v59, %v18024_v59  ;;  %v18031_v22 = vadd.f32 %v17920_v1, %v10766_v8  ;;  %v8594_v39 = vadd.f32 %v8593_v63, %v8592_v38 }
 0x573   : > { %v10850_v0 = vadd.f32 %v10847_v18, %v10835_v6  ;;  %v10813_v43 = vadd.f32 %v10812_v62, %v18031_v22  ;;  %v10836_v46 = vmul.f32 %v18031_v22, %v18031_v22  ;;  %v8595_v37 = vadd.f32 %v8594_v39, %v17704_v49  ;;  %v18976_v49 = vld [vmem:[#allocation36_spill] sm:$0xff] }
 0x574   : > { %v18980_v62 = vld [vmem:[#allocation48_spill] sm:$0xff] }
 0x575   : > { %v10816_v13 = vrot.slane %v10813_v43, 4  ;;  %v10851_v40 = vadd.f32 %v10850_v0, %v10836_v46  ;;  %v18982_v0 = vld [vmem:[#allocation21_spill] sm:$0xff] }
 0x577   : > { %v10817_v56 = vadd.f32 %v10816_v13, %v10813_v43  ;;  %v10854_v48 = vrot.slane %v10851_v40, 4 }
 0x579   : > { %v10818_v29 = vrot.slane %v10817_v56, 2  ;;  %v10855_v52 = vadd.f32 %v10854_v48, %v10851_v40 }
 0x57b   : > { %v10819_v33 = vadd.f32 %v10818_v29, %v10817_v56  ;;  %v10856_v1 = vrot.slane %v10855_v52, 2 }
 0x57d   : > { %v10820_v57 = vrot.slane %v10819_v33, 1  ;;  %v10857_v2 = vadd.f32 %v10856_v1, %v10855_v52 }
 0x57f   : > { %v10821_v47 = vadd.f32 %v10820_v57, %v10819_v33  ;;  %v10858_v61 = vrot.slane %v10857_v2, 1  ;;  %v18983_v57 = vld [vmem:[#allocation25_spill] sm:$0xff] }
 0x581   : > { %v10822_v16 = vadd.f32 %v10821_v47, %v8595_v37  ;;  %v10859_v20 = vadd.f32 %v10858_v61, %v10857_v2  ;;  %v18984_v37 = vld [vmem:[#allocation38_spill] sm:$0xff]  ;;  %v18985_v61 = vld [vmem:[#allocation23_spill] sm:$0xff] }
 0x583   : > { %v10860_v45 = vadd.f32 %v10859_v20, %v8633_v10  ;;  %v18038_v12 = vmul.f32 0.00390625, %v10822_v16 }
 0x585   : > { %v10878_v11 = vmul.f32 0.00390625, %v10860_v45  ;;  %v10879_v5 = vmul.f32 %v18038_v12, %v18038_v12  ;;  %v11351_v50 = vsub.f32 %v18031_v22, %v18038_v12  ;;  %v10888_v53 = vsub.f32 %v18975_v17, %v18038_v12  ;;  %v18981_v22 = vld [vmem:[#allocation52_spill] sm:$0xff] }
 0x586   : > { %v10889_v18 = vsub.f32 %v18976_v49, %v18038_v12  ;;  %v10930_v32 = vsub.f32 %v18977_v21, %v18038_v12  ;;  %v10931_v36 = vsub.f32 %v18978_v23, %v18038_v12  ;;  %v10960_v8 = vsub.f32 %v18979_v9, %v18038_v12 }
 0x587   : > { %v10880_v51 = vsub.f32 %v10878_v11, %v10879_v5  ;;  %v10961_v6 = vsub.f32 %v18980_v62, %v18038_v12  ;;  %v10990_v38 = vsub.f32 %v18981_v22, %v18038_v12  ;;  %v10991_v43 = vsub.f32 %v18982_v0, %v18038_v12  ;;  %v18118_v22 = vld [vmem:[%s18560_s12] ss:$0 sm:$0xff] }
 0x588   : > { %v11020_v46 = vsub.f32 %v17602_v27, %v18038_v12  ;;  %v11021_v15 = vsub.f32 %v17606_v3, %v18038_v12  ;;  %v11050_v13 = vsub.f32 %v17621_v4, %v18038_v12  ;;  %v11051_v40 = vsub.f32 %v17629_v28, %v18038_v12 }
 0x589   : > { %v10881_v63 = vmax.f32 %v10880_v51, 0.0  ;;  %v11260_v48 = vsub.f32 %v17967_v26, %v18038_v12  ;;  %v11261_v34 = vsub.f32 %v17975_v14, %v18038_v12  ;;  %v11290_v29 = vsub.f32 %v17994_v31, %v18038_v12 }
 0x58a   : > { %v11080_v35 = vsub.f32 %v17641_v7, %v18038_v12  ;;  %v11081_v2 = vsub.f32 %v18983_v57, %v18038_v12  ;;  %v11110_v47 = vsub.f32 %v18984_v37, %v18038_v12  ;;  %v11111_v10 = vsub.f32 %v18985_v61, %v18038_v12  ;;  %v18101_v7 = vld [vmem:[%s18559_s11] ss:$0 sm:$0xff] }
 0x58b   : > { %v10882_v56 = vadd.f32 1e-05, %v10881_v63  ;;  %v11140_v16 = vsub.f32 %v17928_v60, %v18038_v12  ;;  %v11141_v20 = vsub.f32 %v17924_v42, %v18038_v12  ;;  %v11170_v45 = vsub.f32 %v17932_v44, %v18038_v12 }
 0x58c   : > { %v11171_v5 = vsub.f32 %v17945_v19, %v18038_v12  ;;  %v11200_v17 = vsub.f32 %v17954_v54, %v18038_v12  ;;  %v11201_v49 = vsub.f32 %v17963_v55, %v18038_v12  ;;  %v11230_v21 = vsub.f32 %v17971_v58, %v18038_v12 }
 0x58d   : > { %14145 = vrsqrt.f32 %v10882_v56 }
 0x597   : > { %v18096_v11 = vpop.eup %14145 }
 0x598   : > { %v11353_v23 = vmul.f32 %v18096_v11, %v11351_v50  ;;  %v10890_v9 = vmul.f32 %v18096_v11, %v10888_v53  ;;  %v10891_v51 = vmul.f32 %v18096_v11, %v10889_v18  ;;  %v10932_v62 = vmul.f32 %v18096_v11, %v10930_v32 }
 0x599   : > { %v10933_v0 = vmul.f32 %v18096_v11, %v10931_v36  ;;  %v10962_v63 = vmul.f32 %v18096_v11, %v10960_v8  ;;  %v10963_v56 = vmul.f32 %v18096_v11, %v10961_v6  ;;  %v10992_v1 = vmul.f32 %v18096_v11, %v10990_v38 }
 0x59a   : > { %v11355_v50 = vmul.f32 %v18101_v7, %v11353_v23  ;;  %v10898_v53 = vmul.f32 %v18101_v7, %v10890_v9  ;;  %v10899_v18 = vmul.f32 %v18101_v7, %v10891_v51  ;;  %v10934_v32 = vmul.f32 %v18101_v7, %v10932_v62 }
 0x59b   : > { %v10935_v33 = vmul.f32 %v18101_v7, %v10933_v0  ;;  %v10964_v39 = vmul.f32 %v18101_v7, %v10962_v63  ;;  %v10965_v36 = vmul.f32 %v18101_v7, %v10963_v56  ;;  %v10993_v8 = vmul.f32 %v18096_v11, %v10991_v43 }
 0x59c   : > { %v18133_v6 = vadd.f32 %v18118_v22, %v11355_v50  ;;  %v18136_v38 = vadd.f32 %v18118_v22, %v10898_v53  ;;  %v18139_v23 = vadd.f32 %v18118_v22, %v10899_v18  ;;  %v18142_v9 = vadd.f32 %v18118_v22, %v10934_v32 }
 0x59d   : > { %v18145_v51 = vadd.f32 %v18118_v22, %v10935_v33  ;;  %v18148_v62 = vadd.f32 %v18118_v22, %v10964_v39  ;;  %v18151_v43 = vadd.f32 %v18118_v22, %v10965_v36  ;;  %v10994_v0 = vmul.f32 %v18101_v7, %v10992_v1 }
 0x59e   : > { %v11883_v63 = vmul.f32 -1.442695, %v18133_v6  ;;  %v11852_v56 = vmul.f32 -1.442695, %v18136_v38  ;;  %v11853_v50 = vmul.f32 -1.442695, %v18139_v23  ;;  %v10995_v53 = vmul.f32 %v18101_v7, %v10993_v8 }
 0x59f   : > { %v11854_v18 = vmul.f32 -1.442695, %v18142_v9  ;;  %v11855_v33 = vmul.f32 -1.442695, %v18145_v51  ;;  %v11856_v39 = vmul.f32 -1.442695, %v18148_v62  ;;  %v18162_v32 = vadd.f32 %v18118_v22, %v10994_v0 }
 0x5a0   : > { %14147 = vpow2.f32 %v11883_v63  ;;  %v11857_v1 = vmul.f32 -1.442695, %v18151_v43  ;;  %v18166_v36 = vadd.f32 %v18118_v22, %v10995_v53  ;;  %v11022_v8 = vmul.f32 %v18096_v11, %v11020_v46 }
 0x5a1   : > { %14149 = vpow2.f32 %v11852_v56  ;;  %v11858_v52 = vmul.f32 -1.442695, %v18162_v32  ;;  %v11023_v0 = vmul.f32 %v18096_v11, %v11021_v15  ;;  %v11052_v63 = vmul.f32 %v18096_v11, %v11050_v13 }
 0x5a2   : > { %14151 = vpow2.f32 %v11853_v50  ;;  %v11859_v53 = vmul.f32 -1.442695, %v18166_v36  ;;  %v11024_v27 = vmul.f32 %v18101_v7, %v11022_v8  ;;  %v11053_v46 = vmul.f32 %v18096_v11, %v11051_v40 }
 0x5a3   : > { %14153 = vpow2.f32 %v11854_v18  ;;  %v11025_v3 = vmul.f32 %v18101_v7, %v11023_v0  ;;  %v11054_v15 = vmul.f32 %v18101_v7, %v11052_v63  ;;  %v11082_v56 = vmul.f32 %v18096_v11, %v11080_v35 }
 0x5a4   : > { %14155 = vpow2.f32 %v11855_v33  ;;  %v18191_v4 = vadd.f32 %v18118_v22, %v11024_v27  ;;  %v11055_v13 = vmul.f32 %v18101_v7, %v11053_v46  ;;  %v11083_v28 = vmul.f32 %v18096_v11, %v11081_v2 }
 0x5a5   : > { %14157 = vpow2.f32 %v11856_v39  ;;  %v18199_v40 = vadd.f32 %v18118_v22, %v11025_v3  ;;  %v18202_v50 = vadd.f32 %v18118_v22, %v11054_v15  ;;  %v11084_v35 = vmul.f32 %v18101_v7, %v11082_v56 }
 0x5a6   : > { %14159 = vpow2.f32 %v11857_v1  ;;  %v11860_v18 = vmul.f32 -1.442695, %v18191_v4  ;;  %v18207_v33 = vadd.f32 %v18118_v22, %v11055_v13  ;;  %v11085_v8 = vmul.f32 %v18101_v7, %v11083_v28 }
 0x5a7   : > { %14161 = vpow2.f32 %v11858_v52  ;;  %v11861_v57 = vmul.f32 -1.442695, %v18199_v40  ;;  %v11862_v2 = vmul.f32 -1.442695, %v18202_v50  ;;  %v18213_v39 = vadd.f32 %v18118_v22, %v11084_v35 }
 0x5a8   : > { %v11231_v0 = vsub.f32 %v17990_v30, %v18038_v12  ;;  %14163 = vpow2.f32 %v11859_v53  ;;  %v11863_v1 = vmul.f32 -1.442695, %v18207_v33  ;;  %v11112_v63 = vmul.f32 %v18096_v11, %v11110_v47 }
 0x5a9   : > { %14165 = vpow2.f32 %v11860_v18  ;;  %v18223_v52 = vadd.f32 %v18118_v22, %v11085_v8  ;;  %v11113_v27 = vmul.f32 %v18096_v11, %v11111_v10  ;;  %v11142_v53 = vmul.f32 %v18096_v11, %v11140_v16 }
 0x5aa   : > { %v14148_v46 = vpop.eup %14147  ;;  %14167 = vpow2.f32 %v11861_v57  ;;  %v18234_v37 = vmul.f32 -1.442695, %v18213_v39  ;;  %v11114_v47 = vmul.f32 %v18101_v7, %v11112_v63  ;;  %v11143_v3 = vmul.f32 %v18096_v11, %v11141_v20 }
 0x5ab   : > { %v14150_v61 = vpop.eup %14149  ;;  %v11365_v15 = vadd.f32 1.0, %v14148_v46  ;;  %14169 = vpow2.f32 %v11862_v2  ;;  %v11115_v10 = vmul.f32 %v18101_v7, %v11113_v27  ;;  %v11144_v60 = vmul.f32 %v18101_v7, %v11142_v53 }
 0x5ac   : > { %v14152_v16 = vpop.eup %14151  ;;  %v10914_v56 = vadd.f32 1.0, %v14150_v61  ;;  %14171 = vpow2.f32 %v11863_v1  ;;  %v18244_v13 = vadd.f32 %v18118_v22, %v11114_v47  ;;  %v11145_v28 = vmul.f32 %v18101_v7, %v11143_v3 }
 0x5ad   : > { %v14154_v35 = vpop.eup %14153  ;;  %14173 = vrcp.f32 %v11365_v15  ;;  %v10915_v42 = vadd.f32 1.0, %v14152_v16  ;;  %v18248_v20 = vadd.f32 %v18118_v22, %v11115_v10  ;;  %v18251_v18 = vadd.f32 %v18118_v22, %v11144_v60 }
 0x5ae   : > { %v14156_v8 = vpop.eup %14155  ;;  %14175 = vrcp.f32 %v10914_v56  ;;  %v10944_v57 = vadd.f32 1.0, %v14154_v35  ;;  %v18254_v2 = vmul.f32 -1.442695, %v18223_v52  ;;  %v18257_v1 = vmul.f32 -1.442695, %v18244_v13 }
 0x5af   : > { %v14158_v63 = vpop.eup %14157  ;;  %14177 = vrcp.f32 %v10915_v42  ;;  %v10945_v27 = vadd.f32 1.0, %v14156_v8  ;;  %v18260_v53 = vmul.f32 -1.442695, %v18248_v20  ;;  %v18263_v46 = vadd.f32 %v18118_v22, %v11145_v28 }
 0x5b0   : > { %v14160_v47 = vpop.eup %14159  ;;  %14179 = vrcp.f32 %v10944_v57  ;;  %v10974_v3 = vadd.f32 1.0, %v14158_v63  ;;  %v18266_v61 = vmul.f32 -1.442695, %v18251_v18  ;;  %v11172_v15 = vmul.f32 %v18096_v11, %v11170_v45 }
 0x5b1   : > { %v14162_v10 = vpop.eup %14161  ;;  %14181 = vrcp.f32 %v10945_v27  ;;  %v10975_v60 = vadd.f32 1.0, %v14160_v47  ;;  %v11173_v16 = vmul.f32 %v18096_v11, %v11171_v5  ;;  %v11202_v56 = vmul.f32 %v18096_v11, %v11200_v17 }
 0x5b2   : > { %v14164_v28 = vpop.eup %14163  ;;  %14183 = vrcp.f32 %v10974_v3  ;;  %v11004_v35 = vadd.f32 1.0, %v14162_v10  ;;  %v11174_v44 = vmul.f32 %v18101_v7, %v11172_v15  ;;  %v11203_v45 = vmul.f32 %v18096_v11, %v11201_v49 }
 0x5b3   : > { %v14166_v42 = vpop.eup %14165  ;;  %14185 = vrcp.f32 %v10975_v60  ;;  %v11005_v19 = vadd.f32 1.0, %v14164_v28  ;;  %v11175_v5 = vmul.f32 %v18101_v7, %v11173_v16  ;;  %v11204_v8 = vmul.f32 %v18101_v7, %v11202_v56 }
 0x5b4   : > { %v14168_v54 = vpop.eup %14167  ;;  %14187 = vrcp.f32 %v11004_v35  ;;  %v11034_v17 = vadd.f32 1.0, %v14166_v42  ;;  %v18288_v57 = vadd.f32 %v18118_v22, %v11174_v44  ;;  %v11205_v63 = vmul.f32 %v18101_v7, %v11203_v45 }
 0x5b5   : > { %v14170_v27 = vpop.eup %14169  ;;  %14189 = vrcp.f32 %v11005_v19  ;;  %v11035_v55 = vadd.f32 1.0, %v14168_v54  ;;  %v18292_v49 = vadd.f32 %v18118_v22, %v11175_v5  ;;  %v18295_v47 = vadd.f32 %v18118_v22, %v11204_v8  ;;  %v11373_v8 = vld [vmem:[%s14692_s16 + $0xf8] sm:$0xff] }
 0x5b6   : > { %v14172_v3 = vpop.eup %14171  ;;  %14191 = vrcp.f32 %v11034_v17  ;;  %v11064_v15 = vadd.f32 1.0, %v14170_v27  ;;  %v11869_v10 = vmul.f32 -1.442695, %v18263_v46  ;;  %v11870_v60 = vmul.f32 -1.442695, %v18288_v57 }
 0x5b7   : > { %v14174_v16 = vpop.eup %14173  ;;  %14193 = vrcp.f32 %v11035_v55  ;;  %v11065_v56 = vadd.f32 1.0, %v14172_v3  ;;  %v18300_v28 = vmul.f32 -1.442695, %v18292_v49  ;;  %v18303_v35 = vadd.f32 %v18118_v22, %v11205_v63 }
 0x5b8   : > { %v14176_v44 = vpop.eup %14175  ;;  %v11371_v45 = vmul.f32 %v14174_v16, %v18133_v6  ;;  %14195 = vrcp.f32 %v11064_v15  ;;  %v18307_v42 = vmul.f32 -1.442695, %v18295_v47  ;;  %v11232_v19 = vmul.f32 %v18096_v11, %v11230_v21  ;;  %v10922_v21 = vld [vmem:[%s14692_s16] sm:$0xff]  ;;  %v10952_v15 = vld [vmem:[%s14692_s16 + $0x10] sm:$0xff] }
 0x5b9   : > { %v14178_v5 = vpop.eup %14177  ;;  %v10920_v54 = vmul.f32 %v14176_v44, %v18136_v38  ;;  %14197 = vrcp.f32 %v11065_v56  ;;  %v11233_v6 = vmul.f32 %v18096_v11, %v11231_v0  ;;  %v18323_v17 = vmul.f32 %v18096_v11, %v11260_v48  ;;  %v10923_v0 = vld [vmem:[%s14692_s16 + $0x8] sm:$0xff] }
 0x5ba   : > { %v14180_v58 = vpop.eup %14179  ;;  %v11375_v63 = vadd.f32 %v11373_v8, %v11371_v45  ;;  %v10921_v27 = vmul.f32 %v14178_v5, %v18139_v23  ;;  %14199 = vpow2.f32 %v18234_v37  ;;  %v11234_v30 = vmul.f32 %v18101_v7, %v11232_v19 }
 0x5bb   : > { %v14182_v38 = vpop.eup %14181  ;;  %v10924_v55 = vadd.f32 %v10922_v21, %v10920_v54  ;;  %v10950_v26 = vmul.f32 %v14180_v58, %v18142_v9  ;;  %14201 = vpow2.f32 %v18254_v2  ;;  %v11235_v48 = vmul.f32 %v18101_v7, %v11233_v6  ;;  %v10953_v9 = vld [vmem:[%s14692_s16 + $0x18] sm:$0xff] }
 0x5bc   : > { %v14184_v3 = vpop.eup %14183  ;;  %11377 = vst [vmem:[%s14692_s16 + $0xf8] sm:$0xff] %v11375_v63  ;;  %v10925_v23 = vadd.f32 %v10923_v0, %v10921_v27  ;;  %v10951_v37 = vmul.f32 %v14182_v38, %v18145_v51  ;;  %14203 = vpow2.f32 %v18257_v1  ;;  %v18338_v16 = vadd.f32 %v18118_v22, %v11234_v30  ;;  %v10982_v1 = vld [vmem:[%s14692_s16 + $0x20] sm:$0xff]  ;;  %v11012_v63 = vld [vmem:[%s14692_s16 + $0x30] sm:$0xff] }
 0x5bd   : > { %v14186_v56 = vpop.eup %14185  ;;  %10926 = vst [vmem:[%s14692_s16] sm:$0xff] %v10924_v55  ;;  %v10954_v2 = vadd.f32 %v10952_v15, %v10950_v26  ;;  %v10980_v44 = vmul.f32 %v14184_v3, %v18148_v62  ;;  %14205 = vpow2.f32 %v18260_v53  ;;  %v18345_v45 = vadd.f32 %v18118_v22, %v11235_v48  ;;  %v10983_v62 = vld [vmem:[%s14692_s16 + $0x28] sm:$0xff]  ;;  %v11042_v0 = vld [vmem:[%s14692_s16 + $0x40] sm:$0xff]  ;;  %v11072_v3 = vld [vmem:[%s14692_s16 + $0x50] sm:$0xff] }
 0x5be   : > { %v14188_v51 = vpop.eup %14187  ;;  %10927 = vst [vmem:[%s14692_s16 + $0x8] sm:$0xff] %v10925_v23  ;;  %v10955_v19 = vadd.f32 %v10953_v9, %v10951_v37  ;;  %v10981_v5 = vmul.f32 %v14186_v56, %v18151_v43  ;;  %14207 = vpow2.f32 %v18266_v61  ;;  %v11873_v8 = vmul.f32 -1.442695, %v18303_v35  ;;  %v11043_v26 = vld [vmem:[%s14692_s16 + $0x48] sm:$0xff]  ;;  %v11073_v37 = vld [vmem:[%s14692_s16 + $0x58] sm:$0xff] }
 0x5bf   : > { %v14190_v54 = vpop.eup %14189  ;;  %10956 = vst [vmem:[%s14692_s16 + $0x10] sm:$0xff] %v10954_v2  ;;  %v10984_v53 = vadd.f32 %v10982_v1, %v10980_v44  ;;  %v11010_v6 = vmul.f32 %v14188_v51, %v18162_v32  ;;  %14209 = vpow2.f32 %v11869_v10  ;;  %v11874_v58 = vmul.f32 -1.442695, %v18338_v16  ;;  %v11013_v10 = vld [vmem:[%s14692_s16 + $0x38] sm:$0xff] }
 0x5c0   : > { %v14192_v21 = vpop.eup %14191  ;;  %10957 = vst [vmem:[%s14692_s16 + $0x18] sm:$0xff] %v10955_v19  ;;  %v10985_v43 = vadd.f32 %v10983_v62, %v10981_v5  ;;  %v11011_v61 = vmul.f32 %v14190_v54, %v18166_v36  ;;  %14211 = vpow2.f32 %v11870_v60  ;;  %v11263_v27 = vmul.f32 %v18096_v11, %v11261_v34 }
 0x5c1   : > { %v14194_v32 = vpop.eup %14193  ;;  %10986 = vst [vmem:[%s14692_s16 + $0x20] sm:$0xff] %v10984_v53  ;;  %v11014_v30 = vadd.f32 %v11012_v63, %v11010_v6  ;;  %v11040_v38 = vmul.f32 %v14192_v21, %v18191_v4  ;;  %14213 = vpow2.f32 %v18300_v28  ;;  %v11875_v36 = vmul.f32 -1.442695, %v18345_v45 }
 0x5c2   : > { %v14196_v60 = vpop.eup %14195  ;;  %10987 = vst [vmem:[%s14692_s16 + $0x28] sm:$0xff] %v10985_v43  ;;  %v11015_v14 = vadd.f32 %v11013_v10, %v11011_v61  ;;  %v11041_v34 = vmul.f32 %v14194_v32, %v18199_v40  ;;  %14215 = vpow2.f32 %v18307_v42  ;;  %v11265_v51 = vmul.f32 %v18101_v7, %v11263_v27 }
 0x5c3   : > { %v14198_v55 = vpop.eup %14197  ;;  %11016 = vst [vmem:[%s14692_s16 + $0x30] sm:$0xff] %v11014_v30  ;;  %v11044_v4 = vadd.f32 %v11042_v0, %v11040_v38  ;;  %v11070_v48 = vmul.f32 %v14196_v60, %v18202_v50  ;;  %14217 = vpow2.f32 %v11873_v8  ;;  %v11264_v50 = vmul.f32 %v18101_v7, %v18323_v17 }
 0x5c4   : > { %v14200_v28 = vpop.eup %14199  ;;  %11017 = vst [vmem:[%s14692_s16 + $0x38] sm:$0xff] %v11015_v14  ;;  %v11045_v15 = vadd.f32 %v11043_v26, %v11041_v34  ;;  %v11071_v23 = vmul.f32 %v14198_v55, %v18207_v33  ;;  %14219 = vpow2.f32 %v11874_v58  ;;  %v11292_v33 = vmul.f32 %v18096_v11, %v11290_v29 }
 0x5c5   : > { %v14202_v40 = vpop.eup %14201  ;;  %11046 = vst [vmem:[%s14692_s16 + $0x40] sm:$0xff] %v11044_v4  ;;  %v11074_v42 = vadd.f32 %v11072_v3, %v11070_v48  ;;  %v11094_v56 = vadd.f32 1.0, %v14200_v28  ;;  %14221 = vpow2.f32 %v11875_v36  ;;  %v18986_v5 = vsub.f32 %v18002_v25, %v18038_v12 }
 0x5c6   : > { %v14204_v9 = vpop.eup %14203  ;;  %11047 = vst [vmem:[%s14692_s16 + $0x48] sm:$0xff] %v11045_v15  ;;  %v11075_v2 = vadd.f32 %v11073_v37, %v11071_v23  ;;  %v11095_v44 = vadd.f32 1.0, %v14202_v40  ;;  %v18987_v8 = vsub.f32 %v18010_v41, %v18038_v12  ;;  %v18988_v29 = vsub.f32 %v18017_v24, %v18038_v12 }
 0x5c7   : > { %v14206_v1 = vpop.eup %14205  ;;  %11076 = vst [vmem:[%s14692_s16 + $0x50] sm:$0xff] %v11074_v42  ;;  %14223 = vrcp.f32 %v11094_v56  ;;  %v11124_v19 = vadd.f32 1.0, %v14204_v9  ;;  %v11293_v17 = vmul.f32 %v18096_v11, %v18986_v5  ;;  %v18403_v25 = vadd.f32 %v18118_v22, %v11264_v50 }
 0x5c8   : > { %v11322_v54 = vmul.f32 %v18096_v11, %v18987_v8  ;;  %v14208_v62 = vpop.eup %14207  ;;  %11077 = vst [vmem:[%s14692_s16 + $0x58] sm:$0xff] %v11075_v2  ;;  %14225 = vrcp.f32 %v11095_v44  ;;  %v11125_v31 = vadd.f32 1.0, %v14206_v1  ;;  %v11323_v53 = vmul.f32 %v18096_v11, %v18988_v29  ;;  %v11102_v44 = vld [vmem:[%s14692_s16 + $0x60] sm:$0xff]  ;;  %v11103_v1 = vld [vmem:[%s14692_s16 + $0x68] sm:$0xff] }
 0x5c9   : > { %v14210_v6 = vpop.eup %14209  ;;  %14227 = vrcp.f32 %v11124_v19  ;;  %v11154_v58 = vadd.f32 1.0, %v14208_v62  ;;  %v11294_v21 = vmul.f32 %v18101_v7, %v11292_v33  ;;  %v11295_v43 = vmul.f32 %v18101_v7, %v11293_v17  ;;  %v11132_v17 = vld [vmem:[%s14692_s16 + $0x70] sm:$0xff] }
 0x5ca   : > { %v14212_v41 = vpop.eup %14211  ;;  %14229 = vrcp.f32 %v11125_v31  ;;  %v11155_v63 = vadd.f32 1.0, %v14210_v6  ;;  %v18408_v24 = vadd.f32 %v18118_v22, %v11265_v51  ;;  %v11324_v32 = vmul.f32 %v18101_v7, %v11322_v54  ;;  %v11133_v31 = vld [vmem:[%s14692_s16 + $0x78] sm:$0xff]  ;;  %v11162_v6 = vld [vmem:[%s14692_s16 + $0x80] sm:$0xff] }
 0x5cb   : > { %v14214_v61 = vpop.eup %14213  ;;  %14231 = vrcp.f32 %v11154_v58  ;;  %v11184_v27 = vadd.f32 1.0, %v14212_v41  ;;  %v11325_v38 = vmul.f32 %v18101_v7, %v11323_v53  ;;  %v11876_v0 = vmul.f32 -1.442695, %v18403_v25  ;;  %v11163_v41 = vld [vmem:[%s14692_s16 + $0x88] sm:$0xff] }
 0x5cc   : > { %v14216_v10 = vpop.eup %14215  ;;  %14233 = vrcp.f32 %v11155_v63  ;;  %v11185_v30 = vadd.f32 1.0, %v14214_v61  ;;  %v18414_v14 = vadd.f32 %v18118_v22, %v11294_v21  ;;  %v18417_v26 = vadd.f32 %v18118_v22, %v11295_v43  ;;  %v11192_v61 = vld [vmem:[%s14692_s16 + $0x90] sm:$0xff] }
 0x5cd   : > { %v14218_v36 = vpop.eup %14217  ;;  %14235 = vrcp.f32 %v11184_v27  ;;  %v11214_v60 = vadd.f32 1.0, %v14216_v10  ;;  %v18989_v4 = vsub.f32 %v18024_v59, %v18038_v12  ;;  %v11877_v15 = vmul.f32 -1.442695, %v18408_v24  ;;  %v11193_v10 = vld [vmem:[%s14692_s16 + $0x98] sm:$0xff] }
 0x5ce   : > { %v14220_v34 = vpop.eup %14219  ;;  %14237 = vrcp.f32 %v11185_v30  ;;  %v11215_v55 = vadd.f32 1.0, %v14218_v36  ;;  %v18425_v23 = vadd.f32 %v18118_v22, %v11324_v32  ;;  %v18428_v37 = vadd.f32 %v18118_v22, %v11325_v38 }
 0x5cf   : > { %v11352_v48 = vmul.f32 %v18096_v11, %v18989_v4  ;;  %v14222_v28 = vpop.eup %14221  ;;  %14239 = vrcp.f32 %v11214_v60  ;;  %v11244_v3 = vadd.f32 1.0, %v14220_v34  ;;  %v11878_v12 = vmul.f32 -1.442695, %v18414_v14 }
 0x5d0   : > { %14241 = vrcp.f32 %v11215_v55  ;;  %v11245_v40 = vadd.f32 1.0, %v14222_v28  ;;  %v11879_v50 = vmul.f32 -1.442695, %v18417_v26  ;;  %v11252_v28 = vld [vmem:[%s14692_s16 + $0xb0] sm:$0xff] }
 0x5d1   : > { %v11354_v42 = vmul.f32 %v18101_v7, %v11352_v48  ;;  %v14224_v59 = vpop.eup %14223  ;;  %14243 = vrcp.f32 %v11244_v3  ;;  %v11880_v7 = vmul.f32 -1.442695, %v18425_v23 }
 0x5d2   : > { %v14226_v11 = vpop.eup %14225  ;;  %v11100_v56 = vmul.f32 %v14224_v59, %v18213_v39  ;;  %14245 = vrcp.f32 %v11245_v40  ;;  %v11253_v40 = vld [vmem:[%s14692_s16 + $0xb8] sm:$0xff] }
 0x5d3   : > { %v18435_v9 = vadd.f32 %v18118_v22, %v11354_v42  ;;  %v14228_v2 = vpop.eup %14227  ;;  %v11101_v51 = vmul.f32 %v14226_v11, %v18223_v52  ;;  %14247 = vpow2.f32 %v11876_v0  ;;  %v11881_v22 = vmul.f32 -1.442695, %v18428_v37 }
 0x5d4   : > { %v14230_v33 = vpop.eup %14229  ;;  %v11104_v19 = vadd.f32 %v11102_v44, %v11100_v56  ;;  %v11130_v39 = vmul.f32 %v14228_v2, %v18244_v13  ;;  %14249 = vpow2.f32 %v11877_v15 }
 0x5d5   : > { %v14232_v5 = vpop.eup %14231  ;;  %v11105_v8 = vadd.f32 %v11103_v1, %v11101_v51  ;;  %v11131_v52 = vmul.f32 %v14230_v33, %v18248_v20  ;;  %14251 = vpow2.f32 %v11878_v12  ;;  %v11882_v54 = vmul.f32 -1.442695, %v18435_v9 }
 0x5d6   : > { %v14234_v62 = vpop.eup %14233  ;;  %11106 = vst [vmem:[%s14692_s16 + $0x60] sm:$0xff] %v11104_v19  ;;  %v11134_v29 = vadd.f32 %v11132_v17, %v11130_v39  ;;  %v11160_v13 = vmul.f32 %v14232_v5, %v18251_v18  ;;  %14253 = vpow2.f32 %v11879_v50  ;;  %v11282_v5 = vld [vmem:[%s14692_s16 + $0xc0] sm:$0xff] }
 0x5d7   : > { %v14236_v53 = vpop.eup %14235  ;;  %11107 = vst [vmem:[%s14692_s16 + $0x68] sm:$0xff] %v11105_v8  ;;  %v11135_v58 = vadd.f32 %v11133_v31, %v11131_v52  ;;  %v11161_v20 = vmul.f32 %v14234_v62, %v18263_v46  ;;  %14255 = vpow2.f32 %v11880_v7  ;;  %v11283_v52 = vld [vmem:[%s14692_s16 + $0xc8] sm:$0xff] }
 0x5d8   : > { %v14238_v21 = vpop.eup %14237  ;;  %11136 = vst [vmem:[%s14692_s16 + $0x70] sm:$0xff] %v11134_v29  ;;  %v11164_v63 = vadd.f32 %v11162_v6, %v11160_v13  ;;  %v11190_v43 = vmul.f32 %v14236_v53, %v18288_v57  ;;  %14257 = vpow2.f32 %v11881_v22  ;;  %v11222_v57 = vld [vmem:[%s14692_s16 + $0xa0] sm:$0xff]  ;;  %v11312_v29 = vld [vmem:[%s14692_s16 + $0xd0] sm:$0xff]  ;;  %v11313_v6 = vld [vmem:[%s14692_s16 + $0xd8] sm:$0xff] }
 0x5d9   : > { %v14240_v18 = vpop.eup %14239  ;;  %11137 = vst [vmem:[%s14692_s16 + $0x78] sm:$0xff] %v11135_v58  ;;  %v11165_v27 = vadd.f32 %v11163_v41, %v11161_v20  ;;  %v11191_v32 = vmul.f32 %v14238_v21, %v18292_v49  ;;  %14259 = vpow2.f32 %v11882_v54  ;;  %v11223_v49 = vld [vmem:[%s14692_s16 + $0xa8] sm:$0xff] }
 0x5da   : > { %v14242_v46 = vpop.eup %14241  ;;  %11166 = vst [vmem:[%s14692_s16 + $0x80] sm:$0xff] %v11164_v63  ;;  %v11194_v30 = vadd.f32 %v11192_v61, %v11190_v43  ;;  %v11220_v38 = vmul.f32 %v14240_v18, %v18295_v47  ;;  %v11343_v41 = vld [vmem:[%s14692_s16 + $0xe8] sm:$0xff]  ;;  %v11372_v18 = vld [vmem:[%s14692_s16 + $0xf0] sm:$0xff] }
 0x5db   : > { %v14244_v36 = vpop.eup %14243  ;;  %11167 = vst [vmem:[%s14692_s16 + $0x88] sm:$0xff] %v11165_v27  ;;  %v11195_v60 = vadd.f32 %v11193_v10, %v11191_v32  ;;  %v11221_v0 = vmul.f32 %v14242_v46, %v18303_v35 }
 0x5dc   : > { %v14246_v34 = vpop.eup %14245  ;;  %11196 = vst [vmem:[%s14692_s16 + $0x90] sm:$0xff] %v11194_v30  ;;  %v11224_v55 = vadd.f32 %v11222_v57, %v11220_v38  ;;  %v11250_v4 = vmul.f32 %v14244_v36, %v18338_v16 }
 0x5dd   : > { %v14248_v48 = vpop.eup %14247  ;;  %11197 = vst [vmem:[%s14692_s16 + $0x98] sm:$0xff] %v11195_v60  ;;  %v11225_v47 = vadd.f32 %v11223_v49, %v11221_v0  ;;  %v11251_v3 = vmul.f32 %v14246_v34, %v18345_v45 }
 0x5de   : > { %v14250_v15 = vpop.eup %14249  ;;  %11226 = vst [vmem:[%s14692_s16 + $0xa0] sm:$0xff] %v11224_v55  ;;  %v11254_v42 = vadd.f32 %v11252_v28, %v11250_v4  ;;  %v11274_v35 = vadd.f32 1.0, %v14248_v48 }
 0x5df   : > { %v14252_v59 = vpop.eup %14251  ;;  %11227 = vst [vmem:[%s14692_s16 + $0xa8] sm:$0xff] %v11225_v47  ;;  %v11255_v12 = vadd.f32 %v11253_v40, %v11251_v3  ;;  %v11275_v11 = vadd.f32 1.0, %v14250_v15 }
 0x5e0   : > { %v14254_v56 = vpop.eup %14253  ;;  %11256 = vst [vmem:[%s14692_s16 + $0xb0] sm:$0xff] %v11254_v42  ;;  %14261 = vrcp.f32 %v11274_v35  ;;  %v11304_v16 = vadd.f32 1.0, %v14252_v59 }
 0x5e1   : > { %v14256_v50 = vpop.eup %14255  ;;  %11257 = vst [vmem:[%s14692_s16 + $0xb8] sm:$0xff] %v11255_v12  ;;  %14263 = vrcp.f32 %v11275_v11  ;;  %v11305_v2 = vadd.f32 1.0, %v14254_v56 }
 0x5e2   : > { %v14258_v44 = vpop.eup %14257  ;;  %14265 = vrcp.f32 %v11304_v16  ;;  %v11334_v45 = vadd.f32 1.0, %v14256_v50 }
 0x5e3   : > { %v14260_v51 = vpop.eup %14259  ;;  %14267 = vrcp.f32 %v11305_v2  ;;  %v11335_v7 = vadd.f32 1.0, %v14258_v44 }
 0x5e4   : > { %14269 = vrcp.f32 %v11334_v45  ;;  %v11364_v33 = vadd.f32 1.0, %v14260_v51 }
 0x5e5   : > { %14271 = vrcp.f32 %v11335_v7 }
 0x5e6   : > { %14273 = vrcp.f32 %v11364_v33 }
 0x5ea   : > { %v14262_v1 = vpop.eup %14261 }
 0x5eb   : > { %v14264_v19 = vpop.eup %14263  ;;  %v11280_v39 = vmul.f32 %v14262_v1, %v18403_v25 }
 0x5ec   : > { %v14266_v22 = vpop.eup %14265  ;;  %v11281_v17 = vmul.f32 %v14264_v19, %v18408_v24 }
 0x5ed   : > { %v14268_v8 = vpop.eup %14267  ;;  %v11284_v54 = vadd.f32 %v11282_v5, %v11280_v39  ;;  %v11310_v62 = vmul.f32 %v14266_v22, %v18414_v14  ;;  %v11342_v14 = vld [vmem:[%s14692_s16 + $0xe0] sm:$0xff] }
 0x5ee   : > { %v14270_v31 = vpop.eup %14269  ;;  %v11285_v13 = vadd.f32 %v11283_v52, %v11281_v17  ;;  %v11311_v25 = vmul.f32 %v14268_v8, %v18417_v26 }
 0x5ef   : > { %v14272_v53 = vpop.eup %14271  ;;  %11286 = vst [vmem:[%s14692_s16 + $0xc0] sm:$0xff] %v11284_v54  ;;  %v11314_v24 = vadd.f32 %v11312_v29, %v11310_v62  ;;  %v11340_v58 = vmul.f32 %v14270_v31, %v18425_v23 }
 0x5f0   : > { %v14274_v20 = vpop.eup %14273  ;;  %11287 = vst [vmem:[%s14692_s16 + $0xc8] sm:$0xff] %v11285_v13  ;;  %v11315_v21 = vadd.f32 %v11313_v6, %v11311_v25  ;;  %v11341_v26 = vmul.f32 %v14272_v53, %v18428_v37 }
 0x5f1   : > { %11316 = vst [vmem:[%s14692_s16 + $0xd0] sm:$0xff] %v11314_v24  ;;  %v11344_v63 = vadd.f32 %v11342_v14, %v11340_v58  ;;  %v11370_v43 = vmul.f32 %v14274_v20, %v18435_v9 }
 0x5f2   : > { %11317 = vst [vmem:[%s14692_s16 + $0xd8] sm:$0xff] %v11315_v21  ;;  %v11345_v23 = vadd.f32 %v11343_v41, %v11341_v26 }
 0x5f3   : > { %11346 = vst [vmem:[%s14692_s16 + $0xe0] sm:$0xff] %v11344_v63  ;;  %v11374_v37 = vadd.f32 %v11372_v18, %v11370_v43 }
 0x5f4   : > { %11347 = vst [vmem:[%s14692_s16 + $0xe8] sm:$0xff] %v11345_v23 }
 0x5f5   : > { %11376 = vst [vmem:[%s14692_s16 + $0xf0] sm:$0xff] %v11374_v37 }
 0x5f6   : > { %14361 = shalt.err (!%p14358_p7)
}
 0x5f7   : > { %s14362_s22 = scalar_lea.hbm %s18498_s29, 4096  ;;  %s14366_s14 = scalar_lea.hbm %s18563_s15, 8192 }
 0x5f8   : > { %p14363_p8 = scmp.ne.s32.totalorder %s18498_s29, %s14362_s22  ;;  %p14367_p1 = scmp.lt.u32.totalorder %s18498_s29, %s18563_s15 }
 0x5f9   : > { %p14368_p0 = scmp.lt.u32.totalorder %s14366_s14, %s14362_s22  ;;  %p14370_p6 = scmp.lt.u32.totalorder %s14362_s22, %s18498_s29 }
 0x5fa   : > { %p14364_p11 = pnand %p14363_p8, %p18990_p9 }
 0x5fb   : > { %p14369_p5 = por %p14368_p0, %p14367_p1 }
 0x5fc   : > { %p14365_p13 = pneg %p14364_p11 }
 0x5fd   : > { %p14371_p10 = por %p14370_p6, %p14369_p5 }
 0x5ff   : > { %p14372_p12 = pnand %p14371_p10, %p14365_p13 }
 0x601   : > { %14375 = shalt.err (!%p14372_p12)
}
 0x602   : > { %s14424_s23 = smov 128   ;;  %s14425_s27 = smov 8  }
 0x603   : > { %13645 = dma.vmem_to_hbm [thread:$0]  (%p18990_p9), %s18500_s28, 4096, %s18498_s29, %s18507_s9, %s14424_s23, %s14424_s23, %s14425_s27  }
 0x604 PF: > { %s18991_s20 = sld [smem:[#allocation13_spill]]  ;;  %p13657_p2 = scmp.ge.s32.totalorder %s14414_s21, 2 }
 0x605   : > { %s11407_s30 = sand.u32 1, %s14402_s18  }
 0x606   : > { %s11408_s25 = scalar_lea.sflag [#allocation6], %s11407_s30 }
 0x60a   : > { %p18992_p3 = scmp.ne.s32.totalorder %s18991_s20, 0 }
 0x60c   : > { %p13652_p4 = pnand %p13657_p2, %p18992_p3 }
 0x60e   : > { %14397 = dma.done.wait (!%p13652_p4), %s11408_s25, 4096  }
 0x60f   : > { %14399 = vsyncadd (!%p13652_p4), %s11408_s25, 4294963200  ;;  %s18993_s21 = sld [smem:[#allocation11_spill]]  ;;  %s18994_s22 = sld [smem:[#allocation10_spill]] }
 0x610   : > { %s18995_s20 = sld [smem:[#allocation12_spill]]  ;;  %s18996_s18 = smov %s14406_s19 }
 0x615   : > { %p26_p7 = scmp.ge.s32.totalorder %s18993_s21, 4   ;;  %s18997_s19 = smov %s18994_s22 }
 0x617   :  { %28 = sbr.rel (!%p26_p7) target bundleno = 6 (0x6), region = 131 }
 0x61e   :  { %11413 = vsyncpa [#allocation5], 1 }
 0x61f   :  { %11415 = vsyncpa [#allocation5 + $0x1], 1 }
 0x620   :  { %11416 = vsyncpa [#allocation6], 1 }
 0x621   :  { %11418 = vsyncpa [#allocation6 + $0x1], 1 }

</bundles_post_ra>
